<compile_context>
chip_gen: v5e
topology: v5e:2x2
jax: 0.10.0
libtpu: 0.0.40
codegen_flags: <defaults>
</compile_context>

<pallas_src>
import numpy as np
import jax
import jax.numpy as jnp
from jax.experimental import pallas as pl
from jax.experimental.pallas import tpu as pltpu

LANES = 128            # lane-dense channel padding for every conv output
KSIZE = 4
STRIDE = 2
PAD = 1
NUM_TAPS = KSIZE * KSIZE


def _round_up(x, m):
    return (x + m - 1) // m * m


# ----------------------------------------------------------------------------
# Spectral norm (parameter setup, matches torch spectral_norm: 1 power iter)
# ----------------------------------------------------------------------------
def spectral_normalize(w, key, eps=1e-12):
    out_dim = w.shape[0]
    w_mat = w.reshape(out_dim, -1)
    u = jax.random.normal(key, (out_dim,), dtype=jnp.float32)
    u = u / (jnp.linalg.norm(u) + eps)
    v = w_mat.T @ u
    v = v / (jnp.linalg.norm(v) + eps)
    u = w_mat @ v
    u = u / (jnp.linalg.norm(u) + eps)
    sigma = u @ (w_mat @ v)
    return (w_mat / sigma).reshape(w.shape)


# ----------------------------------------------------------------------------
# Parameter construction: all repacking (transpose, tap flattening, channel
# padding to 128 lanes, bf16 cast) hoisted out of the forward pass.
# ----------------------------------------------------------------------------
def init_encoder_params(img_dim, latent_dim, key):
    del latent_dim  # unused by the forward pass of this module
    d = 16
    dims = [d, d * 2, d * 4, d * 8]                 # [16, 32, 64, 128]
    in_chs = [img_dim] + dims[:-1]
    cin_pad0 = _round_up(img_dim, 8)                # layer-0 K = 16*8 = 128
    in_pads = [cin_pad0] + [LANES] * (len(dims) - 1)

    convs = []
    for cin, cout, cin_p in zip(in_chs, dims, in_pads):
        key, kw, kb, ku = jax.random.split(key, 4)
        w = 0.02 * jax.random.normal(kw, (cout, cin, KSIZE, KSIZE), jnp.float32)
        b = 0.02 * jax.random.normal(kb, (cout,), jnp.float32)
        w = spectral_normalize(w, ku)
        # (cout,cin,kh,kw) -> (kh,kw,cin,cout) -> (16,cin,cout); tap t = kh*4+kw
        wt = jnp.transpose(w, (2, 3, 1, 0)).reshape(NUM_TAPS, cin, cout)
        w_packed = jnp.zeros((NUM_TAPS, cin_p, LANES), jnp.float32)
        w_packed = w_packed.at[:, :cin, :cout].set(wt).astype(jnp.bfloat16)
        b_packed = jnp.zeros((1, LANES), jnp.float32).at[0, :cout].set(b)
        convs.append((w_packed, b_packed))

    key, kw, kb, ku = jax.random.split(key, 4)
    wl = 0.02 * jax.random.normal(kw, (1, dims[-1]), jnp.float32)
    bl = 0.02 * jax.random.normal(kb, (1,), jnp.float32)
    wl = spectral_normalize(wl, ku)
    wl_packed = jnp.zeros((LANES, LANES), jnp.float32)
    wl_packed = wl_packed.at[:dims[-1], 0].set(wl[0]).astype(jnp.bfloat16)
    bl_packed = jnp.zeros((1, LANES), jnp.float32).at[0, 0].set(bl[0])
    return {"convs": convs, "linear": (wl_packed, bl_packed)}


# ----------------------------------------------------------------------------
# Constant 0/1 gather matrix: row (t*OH*OW + i*OW + j) selects padded-input
# flat position (2i+kh)*Wp + (2j+kw) with t = kh*4+kw.  Built once at trace
# time; turns the in-kernel im2col into a single MXU matmul per layer.
# ----------------------------------------------------------------------------
def _gather_matrix(H, W):
    Hp, Wp = H + 2 * PAD, W + 2 * PAD
    OH, OW = H // 2, W // 2
    g = np.zeros((NUM_TAPS * OH * OW, Hp * Wp), np.float32)
    rows = np.arange(NUM_TAPS * OH * OW)
    t, m = rows // (OH * OW), rows % (OH * OW)
    kh, kw = t // KSIZE, t % KSIZE
    i, j = m // OW, m % OW
    cols = (STRIDE * i + kh) * Wp + (STRIDE * j + kw)
    g[rows, cols] = 1.0
    return jnp.asarray(g, dtype=jnp.bfloat16)


# ----------------------------------------------------------------------------
# Fused Pallas kernel: all 4 conv layers + spatial sum + linear + sigmoid for
# one sample per grid step.  Activations live in VMEM scratch (flattened
# (Hp*Wp, 128) padded layout); only plain 2-D dots, static slices and static
# ref stores are used.
# ----------------------------------------------------------------------------
def _make_encoder_kernel(ohs, ows):
    def kernel(g0, g1, g2, g3, w0, w1, w2, w3, b0, b1, b2, b3,
               wl_ref, bl_ref, x_ref, o_ref, a1_ref, a2_ref, a3_ref):
        g_refs = (g0, g1, g2, g3)
        w_refs = (w0, w1, w2, w3)
        b_refs = (b0, b1, b2, b3)
        nxt_refs = (a1_ref, a2_ref, a3_ref)

        # Zero the padded-activation scratch (provides the conv zero borders).
        for r in nxt_refs:
            r[...] = jnp.zeros(r.shape, r.dtype)

        act = x_ref[0]                                   # (Hp0*Wp0, Cin0) bf16
        for l in range(4):
            oh, ow = ohs[l], ows[l]
            m = oh * ow
            # im2col fused in-kernel: one MXU matmul gathers all 16 taps.
            sel = jnp.dot(g_refs[l][...], act,
                          preferred_element_type=jnp.float32)   # (16*m, Cin_l)
            acc = jnp.zeros((m, LANES), jnp.float32)
            for t in range(NUM_TAPS):
                chunk = sel[t * m:(t + 1) * m, :].astype(jnp.bfloat16)
                acc = acc + jnp.dot(chunk, w_refs[l][t],
                                    preferred_element_type=jnp.float32)
            h = jnp.maximum(acc + b_refs[l][...], 0.0)          # (m, 128) f32

            if l < 3:
                # Scatter the output rows into the next layer's padded buffer.
                dst = nxt_refs[l]
                wp_next = ow + 2
                hb = h.astype(jnp.bfloat16)
                for i in range(oh):
                    d0 = (i + 1) * wp_next + 1
                    dst[d0:d0 + ow, :] = hb[i * ow:(i + 1) * ow, :]
                act = dst[...]
            else:
                # Fused tail: spatial sum + linear (lane-padded) + sigmoid.
                feat = jnp.sum(h, axis=0, keepdims=True)        # (1, 128) f32
                logit = jnp.dot(feat.astype(jnp.bfloat16), wl_ref[...],
                                preferred_element_type=jnp.float32)
                logit = logit + bl_ref[...]
                o_ref[0] = 1.0 / (1.0 + jnp.exp(-logit))        # (1, 128)
    return kernel


# ----------------------------------------------------------------------------
# Forward pass (mirrors Encoder.forward)
# ----------------------------------------------------------------------------
@jax.jit
def encoder_forward(x_nchw, params):
    N, C, H, W = x_nchw.shape
    cin_pad = _round_up(C, 8)

    # Static per-layer spatial dims.
    hs, ws = [H], [W]
    for _ in range(4):
        assert hs[-1] % 2 == 0 and ws[-1] % 2 == 0
        hs.append(hs[-1] // 2)
        ws.append(ws[-1] // 2)
    ohs, ows = hs[1:], ws[1:]

    gathers = [_gather_matrix(hs[l], ws[l]) for l in range(4)]

    # Boundary prep only: NCHW -> NHWC, pad spatial by 1 and channels to
    # cin_pad, flatten rows, cast to bf16.  Everything else runs in-kernel.
    x = jnp.transpose(x_nchw, (0, 2, 3, 1))
    x = jnp.pad(x, ((0, 0), (PAD, PAD), (PAD, PAD), (0, cin_pad - C)))
    x = x.reshape(N, (H + 2 * PAD) * (W + 2 * PAD), cin_pad).astype(jnp.bfloat16)

    conv_ws = [params["convs"][l][0] for l in range(4)]
    conv_bs = [params["convs"][l][1] for l in range(4)]
    wl, bl = params["linear"]

    kernel = _make_encoder_kernel(ohs, ows)

    scratch = [
        pltpu.VMEM(((ohs[l] + 2) * (ows[l] + 2), LANES), jnp.bfloat16)
        for l in range(3)
    ]

    def full(rank):
        return lambda n: (0,) * rank

    in_specs = (
        [pl.BlockSpec(g.shape, full(2)) for g in gathers]
        + [pl.BlockSpec(w.shape, full(3)) for w in conv_ws]
        + [pl.BlockSpec(b.shape, full(2)) for b in conv_bs]
        + [pl.BlockSpec(wl.shape, full(2)), pl.BlockSpec(bl.shape, full(2))]
        + [pl.BlockSpec((1, x.shape[1], cin_pad), lambda n: (n, 0, 0))]
    )

    out = pl.pallas_call(
        kernel,
        out_shape=jax.ShapeDtypeStruct((N, 1, LANES), jnp.float32),
        grid=(N,),
        in_specs=in_specs,
        out_specs=pl.BlockSpec((1, 1, LANES), lambda n: (n, 0, 0)),
        scratch_shapes=scratch,
        compiler_params=pltpu.CompilerParams(
            dimension_semantics=("parallel",),
            vmem_limit_bytes=32 * 1024 * 1024,
        ),
    )(*gathers, *conv_ws, *conv_bs, wl, bl, x)

    # Only lane 0 of the (1,128)-padded logit is the real output.
    return out[:, 0, :1]                                        # (N, 1)


# ----------------------------------------------------------------------------
if __name__ == "__main__":
    img_dim = 3
    latent_dim = 32                   # unused by forward; kept for parity
    batch, H, W = 2, 16, 16

    key = jax.random.PRNGKey(0)
    k_in, k_par = jax.random.split(key)
    x = jax.random.normal(k_in, (batch, img_dim, H, W), dtype=jnp.float32)
    params = init_encoder_params(img_dim, latent_dim, k_par)

    out = jax.block_until_ready(encoder_forward(x, params))
    assert out.shape == (batch, 1), out.shape
    assert bool(jnp.all(jnp.isfinite(out)))
    print("KERNEL_OK")
</pallas_src>

<mosaic_0001>
module attributes {stable_mosaic.version = 11 : i64} {
  func.func @kernel(%arg0: i32, %arg1: memref<1024x324xbf16, #tpu.memory_space<vmem>>, %arg2: memref<256x100xbf16, #tpu.memory_space<vmem>>, %arg3: memref<64x36xbf16, #tpu.memory_space<vmem>>, %arg4: memref<16x16xbf16, #tpu.memory_space<vmem>>, %arg5: memref<16x8x128xbf16, #tpu.memory_space<vmem>>, %arg6: memref<16x128x128xbf16, #tpu.memory_space<vmem>>, %arg7: memref<16x128x128xbf16, #tpu.memory_space<vmem>>, %arg8: memref<16x128x128xbf16, #tpu.memory_space<vmem>>, %arg9: memref<1x128xf32, #tpu.memory_space<vmem>>, %arg10: memref<1x128xf32, #tpu.memory_space<vmem>>, %arg11: memref<1x128xf32, #tpu.memory_space<vmem>>, %arg12: memref<1x128xf32, #tpu.memory_space<vmem>>, %arg13: memref<128x128xbf16, #tpu.memory_space<vmem>>, %arg14: memref<1x128xf32, #tpu.memory_space<vmem>>, %arg15: memref<1x324x8xbf16, #tpu.memory_space<vmem>>, %arg16: memref<1x1x128xf32, #tpu.memory_space<vmem>>, %arg17: memref<100x128xbf16, #tpu.memory_space<vmem>>, %arg18: memref<36x128xbf16, #tpu.memory_space<vmem>>, %arg19: memref<16x128xbf16, #tpu.memory_space<vmem>>) attributes {dimension_semantics = [#tpu.dimension_semantics<parallel>], iteration_bounds = array<i64: 2>, scalar_prefetch = 0 : i64, scratch_operands = 3 : i64, tpu.core_type = #tpu.core_type<tc>, window_params = [{pipeline_mode = #tpu.pipeline_mode<synchronous>, transform_indices = @transform_0, window_bounds = array<i64: 1024, 324>}, {pipeline_mode = #tpu.pipeline_mode<synchronous>, transform_indices = @transform_1, window_bounds = array<i64: 256, 100>}, {pipeline_mode = #tpu.pipeline_mode<synchronous>, transform_indices = @transform_2, window_bounds = array<i64: 64, 36>}, {pipeline_mode = #tpu.pipeline_mode<synchronous>, transform_indices = @transform_3, window_bounds = array<i64: 16, 16>}, {pipeline_mode = #tpu.pipeline_mode<synchronous>, transform_indices = @transform_4, window_bounds = array<i64: 16, 8, 128>}, {pipeline_mode = #tpu.pipeline_mode<synchronous>, transform_indices = @transform_5, window_bounds = array<i64: 16, 128, 128>}, {pipeline_mode = #tpu.pipeline_mode<synchronous>, transform_indices = @transform_6, window_bounds = array<i64: 16, 128, 128>}, {pipeline_mode = #tpu.pipeline_mode<synchronous>, transform_indices = @transform_7, window_bounds = array<i64: 16, 128, 128>}, {pipeline_mode = #tpu.pipeline_mode<synchronous>, transform_indices = @transform_8, window_bounds = array<i64: 1, 128>}, {pipeline_mode = #tpu.pipeline_mode<synchronous>, transform_indices = @transform_9, window_bounds = array<i64: 1, 128>}, {pipeline_mode = #tpu.pipeline_mode<synchronous>, transform_indices = @transform_10, window_bounds = array<i64: 1, 128>}, {pipeline_mode = #tpu.pipeline_mode<synchronous>, transform_indices = @transform_11, window_bounds = array<i64: 1, 128>}, {pipeline_mode = #tpu.pipeline_mode<synchronous>, transform_indices = @transform_12, window_bounds = array<i64: 128, 128>}, {pipeline_mode = #tpu.pipeline_mode<synchronous>, transform_indices = @transform_13, window_bounds = array<i64: 1, 128>}, {transform_indices = @transform_14, window_bounds = array<i64: 1, 324, 8>}, {transform_indices = @transform_15, window_bounds = array<i64: 1, 1, 128>}]} {
    %cst = arith.constant 0.000000e+00 : bf16
    %0 = vector.broadcast %cst : bf16 to vector<100x128xbf16>
    %c0 = arith.constant 0 : index
    %c0_0 = arith.constant 0 : index
    %1 = vector.load %arg17[%c0, %c0_0] : memref<100x128xbf16, #tpu.memory_space<vmem>>, vector<100x128xbf16>
    tpu.vector_store %arg17[%c0, %c0_0], %0 {strides = array<i32>} : memref<100x128xbf16, #tpu.memory_space<vmem>>, vector<100x128xbf16>,
    %cst_1 = arith.constant 0.000000e+00 : bf16
    %2 = vector.broadcast %cst_1 : bf16 to vector<36x128xbf16>
    %c0_2 = arith.constant 0 : index
    %c0_3 = arith.constant 0 : index
    %3 = vector.load %arg18[%c0_2, %c0_3] : memref<36x128xbf16, #tpu.memory_space<vmem>>, vector<36x128xbf16>
    tpu.vector_store %arg18[%c0_2, %c0_3], %2 {strides = array<i32>} : memref<36x128xbf16, #tpu.memory_space<vmem>>, vector<36x128xbf16>,
    %cst_4 = arith.constant 0.000000e+00 : bf16
    %4 = vector.broadcast %cst_4 : bf16 to vector<16x128xbf16>
    %c0_5 = arith.constant 0 : index
    %c0_6 = arith.constant 0 : index
    %5 = vector.load %arg19[%c0_5, %c0_6] : memref<16x128xbf16, #tpu.memory_space<vmem>>, vector<16x128xbf16>
    tpu.vector_store %arg19[%c0_5, %c0_6], %4 {strides = array<i32>} : memref<16x128xbf16, #tpu.memory_space<vmem>>, vector<16x128xbf16>,
    %c0_7 = arith.constant 0 : index
    %c0_8 = arith.constant 0 : index
    %c0_9 = arith.constant 0 : index
    %6 = vector.load %arg15[%c0_7, %c0_8, %c0_9] : memref<1x324x8xbf16, #tpu.memory_space<vmem>>, vector<1x324x8xbf16>
    %7 = vector.shape_cast %6 : vector<1x324x8xbf16> to vector<324x8xbf16>
    %c0_10 = arith.constant 0 : index
    %c0_11 = arith.constant 0 : index
    %8 = vector.load %arg1[%c0_10, %c0_11] : memref<1024x324xbf16, #tpu.memory_space<vmem>>, vector<1024x324xbf16>
    %cst_12 = arith.constant dense<0.000000e+00> : vector<1024x8xf32>
    %9 = tpu.matmul %8, %7, %cst_12 {dimension_numbers = #tpu.dot_dimension_numbers<[1], [0], [0], [1], [0, 0, 1, 1], [], []>} : vector<1024x324xbf16>, vector<324x8xbf16>, vector<1024x8xf32> -> vector<1024x8xf32>
    %cst_13 = arith.constant 0.000000e+00 : f32
    %10 = vector.broadcast %cst_13 : f32 to vector<64x128xf32>
    %11 = vector.extract_strided_slice %9 {offsets = [0, 0], sizes = [64, 8], strides = [1, 1]} : vector<1024x8xf32> to vector<64x8xf32>
    %12 = arith.truncf %11 : vector<64x8xf32> to vector<64x8xbf16>
    %c0_14 = arith.constant 0 : index
    %c0_15 = arith.constant 0 : index
    %c0_16 = arith.constant 0 : index
    %13 = vector.load %arg5[%c0_14, %c0_15, %c0_16] : memref<16x8x128xbf16, #tpu.memory_space<vmem>>, vector<1x8x128xbf16>
    %14 = vector.shape_cast %13 : vector<1x8x128xbf16> to vector<8x128xbf16>
    %cst_17 = arith.constant dense<0.000000e+00> : vector<64x128xf32>
    %15 = tpu.matmul %12, %14, %cst_17 {dimension_numbers = #tpu.dot_dimension_numbers<[1], [0], [0], [1], [0, 0, 1, 1], [], []>} : vector<64x8xbf16>, vector<8x128xbf16>, vector<64x128xf32> -> vector<64x128xf32>
    %16 = arith.addf %10, %15 : vector<64x128xf32>
    %17 = vector.extract_strided_slice %9 {offsets = [64, 0], sizes = [64, 8], strides = [1, 1]} : vector<1024x8xf32> to vector<64x8xf32>
    %18 = arith.truncf %17 : vector<64x8xf32> to vector<64x8xbf16>
    %c1 = arith.constant 1 : index
    %c0_18 = arith.constant 0 : index
    %c0_19 = arith.constant 0 : index
    %19 = vector.load %arg5[%c1, %c0_18, %c0_19] : memref<16x8x128xbf16, #tpu.memory_space<vmem>>, vector<1x8x128xbf16>
    %20 = vector.shape_cast %19 : vector<1x8x128xbf16> to vector<8x128xbf16>
    %cst_20 = arith.constant dense<0.000000e+00> : vector<64x128xf32>
    %21 = tpu.matmul %18, %20, %cst_20 {dimension_numbers = #tpu.dot_dimension_numbers<[1], [0], [0], [1], [0, 0, 1, 1], [], []>} : vector<64x8xbf16>, vector<8x128xbf16>, vector<64x128xf32> -> vector<64x128xf32>
    %22 = arith.addf %16, %21 : vector<64x128xf32>
    %23 = vector.extract_strided_slice %9 {offsets = [128, 0], sizes = [64, 8], strides = [1, 1]} : vector<1024x8xf32> to vector<64x8xf32>
    %24 = arith.truncf %23 : vector<64x8xf32> to vector<64x8xbf16>
    %c2 = arith.constant 2 : index
    %c0_21 = arith.constant 0 : index
    %c0_22 = arith.constant 0 : index
    %25 = vector.load %arg5[%c2, %c0_21, %c0_22] : memref<16x8x128xbf16, #tpu.memory_space<vmem>>, vector<1x8x128xbf16>
    %26 = vector.shape_cast %25 : vector<1x8x128xbf16> to vector<8x128xbf16>
    %cst_23 = arith.constant dense<0.000000e+00> : vector<64x128xf32>
    %27 = tpu.matmul %24, %26, %cst_23 {dimension_numbers = #tpu.dot_dimension_numbers<[1], [0], [0], [1], [0, 0, 1, 1], [], []>} : vector<64x8xbf16>, vector<8x128xbf16>, vector<64x128xf32> -> vector<64x128xf32>
    %28 = arith.addf %22, %27 : vector<64x128xf32>
    %29 = vector.extract_strided_slice %9 {offsets = [192, 0], sizes = [64, 8], strides = [1, 1]} : vector<1024x8xf32> to vector<64x8xf32>
    %30 = arith.truncf %29 : vector<64x8xf32> to vector<64x8xbf16>
    %c3 = arith.constant 3 : index
    %c0_24 = arith.constant 0 : index
    %c0_25 = arith.constant 0 : index
    %31 = vector.load %arg5[%c3, %c0_24, %c0_25] : memref<16x8x128xbf16, #tpu.memory_space<vmem>>, vector<1x8x128xbf16>
    %32 = vector.shape_cast %31 : vector<1x8x128xbf16> to vector<8x128xbf16>
    %cst_26 = arith.constant dense<0.000000e+00> : vector<64x128xf32>
    %33 = tpu.matmul %30, %32, %cst_26 {dimension_numbers = #tpu.dot_dimension_numbers<[1], [0], [0], [1], [0, 0, 1, 1], [], []>} : vector<64x8xbf16>, vector<8x128xbf16>, vector<64x128xf32> -> vector<64x128xf32>
    %34 = arith.addf %28, %33 : vector<64x128xf32>
    %35 = vector.extract_strided_slice %9 {offsets = [256, 0], sizes = [64, 8], strides = [1, 1]} : vector<1024x8xf32> to vector<64x8xf32>
    %36 = arith.truncf %35 : vector<64x8xf32> to vector<64x8xbf16>
    %c4 = arith.constant 4 : index
    %c0_27 = arith.constant 0 : index
    %c0_28 = arith.constant 0 : index
    %37 = vector.load %arg5[%c4, %c0_27, %c0_28] : memref<16x8x128xbf16, #tpu.memory_space<vmem>>, vector<1x8x128xbf16>
    %38 = vector.shape_cast %37 : vector<1x8x128xbf16> to vector<8x128xbf16>
    %cst_29 = arith.constant dense<0.000000e+00> : vector<64x128xf32>
    %39 = tpu.matmul %36, %38, %cst_29 {dimension_numbers = #tpu.dot_dimension_numbers<[1], [0], [0], [1], [0, 0, 1, 1], [], []>} : vector<64x8xbf16>, vector<8x128xbf16>, vector<64x128xf32> -> vector<64x128xf32>
    %40 = arith.addf %34, %39 : vector<64x128xf32>
    %41 = vector.extract_strided_slice %9 {offsets = [320, 0], sizes = [64, 8], strides = [1, 1]} : vector<1024x8xf32> to vector<64x8xf32>
    %42 = arith.truncf %41 : vector<64x8xf32> to vector<64x8xbf16>
    %c5 = arith.constant 5 : index
    %c0_30 = arith.constant 0 : index
    %c0_31 = arith.constant 0 : index
    %43 = vector.load %arg5[%c5, %c0_30, %c0_31] : memref<16x8x128xbf16, #tpu.memory_space<vmem>>, vector<1x8x128xbf16>
    %44 = vector.shape_cast %43 : vector<1x8x128xbf16> to vector<8x128xbf16>
    %cst_32 = arith.constant dense<0.000000e+00> : vector<64x128xf32>
    %45 = tpu.matmul %42, %44, %cst_32 {dimension_numbers = #tpu.dot_dimension_numbers<[1], [0], [0], [1], [0, 0, 1, 1], [], []>} : vector<64x8xbf16>, vector<8x128xbf16>, vector<64x128xf32> -> vector<64x128xf32>
    %46 = arith.addf %40, %45 : vector<64x128xf32>
    %47 = vector.extract_strided_slice %9 {offsets = [384, 0], sizes = [64, 8], strides = [1, 1]} : vector<1024x8xf32> to vector<64x8xf32>
    %48 = arith.truncf %47 : vector<64x8xf32> to vector<64x8xbf16>
    %c6 = arith.constant 6 : index
    %c0_33 = arith.constant 0 : index
    %c0_34 = arith.constant 0 : index
    %49 = vector.load %arg5[%c6, %c0_33, %c0_34] : memref<16x8x128xbf16, #tpu.memory_space<vmem>>, vector<1x8x128xbf16>
    %50 = vector.shape_cast %49 : vector<1x8x128xbf16> to vector<8x128xbf16>
    %cst_35 = arith.constant dense<0.000000e+00> : vector<64x128xf32>
    %51 = tpu.matmul %48, %50, %cst_35 {dimension_numbers = #tpu.dot_dimension_numbers<[1], [0], [0], [1], [0, 0, 1, 1], [], []>} : vector<64x8xbf16>, vector<8x128xbf16>, vector<64x128xf32> -> vector<64x128xf32>
    %52 = arith.addf %46, %51 : vector<64x128xf32>
    %53 = vector.extract_strided_slice %9 {offsets = [448, 0], sizes = [64, 8], strides = [1, 1]} : vector<1024x8xf32> to vector<64x8xf32>
    %54 = arith.truncf %53 : vector<64x8xf32> to vector<64x8xbf16>
    %c7 = arith.constant 7 : index
    %c0_36 = arith.constant 0 : index
    %c0_37 = arith.constant 0 : index
    %55 = vector.load %arg5[%c7, %c0_36, %c0_37] : memref<16x8x128xbf16, #tpu.memory_space<vmem>>, vector<1x8x128xbf16>
    %56 = vector.shape_cast %55 : vector<1x8x128xbf16> to vector<8x128xbf16>
    %cst_38 = arith.constant dense<0.000000e+00> : vector<64x128xf32>
    %57 = tpu.matmul %54, %56, %cst_38 {dimension_numbers = #tpu.dot_dimension_numbers<[1], [0], [0], [1], [0, 0, 1, 1], [], []>} : vector<64x8xbf16>, vector<8x128xbf16>, vector<64x128xf32> -> vector<64x128xf32>
    %58 = arith.addf %52, %57 : vector<64x128xf32>
    %59 = vector.extract_strided_slice %9 {offsets = [512, 0], sizes = [64, 8], strides = [1, 1]} : vector<1024x8xf32> to vector<64x8xf32>
    %60 = arith.truncf %59 : vector<64x8xf32> to vector<64x8xbf16>
    %c8 = arith.constant 8 : index
    %c0_39 = arith.constant 0 : index
    %c0_40 = arith.constant 0 : index
    %61 = vector.load %arg5[%c8, %c0_39, %c0_40] : memref<16x8x128xbf16, #tpu.memory_space<vmem>>, vector<1x8x128xbf16>
    %62 = vector.shape_cast %61 : vector<1x8x128xbf16> to vector<8x128xbf16>
    %cst_41 = arith.constant dense<0.000000e+00> : vector<64x128xf32>
    %63 = tpu.matmul %60, %62, %cst_41 {dimension_numbers = #tpu.dot_dimension_numbers<[1], [0], [0], [1], [0, 0, 1, 1], [], []>} : vector<64x8xbf16>, vector<8x128xbf16>, vector<64x128xf32> -> vector<64x128xf32>
    %64 = arith.addf %58, %63 : vector<64x128xf32>
    %65 = vector.extract_strided_slice %9 {offsets = [576, 0], sizes = [64, 8], strides = [1, 1]} : vector<1024x8xf32> to vector<64x8xf32>
    %66 = arith.truncf %65 : vector<64x8xf32> to vector<64x8xbf16>
    %c9 = arith.constant 9 : index
    %c0_42 = arith.constant 0 : index
    %c0_43 = arith.constant 0 : index
    %67 = vector.load %arg5[%c9, %c0_42, %c0_43] : memref<16x8x128xbf16, #tpu.memory_space<vmem>>, vector<1x8x128xbf16>
    %68 = vector.shape_cast %67 : vector<1x8x128xbf16> to vector<8x128xbf16>
    %cst_44 = arith.constant dense<0.000000e+00> : vector<64x128xf32>
    %69 = tpu.matmul %66, %68, %cst_44 {dimension_numbers = #tpu.dot_dimension_numbers<[1], [0], [0], [1], [0, 0, 1, 1], [], []>} : vector<64x8xbf16>, vector<8x128xbf16>, vector<64x128xf32> -> vector<64x128xf32>
    %70 = arith.addf %64, %69 : vector<64x128xf32>
    %71 = vector.extract_strided_slice %9 {offsets = [640, 0], sizes = [64, 8], strides = [1, 1]} : vector<1024x8xf32> to vector<64x8xf32>
    %72 = arith.truncf %71 : vector<64x8xf32> to vector<64x8xbf16>
    %c10 = arith.constant 10 : index
    %c0_45 = arith.constant 0 : index
    %c0_46 = arith.constant 0 : index
    %73 = vector.load %arg5[%c10, %c0_45, %c0_46] : memref<16x8x128xbf16, #tpu.memory_space<vmem>>, vector<1x8x128xbf16>
    %74 = vector.shape_cast %73 : vector<1x8x128xbf16> to vector<8x128xbf16>
    %cst_47 = arith.constant dense<0.000000e+00> : vector<64x128xf32>
    %75 = tpu.matmul %72, %74, %cst_47 {dimension_numbers = #tpu.dot_dimension_numbers<[1], [0], [0], [1], [0, 0, 1, 1], [], []>} : vector<64x8xbf16>, vector<8x128xbf16>, vector<64x128xf32> -> vector<64x128xf32>
    %76 = arith.addf %70, %75 : vector<64x128xf32>
    %77 = vector.extract_strided_slice %9 {offsets = [704, 0], sizes = [64, 8], strides = [1, 1]} : vector<1024x8xf32> to vector<64x8xf32>
    %78 = arith.truncf %77 : vector<64x8xf32> to vector<64x8xbf16>
    %c11 = arith.constant 11 : index
    %c0_48 = arith.constant 0 : index
    %c0_49 = arith.constant 0 : index
    %79 = vector.load %arg5[%c11, %c0_48, %c0_49] : memref<16x8x128xbf16, #tpu.memory_space<vmem>>, vector<1x8x128xbf16>
    %80 = vector.shape_cast %79 : vector<1x8x128xbf16> to vector<8x128xbf16>
    %cst_50 = arith.constant dense<0.000000e+00> : vector<64x128xf32>
    %81 = tpu.matmul %78, %80, %cst_50 {dimension_numbers = #tpu.dot_dimension_numbers<[1], [0], [0], [1], [0, 0, 1, 1], [], []>} : vector<64x8xbf16>, vector<8x128xbf16>, vector<64x128xf32> -> vector<64x128xf32>
    %82 = arith.addf %76, %81 : vector<64x128xf32>
    %83 = vector.extract_strided_slice %9 {offsets = [768, 0], sizes = [64, 8], strides = [1, 1]} : vector<1024x8xf32> to vector<64x8xf32>
    %84 = arith.truncf %83 : vector<64x8xf32> to vector<64x8xbf16>
    %c12 = arith.constant 12 : index
    %c0_51 = arith.constant 0 : index
    %c0_52 = arith.constant 0 : index
    %85 = vector.load %arg5[%c12, %c0_51, %c0_52] : memref<16x8x128xbf16, #tpu.memory_space<vmem>>, vector<1x8x128xbf16>
    %86 = vector.shape_cast %85 : vector<1x8x128xbf16> to vector<8x128xbf16>
    %cst_53 = arith.constant dense<0.000000e+00> : vector<64x128xf32>
    %87 = tpu.matmul %84, %86, %cst_53 {dimension_numbers = #tpu.dot_dimension_numbers<[1], [0], [0], [1], [0, 0, 1, 1], [], []>} : vector<64x8xbf16>, vector<8x128xbf16>, vector<64x128xf32> -> vector<64x128xf32>
    %88 = arith.addf %82, %87 : vector<64x128xf32>
    %89 = vector.extract_strided_slice %9 {offsets = [832, 0], sizes = [64, 8], strides = [1, 1]} : vector<1024x8xf32> to vector<64x8xf32>
    %90 = arith.truncf %89 : vector<64x8xf32> to vector<64x8xbf16>
    %c13 = arith.constant 13 : index
    %c0_54 = arith.constant 0 : index
    %c0_55 = arith.constant 0 : index
    %91 = vector.load %arg5[%c13, %c0_54, %c0_55] : memref<16x8x128xbf16, #tpu.memory_space<vmem>>, vector<1x8x128xbf16>
    %92 = vector.shape_cast %91 : vector<1x8x128xbf16> to vector<8x128xbf16>
    %cst_56 = arith.constant dense<0.000000e+00> : vector<64x128xf32>
    %93 = tpu.matmul %90, %92, %cst_56 {dimension_numbers = #tpu.dot_dimension_numbers<[1], [0], [0], [1], [0, 0, 1, 1], [], []>} : vector<64x8xbf16>, vector<8x128xbf16>, vector<64x128xf32> -> vector<64x128xf32>
    %94 = arith.addf %88, %93 : vector<64x128xf32>
    %95 = vector.extract_strided_slice %9 {offsets = [896, 0], sizes = [64, 8], strides = [1, 1]} : vector<1024x8xf32> to vector<64x8xf32>
    %96 = arith.truncf %95 : vector<64x8xf32> to vector<64x8xbf16>
    %c14 = arith.constant 14 : index
    %c0_57 = arith.constant 0 : index
    %c0_58 = arith.constant 0 : index
    %97 = vector.load %arg5[%c14, %c0_57, %c0_58] : memref<16x8x128xbf16, #tpu.memory_space<vmem>>, vector<1x8x128xbf16>
    %98 = vector.shape_cast %97 : vector<1x8x128xbf16> to vector<8x128xbf16>
    %cst_59 = arith.constant dense<0.000000e+00> : vector<64x128xf32>
    %99 = tpu.matmul %96, %98, %cst_59 {dimension_numbers = #tpu.dot_dimension_numbers<[1], [0], [0], [1], [0, 0, 1, 1], [], []>} : vector<64x8xbf16>, vector<8x128xbf16>, vector<64x128xf32> -> vector<64x128xf32>
    %100 = arith.addf %94, %99 : vector<64x128xf32>
    %101 = vector.extract_strided_slice %9 {offsets = [960, 0], sizes = [64, 8], strides = [1, 1]} : vector<1024x8xf32> to vector<64x8xf32>
    %102 = arith.truncf %101 : vector<64x8xf32> to vector<64x8xbf16>
    %c15 = arith.constant 15 : index
    %c0_60 = arith.constant 0 : index
    %c0_61 = arith.constant 0 : index
    %103 = vector.load %arg5[%c15, %c0_60, %c0_61] : memref<16x8x128xbf16, #tpu.memory_space<vmem>>, vector<1x8x128xbf16>
    %104 = vector.shape_cast %103 : vector<1x8x128xbf16> to vector<8x128xbf16>
    %cst_62 = arith.constant dense<0.000000e+00> : vector<64x128xf32>
    %105 = tpu.matmul %102, %104, %cst_62 {dimension_numbers = #tpu.dot_dimension_numbers<[1], [0], [0], [1], [0, 0, 1, 1], [], []>} : vector<64x8xbf16>, vector<8x128xbf16>, vector<64x128xf32> -> vector<64x128xf32>
    %106 = arith.addf %100, %105 : vector<64x128xf32>
    %c0_63 = arith.constant 0 : index
    %c0_64 = arith.constant 0 : index
    %107 = vector.load %arg9[%c0_63, %c0_64] : memref<1x128xf32, #tpu.memory_space<vmem>>, vector<1x128xf32>
    %108 = vector.broadcast %107 : vector<1x128xf32> to vector<64x128xf32>
    %109 = arith.addf %106, %108 : vector<64x128xf32>
    %cst_65 = arith.constant 0.000000e+00 : f32
    %110 = vector.broadcast %cst_65 : f32 to vector<64x128xf32>
    %111 = arith.maximumf %109, %110 : vector<64x128xf32>
    %112 = arith.truncf %111 : vector<64x128xf32> to vector<64x128xbf16>
    %113 = vector.extract_strided_slice %112 {offsets = [0, 0], sizes = [8, 128], strides = [1, 1]} : vector<64x128xbf16> to vector<8x128xbf16>
    %c11_66 = arith.constant 11 : index
    %c0_67 = arith.constant 0 : index
    %114 = vector.load %arg17[%c11_66, %c0_67] : memref<100x128xbf16, #tpu.memory_space<vmem>>, vector<8x128xbf16>
    tpu.vector_store %arg17[%c11_66, %c0_67], %113 {strides = array<i32>} : memref<100x128xbf16, #tpu.memory_space<vmem>>, vector<8x128xbf16>,
    %115 = vector.extract_strided_slice %112 {offsets = [8, 0], sizes = [8, 128], strides = [1, 1]} : vector<64x128xbf16> to vector<8x128xbf16>
    %c21 = arith.constant 21 : index
    %c0_68 = arith.constant 0 : index
    %116 = vector.load %arg17[%c21, %c0_68] : memref<100x128xbf16, #tpu.memory_space<vmem>>, vector<8x128xbf16>
    tpu.vector_store %arg17[%c21, %c0_68], %115 {strides = array<i32>} : memref<100x128xbf16, #tpu.memory_space<vmem>>, vector<8x128xbf16>,
    %117 = vector.extract_strided_slice %112 {offsets = [16, 0], sizes = [8, 128], strides = [1, 1]} : vector<64x128xbf16> to vector<8x128xbf16>
    %c31 = arith.constant 31 : index
    %c0_69 = arith.constant 0 : index
    %118 = vector.load %arg17[%c31, %c0_69] : memref<100x128xbf16, #tpu.memory_space<vmem>>, vector<8x128xbf16>
    tpu.vector_store %arg17[%c31, %c0_69], %117 {strides = array<i32>} : memref<100x128xbf16, #tpu.memory_space<vmem>>, vector<8x128xbf16>,
    %119 = vector.extract_strided_slice %112 {offsets = [24, 0], sizes = [8, 128], strides = [1, 1]} : vector<64x128xbf16> to vector<8x128xbf16>
    %c41 = arith.constant 41 : index
    %c0_70 = arith.constant 0 : index
    %120 = vector.load %arg17[%c41, %c0_70] : memref<100x128xbf16, #tpu.memory_space<vmem>>, vector<8x128xbf16>
    tpu.vector_store %arg17[%c41, %c0_70], %119 {strides = array<i32>} : memref<100x128xbf16, #tpu.memory_space<vmem>>, vector<8x128xbf16>,
    %121 = vector.extract_strided_slice %112 {offsets = [32, 0], sizes = [8, 128], strides = [1, 1]} : vector<64x128xbf16> to vector<8x128xbf16>
    %c51 = arith.constant 51 : index
    %c0_71 = arith.constant 0 : index
    %122 = vector.load %arg17[%c51, %c0_71] : memref<100x128xbf16, #tpu.memory_space<vmem>>, vector<8x128xbf16>
    tpu.vector_store %arg17[%c51, %c0_71], %121 {strides = array<i32>} : memref<100x128xbf16, #tpu.memory_space<vmem>>, vector<8x128xbf16>,
    %123 = vector.extract_strided_slice %112 {offsets = [40, 0], sizes = [8, 128], strides = [1, 1]} : vector<64x128xbf16> to vector<8x128xbf16>
    %c61 = arith.constant 61 : index
    %c0_72 = arith.constant 0 : index
    %124 = vector.load %arg17[%c61, %c0_72] : memref<100x128xbf16, #tpu.memory_space<vmem>>, vector<8x128xbf16>
    tpu.vector_store %arg17[%c61, %c0_72], %123 {strides = array<i32>} : memref<100x128xbf16, #tpu.memory_space<vmem>>, vector<8x128xbf16>,
    %125 = vector.extract_strided_slice %112 {offsets = [48, 0], sizes = [8, 128], strides = [1, 1]} : vector<64x128xbf16> to vector<8x128xbf16>
    %c71 = arith.constant 71 : index
    %c0_73 = arith.constant 0 : index
    %126 = vector.load %arg17[%c71, %c0_73] : memref<100x128xbf16, #tpu.memory_space<vmem>>, vector<8x128xbf16>
    tpu.vector_store %arg17[%c71, %c0_73], %125 {strides = array<i32>} : memref<100x128xbf16, #tpu.memory_space<vmem>>, vector<8x128xbf16>,
    %127 = vector.extract_strided_slice %112 {offsets = [56, 0], sizes = [8, 128], strides = [1, 1]} : vector<64x128xbf16> to vector<8x128xbf16>
    %c81 = arith.constant 81 : index
    %c0_74 = arith.constant 0 : index
    %128 = vector.load %arg17[%c81, %c0_74] : memref<100x128xbf16, #tpu.memory_space<vmem>>, vector<8x128xbf16>
    tpu.vector_store %arg17[%c81, %c0_74], %127 {strides = array<i32>} : memref<100x128xbf16, #tpu.memory_space<vmem>>, vector<8x128xbf16>,
    %c0_75 = arith.constant 0 : index
    %c0_76 = arith.constant 0 : index
    %129 = vector.load %arg17[%c0_75, %c0_76] : memref<100x128xbf16, #tpu.memory_space<vmem>>, vector<100x128xbf16>
    %c0_77 = arith.constant 0 : index
    %c0_78 = arith.constant 0 : index
    %130 = vector.load %arg2[%c0_77, %c0_78] : memref<256x100xbf16, #tpu.memory_space<vmem>>, vector<256x100xbf16>
    %cst_79 = arith.constant dense<0.000000e+00> : vector<256x128xf32>
    %131 = tpu.matmul %130, %129, %cst_79 {dimension_numbers = #tpu.dot_dimension_numbers<[1], [0], [0], [1], [0, 0, 1, 1], [], []>} : vector<256x100xbf16>, vector<100x128xbf16>, vector<256x128xf32> -> vector<256x128xf32>
    %cst_80 = arith.constant 0.000000e+00 : f32
    %132 = vector.broadcast %cst_80 : f32 to vector<16x128xf32>
    %133 = vector.extract_strided_slice %131 {offsets = [0, 0], sizes = [16, 128], strides = [1, 1]} : vector<256x128xf32> to vector<16x128xf32>
    %134 = arith.truncf %133 : vector<16x128xf32> to vector<16x128xbf16>
    %c0_81 = arith.constant 0 : index
    %c0_82 = arith.constant 0 : index
    %c0_83 = arith.constant 0 : index
    %135 = vector.load %arg6[%c0_81, %c0_82, %c0_83] : memref<16x128x128xbf16, #tpu.memory_space<vmem>>, vector<1x128x128xbf16>
    %136 = vector.shape_cast %135 : vector<1x128x128xbf16> to vector<128x128xbf16>
    %cst_84 = arith.constant dense<0.000000e+00> : vector<16x128xf32>
    %137 = tpu.matmul %134, %136, %cst_84 {dimension_numbers = #tpu.dot_dimension_numbers<[1], [0], [0], [1], [0, 0, 1, 1], [], []>} : vector<16x128xbf16>, vector<128x128xbf16>, vector<16x128xf32> -> vector<16x128xf32>
    %138 = arith.addf %132, %137 : vector<16x128xf32>
    %139 = vector.extract_strided_slice %131 {offsets = [16, 0], sizes = [16, 128], strides = [1, 1]} : vector<256x128xf32> to vector<16x128xf32>
    %140 = arith.truncf %139 : vector<16x128xf32> to vector<16x128xbf16>
    %c1_85 = arith.constant 1 : index
    %c0_86 = arith.constant 0 : index
    %c0_87 = arith.constant 0 : index
    %141 = vector.load %arg6[%c1_85, %c0_86, %c0_87] : memref<16x128x128xbf16, #tpu.memory_space<vmem>>, vector<1x128x128xbf16>
    %142 = vector.shape_cast %141 : vector<1x128x128xbf16> to vector<128x128xbf16>
    %cst_88 = arith.constant dense<0.000000e+00> : vector<16x128xf32>
    %143 = tpu.matmul %140, %142, %cst_88 {dimension_numbers = #tpu.dot_dimension_numbers<[1], [0], [0], [1], [0, 0, 1, 1], [], []>} : vector<16x128xbf16>, vector<128x128xbf16>, vector<16x128xf32> -> vector<16x128xf32>
    %144 = arith.addf %138, %143 : vector<16x128xf32>
    %145 = vector.extract_strided_slice %131 {offsets = [32, 0], sizes = [16, 128], strides = [1, 1]} : vector<256x128xf32> to vector<16x128xf32>
    %146 = arith.truncf %145 : vector<16x128xf32> to vector<16x128xbf16>
    %c2_89 = arith.constant 2 : index
    %c0_90 = arith.constant 0 : index
    %c0_91 = arith.constant 0 : index
    %147 = vector.load %arg6[%c2_89, %c0_90, %c0_91] : memref<16x128x128xbf16, #tpu.memory_space<vmem>>, vector<1x128x128xbf16>
    %148 = vector.shape_cast %147 : vector<1x128x128xbf16> to vector<128x128xbf16>
    %cst_92 = arith.constant dense<0.000000e+00> : vector<16x128xf32>
    %149 = tpu.matmul %146, %148, %cst_92 {dimension_numbers = #tpu.dot_dimension_numbers<[1], [0], [0], [1], [0, 0, 1, 1], [], []>} : vector<16x128xbf16>, vector<128x128xbf16>, vector<16x128xf32> -> vector<16x128xf32>
    %150 = arith.addf %144, %149 : vector<16x128xf32>
    %151 = vector.extract_strided_slice %131 {offsets = [48, 0], sizes = [16, 128], strides = [1, 1]} : vector<256x128xf32> to vector<16x128xf32>
    %152 = arith.truncf %151 : vector<16x128xf32> to vector<16x128xbf16>
    %c3_93 = arith.constant 3 : index
    %c0_94 = arith.constant 0 : index
    %c0_95 = arith.constant 0 : index
    %153 = vector.load %arg6[%c3_93, %c0_94, %c0_95] : memref<16x128x128xbf16, #tpu.memory_space<vmem>>, vector<1x128x128xbf16>
    %154 = vector.shape_cast %153 : vector<1x128x128xbf16> to vector<128x128xbf16>
    %cst_96 = arith.constant dense<0.000000e+00> : vector<16x128xf32>
    %155 = tpu.matmul %152, %154, %cst_96 {dimension_numbers = #tpu.dot_dimension_numbers<[1], [0], [0], [1], [0, 0, 1, 1], [], []>} : vector<16x128xbf16>, vector<128x128xbf16>, vector<16x128xf32> -> vector<16x128xf32>
    %156 = arith.addf %150, %155 : vector<16x128xf32>
    %157 = vector.extract_strided_slice %131 {offsets = [64, 0], sizes = [16, 128], strides = [1, 1]} : vector<256x128xf32> to vector<16x128xf32>
    %158 = arith.truncf %157 : vector<16x128xf32> to vector<16x128xbf16>
    %c4_97 = arith.constant 4 : index
    %c0_98 = arith.constant 0 : index
    %c0_99 = arith.constant 0 : index
    %159 = vector.load %arg6[%c4_97, %c0_98, %c0_99] : memref<16x128x128xbf16, #tpu.memory_space<vmem>>, vector<1x128x128xbf16>
    %160 = vector.shape_cast %159 : vector<1x128x128xbf16> to vector<128x128xbf16>
    %cst_100 = arith.constant dense<0.000000e+00> : vector<16x128xf32>
    %161 = tpu.matmul %158, %160, %cst_100 {dimension_numbers = #tpu.dot_dimension_numbers<[1], [0], [0], [1], [0, 0, 1, 1], [], []>} : vector<16x128xbf16>, vector<128x128xbf16>, vector<16x128xf32> -> vector<16x128xf32>
    %162 = arith.addf %156, %161 : vector<16x128xf32>
    %163 = vector.extract_strided_slice %131 {offsets = [80, 0], sizes = [16, 128], strides = [1, 1]} : vector<256x128xf32> to vector<16x128xf32>
    %164 = arith.truncf %163 : vector<16x128xf32> to vector<16x128xbf16>
    %c5_101 = arith.constant 5 : index
    %c0_102 = arith.constant 0 : index
    %c0_103 = arith.constant 0 : index
    %165 = vector.load %arg6[%c5_101, %c0_102, %c0_103] : memref<16x128x128xbf16, #tpu.memory_space<vmem>>, vector<1x128x128xbf16>
    %166 = vector.shape_cast %165 : vector<1x128x128xbf16> to vector<128x128xbf16>
    %cst_104 = arith.constant dense<0.000000e+00> : vector<16x128xf32>
    %167 = tpu.matmul %164, %166, %cst_104 {dimension_numbers = #tpu.dot_dimension_numbers<[1], [0], [0], [1], [0, 0, 1, 1], [], []>} : vector<16x128xbf16>, vector<128x128xbf16>, vector<16x128xf32> -> vector<16x128xf32>
    %168 = arith.addf %162, %167 : vector<16x128xf32>
    %169 = vector.extract_strided_slice %131 {offsets = [96, 0], sizes = [16, 128], strides = [1, 1]} : vector<256x128xf32> to vector<16x128xf32>
    %170 = arith.truncf %169 : vector<16x128xf32> to vector<16x128xbf16>
    %c6_105 = arith.constant 6 : index
    %c0_106 = arith.constant 0 : index
    %c0_107 = arith.constant 0 : index
    %171 = vector.load %arg6[%c6_105, %c0_106, %c0_107] : memref<16x128x128xbf16, #tpu.memory_space<vmem>>, vector<1x128x128xbf16>
    %172 = vector.shape_cast %171 : vector<1x128x128xbf16> to vector<128x128xbf16>
    %cst_108 = arith.constant dense<0.000000e+00> : vector<16x128xf32>
    %173 = tpu.matmul %170, %172, %cst_108 {dimension_numbers = #tpu.dot_dimension_numbers<[1], [0], [0], [1], [0, 0, 1, 1], [], []>} : vector<16x128xbf16>, vector<128x128xbf16>, vector<16x128xf32> -> vector<16x128xf32>
    %174 = arith.addf %168, %173 : vector<16x128xf32>
    %175 = vector.extract_strided_slice %131 {offsets = [112, 0], sizes = [16, 128], strides = [1, 1]} : vector<256x128xf32> to vector<16x128xf32>
    %176 = arith.truncf %175 : vector<16x128xf32> to vector<16x128xbf16>
    %c7_109 = arith.constant 7 : index
    %c0_110 = arith.constant 0 : index
    %c0_111 = arith.constant 0 : index
    %177 = vector.load %arg6[%c7_109, %c0_110, %c0_111] : memref<16x128x128xbf16, #tpu.memory_space<vmem>>, vector<1x128x128xbf16>
    %178 = vector.shape_cast %177 : vector<1x128x128xbf16> to vector<128x128xbf16>
    %cst_112 = arith.constant dense<0.000000e+00> : vector<16x128xf32>
    %179 = tpu.matmul %176, %178, %cst_112 {dimension_numbers = #tpu.dot_dimension_numbers<[1], [0], [0], [1], [0, 0, 1, 1], [], []>} : vector<16x128xbf16>, vector<128x128xbf16>, vector<16x128xf32> -> vector<16x128xf32>
    %180 = arith.addf %174, %179 : vector<16x128xf32>
    %181 = vector.extract_strided_slice %131 {offsets = [128, 0], sizes = [16, 128], strides = [1, 1]} : vector<256x128xf32> to vector<16x128xf32>
    %182 = arith.truncf %181 : vector<16x128xf32> to vector<16x128xbf16>
    %c8_113 = arith.constant 8 : index
    %c0_114 = arith.constant 0 : index
    %c0_115 = arith.constant 0 : index
    %183 = vector.load %arg6[%c8_113, %c0_114, %c0_115] : memref<16x128x128xbf16, #tpu.memory_space<vmem>>, vector<1x128x128xbf16>
    %184 = vector.shape_cast %183 : vector<1x128x128xbf16> to vector<128x128xbf16>
    %cst_116 = arith.constant dense<0.000000e+00> : vector<16x128xf32>
    %185 = tpu.matmul %182, %184, %cst_116 {dimension_numbers = #tpu.dot_dimension_numbers<[1], [0], [0], [1], [0, 0, 1, 1], [], []>} : vector<16x128xbf16>, vector<128x128xbf16>, vector<16x128xf32> -> vector<16x128xf32>
    %186 = arith.addf %180, %185 : vector<16x128xf32>
    %187 = vector.extract_strided_slice %131 {offsets = [144, 0], sizes = [16, 128], strides = [1, 1]} : vector<256x128xf32> to vector<16x128xf32>
    %188 = arith.truncf %187 : vector<16x128xf32> to vector<16x128xbf16>
    %c9_117 = arith.constant 9 : index
    %c0_118 = arith.constant 0 : index
    %c0_119 = arith.constant 0 : index
    %189 = vector.load %arg6[%c9_117, %c0_118, %c0_119] : memref<16x128x128xbf16, #tpu.memory_space<vmem>>, vector<1x128x128xbf16>
    %190 = vector.shape_cast %189 : vector<1x128x128xbf16> to vector<128x128xbf16>
    %cst_120 = arith.constant dense<0.000000e+00> : vector<16x128xf32>
    %191 = tpu.matmul %188, %190, %cst_120 {dimension_numbers = #tpu.dot_dimension_numbers<[1], [0], [0], [1], [0, 0, 1, 1], [], []>} : vector<16x128xbf16>, vector<128x128xbf16>, vector<16x128xf32> -> vector<16x128xf32>
    %192 = arith.addf %186, %191 : vector<16x128xf32>
    %193 = vector.extract_strided_slice %131 {offsets = [160, 0], sizes = [16, 128], strides = [1, 1]} : vector<256x128xf32> to vector<16x128xf32>
    %194 = arith.truncf %193 : vector<16x128xf32> to vector<16x128xbf16>
    %c10_121 = arith.constant 10 : index
    %c0_122 = arith.constant 0 : index
    %c0_123 = arith.constant 0 : index
    %195 = vector.load %arg6[%c10_121, %c0_122, %c0_123] : memref<16x128x128xbf16, #tpu.memory_space<vmem>>, vector<1x128x128xbf16>
    %196 = vector.shape_cast %195 : vector<1x128x128xbf16> to vector<128x128xbf16>
    %cst_124 = arith.constant dense<0.000000e+00> : vector<16x128xf32>
    %197 = tpu.matmul %194, %196, %cst_124 {dimension_numbers = #tpu.dot_dimension_numbers<[1], [0], [0], [1], [0, 0, 1, 1], [], []>} : vector<16x128xbf16>, vector<128x128xbf16>, vector<16x128xf32> -> vector<16x128xf32>
    %198 = arith.addf %192, %197 : vector<16x128xf32>
    %199 = vector.extract_strided_slice %131 {offsets = [176, 0], sizes = [16, 128], strides = [1, 1]} : vector<256x128xf32> to vector<16x128xf32>
    %200 = arith.truncf %199 : vector<16x128xf32> to vector<16x128xbf16>
    %c11_125 = arith.constant 11 : index
    %c0_126 = arith.constant 0 : index
    %c0_127 = arith.constant 0 : index
    %201 = vector.load %arg6[%c11_125, %c0_126, %c0_127] : memref<16x128x128xbf16, #tpu.memory_space<vmem>>, vector<1x128x128xbf16>
    %202 = vector.shape_cast %201 : vector<1x128x128xbf16> to vector<128x128xbf16>
    %cst_128 = arith.constant dense<0.000000e+00> : vector<16x128xf32>
    %203 = tpu.matmul %200, %202, %cst_128 {dimension_numbers = #tpu.dot_dimension_numbers<[1], [0], [0], [1], [0, 0, 1, 1], [], []>} : vector<16x128xbf16>, vector<128x128xbf16>, vector<16x128xf32> -> vector<16x128xf32>
    %204 = arith.addf %198, %203 : vector<16x128xf32>
    %205 = vector.extract_strided_slice %131 {offsets = [192, 0], sizes = [16, 128], strides = [1, 1]} : vector<256x128xf32> to vector<16x128xf32>
    %206 = arith.truncf %205 : vector<16x128xf32> to vector<16x128xbf16>
    %c12_129 = arith.constant 12 : index
    %c0_130 = arith.constant 0 : index
    %c0_131 = arith.constant 0 : index
    %207 = vector.load %arg6[%c12_129, %c0_130, %c0_131] : memref<16x128x128xbf16, #tpu.memory_space<vmem>>, vector<1x128x128xbf16>
    %208 = vector.shape_cast %207 : vector<1x128x128xbf16> to vector<128x128xbf16>
    %cst_132 = arith.constant dense<0.000000e+00> : vector<16x128xf32>
    %209 = tpu.matmul %206, %208, %cst_132 {dimension_numbers = #tpu.dot_dimension_numbers<[1], [0], [0], [1], [0, 0, 1, 1], [], []>} : vector<16x128xbf16>, vector<128x128xbf16>, vector<16x128xf32> -> vector<16x128xf32>
    %210 = arith.addf %204, %209 : vector<16x128xf32>
    %211 = vector.extract_strided_slice %131 {offsets = [208, 0], sizes = [16, 128], strides = [1, 1]} : vector<256x128xf32> to vector<16x128xf32>
    %212 = arith.truncf %211 : vector<16x128xf32> to vector<16x128xbf16>
    %c13_133 = arith.constant 13 : index
    %c0_134 = arith.constant 0 : index
    %c0_135 = arith.constant 0 : index
    %213 = vector.load %arg6[%c13_133, %c0_134, %c0_135] : memref<16x128x128xbf16, #tpu.memory_space<vmem>>, vector<1x128x128xbf16>
    %214 = vector.shape_cast %213 : vector<1x128x128xbf16> to vector<128x128xbf16>
    %cst_136 = arith.constant dense<0.000000e+00> : vector<16x128xf32>
    %215 = tpu.matmul %212, %214, %cst_136 {dimension_numbers = #tpu.dot_dimension_numbers<[1], [0], [0], [1], [0, 0, 1, 1], [], []>} : vector<16x128xbf16>, vector<128x128xbf16>, vector<16x128xf32> -> vector<16x128xf32>
    %216 = arith.addf %210, %215 : vector<16x128xf32>
    %217 = vector.extract_strided_slice %131 {offsets = [224, 0], sizes = [16, 128], strides = [1, 1]} : vector<256x128xf32> to vector<16x128xf32>
    %218 = arith.truncf %217 : vector<16x128xf32> to vector<16x128xbf16>
    %c14_137 = arith.constant 14 : index
    %c0_138 = arith.constant 0 : index
    %c0_139 = arith.constant 0 : index
    %219 = vector.load %arg6[%c14_137, %c0_138, %c0_139] : memref<16x128x128xbf16, #tpu.memory_space<vmem>>, vector<1x128x128xbf16>
    %220 = vector.shape_cast %219 : vector<1x128x128xbf16> to vector<128x128xbf16>
    %cst_140 = arith.constant dense<0.000000e+00> : vector<16x128xf32>
    %221 = tpu.matmul %218, %220, %cst_140 {dimension_numbers = #tpu.dot_dimension_numbers<[1], [0], [0], [1], [0, 0, 1, 1], [], []>} : vector<16x128xbf16>, vector<128x128xbf16>, vector<16x128xf32> -> vector<16x128xf32>
    %222 = arith.addf %216, %221 : vector<16x128xf32>
    %223 = vector.extract_strided_slice %131 {offsets = [240, 0], sizes = [16, 128], strides = [1, 1]} : vector<256x128xf32> to vector<16x128xf32>
    %224 = arith.truncf %223 : vector<16x128xf32> to vector<16x128xbf16>
    %c15_141 = arith.constant 15 : index
    %c0_142 = arith.constant 0 : index
    %c0_143 = arith.constant 0 : index
    %225 = vector.load %arg6[%c15_141, %c0_142, %c0_143] : memref<16x128x128xbf16, #tpu.memory_space<vmem>>, vector<1x128x128xbf16>
    %226 = vector.shape_cast %225 : vector<1x128x128xbf16> to vector<128x128xbf16>
    %cst_144 = arith.constant dense<0.000000e+00> : vector<16x128xf32>
    %227 = tpu.matmul %224, %226, %cst_144 {dimension_numbers = #tpu.dot_dimension_numbers<[1], [0], [0], [1], [0, 0, 1, 1], [], []>} : vector<16x128xbf16>, vector<128x128xbf16>, vector<16x128xf32> -> vector<16x128xf32>
    %228 = arith.addf %222, %227 : vector<16x128xf32>
    %c0_145 = arith.constant 0 : index
    %c0_146 = arith.constant 0 : index
    %229 = vector.load %arg10[%c0_145, %c0_146] : memref<1x128xf32, #tpu.memory_space<vmem>>, vector<1x128xf32>
    %230 = vector.broadcast %229 : vector<1x128xf32> to vector<16x128xf32>
    %231 = arith.addf %228, %230 : vector<16x128xf32>
    %cst_147 = arith.constant 0.000000e+00 : f32
    %232 = vector.broadcast %cst_147 : f32 to vector<16x128xf32>
    %233 = arith.maximumf %231, %232 : vector<16x128xf32>
    %234 = arith.truncf %233 : vector<16x128xf32> to vector<16x128xbf16>
    %235 = vector.extract_strided_slice %234 {offsets = [0, 0], sizes = [4, 128], strides = [1, 1]} : vector<16x128xbf16> to vector<4x128xbf16>
    %c7_148 = arith.constant 7 : index
    %c0_149 = arith.constant 0 : index
    %236 = vector.load %arg18[%c7_148, %c0_149] : memref<36x128xbf16, #tpu.memory_space<vmem>>, vector<4x128xbf16>
    tpu.vector_store %arg18[%c7_148, %c0_149], %235 {strides = array<i32>} : memref<36x128xbf16, #tpu.memory_space<vmem>>, vector<4x128xbf16>,
    %237 = vector.extract_strided_slice %234 {offsets = [4, 0], sizes = [4, 128], strides = [1, 1]} : vector<16x128xbf16> to vector<4x128xbf16>
    %c13_150 = arith.constant 13 : index
    %c0_151 = arith.constant 0 : index
    %238 = vector.load %arg18[%c13_150, %c0_151] : memref<36x128xbf16, #tpu.memory_space<vmem>>, vector<4x128xbf16>
    tpu.vector_store %arg18[%c13_150, %c0_151], %237 {strides = array<i32>} : memref<36x128xbf16, #tpu.memory_space<vmem>>, vector<4x128xbf16>,
    %239 = vector.extract_strided_slice %234 {offsets = [8, 0], sizes = [4, 128], strides = [1, 1]} : vector<16x128xbf16> to vector<4x128xbf16>
    %c19 = arith.constant 19 : index
    %c0_152 = arith.constant 0 : index
    %240 = vector.load %arg18[%c19, %c0_152] : memref<36x128xbf16, #tpu.memory_space<vmem>>, vector<4x128xbf16>
    tpu.vector_store %arg18[%c19, %c0_152], %239 {strides = array<i32>} : memref<36x128xbf16, #tpu.memory_space<vmem>>, vector<4x128xbf16>,
    %241 = vector.extract_strided_slice %234 {offsets = [12, 0], sizes = [4, 128], strides = [1, 1]} : vector<16x128xbf16> to vector<4x128xbf16>
    %c25 = arith.constant 25 : index
    %c0_153 = arith.constant 0 : index
    %242 = vector.load %arg18[%c25, %c0_153] : memref<36x128xbf16, #tpu.memory_space<vmem>>, vector<4x128xbf16>
    tpu.vector_store %arg18[%c25, %c0_153], %241 {strides = array<i32>} : memref<36x128xbf16, #tpu.memory_space<vmem>>, vector<4x128xbf16>,
    %c0_154 = arith.constant 0 : index
    %c0_155 = arith.constant 0 : index
    %243 = vector.load %arg18[%c0_154, %c0_155] : memref<36x128xbf16, #tpu.memory_space<vmem>>, vector<36x128xbf16>
    %c0_156 = arith.constant 0 : index
    %c0_157 = arith.constant 0 : index
    %244 = vector.load %arg3[%c0_156, %c0_157] : memref<64x36xbf16, #tpu.memory_space<vmem>>, vector<64x36xbf16>
    %cst_158 = arith.constant dense<0.000000e+00> : vector<64x128xf32>
    %245 = tpu.matmul %244, %243, %cst_158 {dimension_numbers = #tpu.dot_dimension_numbers<[1], [0], [0], [1], [0, 0, 1, 1], [], []>} : vector<64x36xbf16>, vector<36x128xbf16>, vector<64x128xf32> -> vector<64x128xf32>
    %cst_159 = arith.constant 0.000000e+00 : f32
    %246 = vector.broadcast %cst_159 : f32 to vector<4x128xf32>
    %247 = vector.extract_strided_slice %245 {offsets = [0, 0], sizes = [4, 128], strides = [1, 1]} : vector<64x128xf32> to vector<4x128xf32>
    %248 = arith.truncf %247 : vector<4x128xf32> to vector<4x128xbf16>
    %c0_160 = arith.constant 0 : index
    %c0_161 = arith.constant 0 : index
    %c0_162 = arith.constant 0 : index
    %249 = vector.load %arg7[%c0_160, %c0_161, %c0_162] : memref<16x128x128xbf16, #tpu.memory_space<vmem>>, vector<1x128x128xbf16>
    %250 = vector.shape_cast %249 : vector<1x128x128xbf16> to vector<128x128xbf16>
    %cst_163 = arith.constant dense<0.000000e+00> : vector<4x128xf32>
    %251 = tpu.matmul %248, %250, %cst_163 {dimension_numbers = #tpu.dot_dimension_numbers<[1], [0], [0], [1], [0, 0, 1, 1], [], []>} : vector<4x128xbf16>, vector<128x128xbf16>, vector<4x128xf32> -> vector<4x128xf32>
    %252 = arith.addf %246, %251 : vector<4x128xf32>
    %253 = vector.extract_strided_slice %245 {offsets = [4, 0], sizes = [4, 128], strides = [1, 1]} : vector<64x128xf32> to vector<4x128xf32>
    %254 = arith.truncf %253 : vector<4x128xf32> to vector<4x128xbf16>
    %c1_164 = arith.constant 1 : index
    %c0_165 = arith.constant 0 : index
    %c0_166 = arith.constant 0 : index
    %255 = vector.load %arg7[%c1_164, %c0_165, %c0_166] : memref<16x128x128xbf16, #tpu.memory_space<vmem>>, vector<1x128x128xbf16>
    %256 = vector.shape_cast %255 : vector<1x128x128xbf16> to vector<128x128xbf16>
    %cst_167 = arith.constant dense<0.000000e+00> : vector<4x128xf32>
    %257 = tpu.matmul %254, %256, %cst_167 {dimension_numbers = #tpu.dot_dimension_numbers<[1], [0], [0], [1], [0, 0, 1, 1], [], []>} : vector<4x128xbf16>, vector<128x128xbf16>, vector<4x128xf32> -> vector<4x128xf32>
    %258 = arith.addf %252, %257 : vector<4x128xf32>
    %259 = vector.extract_strided_slice %245 {offsets = [8, 0], sizes = [4, 128], strides = [1, 1]} : vector<64x128xf32> to vector<4x128xf32>
    %260 = arith.truncf %259 : vector<4x128xf32> to vector<4x128xbf16>
    %c2_168 = arith.constant 2 : index
    %c0_169 = arith.constant 0 : index
    %c0_170 = arith.constant 0 : index
    %261 = vector.load %arg7[%c2_168, %c0_169, %c0_170] : memref<16x128x128xbf16, #tpu.memory_space<vmem>>, vector<1x128x128xbf16>
    %262 = vector.shape_cast %261 : vector<1x128x128xbf16> to vector<128x128xbf16>
    %cst_171 = arith.constant dense<0.000000e+00> : vector<4x128xf32>
    %263 = tpu.matmul %260, %262, %cst_171 {dimension_numbers = #tpu.dot_dimension_numbers<[1], [0], [0], [1], [0, 0, 1, 1], [], []>} : vector<4x128xbf16>, vector<128x128xbf16>, vector<4x128xf32> -> vector<4x128xf32>
    %264 = arith.addf %258, %263 : vector<4x128xf32>
    %265 = vector.extract_strided_slice %245 {offsets = [12, 0], sizes = [4, 128], strides = [1, 1]} : vector<64x128xf32> to vector<4x128xf32>
    %266 = arith.truncf %265 : vector<4x128xf32> to vector<4x128xbf16>
    %c3_172 = arith.constant 3 : index
    %c0_173 = arith.constant 0 : index
    %c0_174 = arith.constant 0 : index
    %267 = vector.load %arg7[%c3_172, %c0_173, %c0_174] : memref<16x128x128xbf16, #tpu.memory_space<vmem>>, vector<1x128x128xbf16>
    %268 = vector.shape_cast %267 : vector<1x128x128xbf16> to vector<128x128xbf16>
    %cst_175 = arith.constant dense<0.000000e+00> : vector<4x128xf32>
    %269 = tpu.matmul %266, %268, %cst_175 {dimension_numbers = #tpu.dot_dimension_numbers<[1], [0], [0], [1], [0, 0, 1, 1], [], []>} : vector<4x128xbf16>, vector<128x128xbf16>, vector<4x128xf32> -> vector<4x128xf32>
    %270 = arith.addf %264, %269 : vector<4x128xf32>
    %271 = vector.extract_strided_slice %245 {offsets = [16, 0], sizes = [4, 128], strides = [1, 1]} : vector<64x128xf32> to vector<4x128xf32>
    %272 = arith.truncf %271 : vector<4x128xf32> to vector<4x128xbf16>
    %c4_176 = arith.constant 4 : index
    %c0_177 = arith.constant 0 : index
    %c0_178 = arith.constant 0 : index
    %273 = vector.load %arg7[%c4_176, %c0_177, %c0_178] : memref<16x128x128xbf16, #tpu.memory_space<vmem>>, vector<1x128x128xbf16>
    %274 = vector.shape_cast %273 : vector<1x128x128xbf16> to vector<128x128xbf16>
    %cst_179 = arith.constant dense<0.000000e+00> : vector<4x128xf32>
    %275 = tpu.matmul %272, %274, %cst_179 {dimension_numbers = #tpu.dot_dimension_numbers<[1], [0], [0], [1], [0, 0, 1, 1], [], []>} : vector<4x128xbf16>, vector<128x128xbf16>, vector<4x128xf32> -> vector<4x128xf32>
    %276 = arith.addf %270, %275 : vector<4x128xf32>
    %277 = vector.extract_strided_slice %245 {offsets = [20, 0], sizes = [4, 128], strides = [1, 1]} : vector<64x128xf32> to vector<4x128xf32>
    %278 = arith.truncf %277 : vector<4x128xf32> to vector<4x128xbf16>
    %c5_180 = arith.constant 5 : index
    %c0_181 = arith.constant 0 : index
    %c0_182 = arith.constant 0 : index
    %279 = vector.load %arg7[%c5_180, %c0_181, %c0_182] : memref<16x128x128xbf16, #tpu.memory_space<vmem>>, vector<1x128x128xbf16>
    %280 = vector.shape_cast %279 : vector<1x128x128xbf16> to vector<128x128xbf16>
    %cst_183 = arith.constant dense<0.000000e+00> : vector<4x128xf32>
    %281 = tpu.matmul %278, %280, %cst_183 {dimension_numbers = #tpu.dot_dimension_numbers<[1], [0], [0], [1], [0, 0, 1, 1], [], []>} : vector<4x128xbf16>, vector<128x128xbf16>, vector<4x128xf32> -> vector<4x128xf32>
    %282 = arith.addf %276, %281 : vector<4x128xf32>
    %283 = vector.extract_strided_slice %245 {offsets = [24, 0], sizes = [4, 128], strides = [1, 1]} : vector<64x128xf32> to vector<4x128xf32>
    %284 = arith.truncf %283 : vector<4x128xf32> to vector<4x128xbf16>
    %c6_184 = arith.constant 6 : index
    %c0_185 = arith.constant 0 : index
    %c0_186 = arith.constant 0 : index
    %285 = vector.load %arg7[%c6_184, %c0_185, %c0_186] : memref<16x128x128xbf16, #tpu.memory_space<vmem>>, vector<1x128x128xbf16>
    %286 = vector.shape_cast %285 : vector<1x128x128xbf16> to vector<128x128xbf16>
    %cst_187 = arith.constant dense<0.000000e+00> : vector<4x128xf32>
    %287 = tpu.matmul %284, %286, %cst_187 {dimension_numbers = #tpu.dot_dimension_numbers<[1], [0], [0], [1], [0, 0, 1, 1], [], []>} : vector<4x128xbf16>, vector<128x128xbf16>, vector<4x128xf32> -> vector<4x128xf32>
    %288 = arith.addf %282, %287 : vector<4x128xf32>
    %289 = vector.extract_strided_slice %245 {offsets = [28, 0], sizes = [4, 128], strides = [1, 1]} : vector<64x128xf32> to vector<4x128xf32>
    %290 = arith.truncf %289 : vector<4x128xf32> to vector<4x128xbf16>
    %c7_188 = arith.constant 7 : index
    %c0_189 = arith.constant 0 : index
    %c0_190 = arith.constant 0 : index
    %291 = vector.load %arg7[%c7_188, %c0_189, %c0_190] : memref<16x128x128xbf16, #tpu.memory_space<vmem>>, vector<1x128x128xbf16>
    %292 = vector.shape_cast %291 : vector<1x128x128xbf16> to vector<128x128xbf16>
    %cst_191 = arith.constant dense<0.000000e+00> : vector<4x128xf32>
    %293 = tpu.matmul %290, %292, %cst_191 {dimension_numbers = #tpu.dot_dimension_numbers<[1], [0], [0], [1], [0, 0, 1, 1], [], []>} : vector<4x128xbf16>, vector<128x128xbf16>, vector<4x128xf32> -> vector<4x128xf32>
    %294 = arith.addf %288, %293 : vector<4x128xf32>
    %295 = vector.extract_strided_slice %245 {offsets = [32, 0], sizes = [4, 128], strides = [1, 1]} : vector<64x128xf32> to vector<4x128xf32>
    %296 = arith.truncf %295 : vector<4x128xf32> to vector<4x128xbf16>
    %c8_192 = arith.constant 8 : index
    %c0_193 = arith.constant 0 : index
    %c0_194 = arith.constant 0 : index
    %297 = vector.load %arg7[%c8_192, %c0_193, %c0_194] : memref<16x128x128xbf16, #tpu.memory_space<vmem>>, vector<1x128x128xbf16>
    %298 = vector.shape_cast %297 : vector<1x128x128xbf16> to vector<128x128xbf16>
    %cst_195 = arith.constant dense<0.000000e+00> : vector<4x128xf32>
    %299 = tpu.matmul %296, %298, %cst_195 {dimension_numbers = #tpu.dot_dimension_numbers<[1], [0], [0], [1], [0, 0, 1, 1], [], []>} : vector<4x128xbf16>, vector<128x128xbf16>, vector<4x128xf32> -> vector<4x128xf32>
    %300 = arith.addf %294, %299 : vector<4x128xf32>
    %301 = vector.extract_strided_slice %245 {offsets = [36, 0], sizes = [4, 128], strides = [1, 1]} : vector<64x128xf32> to vector<4x128xf32>
    %302 = arith.truncf %301 : vector<4x128xf32> to vector<4x128xbf16>
    %c9_196 = arith.constant 9 : index
    %c0_197 = arith.constant 0 : index
    %c0_198 = arith.constant 0 : index
    %303 = vector.load %arg7[%c9_196, %c0_197, %c0_198] : memref<16x128x128xbf16, #tpu.memory_space<vmem>>, vector<1x128x128xbf16>
    %304 = vector.shape_cast %303 : vector<1x128x128xbf16> to vector<128x128xbf16>
    %cst_199 = arith.constant dense<0.000000e+00> : vector<4x128xf32>
    %305 = tpu.matmul %302, %304, %cst_199 {dimension_numbers = #tpu.dot_dimension_numbers<[1], [0], [0], [1], [0, 0, 1, 1], [], []>} : vector<4x128xbf16>, vector<128x128xbf16>, vector<4x128xf32> -> vector<4x128xf32>
    %306 = arith.addf %300, %305 : vector<4x128xf32>
    %307 = vector.extract_strided_slice %245 {offsets = [40, 0], sizes = [4, 128], strides = [1, 1]} : vector<64x128xf32> to vector<4x128xf32>
    %308 = arith.truncf %307 : vector<4x128xf32> to vector<4x128xbf16>
    %c10_200 = arith.constant 10 : index
    %c0_201 = arith.constant 0 : index
    %c0_202 = arith.constant 0 : index
    %309 = vector.load %arg7[%c10_200, %c0_201, %c0_202] : memref<16x128x128xbf16, #tpu.memory_space<vmem>>, vector<1x128x128xbf16>
    %310 = vector.shape_cast %309 : vector<1x128x128xbf16> to vector<128x128xbf16>
    %cst_203 = arith.constant dense<0.000000e+00> : vector<4x128xf32>
    %311 = tpu.matmul %308, %310, %cst_203 {dimension_numbers = #tpu.dot_dimension_numbers<[1], [0], [0], [1], [0, 0, 1, 1], [], []>} : vector<4x128xbf16>, vector<128x128xbf16>, vector<4x128xf32> -> vector<4x128xf32>
    %312 = arith.addf %306, %311 : vector<4x128xf32>
    %313 = vector.extract_strided_slice %245 {offsets = [44, 0], sizes = [4, 128], strides = [1, 1]} : vector<64x128xf32> to vector<4x128xf32>
    %314 = arith.truncf %313 : vector<4x128xf32> to vector<4x128xbf16>
    %c11_204 = arith.constant 11 : index
    %c0_205 = arith.constant 0 : index
    %c0_206 = arith.constant 0 : index
    %315 = vector.load %arg7[%c11_204, %c0_205, %c0_206] : memref<16x128x128xbf16, #tpu.memory_space<vmem>>, vector<1x128x128xbf16>
    %316 = vector.shape_cast %315 : vector<1x128x128xbf16> to vector<128x128xbf16>
    %cst_207 = arith.constant dense<0.000000e+00> : vector<4x128xf32>
    %317 = tpu.matmul %314, %316, %cst_207 {dimension_numbers = #tpu.dot_dimension_numbers<[1], [0], [0], [1], [0, 0, 1, 1], [], []>} : vector<4x128xbf16>, vector<128x128xbf16>, vector<4x128xf32> -> vector<4x128xf32>
    %318 = arith.addf %312, %317 : vector<4x128xf32>
    %319 = vector.extract_strided_slice %245 {offsets = [48, 0], sizes = [4, 128], strides = [1, 1]} : vector<64x128xf32> to vector<4x128xf32>
    %320 = arith.truncf %319 : vector<4x128xf32> to vector<4x128xbf16>
    %c12_208 = arith.constant 12 : index
    %c0_209 = arith.constant 0 : index
    %c0_210 = arith.constant 0 : index
    %321 = vector.load %arg7[%c12_208, %c0_209, %c0_210] : memref<16x128x128xbf16, #tpu.memory_space<vmem>>, vector<1x128x128xbf16>
    %322 = vector.shape_cast %321 : vector<1x128x128xbf16> to vector<128x128xbf16>
    %cst_211 = arith.constant dense<0.000000e+00> : vector<4x128xf32>
    %323 = tpu.matmul %320, %322, %cst_211 {dimension_numbers = #tpu.dot_dimension_numbers<[1], [0], [0], [1], [0, 0, 1, 1], [], []>} : vector<4x128xbf16>, vector<128x128xbf16>, vector<4x128xf32> -> vector<4x128xf32>
    %324 = arith.addf %318, %323 : vector<4x128xf32>
    %325 = vector.extract_strided_slice %245 {offsets = [52, 0], sizes = [4, 128], strides = [1, 1]} : vector<64x128xf32> to vector<4x128xf32>
    %326 = arith.truncf %325 : vector<4x128xf32> to vector<4x128xbf16>
    %c13_212 = arith.constant 13 : index
    %c0_213 = arith.constant 0 : index
    %c0_214 = arith.constant 0 : index
    %327 = vector.load %arg7[%c13_212, %c0_213, %c0_214] : memref<16x128x128xbf16, #tpu.memory_space<vmem>>, vector<1x128x128xbf16>
    %328 = vector.shape_cast %327 : vector<1x128x128xbf16> to vector<128x128xbf16>
    %cst_215 = arith.constant dense<0.000000e+00> : vector<4x128xf32>
    %329 = tpu.matmul %326, %328, %cst_215 {dimension_numbers = #tpu.dot_dimension_numbers<[1], [0], [0], [1], [0, 0, 1, 1], [], []>} : vector<4x128xbf16>, vector<128x128xbf16>, vector<4x128xf32> -> vector<4x128xf32>
    %330 = arith.addf %324, %329 : vector<4x128xf32>
    %331 = vector.extract_strided_slice %245 {offsets = [56, 0], sizes = [4, 128], strides = [1, 1]} : vector<64x128xf32> to vector<4x128xf32>
    %332 = arith.truncf %331 : vector<4x128xf32> to vector<4x128xbf16>
    %c14_216 = arith.constant 14 : index
    %c0_217 = arith.constant 0 : index
    %c0_218 = arith.constant 0 : index
    %333 = vector.load %arg7[%c14_216, %c0_217, %c0_218] : memref<16x128x128xbf16, #tpu.memory_space<vmem>>, vector<1x128x128xbf16>
    %334 = vector.shape_cast %333 : vector<1x128x128xbf16> to vector<128x128xbf16>
    %cst_219 = arith.constant dense<0.000000e+00> : vector<4x128xf32>
    %335 = tpu.matmul %332, %334, %cst_219 {dimension_numbers = #tpu.dot_dimension_numbers<[1], [0], [0], [1], [0, 0, 1, 1], [], []>} : vector<4x128xbf16>, vector<128x128xbf16>, vector<4x128xf32> -> vector<4x128xf32>
    %336 = arith.addf %330, %335 : vector<4x128xf32>
    %337 = vector.extract_strided_slice %245 {offsets = [60, 0], sizes = [4, 128], strides = [1, 1]} : vector<64x128xf32> to vector<4x128xf32>
    %338 = arith.truncf %337 : vector<4x128xf32> to vector<4x128xbf16>
    %c15_220 = arith.constant 15 : index
    %c0_221 = arith.constant 0 : index
    %c0_222 = arith.constant 0 : index
    %339 = vector.load %arg7[%c15_220, %c0_221, %c0_222] : memref<16x128x128xbf16, #tpu.memory_space<vmem>>, vector<1x128x128xbf16>
    %340 = vector.shape_cast %339 : vector<1x128x128xbf16> to vector<128x128xbf16>
    %cst_223 = arith.constant dense<0.000000e+00> : vector<4x128xf32>
    %341 = tpu.matmul %338, %340, %cst_223 {dimension_numbers = #tpu.dot_dimension_numbers<[1], [0], [0], [1], [0, 0, 1, 1], [], []>} : vector<4x128xbf16>, vector<128x128xbf16>, vector<4x128xf32> -> vector<4x128xf32>
    %342 = arith.addf %336, %341 : vector<4x128xf32>
    %c0_224 = arith.constant 0 : index
    %c0_225 = arith.constant 0 : index
    %343 = vector.load %arg11[%c0_224, %c0_225] : memref<1x128xf32, #tpu.memory_space<vmem>>, vector<1x128xf32>
    %344 = vector.broadcast %343 : vector<1x128xf32> to vector<4x128xf32>
    %345 = arith.addf %342, %344 : vector<4x128xf32>
    %cst_226 = arith.constant 0.000000e+00 : f32
    %346 = vector.broadcast %cst_226 : f32 to vector<4x128xf32>
    %347 = arith.maximumf %345, %346 : vector<4x128xf32>
    %348 = arith.truncf %347 : vector<4x128xf32> to vector<4x128xbf16>
    %349 = vector.extract_strided_slice %348 {offsets = [0, 0], sizes = [2, 128], strides = [1, 1]} : vector<4x128xbf16> to vector<2x128xbf16>
    %c5_227 = arith.constant 5 : index
    %c0_228 = arith.constant 0 : index
    %350 = vector.load %arg19[%c5_227, %c0_228] : memref<16x128xbf16, #tpu.memory_space<vmem>>, vector<2x128xbf16>
    tpu.vector_store %arg19[%c5_227, %c0_228], %349 {strides = array<i32>} : memref<16x128xbf16, #tpu.memory_space<vmem>>, vector<2x128xbf16>,
    %351 = vector.extract_strided_slice %348 {offsets = [2, 0], sizes = [2, 128], strides = [1, 1]} : vector<4x128xbf16> to vector<2x128xbf16>
    %c9_229 = arith.constant 9 : index
    %c0_230 = arith.constant 0 : index
    %352 = vector.load %arg19[%c9_229, %c0_230] : memref<16x128xbf16, #tpu.memory_space<vmem>>, vector<2x128xbf16>
    tpu.vector_store %arg19[%c9_229, %c0_230], %351 {strides = array<i32>} : memref<16x128xbf16, #tpu.memory_space<vmem>>, vector<2x128xbf16>,
    %c0_231 = arith.constant 0 : index
    %c0_232 = arith.constant 0 : index
    %353 = vector.load %arg19[%c0_231, %c0_232] : memref<16x128xbf16, #tpu.memory_space<vmem>>, vector<16x128xbf16>
    %c0_233 = arith.constant 0 : index
    %c0_234 = arith.constant 0 : index
    %354 = vector.load %arg4[%c0_233, %c0_234] : memref<16x16xbf16, #tpu.memory_space<vmem>>, vector<16x16xbf16>
    %cst_235 = arith.constant dense<0.000000e+00> : vector<16x128xf32>
    %355 = tpu.matmul %354, %353, %cst_235 {dimension_numbers = #tpu.dot_dimension_numbers<[1], [0], [0], [1], [0, 0, 1, 1], [], []>} : vector<16x16xbf16>, vector<16x128xbf16>, vector<16x128xf32> -> vector<16x128xf32>
    %cst_236 = arith.constant 0.000000e+00 : f32
    %356 = vector.broadcast %cst_236 : f32 to vector<1x128xf32>
    %357 = vector.extract_strided_slice %355 {offsets = [0, 0], sizes = [1, 128], strides = [1, 1]} : vector<16x128xf32> to vector<1x128xf32>
    %358 = arith.truncf %357 : vector<1x128xf32> to vector<1x128xbf16>
    %c0_237 = arith.constant 0 : index
    %c0_238 = arith.constant 0 : index
    %c0_239 = arith.constant 0 : index
    %359 = vector.load %arg8[%c0_237, %c0_238, %c0_239] : memref<16x128x128xbf16, #tpu.memory_space<vmem>>, vector<1x128x128xbf16>
    %360 = vector.shape_cast %359 : vector<1x128x128xbf16> to vector<128x128xbf16>
    %cst_240 = arith.constant dense<0.000000e+00> : vector<1x128xf32>
    %361 = tpu.matmul %358, %360, %cst_240 {dimension_numbers = #tpu.dot_dimension_numbers<[1], [0], [0], [1], [0, 0, 1, 1], [], []>} : vector<1x128xbf16>, vector<128x128xbf16>, vector<1x128xf32> -> vector<1x128xf32>
    %362 = arith.addf %356, %361 : vector<1x128xf32>
    %363 = vector.extract_strided_slice %355 {offsets = [1, 0], sizes = [1, 128], strides = [1, 1]} : vector<16x128xf32> to vector<1x128xf32>
    %364 = arith.truncf %363 : vector<1x128xf32> to vector<1x128xbf16>
    %c1_241 = arith.constant 1 : index
    %c0_242 = arith.constant 0 : index
    %c0_243 = arith.constant 0 : index
    %365 = vector.load %arg8[%c1_241, %c0_242, %c0_243] : memref<16x128x128xbf16, #tpu.memory_space<vmem>>, vector<1x128x128xbf16>
    %366 = vector.shape_cast %365 : vector<1x128x128xbf16> to vector<128x128xbf16>
    %cst_244 = arith.constant dense<0.000000e+00> : vector<1x128xf32>
    %367 = tpu.matmul %364, %366, %cst_244 {dimension_numbers = #tpu.dot_dimension_numbers<[1], [0], [0], [1], [0, 0, 1, 1], [], []>} : vector<1x128xbf16>, vector<128x128xbf16>, vector<1x128xf32> -> vector<1x128xf32>
    %368 = arith.addf %362, %367 : vector<1x128xf32>
    %369 = vector.extract_strided_slice %355 {offsets = [2, 0], sizes = [1, 128], strides = [1, 1]} : vector<16x128xf32> to vector<1x128xf32>
    %370 = arith.truncf %369 : vector<1x128xf32> to vector<1x128xbf16>
    %c2_245 = arith.constant 2 : index
    %c0_246 = arith.constant 0 : index
    %c0_247 = arith.constant 0 : index
    %371 = vector.load %arg8[%c2_245, %c0_246, %c0_247] : memref<16x128x128xbf16, #tpu.memory_space<vmem>>, vector<1x128x128xbf16>
    %372 = vector.shape_cast %371 : vector<1x128x128xbf16> to vector<128x128xbf16>
    %cst_248 = arith.constant dense<0.000000e+00> : vector<1x128xf32>
    %373 = tpu.matmul %370, %372, %cst_248 {dimension_numbers = #tpu.dot_dimension_numbers<[1], [0], [0], [1], [0, 0, 1, 1], [], []>} : vector<1x128xbf16>, vector<128x128xbf16>, vector<1x128xf32> -> vector<1x128xf32>
    %374 = arith.addf %368, %373 : vector<1x128xf32>
    %375 = vector.extract_strided_slice %355 {offsets = [3, 0], sizes = [1, 128], strides = [1, 1]} : vector<16x128xf32> to vector<1x128xf32>
    %376 = arith.truncf %375 : vector<1x128xf32> to vector<1x128xbf16>
    %c3_249 = arith.constant 3 : index
    %c0_250 = arith.constant 0 : index
    %c0_251 = arith.constant 0 : index
    %377 = vector.load %arg8[%c3_249, %c0_250, %c0_251] : memref<16x128x128xbf16, #tpu.memory_space<vmem>>, vector<1x128x128xbf16>
    %378 = vector.shape_cast %377 : vector<1x128x128xbf16> to vector<128x128xbf16>
    %cst_252 = arith.constant dense<0.000000e+00> : vector<1x128xf32>
    %379 = tpu.matmul %376, %378, %cst_252 {dimension_numbers = #tpu.dot_dimension_numbers<[1], [0], [0], [1], [0, 0, 1, 1], [], []>} : vector<1x128xbf16>, vector<128x128xbf16>, vector<1x128xf32> -> vector<1x128xf32>
    %380 = arith.addf %374, %379 : vector<1x128xf32>
    %381 = vector.extract_strided_slice %355 {offsets = [4, 0], sizes = [1, 128], strides = [1, 1]} : vector<16x128xf32> to vector<1x128xf32>
    %382 = arith.truncf %381 : vector<1x128xf32> to vector<1x128xbf16>
    %c4_253 = arith.constant 4 : index
    %c0_254 = arith.constant 0 : index
    %c0_255 = arith.constant 0 : index
    %383 = vector.load %arg8[%c4_253, %c0_254, %c0_255] : memref<16x128x128xbf16, #tpu.memory_space<vmem>>, vector<1x128x128xbf16>
    %384 = vector.shape_cast %383 : vector<1x128x128xbf16> to vector<128x128xbf16>
    %cst_256 = arith.constant dense<0.000000e+00> : vector<1x128xf32>
    %385 = tpu.matmul %382, %384, %cst_256 {dimension_numbers = #tpu.dot_dimension_numbers<[1], [0], [0], [1], [0, 0, 1, 1], [], []>} : vector<1x128xbf16>, vector<128x128xbf16>, vector<1x128xf32> -> vector<1x128xf32>
    %386 = arith.addf %380, %385 : vector<1x128xf32>
    %387 = vector.extract_strided_slice %355 {offsets = [5, 0], sizes = [1, 128], strides = [1, 1]} : vector<16x128xf32> to vector<1x128xf32>
    %388 = arith.truncf %387 : vector<1x128xf32> to vector<1x128xbf16>
    %c5_257 = arith.constant 5 : index
    %c0_258 = arith.constant 0 : index
    %c0_259 = arith.constant 0 : index
    %389 = vector.load %arg8[%c5_257, %c0_258, %c0_259] : memref<16x128x128xbf16, #tpu.memory_space<vmem>>, vector<1x128x128xbf16>
    %390 = vector.shape_cast %389 : vector<1x128x128xbf16> to vector<128x128xbf16>
    %cst_260 = arith.constant dense<0.000000e+00> : vector<1x128xf32>
    %391 = tpu.matmul %388, %390, %cst_260 {dimension_numbers = #tpu.dot_dimension_numbers<[1], [0], [0], [1], [0, 0, 1, 1], [], []>} : vector<1x128xbf16>, vector<128x128xbf16>, vector<1x128xf32> -> vector<1x128xf32>
    %392 = arith.addf %386, %391 : vector<1x128xf32>
    %393 = vector.extract_strided_slice %355 {offsets = [6, 0], sizes = [1, 128], strides = [1, 1]} : vector<16x128xf32> to vector<1x128xf32>
    %394 = arith.truncf %393 : vector<1x128xf32> to vector<1x128xbf16>
    %c6_261 = arith.constant 6 : index
    %c0_262 = arith.constant 0 : index
    %c0_263 = arith.constant 0 : index
    %395 = vector.load %arg8[%c6_261, %c0_262, %c0_263] : memref<16x128x128xbf16, #tpu.memory_space<vmem>>, vector<1x128x128xbf16>
    %396 = vector.shape_cast %395 : vector<1x128x128xbf16> to vector<128x128xbf16>
    %cst_264 = arith.constant dense<0.000000e+00> : vector<1x128xf32>
    %397 = tpu.matmul %394, %396, %cst_264 {dimension_numbers = #tpu.dot_dimension_numbers<[1], [0], [0], [1], [0, 0, 1, 1], [], []>} : vector<1x128xbf16>, vector<128x128xbf16>, vector<1x128xf32> -> vector<1x128xf32>
    %398 = arith.addf %392, %397 : vector<1x128xf32>
    %399 = vector.extract_strided_slice %355 {offsets = [7, 0], sizes = [1, 128], strides = [1, 1]} : vector<16x128xf32> to vector<1x128xf32>
    %400 = arith.truncf %399 : vector<1x128xf32> to vector<1x128xbf16>
    %c7_265 = arith.constant 7 : index
    %c0_266 = arith.constant 0 : index
    %c0_267 = arith.constant 0 : index
    %401 = vector.load %arg8[%c7_265, %c0_266, %c0_267] : memref<16x128x128xbf16, #tpu.memory_space<vmem>>, vector<1x128x128xbf16>
    %402 = vector.shape_cast %401 : vector<1x128x128xbf16> to vector<128x128xbf16>
    %cst_268 = arith.constant dense<0.000000e+00> : vector<1x128xf32>
    %403 = tpu.matmul %400, %402, %cst_268 {dimension_numbers = #tpu.dot_dimension_numbers<[1], [0], [0], [1], [0, 0, 1, 1], [], []>} : vector<1x128xbf16>, vector<128x128xbf16>, vector<1x128xf32> -> vector<1x128xf32>
    %404 = arith.addf %398, %403 : vector<1x128xf32>
    %405 = vector.extract_strided_slice %355 {offsets = [8, 0], sizes = [1, 128], strides = [1, 1]} : vector<16x128xf32> to vector<1x128xf32>
    %406 = arith.truncf %405 : vector<1x128xf32> to vector<1x128xbf16>
    %c8_269 = arith.constant 8 : index
    %c0_270 = arith.constant 0 : index
    %c0_271 = arith.constant 0 : index
    %407 = vector.load %arg8[%c8_269, %c0_270, %c0_271] : memref<16x128x128xbf16, #tpu.memory_space<vmem>>, vector<1x128x128xbf16>
    %408 = vector.shape_cast %407 : vector<1x128x128xbf16> to vector<128x128xbf16>
    %cst_272 = arith.constant dense<0.000000e+00> : vector<1x128xf32>
    %409 = tpu.matmul %406, %408, %cst_272 {dimension_numbers = #tpu.dot_dimension_numbers<[1], [0], [0], [1], [0, 0, 1, 1], [], []>} : vector<1x128xbf16>, vector<128x128xbf16>, vector<1x128xf32> -> vector<1x128xf32>
    %410 = arith.addf %404, %409 : vector<1x128xf32>
    %411 = vector.extract_strided_slice %355 {offsets = [9, 0], sizes = [1, 128], strides = [1, 1]} : vector<16x128xf32> to vector<1x128xf32>
    %412 = arith.truncf %411 : vector<1x128xf32> to vector<1x128xbf16>
    %c9_273 = arith.constant 9 : index
    %c0_274 = arith.constant 0 : index
    %c0_275 = arith.constant 0 : index
    %413 = vector.load %arg8[%c9_273, %c0_274, %c0_275] : memref<16x128x128xbf16, #tpu.memory_space<vmem>>, vector<1x128x128xbf16>
    %414 = vector.shape_cast %413 : vector<1x128x128xbf16> to vector<128x128xbf16>
    %cst_276 = arith.constant dense<0.000000e+00> : vector<1x128xf32>
    %415 = tpu.matmul %412, %414, %cst_276 {dimension_numbers = #tpu.dot_dimension_numbers<[1], [0], [0], [1], [0, 0, 1, 1], [], []>} : vector<1x128xbf16>, vector<128x128xbf16>, vector<1x128xf32> -> vector<1x128xf32>
    %416 = arith.addf %410, %415 : vector<1x128xf32>
    %417 = vector.extract_strided_slice %355 {offsets = [10, 0], sizes = [1, 128], strides = [1, 1]} : vector<16x128xf32> to vector<1x128xf32>
    %418 = arith.truncf %417 : vector<1x128xf32> to vector<1x128xbf16>
    %c10_277 = arith.constant 10 : index
    %c0_278 = arith.constant 0 : index
    %c0_279 = arith.constant 0 : index
    %419 = vector.load %arg8[%c10_277, %c0_278, %c0_279] : memref<16x128x128xbf16, #tpu.memory_space<vmem>>, vector<1x128x128xbf16>
    %420 = vector.shape_cast %419 : vector<1x128x128xbf16> to vector<128x128xbf16>
    %cst_280 = arith.constant dense<0.000000e+00> : vector<1x128xf32>
    %421 = tpu.matmul %418, %420, %cst_280 {dimension_numbers = #tpu.dot_dimension_numbers<[1], [0], [0], [1], [0, 0, 1, 1], [], []>} : vector<1x128xbf16>, vector<128x128xbf16>, vector<1x128xf32> -> vector<1x128xf32>
    %422 = arith.addf %416, %421 : vector<1x128xf32>
    %423 = vector.extract_strided_slice %355 {offsets = [11, 0], sizes = [1, 128], strides = [1, 1]} : vector<16x128xf32> to vector<1x128xf32>
    %424 = arith.truncf %423 : vector<1x128xf32> to vector<1x128xbf16>
    %c11_281 = arith.constant 11 : index
    %c0_282 = arith.constant 0 : index
    %c0_283 = arith.constant 0 : index
    %425 = vector.load %arg8[%c11_281, %c0_282, %c0_283] : memref<16x128x128xbf16, #tpu.memory_space<vmem>>, vector<1x128x128xbf16>
    %426 = vector.shape_cast %425 : vector<1x128x128xbf16> to vector<128x128xbf16>
    %cst_284 = arith.constant dense<0.000000e+00> : vector<1x128xf32>
    %427 = tpu.matmul %424, %426, %cst_284 {dimension_numbers = #tpu.dot_dimension_numbers<[1], [0], [0], [1], [0, 0, 1, 1], [], []>} : vector<1x128xbf16>, vector<128x128xbf16>, vector<1x128xf32> -> vector<1x128xf32>
    %428 = arith.addf %422, %427 : vector<1x128xf32>
    %429 = vector.extract_strided_slice %355 {offsets = [12, 0], sizes = [1, 128], strides = [1, 1]} : vector<16x128xf32> to vector<1x128xf32>
    %430 = arith.truncf %429 : vector<1x128xf32> to vector<1x128xbf16>
    %c12_285 = arith.constant 12 : index
    %c0_286 = arith.constant 0 : index
    %c0_287 = arith.constant 0 : index
    %431 = vector.load %arg8[%c12_285, %c0_286, %c0_287] : memref<16x128x128xbf16, #tpu.memory_space<vmem>>, vector<1x128x128xbf16>
    %432 = vector.shape_cast %431 : vector<1x128x128xbf16> to vector<128x128xbf16>
    %cst_288 = arith.constant dense<0.000000e+00> : vector<1x128xf32>
    %433 = tpu.matmul %430, %432, %cst_288 {dimension_numbers = #tpu.dot_dimension_numbers<[1], [0], [0], [1], [0, 0, 1, 1], [], []>} : vector<1x128xbf16>, vector<128x128xbf16>, vector<1x128xf32> -> vector<1x128xf32>
    %434 = arith.addf %428, %433 : vector<1x128xf32>
    %435 = vector.extract_strided_slice %355 {offsets = [13, 0], sizes = [1, 128], strides = [1, 1]} : vector<16x128xf32> to vector<1x128xf32>
    %436 = arith.truncf %435 : vector<1x128xf32> to vector<1x128xbf16>
    %c13_289 = arith.constant 13 : index
    %c0_290 = arith.constant 0 : index
    %c0_291 = arith.constant 0 : index
    %437 = vector.load %arg8[%c13_289, %c0_290, %c0_291] : memref<16x128x128xbf16, #tpu.memory_space<vmem>>, vector<1x128x128xbf16>
    %438 = vector.shape_cast %437 : vector<1x128x128xbf16> to vector<128x128xbf16>
    %cst_292 = arith.constant dense<0.000000e+00> : vector<1x128xf32>
    %439 = tpu.matmul %436, %438, %cst_292 {dimension_numbers = #tpu.dot_dimension_numbers<[1], [0], [0], [1], [0, 0, 1, 1], [], []>} : vector<1x128xbf16>, vector<128x128xbf16>, vector<1x128xf32> -> vector<1x128xf32>
    %440 = arith.addf %434, %439 : vector<1x128xf32>
    %441 = vector.extract_strided_slice %355 {offsets = [14, 0], sizes = [1, 128], strides = [1, 1]} : vector<16x128xf32> to vector<1x128xf32>
    %442 = arith.truncf %441 : vector<1x128xf32> to vector<1x128xbf16>
    %c14_293 = arith.constant 14 : index
    %c0_294 = arith.constant 0 : index
    %c0_295 = arith.constant 0 : index
    %443 = vector.load %arg8[%c14_293, %c0_294, %c0_295] : memref<16x128x128xbf16, #tpu.memory_space<vmem>>, vector<1x128x128xbf16>
    %444 = vector.shape_cast %443 : vector<1x128x128xbf16> to vector<128x128xbf16>
    %cst_296 = arith.constant dense<0.000000e+00> : vector<1x128xf32>
    %445 = tpu.matmul %442, %444, %cst_296 {dimension_numbers = #tpu.dot_dimension_numbers<[1], [0], [0], [1], [0, 0, 1, 1], [], []>} : vector<1x128xbf16>, vector<128x128xbf16>, vector<1x128xf32> -> vector<1x128xf32>
    %446 = arith.addf %440, %445 : vector<1x128xf32>
    %447 = vector.extract_strided_slice %355 {offsets = [15, 0], sizes = [1, 128], strides = [1, 1]} : vector<16x128xf32> to vector<1x128xf32>
    %448 = arith.truncf %447 : vector<1x128xf32> to vector<1x128xbf16>
    %c15_297 = arith.constant 15 : index
    %c0_298 = arith.constant 0 : index
    %c0_299 = arith.constant 0 : index
    %449 = vector.load %arg8[%c15_297, %c0_298, %c0_299] : memref<16x128x128xbf16, #tpu.memory_space<vmem>>, vector<1x128x128xbf16>
    %450 = vector.shape_cast %449 : vector<1x128x128xbf16> to vector<128x128xbf16>
    %cst_300 = arith.constant dense<0.000000e+00> : vector<1x128xf32>
    %451 = tpu.matmul %448, %450, %cst_300 {dimension_numbers = #tpu.dot_dimension_numbers<[1], [0], [0], [1], [0, 0, 1, 1], [], []>} : vector<1x128xbf16>, vector<128x128xbf16>, vector<1x128xf32> -> vector<1x128xf32>
    %452 = arith.addf %446, %451 : vector<1x128xf32>
    %c0_301 = arith.constant 0 : index
    %c0_302 = arith.constant 0 : index
    %453 = vector.load %arg12[%c0_301, %c0_302] : memref<1x128xf32, #tpu.memory_space<vmem>>, vector<1x128xf32>
    %454 = arith.addf %452, %453 : vector<1x128xf32>
    %cst_303 = arith.constant 0.000000e+00 : f32
    %455 = vector.broadcast %cst_303 : f32 to vector<1x128xf32>
    %456 = arith.maximumf %454, %455 : vector<1x128xf32>
    %cst_304 = arith.constant dense<0.000000e+00> : vector<128xf32>
    %457 = vector.multi_reduction <add>, %456, %cst_304 [0] : vector<1x128xf32> to vector<128xf32>
    %458 = vector.shape_cast %457 : vector<128xf32> to vector<1x128xf32>
    %459 = arith.truncf %458 : vector<1x128xf32> to vector<1x128xbf16>
    %c0_305 = arith.constant 0 : index
    %c0_306 = arith.constant 0 : index
    %460 = vector.load %arg13[%c0_305, %c0_306] : memref<128x128xbf16, #tpu.memory_space<vmem>>, vector<128x128xbf16>
    %cst_307 = arith.constant dense<0.000000e+00> : vector<1x128xf32>
    %461 = tpu.matmul %459, %460, %cst_307 {dimension_numbers = #tpu.dot_dimension_numbers<[1], [0], [0], [1], [0, 0, 1, 1], [], []>} : vector<1x128xbf16>, vector<128x128xbf16>, vector<1x128xf32> -> vector<1x128xf32>
    %c0_308 = arith.constant 0 : index
    %c0_309 = arith.constant 0 : index
    %462 = vector.load %arg14[%c0_308, %c0_309] : memref<1x128xf32, #tpu.memory_space<vmem>>, vector<1x128xf32>
    %463 = arith.addf %461, %462 : vector<1x128xf32>
    %cst_310 = arith.constant 0.000000e+00 : f32
    %464 = vector.broadcast %cst_310 : f32 to vector<1x128xf32>
    %465 = arith.subf %464, %463 : vector<1x128xf32>
    %466 = math.exp %465 : vector<1x128xf32>
    %cst_311 = arith.constant 1.000000e+00 : f32
    %467 = vector.broadcast %cst_311 : f32 to vector<1x128xf32>
    %468 = arith.addf %467, %466 : vector<1x128xf32>
    %cst_312 = arith.constant 1.000000e+00 : f32
    %469 = vector.broadcast %cst_312 : f32 to vector<1x128xf32>
    %470 = arith.divf %469, %468 : vector<1x128xf32>
    %c0_313 = arith.constant 0 : index
    %c0_314 = arith.constant 0 : index
    %c0_315 = arith.constant 0 : index
    %471 = vector.load %arg16[%c0_313, %c0_314, %c0_315] : memref<1x1x128xf32, #tpu.memory_space<vmem>>, vector<1x1x128xf32>
    %472 = vector.shape_cast %471 : vector<1x1x128xf32> to vector<1x128xf32>
    %473 = vector.shape_cast %470 : vector<1x128xf32> to vector<1x1x128xf32>
    tpu.vector_store %arg16[%c0_313, %c0_314, %c0_315], %473 {strides = array<i32>} : memref<1x1x128xf32, #tpu.memory_space<vmem>>, vector<1x1x128xf32>,
    return
  }
  func.func @transform_0(%arg0: i32) -> (i32, i32) {
    %c0_i32 = arith.constant 0 : i32
    %c0_i32_0 = arith.constant 0 : i32
    %c0_i32_1 = arith.constant 0 : i32
    return %c0_i32, %c0_i32_0 : i32, i32
  }
  func.func @transform_1(%arg0: i32) -> (i32, i32) {
    %c0_i32 = arith.constant 0 : i32
    %c0_i32_0 = arith.constant 0 : i32
    %c0_i32_1 = arith.constant 0 : i32
    return %c0_i32, %c0_i32_0 : i32, i32
  }
  func.func @transform_2(%arg0: i32) -> (i32, i32) {
    %c0_i32 = arith.constant 0 : i32
    %c0_i32_0 = arith.constant 0 : i32
    %c0_i32_1 = arith.constant 0 : i32
    return %c0_i32, %c0_i32_0 : i32, i32
  }
  func.func @transform_3(%arg0: i32) -> (i32, i32) {
    %c0_i32 = arith.constant 0 : i32
    %c0_i32_0 = arith.constant 0 : i32
    %c0_i32_1 = arith.constant 0 : i32
    return %c0_i32, %c0_i32_0 : i32, i32
  }
  func.func @transform_4(%arg0: i32) -> (i32, i32, i32) {
    %c0_i32 = arith.constant 0 : i32
    %c0_i32_0 = arith.constant 0 : i32
    %c0_i32_1 = arith.constant 0 : i32
    %c0_i32_2 = arith.constant 0 : i32
    return %c0_i32, %c0_i32_0, %c0_i32_1 : i32, i32, i32
  }
  func.func @transform_5(%arg0: i32) -> (i32, i32, i32) {
    %c0_i32 = arith.constant 0 : i32
    %c0_i32_0 = arith.constant 0 : i32
    %c0_i32_1 = arith.constant 0 : i32
    %c0_i32_2 = arith.constant 0 : i32
    return %c0_i32, %c0_i32_0, %c0_i32_1 : i32, i32, i32
  }
  func.func @transform_6(%arg0: i32) -> (i32, i32, i32) {
    %c0_i32 = arith.constant 0 : i32
    %c0_i32_0 = arith.constant 0 : i32
    %c0_i32_1 = arith.constant 0 : i32
    %c0_i32_2 = arith.constant 0 : i32
    return %c0_i32, %c0_i32_0, %c0_i32_1 : i32, i32, i32
  }
  func.func @transform_7(%arg0: i32) -> (i32, i32, i32) {
    %c0_i32 = arith.constant 0 : i32
    %c0_i32_0 = arith.constant 0 : i32
    %c0_i32_1 = arith.constant 0 : i32
    %c0_i32_2 = arith.constant 0 : i32
    return %c0_i32, %c0_i32_0, %c0_i32_1 : i32, i32, i32
  }
  func.func @transform_8(%arg0: i32) -> (i32, i32) {
    %c0_i32 = arith.constant 0 : i32
    %c0_i32_0 = arith.constant 0 : i32
    %c0_i32_1 = arith.constant 0 : i32
    return %c0_i32, %c0_i32_0 : i32, i32
  }
  func.func @transform_9(%arg0: i32) -> (i32, i32) {
    %c0_i32 = arith.constant 0 : i32
    %c0_i32_0 = arith.constant 0 : i32
    %c0_i32_1 = arith.constant 0 : i32
    return %c0_i32, %c0_i32_0 : i32, i32
  }
  func.func @transform_10(%arg0: i32) -> (i32, i32) {
    %c0_i32 = arith.constant 0 : i32
    %c0_i32_0 = arith.constant 0 : i32
    %c0_i32_1 = arith.constant 0 : i32
    return %c0_i32, %c0_i32_0 : i32, i32
  }
  func.func @transform_11(%arg0: i32) -> (i32, i32) {
    %c0_i32 = arith.constant 0 : i32
    %c0_i32_0 = arith.constant 0 : i32
    %c0_i32_1 = arith.constant 0 : i32
    return %c0_i32, %c0_i32_0 : i32, i32
  }
  func.func @transform_12(%arg0: i32) -> (i32, i32) {
    %c0_i32 = arith.constant 0 : i32
    %c0_i32_0 = arith.constant 0 : i32
    %c0_i32_1 = arith.constant 0 : i32
    return %c0_i32, %c0_i32_0 : i32, i32
  }
  func.func @transform_13(%arg0: i32) -> (i32, i32) {
    %c0_i32 = arith.constant 0 : i32
    %c0_i32_0 = arith.constant 0 : i32
    %c0_i32_1 = arith.constant 0 : i32
    return %c0_i32, %c0_i32_0 : i32, i32
  }
  func.func @transform_14(%arg0: i32) -> (i32, i32, i32) {
    %c0_i32 = arith.constant 0 : i32
    %c0_i32_0 = arith.constant 0 : i32
    %c0_i32_1 = arith.constant 0 : i32
    return %arg0, %c0_i32, %c0_i32_0 : i32, i32, i32
  }
  func.func @transform_15(%arg0: i32) -> (i32, i32, i32) {
    %c0_i32 = arith.constant 0 : i32
    %c0_i32_0 = arith.constant 0 : i32
    %c0_i32_1 = arith.constant 0 : i32
    return %arg0, %c0_i32, %c0_i32_0 : i32, i32, i32
  }
}

</mosaic_0001>

<bundles_post_ra>
// kernel: encoder_forward.1
= control target key start
LH: loop header
LB: loop body
LE: loop exit
PB: predicated region body
PF: predicated region fallthrough
CT: control target
= control target key end

     0   :  { %s14189_s0 = inlined_call_operand.hbm [shape: bf16[1024,324], index: 0, kind: input, shape index: {}]   ;;  %s14190_s1 = inlined_call_operand.vmem [shape: bf16[256,100], index: 1, kind: input, shape index: {}]   ;;  %s14191_s2 = inlined_call_operand.vmem [shape: bf16[64,36], index: 2, kind: input, shape index: {}]   ;;  %s14192_s3 = inlined_call_operand.vmem [shape: bf16[16,16], index: 3, kind: input, shape index: {}]   ;;  %s14193_s4 = inlined_call_operand.vmem [shape: bf16[16,8,128], index: 4, kind: input, shape index: {}]   ;;  %s14194_s5 = inlined_call_operand.hbm [shape: bf16[16,128,128], index: 5, kind: input, shape index: {}]   ;;  %s14195_s6 = inlined_call_operand.hbm [shape: bf16[16,128,128], index: 6, kind: input, shape index: {}]   ;;  %s14196_s7 = inlined_call_operand.hbm [shape: bf16[16,128,128], index: 7, kind: input, shape index: {}]   ;;  %s14197_s8 = inlined_call_operand.vmem [shape: f32[1,128], index: 8, kind: input, shape index: {}]   ;;  %s14198_s9 = inlined_call_operand.vmem [shape: f32[1,128], index: 9, kind: input, shape index: {}]   ;;  %s14199_s10 = inlined_call_operand.vmem [shape: f32[1,128], index: 10, kind: input, shape index: {}]   ;;  %s14200_s11 = inlined_call_operand.vmem [shape: f32[1,128], index: 11, kind: input, shape index: {}]   ;;  %s14201_s12 = inlined_call_operand.vmem [shape: bf16[128,128], index: 12, kind: input, shape index: {}]   ;;  %s14202_s13 = inlined_call_operand.vmem [shape: f32[1,128], index: 13, kind: input, shape index: {}]   ;;  %s14203_s14 = inlined_call_operand.vmem [shape: bf16[2,324,8], index: 14, kind: input, shape index: {}]   ;;  %s14204_s15 = inlined_call_operand.vmem [shape: f32[2,1,128], index: 15, kind: output, shape index: {}]  }
   0x1   :  { %14206 = sst [smem:[#allocation16_spill]] %s14189_s0 }
   0x2   :  { %14207 = sst [smem:[#allocation17_spill]] %s14194_s5 }
   0x3   :  { %14208 = sst [smem:[#allocation18_spill]] %s14202_s13 }
   0x4   :  { %14209 = sst [smem:[#allocation19_spill]] %s14204_s15 }
   0x5   :  { %20 = vsyncpa [#allocation6], 0 }
   0x6   :  { %21 = vsyncpa [#allocation8], 0 }
   0x7   :  { %22 = vsyncpa [#allocation11], 0  ;;  %s12494_s18 = smov 0  }
   0x8 LB: > { %14210 = sst [smem:[#allocation15_spill]] %s12403_s18  ;;  %s12503_s22 = sadd.s32 4294967295, %s12403_s18   ;;  %s12403_s18 = sphi %s12494_s18, %s28_s18  }
   0x9   : > { %s14211_s5 = sld [smem:[#allocation17_spill]]  ;;  %p8855_p0 = scmp.ge.s32.totalorder %s12403_s18, 1 }
   0xa   : > { %p379_p1 = scmp.lt.s32.totalorder %s12403_s18, 3  ;;  %p12233_p2 = scmp.eq.s32.totalorder %s12503_s22, 0 }
   0xb   : > { %s12405_s24 = smov [#allocation7]   ;;  %s14213_s0 = sld [smem:[#allocation16_spill]] }
   0xc   : > { %p12508_p3 = pnand %p8855_p0, %p379_p1  ;;  %s418_s25 = sshll.u32 %s12405_s24, 4  ;;  %s419_s25 = int_to_ptr.vmem [resolvable:$true] %s418_s25 }
   0xd   : > { %s12406_s30 = smov [#allocation5]   ;;  %s12407_s17 = smov 64  }
   0xe   : > { %p12220_p4 = pneg %p12508_p3  ;;  %s392_s16 = sshll.u32 %s12406_s30, 4  ;;  %s393_s16 = int_to_ptr.vmem [resolvable:$true] %s392_s16 }
   0xf   : > { %s416_s21 = sshll.u32 %s14211_s5, 4  ;;  %s12408_s19 = smov 4   ;;  %s417_s21 = int_to_ptr.hbm [resolvable:$true] %s416_s21 }
  0x10   : > { %p12519_p5 = pnand %p12233_p2, %p12220_p4  ;;  %s430_s26 = sshll.u32 %s14195_s6, 4  ;;  %s431_s26 = int_to_ptr.hbm [resolvable:$true] %s430_s26 }
  0x11   : > { %s390_s28 = sshll.u32 %s14213_s0, 4  ;;  %s12409_s27 = smov 192   ;;  %s391_s28 = int_to_ptr.hbm [resolvable:$true] %s390_s28 }
  0x12   : > { %12226 = dma.hbm_to_vmem [thread:$0]  (!%p12519_p5), %s417_s21, 16384, %s419_s25, [#allocation8], %s12407_s17, %s12407_s17, %s12408_s19  }
  0x13   : > { %s12410_s0 = smov 12   ;;  %s12411_s5 = smov [#allocation9]  }
  0x14   : > { %12223 = dma.hbm_to_vmem [thread:$0]  (!%p12519_p5), %s391_s28, 24576, %s393_s16, [#allocation6], %s12409_s27, %s12409_s27, %s12410_s0  }
  0x15   : > { %s432_s18 = sshll.u32 %s12411_s5, 4  ;;  %s444_s30 = sshll.u32 %s14196_s7, 4  ;;  %s433_s18 = int_to_ptr.vmem [resolvable:$true] %s432_s18  ;;  %s445_s30 = int_to_ptr.hbm [resolvable:$true] %s444_s30 }
  0x16   : > { %12229 = dma.hbm_to_vmem [thread:$0]  (!%p12519_p5), %s431_s26, 16384, %s433_s18, [#allocation8], %s12407_s17, %s12407_s17, %s12408_s19  }
  0x17   : > { %s12412_s21 = smov [#allocation10]   ;;  %488 = sbr.rel (%p12508_p3) target bundleno = 2911 (0xb5f), region = 80 }
  0x18   : > { %s446_s25 = sshll.u32 %s12412_s21, 4  ;;  %s447_s25 = int_to_ptr.vmem [resolvable:$true] %s446_s25 }
  0x19   : > { %12232 = dma.hbm_to_vmem [thread:$0]  (!%p12519_p5), %s445_s30, 16384, %s447_s25, [#allocation11], %s12407_s17, %s12407_s17, %s12408_s19  }
  0x1c   : > { %12390 = dma.done.wait (%p12233_p2), [#allocation6], 24576  }
  0x1d   : > { %12392 = vsyncadd (%p12233_p2), [#allocation6], 4294942720 }
  0x1e   : > { %12394 = dma.done.wait (%p12233_p2), [#allocation8], 32768  }
  0x1f   : > { %12396 = vsyncadd (%p12233_p2), [#allocation8], 4294934528 }
  0x20   : > { %12398 = dma.done.wait (%p12233_p2), [#allocation11], 16384  }
  0x21   : > { %12400 = vsyncadd (%p12233_p2), [#allocation11], 4294950912  ;;  %p550_p6 = scmp.lt.s32.totalorder %s12503_s22, 1  ;;  %vm2152_vm0 = vcmask 1041408   ;;  %v8877_v19 = vld [vmem:[#allocation5 + $0x8] sm:$0xf] }
  0x22   : > { %v11591_v20 = vld [vmem:[#allocation5 + $0x10] sm:$0xf0]  ;;  %vm1959_vm1 = vcmask 556032   ;;  %v8869_v26 = vld [vmem:[#allocation5] sm:$0xf]  ;;  %vm3167_vm2 = vcmask 1043456  }
  0x23   : > { %s14237_s22 = smov (!%p550_p6, %s12503_s22), 1  ;;  %v8878_v22 = vor.u32 %v11591_v20, %v8877_v19  ;;  %v11590_v27 = vld [vmem:[#allocation5 + $0x8] sm:$0xf0]  ;;  %v11589_v29 = vld [vmem:[#allocation5 + $0x4] sm:$0xf]  ;;  %vm3154_vm3 = vcmask 64512  }
  0x24   : > { %s12203_s0 = smul.u32 164, %s14237_s22  ;;  %v8871_v30 = vld [vmem:[#allocation5 + $0xc] sm:$0xf0]  ;;  %v8870_v31 = vor.u32 %v11590_v27, %v8869_v26  ;;  %v8889_v33 = vld [vmem:[#allocation5 + $0x20] sm:$0xf]  ;;  %vm4095_vm4 = vcmask 1043457  }
  0x25   : > { %v8874_v32 = vor.u32 %v11589_v29, %v8871_v30  ;;  %v11594_v34 = vld [vmem:[#allocation5 + $0x28] sm:$0xf0]  ;;  %v8881_v36 = vld [vmem:[#allocation5 + $0x18] sm:$0xf]  ;;  %v11593_v37 = vld [vmem:[#allocation5 + $0x20] sm:$0xf0] }
  0x26   : > { %s12559_s15 = scalar_lea.vmem %s14203_s14, %s12203_s0  ;;  %v8890_v35 = vor.u32 %v11594_v34, %v8889_v33  ;;  %v11592_v38 = vld [vmem:[#allocation5 + $0x1c] sm:$0xf]  ;;  %v8883_v39 = vld [vmem:[#allocation5 + $0x24] sm:$0xf0]  ;;  %v8882_v40 = vor.u32 %v11593_v37, %v8881_v36  ;;  %v8901_v42 = vld [vmem:[#allocation5 + $0x38] sm:$0xf] }
  0x27   : > { %v11576_v0 = vld [vmem:[%s12559_s15 + $0x38] sm:$0xff]  ;;  %v619_v2 = vld [vmem:[%s12559_s15 + $0xa0] sm:$0x3]  ;;  %v11575_v4 = vld [vmem:[%s12559_s15 + $0x30] sm:$0xff]  ;;  %v8886_v41 = vor.u32 %v11592_v38, %v8883_v39  ;;  %vm4096_vm5 = vsmask.f32 7942 }
  0x28   : > { %v11584_v1 = vld [vmem:[%s12559_s15 + $0x78] sm:$0xff]  ;;  %v1917_v3 = vunpack.c.l.b16 %v619_v2  ;;  %2156 = vmatpush.bf16.msra.mxu0 %v11576_v0  ;;  %v11583_v6 = vld [vmem:[%s12559_s15 + $0x70] sm:$0xff]  ;;  %v11574_v9 = vld [vmem:[%s12559_s15 + $0x28] sm:$0xff]  ;;  %vm4102_vm6 = vsmask.f32 1280  ;;  %vm4118_vm9 = vcmask 1043458  }
  0x29   : > { %2485 = vmatpush.bf16.msra.mxu1 %v11584_v1  ;;  %v11588_v8 = vld [vmem:[%s12559_s15 + $0x98] sm:$0xff]  ;;  %v11582_v10 = vld [vmem:[%s12559_s15 + $0x68] sm:$0xff]  ;;  %v11587_v11 = vld [vmem:[%s12559_s15 + $0x90] sm:$0xff]  ;;  %vm4119_vm10 = vsmask.f32 7946  ;;  %vm4124_vm11 = vcmask 1042432  }
  0x2a   : > { %v1938_v5 = vpack.c.b16 %v1917_v3, %v1917_v3  ;;  %v11573_v12 = vld [vmem:[%s12559_s15 + $0x20] sm:$0xff]  ;;  %v11586_v14 = vld [vmem:[%s12559_s15 + $0x88] sm:$0xff]  ;;  %v11572_v15 = vld [vmem:[%s12559_s15 + $0x18] sm:$0xff]  ;;  %vm4125_vm12 = vsmask.f32 2304  ;;  %vm4141_vm15 = vcmask 1043459  }
  0x2b   : > { %v11581_v13 = vld [vmem:[%s12559_s15 + $0x60] sm:$0xff]  ;;  %v11580_v16 = vld [vmem:[%s12559_s15 + $0x58] sm:$0xff]  ;;  %v11571_v18 = vld [vmem:[%s12559_s15 + $0x10] sm:$0xff]  ;;  %s14233_s27 = sld [smem:[#allocation18_spill]] }
  0x2c   : > { %v2154_v7 = vsel %vm2152_vm0, %v1938_v5, 0  ;;  %2157 = vmatpush.bf16.msra.mxu0 %v11575_v4  ;;  %v11585_v17 = vld [vmem:[%s12559_s15 + $0x80] sm:$0xff]  ;;  %v11579_v21 = vld [vmem:[%s12559_s15 + $0x50] sm:$0xff]  ;;  %v11570_v23 = vld [vmem:[%s12559_s15 + $0x8] sm:$0xff]  ;;  %s14234_s25 = sld [smem:[#allocation19_spill]] }
  0x2d   : > { %2817 = vmatpush.bf16.msra.mxu2 %v2154_v7  ;;  %2486 = vmatpush.bf16.msra.mxu1 %v11583_v6  ;;  %v11578_v24 = vld [vmem:[%s12559_s15 + $0x48] sm:$0xff]  ;;  %v11569_v25 = vld [vmem:[%s12559_s15] sm:$0xff]  ;;  %v11597_v43 = vld [vmem:[#allocation5 + $0x40] sm:$0xf0] }
  0x2e   : > { %v11577_v28 = vld [vmem:[%s12559_s15 + $0x40] sm:$0xff]  ;;  %v8902_v44 = vor.u32 %v11597_v43, %v8901_v42  ;;  %v11596_v46 = vld [vmem:[#allocation5 + $0x38] sm:$0xf0]  ;;  %v8895_v48 = vld [vmem:[#allocation5 + $0x3c] sm:$0xf0] }
  0x2f   : > { %v8893_v45 = vld [vmem:[#allocation5 + $0x30] sm:$0xf]  ;;  %v11595_v47 = vld [vmem:[#allocation5 + $0x34] sm:$0xf]  ;;  %v11600_v52 = vld [vmem:[#allocation5 + $0x58] sm:$0xf0] }
  0x30   : > { %2158 = vmatpush.bf16.msra.mxu0 %v11574_v9  ;;  %v8894_v49 = vor.u32 %v11596_v46, %v8893_v45  ;;  %v8898_v50 = vor.u32 %v11595_v47, %v8895_v48  ;;  %v8913_v51 = vld [vmem:[#allocation5 + $0x50] sm:$0xf]  ;;  %v8905_v54 = vld [vmem:[#allocation5 + $0x48] sm:$0xf]  ;;  %v11599_v55 = vld [vmem:[#allocation5 + $0x50] sm:$0xf0] }
  0x31   : > { %2818 = vmatpush.bf16.msra.mxu2 %v11588_v8  ;;  %2487 = vmatpush.bf16.msra.mxu1 %v11582_v10  ;;  %v8914_v53 = vor.u32 %v11600_v52, %v8913_v51  ;;  %v11598_v56 = vld [vmem:[#allocation5 + $0x4c] sm:$0xf]  ;;  %v8907_v57 = vld [vmem:[#allocation5 + $0x54] sm:$0xf0]  ;;  %v8906_v58 = vor.u32 %v11599_v55, %v8905_v54  ;;  %v8925_v60 = vld [vmem:[#allocation5 + $0x68] sm:$0xf] }
  0x32   : > { %v8910_v59 = vor.u32 %v11598_v56, %v8907_v57  ;;  %v11603_v61 = vld [vmem:[#allocation5 + $0x70] sm:$0xf0]  ;;  %v8917_v63 = vld [vmem:[#allocation5 + $0x60] sm:$0xf]  ;;  %v11602_v0 = vld [vmem:[#allocation5 + $0x68] sm:$0xf0]  ;;  %s557_s0 = scalar_lea.vmem %s14234_s25, %s14237_s22 }
  0x33   : > { %v8926_v62 = vor.u32 %v11603_v61, %v8925_v60  ;;  %v11601_v1 = vld [vmem:[#allocation5 + $0x64] sm:$0xf]  ;;  %v8919_v2 = vld [vmem:[#allocation5 + $0x6c] sm:$0xf0]  ;;  %v8918_v3 = vor.u32 %v11602_v0, %v8917_v63  ;;  %v8937_v5 = vld [vmem:[#allocation5 + $0x80] sm:$0xf] }
  0x34   : > { %2159 = vmatpush.bf16.msra.mxu0 %v11573_v12  ;;  %v8922_v4 = vor.u32 %v11601_v1, %v8919_v2  ;;  %v11606_v6 = vld [vmem:[#allocation5 + $0x88] sm:$0xf0]  ;;  %v8929_v8 = vld [vmem:[#allocation5 + $0x78] sm:$0xf]  ;;  %v11605_v9 = vld [vmem:[#allocation5 + $0x80] sm:$0xf0] }
  0x35   : > { %2819 = vmatpush.bf16.msra.mxu2 %v11587_v11  ;;  %2488 = vmatpush.bf16.msra.mxu1 %v11581_v13  ;;  %v8938_v7 = vor.u32 %v11606_v6, %v8937_v5  ;;  %v11604_v10 = vld [vmem:[#allocation5 + $0x7c] sm:$0xf]  ;;  %v8931_v11 = vld [vmem:[#allocation5 + $0x84] sm:$0xf0]  ;;  %v8930_v12 = vor.u32 %v11605_v9, %v8929_v8  ;;  %v11607_v19 = vld [vmem:[#allocation5 + $0x94] sm:$0xf] }
  0x36   : > { %v8934_v13 = vor.u32 %v11604_v10, %v8931_v11  ;;  %v8943_v20 = vld [vmem:[#allocation5 + $0x9c] sm:$0xf0]  ;;  %v8953_v26 = vld [vmem:[#allocation5 + $0xa8] sm:$0xf]  ;;  %v11611_v27 = vld [vmem:[#allocation5 + $0xb0] sm:$0xf0] }
  0x37   : > { %v8955_v29 = vld [vmem:[#allocation5 + $0xb4] sm:$0xf0]  ;;  %v8954_v30 = vor.u32 %v11611_v27, %v8953_v26  ;;  %v8973_v45 = vld [vmem:[#allocation5 + $0xc8] sm:$0xf]  ;;  %v11615_v46 = vld [vmem:[#allocation5 + $0xd0] sm:$0xf0] }
  0x38   : > { %2160 = vmatpush.bf16.msra.mxu0 %v11572_v15  ;;  %v11609_v15 = vld [vmem:[#allocation5 + $0xa0] sm:$0xf0]  ;;  %v8974_v48 = vor.u32 %v11615_v46, %v8973_v45  ;;  %v8965_v51 = vld [vmem:[#allocation5 + $0xc0] sm:$0xf]  ;;  %v11614_v52 = vld [vmem:[#allocation5 + $0xc8] sm:$0xf0] }
  0x39   : > { %2820 = vmatpush.bf16.msra.mxu2 %v11586_v14  ;;  %2489 = vmatpush.bf16.msra.mxu1 %v11580_v16  ;;  %v8949_v14 = vld [vmem:[#allocation5 + $0x98] sm:$0xf]  ;;  %v8966_v54 = vor.u32 %v11614_v52, %v8965_v51  ;;  %v8967_v55 = vld [vmem:[#allocation5 + $0xcc] sm:$0xf0]  ;;  %v11618_v63 = vld [vmem:[#allocation5 + $0xe8] sm:$0xf0] }
  0x3a   : > { %v8950_v16 = vor.u32 %v11609_v15, %v8949_v14  ;;  %v11617_v5 = vld [vmem:[#allocation5 + $0xe0] sm:$0xf0]  ;;  %v11616_v6 = vld [vmem:[#allocation5 + $0xdc] sm:$0xf]  ;;  %v8979_v8 = vld [vmem:[#allocation5 + $0xe4] sm:$0xf0] }
  0x3b   : > { %v8982_v9 = vor.u32 %v11616_v6, %v8979_v8  ;;  %v9779_v10 = vld [vmem:[%s14193_s4 + $0x4] sm:$0xf]  ;;  %v8991_v27 = vld [vmem:[#allocation5 + $0xfc] sm:$0xf0]  ;;  %v11622_v46 = vld [vmem:[#allocation5 + $0x10c] sm:$0xf] }
  0x3c   : > { %2161 = vmatpush.bf16.msra.mxu0 %v11571_v18  ;;  %v11608_v18 = vld [vmem:[#allocation5 + $0x98] sm:$0xf0]  ;;  %v3169_v11 = vsel %vm3167_vm2, %v9779_v10, 0  ;;  %v11623_v45 = vld [vmem:[#allocation5 + $0x110] sm:$0xf0]  ;;  %vm13936_vm7 = vmand %vm4095_vm4, %vm4096_vm5 }
  0x3d   : > { %2821 = vmatpush.bf16.msra.mxu2 %v11585_v17  ;;  %2490 = vmatpush.bf16.msra.mxu1 %v11579_v21  ;;  %v8941_v17 = vld [vmem:[#allocation5 + $0x90] sm:$0xf]  ;;  %v9003_v52 = vld [vmem:[#allocation5 + $0x114] sm:$0xf0]  ;;  %v11626_v10 = vld [vmem:[#allocation5 + $0x128] sm:$0xf0] }
  0x3e   : > { %v8942_v21 = vor.u32 %v11608_v18, %v8941_v17  ;;  %3178 = vmatpush.bf16.msra.mxu3 %v3169_v11  ;;  %v8997_v17 = vld [vmem:[#allocation5 + $0xf8] sm:$0xf]  ;;  %v11621_v18 = vld [vmem:[#allocation5 + $0x100] sm:$0xf0]  ;;  %vm13941_vm8 = vmand %vm2152_vm0, %vm4102_vm6  ;;  %vm4148_vm5 = vsmask.f32 3328 }
  0x3f   : > { %v11625_v11 = vld [vmem:[#allocation5 + $0x124] sm:$0xf]  ;;  %vm13954_vm13 = vmand %vm4118_vm9, %vm4119_vm10  ;;  %vm4163_vm10 = vsmask.f32 7938 }
  0x40   : > { %9715 = vmatmul.msk.bf16.vlgmr.msra.gmra.mxu2 %vm1959_vm1, %v8878_v22  ;;  %2162 = vmatpush.bf16.msra.mxu0 %v11570_v23  ;;  %v8946_v22 = vor.u32 %v11607_v19, %v8943_v20  ;;  %v8961_v23 = vld [vmem:[#allocation5 + $0xb0] sm:$0xf]  ;;  %v8998_v20 = vor.u32 %v11621_v18, %v8997_v17  ;;  %vm13960_vm14 = vmand %vm4124_vm11, %vm4125_vm12  ;;  %vm4168_vm12 = vcmask 1040384  }
  0x41   : > { %2491 = vmatpush.bf16.msra.mxu1 %v11578_v24  ;;  %v11612_v24 = vld [vmem:[#allocation5 + $0xb8] sm:$0xf0]  ;;  %vm13976_vm6 = vmand %vm3167_vm2, %vm4148_vm5 }
  0x44   : > { %2163 = vmatpush.bf16.msra.mxu0 %v11569_v25  ;;  %v8962_v25 = vor.u32 %v11612_v24, %v8961_v23  ;;  %v8989_v23 = vld [vmem:[#allocation5 + $0xf0] sm:$0xf]  ;;  %v11620_v24 = vld [vmem:[#allocation5 + $0xf8] sm:$0xf0] }
  0x45   : > { %2492 = vmatpush.bf16.msra.mxu1 %v11577_v28  ;;  %v11610_v28 = vld [vmem:[#allocation5 + $0xac] sm:$0xf]  ;;  %v8990_v26 = vor.u32 %v11620_v24, %v8989_v23 }
  0x47   : > { %2164 = vmatmul.bf16.vlgmr.msra.gmra.mxu0 %v8870_v31  ;;  %v8958_v31 = vor.u32 %v11610_v28, %v8955_v29 }
  0x48   : > { %2493 = vmatmul.bf16.vlgmr.msra.gmra.mxu1 %v8874_v32 }
  0x50   : > { %9716 = vmatmul.msk.bf16.gmra.mxu2 %vm1959_vm1, %v8890_v35 }
  0x57   : > { %2169 = vmatmul.bf16.gmra.mxu0 %v8882_v40 }
  0x58   : > { %2498 = vmatmul.bf16.gmra.mxu1 %v8886_v41 }
  0x60   : > { %9717 = vmatmul.msk.bf16.gmra.mxu2 %vm1959_vm1, %v8902_v44 }
  0x67   : > { %2174 = vmatmul.bf16.gmra.mxu0 %v8894_v49 }
  0x68   : > { %2503 = vmatmul.bf16.gmra.mxu1 %v8898_v50 }
  0x70   : > { %9718 = vmatmul.msk.bf16.gmra.mxu2 %vm1959_vm1, %v8914_v53  ;;  %v11613_v53 = vld [vmem:[#allocation5 + $0xc4] sm:$0xf] }
  0x71   : > { %v8970_v56 = vor.u32 %v11613_v53, %v8967_v55  ;;  %v9006_v53 = vor.u32 %v11622_v46, %v9003_v52 }
  0x77   : > { %2179 = vmatmul.bf16.gmra.mxu0 %v8906_v58 }
  0x78   : > { %2508 = vmatmul.bf16.gmra.mxu1 %v8910_v59 }
  0x80   : > { %9719 = vmatmul.msk.bf16.gmra.mxu2 %vm1959_vm1, %v8926_v62  ;;  %v8985_v62 = vld [vmem:[#allocation5 + $0xe0] sm:$0xf] }
  0x81   : > { %v8986_v1 = vor.u32 %v11618_v63, %v8985_v62  ;;  %v11627_v62 = vld [vmem:[#allocation5 + $0x130] sm:$0xf0] }
  0x87   : > { %2184 = vmatmul.bf16.gmra.mxu0 %v8918_v3 }
  0x88   : > { %2513 = vmatmul.bf16.gmra.mxu1 %v8922_v4  ;;  %v8977_v4 = vld [vmem:[#allocation5 + $0xd8] sm:$0xf] }
  0x90   : > { %9720 = vmatmul.msk.bf16.gmra.mxu2 %vm1959_vm1, %v8938_v7  ;;  %v8978_v7 = vor.u32 %v11617_v5, %v8977_v4 }
  0x97   : > { %2189 = vmatmul.bf16.gmra.mxu0 %v8930_v12 }
  0x98   : > { %2518 = vmatmul.bf16.gmra.mxu1 %v8934_v13 }
  0xa0   : > { %9721 = vmatmul.msk.bf16.gmra.mxu2 %vm1959_vm1, %v8950_v16 }
  0xa7   : > { %2194 = vmatmul.bf16.gmra.mxu0 %v8942_v21 }
  0xa8   : > { %2523 = vmatmul.bf16.gmra.mxu1 %v8946_v22 }
  0xb0   : > { %9722 = vmatmul.msk.bf16.gmra.mxu2 %vm1959_vm1, %v8962_v25  ;;  %v11619_v25 = vld [vmem:[#allocation5 + $0xf4] sm:$0xf] }
  0xb1   : > { %v8994_v28 = vor.u32 %v11619_v25, %v8991_v27  ;;  %v11630_v27 = vld [vmem:[#allocation5 + $0x148] sm:$0xf0] }
  0xb7   : > { %2199 = vmatmul.bf16.gmra.mxu0 %v8954_v30 }
  0xb8   : > { %2528 = vmatmul.bf16.gmra.mxu1 %v8958_v31 }
  0xc0   : > { %9723 = vmatmul.msk.bf16.gmra.mxu2 %vm1959_vm1, %v8974_v48 }
  0xc3   : > { %v2823_v32 = vpop.f32.mrf.mxu2 }
  0xc4   : > { %v2165_v33 = vpop.f32.mrf.mxu0 }
  0xc5   : > { %v2494_v34 = vpop.f32.mrf.mxu1 }
  0xc6   : > { %v2495_v35 = vadd.f32 %v2494_v34, %v2165_v33  ;;  %v11624_v33 = vld [vmem:[#allocation5 + $0x118] sm:$0xf0] }
  0xc7   : > { %2204 = vmatmul.bf16.gmra.mxu0 %v8966_v54 }
  0xc8   : > { %v12591_v36 = vadd.f32 %v2823_v32, %v2495_v35  ;;  %2533 = vmatmul.bf16.gmra.mxu1 %v8970_v56  ;;  %v9009_v32 = vld [vmem:[#allocation5 + $0x110] sm:$0xf] }
  0xc9   : > { %v9010_v35 = vor.u32 %v11624_v33, %v9009_v32  ;;  %v9027_v32 = vld [vmem:[#allocation5 + $0x144] sm:$0xf0] }
  0xcb   : > { %v12593_v37 = vpop.f32.mrf.mxu2 }
  0xcc   : > { %v12595_v38 = vpop.f32.mrf.mxu0 }
  0xcd   : > { %v12597_v39 = vpop.f32.mrf.mxu1 }
  0xd0   : > { %9724 = vmatmul.msk.bf16.gmra.mxu2 %vm1959_vm1, %v8986_v1  ;;  %v3147_v1 = vld [vmem:[%s14193_s4] sm:$0xf] }
  0xd1   : > { %v3213_v5 = vsel %vm3167_vm2, %v3147_v1, 0 }
  0xd2   : > { %3222 = vmatpush.bf16.msrb.mxu3 %v3213_v5 }
  0xd3   : > { %v2828_v40 = vpop.f32.mrf.mxu2 }
  0xd4   : > { %v2170_v41 = vpop.f32.mrf.mxu0 }
  0xd5   : > { %v2499_v42 = vpop.f32.mrf.mxu1 }
  0xd6   : > { %v2500_v43 = vadd.f32 %v2499_v42, %v2170_v41 }
  0xd7   : > { %2209 = vmatmul.bf16.gmra.mxu0 %v8978_v7 }
  0xd8   : > { %v12599_v44 = vadd.f32 %v2828_v40, %v2500_v43  ;;  %2538 = vmatmul.bf16.gmra.mxu1 %v8982_v9  ;;  %v9001_v43 = vld [vmem:[#allocation5 + $0x108] sm:$0xf]  ;;  %v9013_v9 = vld [vmem:[#allocation5 + $0x120] sm:$0xf] }
  0xd9   : > { %v9002_v51 = vor.u32 %v11623_v45, %v9001_v43 }
  0xdb   : > { %v12601_v47 = vpop.f32.mrf.mxu2 }
  0xdc   : > { %v12603_v49 = vpop.f32.mrf.mxu0 }
  0xdd   : > { %v12606_v50 = vpop.f32.mrf.mxu1 }
  0xe0   : > { %9725 = vmatmul.msk.bf16.gmra.mxu2 %vm1959_vm1, %v8998_v20 }
  0xe3   : > { %v2833_v57 = vpop.f32.mrf.mxu2 }
  0xe4   : > { %v2175_v58 = vpop.f32.mrf.mxu0 }
  0xe5   : > { %v2504_v59 = vpop.f32.mrf.mxu1 }
  0xe6   : > { %v2505_v60 = vadd.f32 %v2504_v59, %v2175_v58 }
  0xe7   : > { %2214 = vmatmul.bf16.gmra.mxu0 %v8990_v26  ;;  %v9033_v26 = vld [vmem:[#allocation5 + $0x140] sm:$0xf] }
  0xe8   : > { %v12608_v61 = vadd.f32 %v2833_v57, %v2505_v60  ;;  %2543 = vmatmul.bf16.gmra.mxu1 %v8994_v28  ;;  %v9021_v60 = vld [vmem:[#allocation5 + $0x128] sm:$0xf]  ;;  %v9034_v28 = vor.u32 %v11630_v27, %v9033_v26  ;;  %v9788_v27 = vld [vmem:[%s14193_s4 + $0x8] sm:$0xf] }
  0xe9   : > { %v9022_v4 = vor.u32 %v11627_v62, %v9021_v60  ;;  %v9039_v60 = vld [vmem:[#allocation5 + $0x15c] sm:$0xf0] }
  0xeb   : > { %v12610_v0 = vpop.f32.mrf.mxu2 }
  0xec   : > { %v12612_v2 = vpop.f32.mrf.mxu0 }
  0xed   : > { %v12615_v3 = vpop.f32.mrf.mxu1 }
  0xf0   : > { %9726 = vmatmul.msk.bf16.gmra.mxu2 %vm1959_vm1, %v9010_v35 }
  0xf3   : > { %v2838_v12 = vpop.f32.mrf.mxu2 }
  0xf4   : > { %v2180_v13 = vpop.f32.mrf.mxu0 }
  0xf5   : > { %v2509_v14 = vpop.f32.mrf.mxu1 }
  0xf6   : > { %v2510_v15 = vadd.f32 %v2509_v14, %v2180_v13  ;;  %v9014_v13 = vor.u32 %v11626_v10, %v9013_v9  ;;  %v9015_v14 = vld [vmem:[#allocation5 + $0x12c] sm:$0xf0] }
  0xf7   : > { %2219 = vmatmul.bf16.gmra.mxu0 %v9002_v51 }
  0xf8   : > { %v12621_v16 = vadd.f32 %v2838_v12, %v2510_v15  ;;  %2548 = vmatmul.bf16.gmra.mxu1 %v9006_v53  ;;  %v9018_v15 = vor.u32 %v11625_v11, %v9015_v14  ;;  %v9057_v11 = vld [vmem:[#allocation5 + $0x170] sm:$0xf]  ;;  %v9049_v14 = vld [vmem:[#allocation5 + $0x168] sm:$0xf] }
  0xfb   : > { %v12623_v19 = vpop.f32.mrf.mxu2 }
  0xfc   : > { %v12625_v21 = vpop.f32.mrf.mxu0 }
  0xfd   : > { %v12628_v22 = vpop.f32.mrf.mxu1 }
 0x100   : > { %9727 = vmatmul.msk.bf16.gmra.mxu2 %vm1959_vm1, %v9022_v4 }
 0x103   : > { %v2843_v29 = vpop.f32.mrf.mxu2 }
 0x104   : > { %v2185_v30 = vpop.f32.mrf.mxu0 }
 0x105   : > { %v2514_v31 = vpop.f32.mrf.mxu1 }
 0x106   : > { %v2515_v40 = vadd.f32 %v2514_v31, %v2185_v30  ;;  %v11629_v30 = vld [vmem:[#allocation5 + $0x140] sm:$0xf0]  ;;  %v11628_v31 = vld [vmem:[#allocation5 + $0x13c] sm:$0xf] }
 0x107   : > { %2224 = vmatmul.bf16.gmra.mxu0 %v9014_v13 }
 0x108   : > { %v2844_v54 = vadd.f32 %v2843_v29, %v2515_v40  ;;  %2553 = vmatmul.bf16.gmra.mxu1 %v9018_v15  ;;  %v9025_v29 = vld [vmem:[#allocation5 + $0x138] sm:$0xf]  ;;  %v11635_v15 = vld [vmem:[#allocation5 + $0x170] sm:$0xf0] }
 0x109   : > { %v9026_v40 = vor.u32 %v11629_v30, %v9025_v29  ;;  %v9061_v30 = vld [vmem:[#allocation5 + $0x180] sm:$0xf] }
 0x10b   : > { %v2845_v34 = vpop.f32.mrf.mxu2 }
 0x10c   : > { %v2187_v41 = vpop.f32.mrf.mxu0 }
 0x10d   : > { %v2516_v42 = vpop.f32.mrf.mxu1 }
 0x10e   : > { %v2517_v48 = vadd.f32 %v2516_v42, %v2187_v41  ;;  %v9030_v42 = vor.u32 %v11628_v31, %v9027_v32  ;;  %v11638_v31 = vld [vmem:[#allocation5 + $0x188] sm:$0xf0]  ;;  %v11637_v32 = vld [vmem:[#allocation5 + $0x184] sm:$0xf] }
 0x110   : > { %v2846_v55 = vadd.f32 %v2845_v34, %v2517_v48  ;;  %9728 = vmatmul.msk.bf16.gmra.mxu2 %vm1959_vm1, %v9034_v28  ;;  %v11639_v28 = vld [vmem:[#allocation5 + $0x190] sm:$0xf0] }
 0x112   : > { %v3148_v57 = vpack.c.bf16 %v2846_v55, %v2844_v54  ;;  %v9045_v54 = vld [vmem:[#allocation5 + $0x158] sm:$0xf]  ;;  %v11633_v55 = vld [vmem:[#allocation5 + $0x160] sm:$0xf0] }
 0x113   : > { %v2848_v56 = vpop.f32.mrf.mxu2 }
 0x114   : > { %9780 = vmatmul.msk.bf16.vlgmr.msra.gmra.mxu3 %vm3154_vm3, %v3148_v57  ;;  %v2190_v58 = vpop.f32.mrf.mxu0  ;;  %v9037_v57 = vld [vmem:[#allocation5 + $0x150] sm:$0xf] }
 0x115   : > { %v2519_v59 = vpop.f32.mrf.mxu1 }
 0x116   : > { %v2520_v6 = vadd.f32 %v2519_v59, %v2190_v58  ;;  %v11632_v58 = vld [vmem:[#allocation5 + $0x158] sm:$0xf0]  ;;  %v11631_v59 = vld [vmem:[#allocation5 + $0x154] sm:$0xf] }
 0x117   : > { %2229 = vmatmul.bf16.gmra.mxu0 %v9026_v40  ;;  %v9038_v1 = vor.u32 %v11632_v58, %v9037_v57  ;;  %v9042_v5 = vor.u32 %v11631_v59, %v9039_v60 }
 0x118   : > { %v2849_v17 = vadd.f32 %v2848_v56, %v2520_v6  ;;  %2558 = vmatmul.bf16.gmra.mxu1 %v9030_v42  ;;  %v9046_v56 = vor.u32 %v11633_v55, %v9045_v54  ;;  %v2507_v54 = vadd.f32 %v12615_v3, %v12612_v2  ;;  %v9075_v55 = vld [vmem:[#allocation5 + $0x1a4] sm:$0xf0] }
 0x11a   : > { %v2836_v58 = vadd.f32 %v12610_v0, %v2507_v54 }
 0x11b   : > { %v2850_v63 = vpop.f32.mrf.mxu2 }
 0x11c   : > { %v2192_v7 = vpop.f32.mrf.mxu0 }
 0x11d   : > { %v2521_v8 = vpop.f32.mrf.mxu1 }
 0x11e   : > { %v2522_v12 = vadd.f32 %v2521_v8, %v2192_v7 }
 0x120   : > { %v2851_v18 = vadd.f32 %v2850_v63, %v2522_v12  ;;  %9729 = vmatmul.msk.bf16.gmra.mxu2 %vm1959_vm1, %v9046_v56  ;;  %v11636_v12 = vld [vmem:[#allocation5 + $0x178] sm:$0xf0] }
 0x121   : > { %v9058_v13 = vor.u32 %v11636_v12, %v9057_v11  ;;  %v9087_v12 = vld [vmem:[#allocation5 + $0x1bc] sm:$0xf0] }
 0x122   : > { %v3149_v23 = vpack.c.bf16 %v2851_v18, %v2849_v17  ;;  %v2497_v17 = vadd.f32 %v12597_v39, %v12595_v38  ;;  %v11634_v18 = vld [vmem:[#allocation5 + $0x16c] sm:$0xf]  ;;  %v3263_v38 = vsel %vm3167_vm2, %v9788_v27, 0  ;;  %v9069_v39 = vld [vmem:[#allocation5 + $0x188] sm:$0xf] }
 0x123   : > { %v2853_v20 = vpop.f32.mrf.mxu2  ;;  %3272 = vmatpush.bf16.msra.mxu3 %v3263_v38  ;;  %v9070_v29 = vor.u32 %v11639_v28, %v9069_v39  ;;  %v11647_v27 = vld [vmem:[#allocation5 + $0x1d0] sm:$0xf0]  ;;  %v11646_v38 = vld [vmem:[#allocation5 + $0x1cc] sm:$0xf] }
 0x124   : > { %9781 = vmatmul.msk.bf16.gmra.mxu3 %vm3154_vm3, %v3149_v23  ;;  %v2195_v24 = vpop.f32.mrf.mxu0  ;;  %v9050_v23 = vor.u32 %v11635_v15, %v9049_v14 }
 0x125   : > { %v2524_v25 = vpop.f32.mrf.mxu1 }
 0x126   : > { %v2525_v34 = vadd.f32 %v2524_v25, %v2195_v24  ;;  %v2826_v25 = vadd.f32 %v12593_v37, %v2497_v17  ;;  %v2502_v37 = vadd.f32 %v12606_v50, %v12603_v49  ;;  %v11642_v49 = vld [vmem:[#allocation5 + $0x1a8] sm:$0xf0] }
 0x127   : > { %2234 = vmatmul.bf16.gmra.mxu0 %v9038_v1  ;;  %v9093_v1 = vld [vmem:[#allocation5 + $0x1b8] sm:$0xf] }
 0x128   : > { %v2854_v45 = vadd.f32 %v2853_v20, %v2525_v34  ;;  %2563 = vmatmul.bf16.gmra.mxu1 %v9042_v5  ;;  %v9051_v20 = vld [vmem:[#allocation5 + $0x174] sm:$0xf0]  ;;  %v3143_v26 = vpack.c.bf16 %v2826_v25, %v12591_v36  ;;  %v9062_v36 = vor.u32 %v11638_v31, %v9061_v30  ;;  %v2831_v40 = vadd.f32 %v12601_v47, %v2502_v37  ;;  %v11640_v47 = vld [vmem:[#allocation5 + $0x19c] sm:$0xf] }
 0x129   : > { %v9054_v24 = vor.u32 %v11634_v18, %v9051_v20  ;;  %v9105_v18 = vld [vmem:[#allocation5 + $0x1d0] sm:$0xf]  ;;  %v11648_v20 = vld [vmem:[#allocation5 + $0x1d8] sm:$0xf0]  ;;  %v9099_v30 = vld [vmem:[#allocation5 + $0x1d4] sm:$0xf0] }
 0x12a   : > { %v9102_v37 = vor.u32 %v11646_v38, %v9099_v30  ;;  %v11655_v30 = vld [vmem:[#allocation5 + $0x214] sm:$0xf] }
 0x12b   : > { %v2855_v33 = vpop.f32.mrf.mxu2 }
 0x12c   : > { %v2197_v35 = vpop.f32.mrf.mxu0 }
 0x12d   : > { %v2526_v41 = vpop.f32.mrf.mxu1 }
 0x12e   : > { %v2527_v43 = vadd.f32 %v2526_v41, %v2197_v35 }
 0x130   : > { %v2856_v46 = vadd.f32 %v2855_v33, %v2527_v43  ;;  %9730 = vmatmul.msk.bf16.gmra.mxu2 %vm1959_vm1, %v9058_v13  ;;  %v9063_v33 = vld [vmem:[#allocation5 + $0x18c] sm:$0xf0]  ;;  %v3144_v43 = vpack.c.bf16 %v2831_v40, %v12599_v44  ;;  %v9078_v44 = vor.u32 %v11640_v47, %v9075_v55  ;;  %v9793_v40 = vld [vmem:[%s14193_s4 + $0xc] sm:$0xf] }
 0x131   : > { %v9066_v35 = vor.u32 %v11637_v32, %v9063_v33 }
 0x132   : > { %v3150_v48 = vpack.c.bf16 %v2856_v46, %v2854_v45  ;;  %v9081_v46 = vld [vmem:[#allocation5 + $0x1a0] sm:$0xf] }
 0x133   : > { %v2858_v52 = vpop.f32.mrf.mxu2 }
 0x134   : > { %9782 = vmatmul.msk.bf16.gmra.mxu3 %vm3154_vm3, %v3150_v48  ;;  %v2200_v51 = vpop.f32.mrf.mxu0 }
 0x135   : > { %v2529_v53 = vpop.f32.mrf.mxu1 }
 0x136   : > { %v2530_v62 = vadd.f32 %v2529_v53, %v2200_v51  ;;  %v9082_v51 = vor.u32 %v11642_v49, %v9081_v46  ;;  %v11641_v53 = vld [vmem:[#allocation5 + $0x1a0] sm:$0xf0] }
 0x137   : > { %2239 = vmatmul.bf16.gmra.mxu0 %v9050_v23 }
 0x138   : > { %v2859_v8 = vadd.f32 %v2858_v52, %v2530_v62  ;;  %2568 = vmatmul.bf16.gmra.mxu1 %v9054_v24  ;;  %v9073_v52 = vld [vmem:[#allocation5 + $0x198] sm:$0xf]  ;;  %v3145_v62 = vpack.c.bf16 %v2836_v58, %v12608_v61 }
 0x139   : > { %v9074_v56 = vor.u32 %v11641_v53, %v9073_v52  ;;  %v11649_v52 = vld [vmem:[#allocation5 + $0x1e4] sm:$0xf] }
 0x13b   : > { %v2860_v7 = vpop.f32.mrf.mxu2 }
 0x13c   : > { %v2202_v63 = vpop.f32.mrf.mxu0 }
 0x13d   : > { %v2531_v4 = vpop.f32.mrf.mxu1 }
 0x13e   : > { %v2532_v6 = vadd.f32 %v2531_v4, %v2202_v63  ;;  %v11645_v4 = vld [vmem:[#allocation5 + $0x1c0] sm:$0xf0] }
 0x13f   : > { %v9094_v5 = vor.u32 %v11645_v4, %v9093_v1  ;;  %v11654_v1 = vld [vmem:[#allocation5 + $0x208] sm:$0xf0] }
 0x140   : > { %v2861_v9 = vadd.f32 %v2860_v7, %v2532_v6  ;;  %9731 = vmatmul.msk.bf16.gmra.mxu2 %vm1959_vm1, %v9070_v29  ;;  %v2512_v6 = vadd.f32 %v12628_v22, %v12625_v21  ;;  %v9085_v7 = vld [vmem:[#allocation5 + $0x1b0] sm:$0xf] }
 0x142   : > { %v3151_v10 = vpack.c.bf16 %v2861_v9, %v2859_v8  ;;  %v11644_v8 = vld [vmem:[#allocation5 + $0x1b8] sm:$0xf0]  ;;  %v11643_v9 = vld [vmem:[#allocation5 + $0x1b4] sm:$0xf]  ;;  %v2841_v61 = vadd.f32 %v12623_v19, %v2512_v6  ;;  %v9106_v19 = vor.u32 %v11648_v20, %v9105_v18  ;;  %v9123_v18 = vld [vmem:[#allocation5 + $0x204] sm:$0xf0] }
 0x143   : > { %v2863_v42 = vpop.f32.mrf.mxu2  ;;  %v9086_v11 = vor.u32 %v11644_v8, %v9085_v7  ;;  %v9090_v14 = vor.u32 %v11643_v9, %v9087_v12  ;;  %v9121_v8 = vld [vmem:[#allocation5 + $0x1f8] sm:$0xf]  ;;  %v11653_v9 = vld [vmem:[#allocation5 + $0x200] sm:$0xf0] }
 0x144   : > { %9783 = vmatmul.msk.bf16.gmra.mxu3 %vm3154_vm3, %v3151_v10  ;;  %v2205_v34 = vpop.f32.mrf.mxu0  ;;  %v3146_v21 = vpack.c.bf16 %v2841_v61, %v12621_v16  ;;  %v11652_v61 = vld [vmem:[#allocation5 + $0x1fc] sm:$0xf] }
 0x145   : > { %v2534_v41 = vpop.f32.mrf.mxu1 }
 0x146   : > { %v2535_v23 = vadd.f32 %v2534_v41, %v2205_v34  ;;  %v9117_v41 = vld [vmem:[#allocation5 + $0x1e8] sm:$0xf] }
 0x147   : > { %2244 = vmatmul.bf16.gmra.mxu0 %v9062_v36 }
 0x148   : > { %2573 = vmatmul.bf16.gmra.mxu1 %v9066_v35  ;;  %v2864_v39 = vadd.f32 %v2863_v42, %v2535_v23  ;;  %v11651_v42 = vld [vmem:[#allocation5 + $0x1f0] sm:$0xf0]  ;;  %v9141_v23 = vld [vmem:[#allocation5 + $0x218] sm:$0xf] }
 0x14b   : > { %v2865_v48 = vpop.f32.mrf.mxu2 }
 0x14c   : > { %v2207_v45 = vpop.f32.mrf.mxu0 }
 0x14d   : > { %v2536_v50 = vpop.f32.mrf.mxu1 }
 0x14e   : > { %v2537_v24 = vadd.f32 %v2536_v50, %v2207_v45  ;;  %v9118_v45 = vor.u32 %v11651_v42, %v9117_v41  ;;  %v9135_v42 = vld [vmem:[#allocation5 + $0x21c] sm:$0xf0] }
 0x150   : > { %9732 = vmatmul.msk.bf16.gmra.mxu2 %vm1959_vm1, %v9082_v51  ;;  %v2866_v16 = vadd.f32 %v2865_v48, %v2537_v24  ;;  %v9109_v48 = vld [vmem:[#allocation5 + $0x1e0] sm:$0xf]  ;;  %v11650_v51 = vld [vmem:[#allocation5 + $0x1e8] sm:$0xf0]  ;;  %v11657_v24 = vld [vmem:[#allocation5 + $0x220] sm:$0xf0] }
 0x151   : > { %v9110_v55 = vor.u32 %v11650_v51, %v9109_v48 }
 0x152   : > { %v3244_v32 = vpack.c.bf16 %v2866_v16, %v2864_v39  ;;  %v9133_v16 = vld [vmem:[#allocation5 + $0x210] sm:$0xf] }
 0x153   : > { %v12664_v60 = vpop.f32.mrf.mxu2 }
 0x154   : > { %9784 = vmatmul.msk.bf16.vlgmr.msrb.gmra.mxu3 %vm3154_vm3, %v3143_v26  ;;  %v12661_v57 = vpop.f32.mrf.mxu0  ;;  %v9097_v26 = vld [vmem:[#allocation5 + $0x1c8] sm:$0xf] }
 0x155   : > { %v2539_v59 = vpop.f32.mrf.mxu1  ;;  %v9098_v29 = vor.u32 %v11647_v27, %v9097_v26  ;;  %v9142_v26 = vor.u32 %v11657_v24, %v9141_v23  ;;  %v11662_v23 = vld [vmem:[#allocation5 + $0x248] sm:$0xf0]  ;;  %v11661_v24 = vld [vmem:[#allocation5 + $0x244] sm:$0xf] }
 0x156   : > { %v2540_v46 = vadd.f32 %v2539_v59, %v12661_v57 }
 0x157   : > { %2249 = vmatmul.bf16.gmra.mxu0 %v9074_v56  ;;  %v9111_v56 = vld [vmem:[#allocation5 + $0x1ec] sm:$0xf0] }
 0x158   : > { %2578 = vmatmul.bf16.gmra.mxu1 %v9078_v44  ;;  %v2869_v53 = vadd.f32 %v12664_v60, %v2540_v46  ;;  %v9114_v57 = vor.u32 %v11649_v52, %v9111_v56  ;;  %v9153_v46 = vld [vmem:[#allocation5 + $0x230] sm:$0xf]  ;;  %v11658_v56 = vld [vmem:[#allocation5 + $0x22c] sm:$0xf] }
 0x15b   : > { %v2870_v63 = vpop.f32.mrf.mxu2 }
 0x15c   : > { %v2212_v2 = vpop.f32.mrf.mxu0 }
 0x15d   : > { %v2541_v3 = vpop.f32.mrf.mxu1 }
 0x15e   : > { %v2542_v49 = vadd.f32 %v2541_v3, %v2212_v2 }
 0x160   : > { %9733 = vmatmul.msk.bf16.gmra.mxu2 %vm1959_vm1, %v9094_v5  ;;  %v2871_v54 = vadd.f32 %v2870_v63, %v2542_v49  ;;  %v9129_v63 = vld [vmem:[#allocation5 + $0x200] sm:$0xf]  ;;  %v11660_v49 = vld [vmem:[#allocation5 + $0x238] sm:$0xf0] }
 0x161   : > { %v9130_v4 = vor.u32 %v11654_v1, %v9129_v63  ;;  %v9154_v48 = vor.u32 %v11660_v49, %v9153_v46 }
 0x162   : > { %v3245_v59 = vpack.c.bf16 %v2871_v54, %v2869_v53  ;;  %v9145_v54 = vld [vmem:[#allocation5 + $0x228] sm:$0xf] }
 0x163   : > { %v12676_v13 = vpop.f32.mrf.mxu2 }
 0x164   : > { %9785 = vmatmul.msk.bf16.gmra.mxu3 %vm3154_vm3, %v3144_v43  ;;  %v12671_v0 = vpop.f32.mrf.mxu0  ;;  %v3321_v43 = vsel %vm3167_vm2, %v9793_v40, 0 }
 0x165   : > { %v12674_v10 = vpop.f32.mrf.mxu1  ;;  %3330 = vmatpush.bf16.msrb.mxu3 %v3321_v43 }
 0x166   : > { %v2545_v5 = vadd.f32 %v12674_v10, %v12671_v0  ;;  %v9126_v0 = vor.u32 %v11652_v61, %v9123_v18  ;;  %v9165_v61 = vld [vmem:[#allocation5 + $0x248] sm:$0xf] }
 0x167   : > { %2254 = vmatmul.bf16.gmra.mxu0 %v9086_v11 }
 0x168   : > { %2583 = vmatmul.bf16.gmra.mxu1 %v9090_v14  ;;  %v2874_v11 = vadd.f32 %v12676_v13, %v2545_v5 }
 0x16b   : > { %v12680_v17 = vpop.f32.mrf.mxu2 }
 0x16c   : > { %v2217_v22 = vpop.f32.mrf.mxu0 }
 0x16d   : > { %v2546_v15 = vpop.f32.mrf.mxu1 }
 0x16e   : > { %v2547_v6 = vadd.f32 %v2546_v15, %v2217_v22 }
 0x170   : > { %9734 = vmatmul.msk.bf16.gmra.mxu2 %vm1959_vm1, %v9106_v19  ;;  %v2876_v12 = vadd.f32 %v12680_v17, %v2547_v6 }
 0x172   : > { %v3246_v10 = vpack.c.bf16 %v2876_v12, %v2874_v11  ;;  %v11663_v11 = vld [vmem:[#allocation5 + $0x250] sm:$0xf0] }
 0x173   : > { %v12687_v31 = vpop.f32.mrf.mxu2 }
 0x174   : > { %9786 = vmatmul.msk.bf16.gmra.mxu3 %vm3154_vm3, %v3145_v62  ;;  %v12683_v25 = vpop.f32.mrf.mxu0 }
 0x175   : > { %v12685_v28 = vpop.f32.mrf.mxu1 }
 0x176   : > { %v2550_v27 = vadd.f32 %v12685_v28, %v12683_v25  ;;  %v9138_v28 = vor.u32 %v11655_v30, %v9135_v42  ;;  %v9177_v42 = vld [vmem:[#allocation5 + $0x260] sm:$0xf] }
 0x177   : > { %2259 = vmatmul.bf16.gmra.mxu0 %v9098_v29  ;;  %v11656_v29 = vld [vmem:[#allocation5 + $0x218] sm:$0xf0] }
 0x178   : > { %2588 = vmatmul.bf16.gmra.mxu1 %v9102_v37  ;;  %v2879_v37 = vadd.f32 %v12687_v31, %v2550_v27  ;;  %v9134_v41 = vor.u32 %v11656_v29, %v9133_v16  ;;  %v9159_v29 = vld [vmem:[#allocation5 + $0x24c] sm:$0xf0] }
 0x17b   : > { %v12694_v35 = vpop.f32.mrf.mxu2 }
 0x17c   : > { %v12690_v33 = vpop.f32.mrf.mxu0 }
 0x17d   : > { %v2551_v36 = vpop.f32.mrf.mxu1 }
 0x17e   : > { %v2552_v38 = vadd.f32 %v2551_v36, %v12690_v33 }
 0x180   : > { %9735 = vmatmul.msk.bf16.gmra.mxu2 %vm1959_vm1, %v9118_v45 }
 0x183   : > { %v12709_v58 = vpop.f32.mrf.mxu2 }
 0x184   : > { %9787 = vmatmul.msk.bf16.gmra.mxu3 %vm3154_vm3, %v3146_v21  ;;  %v12702_v50 = vpop.f32.mrf.mxu0  ;;  %v9122_v21 = vor.u32 %v11653_v9, %v9121_v8  ;;  %v9798_v9 = vld [vmem:[%s14193_s4 + $0x10] sm:$0xf] }
 0x185   : > { %v12705_v47 = vpop.f32.mrf.mxu1  ;;  %v3379_v12 = vsel %vm3167_vm2, %v9798_v9, 0 }
 0x186   : > { %v2555_v51 = vadd.f32 %v12705_v47, %v12702_v50 }
 0x187   : > { %2264 = vmatmul.bf16.gmra.mxu0 %v9110_v55  ;;  %v11659_v55 = vld [vmem:[#allocation5 + $0x230] sm:$0xf0] }
 0x188   : > { %2593 = vmatmul.bf16.gmra.mxu1 %v9114_v57  ;;  %v2884_v57 = vadd.f32 %v12709_v58, %v2555_v51  ;;  %v9146_v1 = vor.u32 %v11659_v55, %v9145_v54  ;;  %v11665_v51 = vld [vmem:[#allocation5 + $0x260] sm:$0xf0] }
 0x18b   : > { %v12714_v60 = vpop.f32.mrf.mxu2 }
 0x18c   : > { %v2227_v62 = vpop.f32.mrf.mxu0 }
 0x18d   : > { %v2556_v2 = vpop.f32.mrf.mxu1 }
 0x18e   : > { %v2557_v52 = vadd.f32 %v2556_v2, %v2227_v62 }
 0x190   : > { %9736 = vmatmul.msk.bf16.gmra.mxu2 %vm1959_vm1, %v9130_v4  ;;  %v9147_v4 = vld [vmem:[#allocation5 + $0x234] sm:$0xf0] }
 0x191   : > { %v9150_v50 = vor.u32 %v11658_v56, %v9147_v4 }
 0x193   : > { %v12727_v19 = vpop.f32.mrf.mxu2 }
 0x194   : > { %9789 = vmatmul.msk.bf16.vlgmr.msra.gmra.mxu3 %vm3154_vm3, %v3244_v32  ;;  %v12719_v7 = vpop.f32.mrf.mxu0  ;;  %v2881_v32 = vadd.f32 %v12694_v35, %v2552_v38 }
 0x195   : > { %v12723_v14 = vpop.f32.mrf.mxu1  ;;  %3388 = vmatpush.bf16.msra.mxu3 %v3379_v12  ;;  %v9181_v12 = vld [vmem:[#allocation5 + $0x270] sm:$0xf] }
 0x196   : > { %v3247_v33 = vpack.c.bf16 %v2881_v32, %v2879_v37  ;;  %v2560_v18 = vadd.f32 %v12723_v14, %v12719_v7  ;;  %v9162_v14 = vor.u32 %v11661_v24, %v9159_v29  ;;  %v9183_v24 = vld [vmem:[#allocation5 + $0x27c] sm:$0xf0] }
 0x197   : > { %v12692_v34 = vpop.f32.mrf.mxu3  ;;  %2269 = vmatmul.bf16.gmra.mxu0 %v9122_v21  ;;  %v9166_v21 = vor.u32 %v11663_v11, %v9165_v61 }
 0x198   : > { %2598 = vmatmul.bf16.gmra.mxu1 %v9126_v0 }
 0x19b   : > { %v12734_v17 = vpop.f32.mrf.mxu2 }
 0x19c   : > { %v12730_v22 = vpop.f32.mrf.mxu0 }
 0x19d   : > { %v2561_v15 = vpop.f32.mrf.mxu1 }
 0x19e   : > { %v2562_v0 = vadd.f32 %v2561_v15, %v12730_v22 }
 0x19f   : > { %v12707_v44 = vpop.f32.mrf.mxu3 }
 0x1a0   : > { %9737 = vmatmul.msk.bf16.gmra.mxu2 %vm1959_vm1, %v9142_v26  ;;  %v2889_v26 = vadd.f32 %v12727_v19, %v2560_v18  ;;  %v2891_v27 = vadd.f32 %v12734_v17, %v2562_v0  ;;  %v11667_v18 = vld [vmem:[#allocation5 + $0x274] sm:$0xf] }
 0x1a2   : > { %v3303_v15 = vpack.c.bf16 %v2891_v27, %v2889_v26 }
 0x1a3   : > { %v12748_v25 = vpop.f32.mrf.mxu2 }
 0x1a4   : > { %9790 = vmatmul.msk.bf16.gmra.mxu3 %vm3154_vm3, %v3245_v59  ;;  %v12740_v39 = vpop.f32.mrf.mxu0  ;;  %v2886_v59 = vadd.f32 %v12714_v60, %v2557_v52  ;;  %v11664_v52 = vld [vmem:[#allocation5 + $0x25c] sm:$0xf] }
 0x1a5   : > { %v12744_v40 = vpop.f32.mrf.mxu1 }
 0x1a6   : > { %v3302_v47 = vpack.c.bf16 %v2886_v59, %v2884_v57  ;;  %v9171_v57 = vld [vmem:[#allocation5 + $0x264] sm:$0xf0] }
 0x1a7   : > { %v12712_v3 = vpop.f32.mrf.mxu3  ;;  %2274 = vmatmul.bf16.gmra.mxu0 %v9134_v41 }
 0x1a8   : > { %2603 = vmatmul.bf16.gmra.mxu1 %v9138_v28  ;;  %v11666_v28 = vld [vmem:[#allocation5 + $0x268] sm:$0xf0] }
 0x1ab   : > { %v12757_v35 = vpop.f32.mrf.mxu2 }
 0x1ac   : > { %v12751_v36 = vpop.f32.mrf.mxu0 }
 0x1ad   : > { %v12753_v45 = vpop.f32.mrf.mxu1 }
 0x1ae   : > { %v2567_v46 = vadd.f32 %v12753_v45, %v12751_v36 }
 0x1af   : > { %v12725_v20 = vpop.f32.mrf.mxu3 }
 0x1b0   : > { %9738 = vmatmul.msk.bf16.gmra.mxu2 %vm1959_vm1, %v9154_v48  ;;  %v9169_v48 = vld [vmem:[#allocation5 + $0x258] sm:$0xf] }
 0x1b1   : > { %v9170_v56 = vor.u32 %v11665_v51, %v9169_v48 }
 0x1b3   : > { %v12770_v6 = vpop.f32.mrf.mxu2 }
 0x1b4   : > { %9791 = vmatmul.msk.bf16.gmra.mxu3 %vm3154_vm3, %v3246_v10  ;;  %v12762_v53 = vpop.f32.mrf.mxu0 }
 0x1b5   : > { %v12766_v63 = vpop.f32.mrf.mxu1 }
 0x1b7   : > { %v12732_v13 = vpop.f32.mrf.mxu3  ;;  %2279 = vmatmul.bf16.gmra.mxu0 %v9146_v1 }
 0x1b8   : > { %2608 = vmatmul.bf16.gmra.mxu1 %v9150_v50 }
 0x1bb   : > { %v12777_v60 = vpop.f32.mrf.mxu2 }
 0x1bc   : > { %v12773_v62 = vpop.f32.mrf.mxu0 }
 0x1bd   : > { %v12775_v2 = vpop.f32.mrf.mxu1 }
 0x1be   : > { %v2572_v61 = vadd.f32 %v12775_v2, %v12773_v62 }
 0x1bf   : > { %v12746_v43 = vpop.f32.mrf.mxu3 }
 0x1c0   : > { %9739 = vmatmul.msk.bf16.gmra.mxu2 %vm1959_vm1, %v9166_v21  ;;  %v11668_v21 = vld [vmem:[#allocation5 + $0x278] sm:$0xf0] }
 0x1c3   : > { %v12796_v7 = vpop.f32.mrf.mxu2 }
 0x1c4   : > { %9792 = vmatmul.msk.bf16.gmra.mxu3 %vm3154_vm3, %v3247_v33  ;;  %v12790_v10 = vpop.f32.mrf.mxu0  ;;  %v9178_v33 = vor.u32 %v11666_v28, %v9177_v42  ;;  %v9193_v28 = vld [vmem:[#allocation5 + $0x288] sm:$0xf] }
 0x1c5   : > { %v12794_v38 = vpop.f32.mrf.mxu1 }
 0x1c7   : > { %v12755_v31 = vpop.f32.mrf.mxu3 }
 0x1c8   : > { %2613 = vmatmul.bf16.gmra.mxu1 %v9162_v14  ;;  %v11672_v14 = vld [vmem:[#allocation5 + $0x298] sm:$0xf0] }
 0x1cb   : > { %v12806_v32 = vpop.f32.mrf.mxu2 }
 0x1cc   : > { %v12802_v37 = vpop.f32.mrf.mxu0 }
 0x1cd   : > { %v12804_v19 = vpop.f32.mrf.mxu1 }
 0x1cf   : > { %v12768_v5 = vpop.f32.mrf.mxu3 }
 0x1d0   : > { %9740 = vmatmul.msk.bf16.gmra.mxu2 %vm1959_vm1, %v9178_v33  ;;  %v11671_v33 = vld [vmem:[#allocation5 + $0x290] sm:$0xf0] }
 0x1d1   : > { %v9194_v51 = vor.u32 %v11671_v33, %v9193_v28  ;;  %v11676_v28 = vld [vmem:[#allocation5 + $0x2bc] sm:$0xf] }
 0x1d4   : > { %9794 = vmatmul.msk.bf16.vlgmr.msrb.gmra.mxu3 %vm3154_vm3, %v3302_v47  ;;  %v12816_v49 = vpop.f32.mrf.mxu0  ;;  %v9189_v47 = vld [vmem:[#allocation5 + $0x278] sm:$0xf] }
 0x1d5   : > { %v12820_v55 = vpop.f32.mrf.mxu1 }
 0x1d7   : > { %v3224_v58 = vpop.f32.mrf.mxu3 }
 0x1d8   : > { %v12780_v8 = vadd.f32 %v3224_v58, %v12692_v34  ;;  %v9157_v34 = vld [vmem:[#allocation5 + $0x240] sm:$0xf]  ;;  %v11669_v58 = vld [vmem:[#allocation5 + $0x280] sm:$0xf0] }
 0x1d9   : > { %v9158_v16 = vor.u32 %v11662_v23, %v9157_v34  ;;  %v9190_v9 = vor.u32 %v11669_v58, %v9189_v47  ;;  %v9182_v23 = vor.u32 %v11668_v21, %v9181_v12  ;;  %v2580_v47 = vadd.f32 %v12820_v55, %v12816_v49 }
 0x1db   : > { %2284 = vmatmul.bf16.gmra.mxu0 %v9158_v16 }
 0x1dc   : > { %v12828_v1 = vpop.f32.mrf.mxu0 }
 0x1df   : > { %v3226_v30 = vpop.f32.mrf.mxu3 }
 0x1e0   : > { %v12799_v22 = vadd.f32 %v3226_v30, %v12707_v44  ;;  %v2565_v44 = vadd.f32 %v12744_v40, %v12740_v39  ;;  %v12822_v39 = vpop.f32.mrf.mxu2  ;;  %v9174_v40 = vor.u32 %v11664_v52, %v9171_v57  ;;  %9741 = vmatmul.msk.bf16.gmra.mxu2 %vm1959_vm1, %v9190_v9  ;;  %v9201_v30 = vld [vmem:[#allocation5 + $0x290] sm:$0xf]  ;;  %v9195_v52 = vld [vmem:[#allocation5 + $0x294] sm:$0xf0]  ;;  %v9205_v9 = vld [vmem:[#allocation5 + $0x2a0] sm:$0xf] }
 0x1e1   : > { %v2909_v12 = vadd.f32 %v12822_v39, %v2580_v47  ;;  %v11679_v47 = vld [vmem:[#allocation5 + $0x2d4] sm:$0xf] }
 0x1e2   : > { %v2894_v54 = vadd.f32 %v12748_v25, %v2565_v44  ;;  %2618 = vmatmul.bf16.gmra.mxu1 %v9174_v40  ;;  %v12830_v25 = vpop.f32.mrf.mxu1  ;;  %v11670_v44 = vld [vmem:[#allocation5 + $0x28c] sm:$0xf]  ;;  %v11675_v40 = vld [vmem:[#allocation5 + $0x2b0] sm:$0xf0] }
 0x1e3   : > { %v2582_v58 = vadd.f32 %v12830_v25, %v12828_v1 }
 0x1e4   : > { %9795 = vmatmul.msk.bf16.gmra.mxu3 %vm3154_vm3, %v3303_v15  ;;  %v12842_v11 = vpop.f32.mrf.mxu0  ;;  %v9202_v15 = vor.u32 %v11672_v14, %v9201_v30 }
 0x1e7   : > { %v3229_v17 = vpop.f32.mrf.mxu3 }
 0x1e8   : > { %v12809_v41 = vadd.f32 %v3229_v17, %v12712_v3  ;;  %v2896_v3 = vadd.f32 %v12757_v35, %v2567_v46  ;;  %v12832_v4 = vpop.f32.mrf.mxu2  ;;  %v2577_v17 = vadd.f32 %v12804_v19, %v12802_v37 }
 0x1e9   : > { %v2911_v21 = vadd.f32 %v12832_v4, %v2582_v58 }
 0x1ea   : > { %v3304_v45 = vpack.c.bf16 %v2896_v3, %v2894_v54  ;;  %v12846_v34 = vpop.f32.mrf.mxu1 }
 0x1eb   : > { %2289 = vmatmul.bf16.gmra.mxu0 %v9170_v56 }
 0x1ec   : > { %v12854_v27 = vpop.f32.mrf.mxu0 }
 0x1ef   : > { %v3231_v59 = vpop.f32.mrf.mxu3 }
 0x1f0   : > { %v12825_v36 = vadd.f32 %v3231_v59, %v12725_v20  ;;  %v2570_v20 = vadd.f32 %v12766_v63, %v12762_v53  ;;  %v12848_v53 = vpop.f32.mrf.mxu2  ;;  %v9186_v63 = vor.u32 %v11667_v18, %v9183_v24  ;;  %9742 = vmatmul.msk.bf16.gmra.mxu2 %vm1959_vm1, %v9202_v15  ;;  %v9213_v59 = vld [vmem:[#allocation5 + $0x2a8] sm:$0xf] }
 0x1f2   : > { %v2899_v0 = vadd.f32 %v12770_v6, %v2570_v20  ;;  %2623 = vmatmul.bf16.gmra.mxu1 %v9186_v63  ;;  %v12856_v6 = vpop.f32.mrf.mxu1  ;;  %v11674_v20 = vld [vmem:[#allocation5 + $0x2a8] sm:$0xf0] }
 0x1f3   : > { %v2587_v14 = vadd.f32 %v12856_v6, %v12854_v27 }
 0x1f4   : > { %9796 = vmatmul.msk.bf16.gmra.mxu3 %vm3154_vm3, %v3304_v45  ;;  %v12868_v42 = vpop.f32.mrf.mxu0 }
 0x1f7   : > { %v3234_v35 = vpop.f32.mrf.mxu3 }
 0x1f8   : > { %v12835_v50 = vadd.f32 %v3234_v35, %v12732_v13  ;;  %v2901_v13 = vadd.f32 %v12777_v60, %v2572_v61  ;;  %v12858_v16 = vpop.f32.mrf.mxu2  ;;  %v9214_v35 = vor.u32 %v11675_v40, %v9213_v59  ;;  %v11673_v61 = vld [vmem:[#allocation5 + $0x2a4] sm:$0xf] }
 0x1fa   : > { %v3305_v2 = vpack.c.bf16 %v2901_v13, %v2899_v0  ;;  %v12872_v48 = vpop.f32.mrf.mxu1  ;;  %v9206_v0 = vor.u32 %v11674_v20, %v9205_v9  ;;  %v9207_v13 = vld [vmem:[#allocation5 + $0x2ac] sm:$0xf0] }
 0x1fb   : > { %2294 = vmatmul.bf16.gmra.mxu0 %v9182_v23  ;;  %v9210_v1 = vor.u32 %v11673_v61, %v9207_v13  ;;  %v3361_v23 = vpack.c.bf16 %v2911_v21, %v2909_v12  ;;  %v9231_v61 = vld [vmem:[#allocation5 + $0x2dc] sm:$0xf0] }
 0x1fc   : > { %v12880_v3 = vpop.f32.mrf.mxu0 }
 0x1ff   : > { %v3236_v26 = vpop.f32.mrf.mxu3 }
 0x200   : > { %v12851_v62 = vadd.f32 %v3236_v26, %v12746_v43  ;;  %v2575_v43 = vadd.f32 %v12794_v38, %v12790_v10  ;;  %v12874_v10 = vpop.f32.mrf.mxu2  ;;  %v9198_v38 = vor.u32 %v11670_v44, %v9195_v52  ;;  %9743 = vmatmul.msk.bf16.gmra.mxu2 %vm1959_vm1, %v9214_v35  ;;  %v11680_v35 = vld [vmem:[#allocation5 + $0x2d8] sm:$0xf0] }
 0x202   : > { %v2904_v46 = vadd.f32 %v12796_v7, %v2575_v43  ;;  %2628 = vmatmul.bf16.gmra.mxu1 %v9198_v38  ;;  %v12882_v7 = vpop.f32.mrf.mxu1  ;;  %v9217_v43 = vld [vmem:[#allocation5 + $0x2b8] sm:$0xf] }
 0x203   : > { %v2592_v59 = vadd.f32 %v12882_v7, %v12880_v3 }
 0x204   : > { %9797 = vmatmul.msk.bf16.gmra.mxu3 %vm3154_vm3, %v3305_v2  ;;  %v9225_v2 = vld [vmem:[#allocation5 + $0x2c0] sm:$0xf] }
 0x207   : > { %v3239_v60 = vpop.f32.mrf.mxu3 }
 0x208   : > { %v12861_v29 = vadd.f32 %v3239_v60, %v12755_v31  ;;  %v2906_v31 = vadd.f32 %v12806_v32, %v2577_v17  ;;  %v12884_v56 = vpop.f32.mrf.mxu2  ;;  %v11678_v60 = vld [vmem:[#allocation5 + $0x2c8] sm:$0xf0]  ;;  %v11677_v17 = vld [vmem:[#allocation5 + $0x2c0] sm:$0xf0] }
 0x209   : > { %v9226_v30 = vor.u32 %v11678_v60, %v9225_v2  ;;  %v9241_v60 = vld [vmem:[#allocation5 + $0x2e8] sm:$0xf] }
 0x20a   : > { %v3360_v19 = vpack.c.bf16 %v2906_v31, %v2904_v46  ;;  %v12902_v18 = vpop.f32.mrf.mxu1  ;;  %v9218_v46 = vor.u32 %v11677_v17, %v9217_v43  ;;  %v9219_v31 = vld [vmem:[#allocation5 + $0x2c4] sm:$0xf0] }
 0x20b   : > { %2299 = vmatmul.bf16.gmra.mxu0 %v9194_v51 }
 0x20f   : > { %v3241_v54 = vpop.f32.mrf.mxu3 }
 0x210   : > { %v12877_v37 = vadd.f32 %v3241_v54, %v12768_v5  ;;  %v9803_v5 = vld [vmem:[%s14193_s4 + $0x14] sm:$0xf]  ;;  %v12904_v55 = vpop.f32.mrf.mxu2  ;;  %9744 = vmatmul.msk.bf16.gmra.mxu2 %vm1959_vm1, %v9226_v30  ;;  %v11683_v30 = vld [vmem:[#allocation5 + $0x2f0] sm:$0xf0] }
 0x211   : > { %v3437_v45 = vsel %vm3167_vm2, %v9803_v5, 0  ;;  %v9242_v17 = vor.u32 %v11683_v30, %v9241_v60  ;;  %v11688_v60 = vld [vmem:[#allocation5 + $0x31c] sm:$0xf] }
 0x212   : > { %3446 = vmatpush.bf16.msrb.mxu3 %v3437_v45  ;;  %2633 = vmatmul.bf16.gmra.mxu1 %v9210_v1  ;;  %v12912_v39 = vpop.f32.mrf.mxu1  ;;  %v9229_v45 = vld [vmem:[#allocation5 + $0x2d0] sm:$0xf]  ;;  %v11684_v1 = vld [vmem:[#allocation5 + $0x2f8] sm:$0xf0] }
 0x213   : > { %v9230_v20 = vor.u32 %v11680_v35, %v9229_v45 }
 0x214   : > { %9799 = vmatmul.msk.bf16.vlgmr.msra.gmra.mxu3 %vm3154_vm3, %v3360_v19  ;;  %v9237_v19 = vld [vmem:[#allocation5 + $0x2d8] sm:$0xf] }
 0x217   : > { %v3274_v32 = vpop.f32.mrf.mxu3 }
 0x218   : > { %v12887_v57 = vadd.f32 %v3274_v32, %v12780_v8  ;;  %v12898_v8 = vpop.f32.mrf.mxu0  ;;  %v12914_v26 = vpop.f32.mrf.mxu2  ;;  %v11681_v32 = vld [vmem:[#allocation5 + $0x2e0] sm:$0xf0] }
 0x219   : > { %v9238_v5 = vor.u32 %v11681_v32, %v9237_v19 }
 0x21a   : > { %v12928_v44 = vpop.f32.mrf.mxu1 }
 0x21b   : > { %2304 = vmatmul.bf16.gmra.mxu0 %v9206_v0 }
 0x21f   : > { %v3276_v49 = vpop.f32.mrf.mxu3 }
 0x220   : > { %v12907_v25 = vadd.f32 %v3276_v49, %v12799_v22  ;;  %v12910_v24 = vpop.f32.mrf.mxu0  ;;  %v2585_v22 = vadd.f32 %v12846_v34, %v12842_v11  ;;  %v12930_v11 = vpop.f32.mrf.mxu2  ;;  %v9222_v34 = vor.u32 %v11676_v28, %v9219_v31  ;;  %9745 = vmatmul.msk.bf16.gmra.mxu2 %vm1959_vm1, %v9238_v5  ;;  %v9249_v49 = vld [vmem:[#allocation5 + $0x2f0] sm:$0xf]  ;;  %v9243_v28 = vld [vmem:[#allocation5 + $0x2f4] sm:$0xf0]  ;;  %v9253_v5 = vld [vmem:[#allocation5 + $0x300] sm:$0xf] }
 0x222   : > { %v2914_v33 = vadd.f32 %v12848_v53, %v2585_v22  ;;  %2638 = vmatmul.bf16.gmra.mxu1 %v9222_v34  ;;  %v12938_v53 = vpop.f32.mrf.mxu1  ;;  %v11682_v22 = vld [vmem:[#allocation5 + $0x2ec] sm:$0xf]  ;;  %v11687_v34 = vld [vmem:[#allocation5 + $0x310] sm:$0xf0] }
 0x224   : > { %9800 = vmatmul.msk.bf16.gmra.mxu3 %vm3154_vm3, %v3361_v23  ;;  %v9250_v23 = vor.u32 %v11684_v1, %v9249_v49 }
 0x227   : > { %v3279_v4 = vpop.f32.mrf.mxu3 }
 0x228   : > { %v12917_v63 = vadd.f32 %v3279_v4, %v12809_v41  ;;  %v12924_v15 = vpop.f32.mrf.mxu0  ;;  %v2916_v41 = vadd.f32 %v12858_v16, %v2587_v14  ;;  %v12940_v54 = vpop.f32.mrf.mxu2  ;;  %v2597_v4 = vadd.f32 %v12912_v39, %v12910_v24 }
 0x229   : > { %v2600_v19 = vadd.f32 %v12928_v44, %v12924_v15 }
 0x22a   : > { %v3362_v6 = vpack.c.bf16 %v2916_v41, %v2914_v33  ;;  %v12954_v9 = vpop.f32.mrf.mxu1 }
 0x22b   : > { %2309 = vmatmul.bf16.gmra.mxu0 %v9218_v46  ;;  %v2929_v45 = vadd.f32 %v12930_v11, %v2600_v19  ;;  %v11691_v19 = vld [vmem:[#allocation5 + $0x334] sm:$0xf] }
 0x22f   : > { %v3281_v51 = vpop.f32.mrf.mxu3 }
 0x230   : > { %v12933_v27 = vadd.f32 %v3281_v51, %v12825_v36  ;;  %v12936_v52 = vpop.f32.mrf.mxu0  ;;  %v2590_v36 = vadd.f32 %v12872_v48, %v12868_v42  ;;  %v12956_v42 = vpop.f32.mrf.mxu2  ;;  %v9234_v48 = vor.u32 %v11679_v47, %v9231_v61  ;;  %9746 = vmatmul.msk.bf16.gmra.mxu2 %vm1959_vm1, %v9250_v23  ;;  %v9261_v51 = vld [vmem:[#allocation5 + $0x308] sm:$0xf] }
 0x231   : > { %v2602_v32 = vadd.f32 %v12938_v53, %v12936_v52 }
 0x232   : > { %v2919_v58 = vadd.f32 %v12874_v10, %v2590_v36  ;;  %2643 = vmatmul.bf16.gmra.mxu1 %v9234_v48  ;;  %v12964_v10 = vpop.f32.mrf.mxu1  ;;  %v11686_v36 = vld [vmem:[#allocation5 + $0x308] sm:$0xf0] }
 0x233   : > { %v2931_v35 = vadd.f32 %v12940_v54, %v2602_v32 }
 0x234   : > { %9801 = vmatmul.msk.bf16.gmra.mxu3 %vm3154_vm3, %v3362_v6 }
 0x237   : > { %v3284_v16 = vpop.f32.mrf.mxu3 }
 0x238   : > { %v12943_v38 = vadd.f32 %v3284_v16, %v12835_v50  ;;  %v12950_v40 = vpop.f32.mrf.mxu0  ;;  %v2921_v50 = vadd.f32 %v12884_v56, %v2592_v59  ;;  %v12966_v0 = vpop.f32.mrf.mxu2  ;;  %v9262_v16 = vor.u32 %v11687_v34, %v9261_v51  ;;  %v11685_v59 = vld [vmem:[#allocation5 + $0x304] sm:$0xf] }
 0x23a   : > { %v3363_v7 = vpack.c.bf16 %v2921_v50, %v2919_v58  ;;  %v12980_v43 = vpop.f32.mrf.mxu1  ;;  %v9254_v58 = vor.u32 %v11686_v36, %v9253_v5  ;;  %v9255_v50 = vld [vmem:[#allocation5 + $0x30c] sm:$0xf0] }
 0x23b   : > { %2314 = vmatmul.bf16.gmra.mxu0 %v9230_v20  ;;  %v9258_v52 = vor.u32 %v11685_v59, %v9255_v50  ;;  %v3419_v20 = vpack.c.bf16 %v2931_v35, %v2929_v45  ;;  %v9279_v59 = vld [vmem:[#allocation5 + $0x33c] sm:$0xf0] }
 0x23f   : > { %v3286_v12 = vpop.f32.mrf.mxu3 }
 0x240   : > { %v12959_v3 = vadd.f32 %v3286_v12, %v12851_v62  ;;  %v12962_v21 = vpop.f32.mrf.mxu0  ;;  %v2595_v62 = vadd.f32 %v12902_v18, %v12898_v8  ;;  %v12982_v8 = vpop.f32.mrf.mxu2  ;;  %v9246_v18 = vor.u32 %v11682_v22, %v9243_v28  ;;  %9747 = vmatmul.msk.bf16.gmra.mxu2 %vm1959_vm1, %v9262_v16  ;;  %v11692_v16 = vld [vmem:[#allocation5 + $0x338] sm:$0xf0] }
 0x241   : > { %v2607_v1 = vadd.f32 %v12964_v10, %v12962_v21 }
 0x242   : > { %v2924_v14 = vadd.f32 %v12904_v55, %v2595_v62  ;;  %2648 = vmatmul.bf16.gmra.mxu1 %v9246_v18  ;;  %v12990_v55 = vpop.f32.mrf.mxu1  ;;  %v9265_v62 = vld [vmem:[#allocation5 + $0x318] sm:$0xf] }
 0x244   : > { %9802 = vmatmul.msk.bf16.gmra.mxu3 %vm3154_vm3, %v3363_v7  ;;  %v9273_v7 = vld [vmem:[#allocation5 + $0x320] sm:$0xf] }
 0x247   : > { %v3289_v56 = vpop.f32.mrf.mxu3 }
 0x248   : > { %v12969_v13 = vadd.f32 %v3289_v56, %v12861_v29  ;;  %v12976_v2 = vpop.f32.mrf.mxu0  ;;  %v2926_v29 = vadd.f32 %v12914_v26, %v2597_v4  ;;  %v12992_v46 = vpop.f32.mrf.mxu2  ;;  %v11690_v56 = vld [vmem:[#allocation5 + $0x328] sm:$0xf0]  ;;  %v11689_v4 = vld [vmem:[#allocation5 + $0x320] sm:$0xf0] }
 0x249   : > { %v9274_v49 = vor.u32 %v11690_v56, %v9273_v7  ;;  %v9289_v56 = vld [vmem:[#allocation5 + $0x348] sm:$0xf] }
 0x24a   : > { %v3418_v39 = vpack.c.bf16 %v2926_v29, %v2924_v14  ;;  %v13010_v47 = vpop.f32.mrf.mxu1  ;;  %v9266_v14 = vor.u32 %v11689_v4, %v9265_v62  ;;  %v9267_v29 = vld [vmem:[#allocation5 + $0x324] sm:$0xf0] }
 0x24b   : > { %2319 = vmatmul.bf16.gmra.mxu0 %v9242_v17 }
 0x24f   : > { %v3291_v33 = vpop.f32.mrf.mxu3 }
 0x250   : > { %v12985_v24 = vadd.f32 %v3291_v33, %v12877_v37  ;;  %v12988_v41 = vpop.f32.mrf.mxu0  ;;  %v9808_v37 = vld [vmem:[%s14193_s4 + $0x18] sm:$0xf]  ;;  %v13012_v44 = vpop.f32.mrf.mxu2  ;;  %9748 = vmatmul.msk.bf16.gmra.mxu2 %vm1959_vm1, %v9274_v49  ;;  %v11695_v49 = vld [vmem:[#allocation5 + $0x350] sm:$0xf0] }
 0x251   : > { %v3495_v6 = vsel %vm3167_vm2, %v9808_v37, 0  ;;  %v2612_v51 = vadd.f32 %v12990_v55, %v12988_v41  ;;  %v9290_v4 = vor.u32 %v11695_v49, %v9289_v56  ;;  %v11700_v56 = vld [vmem:[#allocation5 + $0x37c] sm:$0xf] }
 0x252   : > { %3504 = vmatpush.bf16.msra.mxu3 %v3495_v6  ;;  %2653 = vmatmul.bf16.gmra.mxu1 %v9258_v52  ;;  %v13020_v11 = vpop.f32.mrf.mxu1  ;;  %v9277_v6 = vld [vmem:[#allocation5 + $0x330] sm:$0xf]  ;;  %v11696_v52 = vld [vmem:[#allocation5 + $0x358] sm:$0xf0] }
 0x253   : > { %v9278_v36 = vor.u32 %v11692_v16, %v9277_v6 }
 0x254   : > { %9804 = vmatmul.msk.bf16.vlgmr.msrb.gmra.mxu3 %vm3154_vm3, %v3418_v39  ;;  %v9285_v39 = vld [vmem:[#allocation5 + $0x338] sm:$0xf] }
 0x257   : > { %v3332_v26 = vpop.f32.mrf.mxu3 }
 0x258   : > { %v12995_v31 = vadd.f32 %v3332_v26, %v12887_v57  ;;  %v13006_v57 = vpop.f32.mrf.mxu0  ;;  %v13022_v12 = vpop.f32.mrf.mxu2  ;;  %v11693_v26 = vld [vmem:[#allocation5 + $0x340] sm:$0xf0] }
 0x259   : > { %v9286_v37 = vor.u32 %v11693_v26, %v9285_v39 }
 0x25b   : > { %2324 = vmatmul.bf16.gmra.mxu0 %v9254_v58 }
 0x25f   : > { %v3334_v15 = vpop.f32.mrf.mxu3  ;;  %v13036_v22 = vpop.f32.mrf.mxu1 }
 0x260   : > { %v13015_v53 = vadd.f32 %v3334_v15, %v12907_v25  ;;  %v13018_v61 = vpop.f32.mrf.mxu0  ;;  %v2605_v25 = vadd.f32 %v12954_v9, %v12950_v40  ;;  %v13038_v40 = vpop.f32.mrf.mxu2  ;;  %v9270_v9 = vor.u32 %v11688_v60, %v9267_v29  ;;  %9749 = vmatmul.msk.bf16.gmra.mxu2 %vm1959_vm1, %v9286_v37  ;;  %v9297_v15 = vld [vmem:[#allocation5 + $0x350] sm:$0xf]  ;;  %v9291_v60 = vld [vmem:[#allocation5 + $0x354] sm:$0xf0]  ;;  %v9301_v37 = vld [vmem:[#allocation5 + $0x360] sm:$0xf] }
 0x262   : > { %v2934_v30 = vadd.f32 %v12956_v42, %v2605_v25  ;;  %2658 = vmatmul.bf16.gmra.mxu1 %v9270_v9  ;;  %v11694_v25 = vld [vmem:[#allocation5 + $0x34c] sm:$0xf]  ;;  %v11699_v9 = vld [vmem:[#allocation5 + $0x370] sm:$0xf0] }
 0x264   : > { %9805 = vmatmul.msk.bf16.gmra.mxu3 %vm3154_vm3, %v3419_v20  ;;  %v9298_v20 = vor.u32 %v11696_v52, %v9297_v15 }
 0x267   : > { %v3337_v54 = vpop.f32.mrf.mxu3  ;;  %v13046_v42 = vpop.f32.mrf.mxu1 }
 0x268   : > { %v13025_v48 = vadd.f32 %v3337_v54, %v12917_v63  ;;  %v13032_v23 = vpop.f32.mrf.mxu0  ;;  %v2936_v63 = vadd.f32 %v12966_v0, %v2607_v1  ;;  %v13048_v33 = vpop.f32.mrf.mxu2  ;;  %v2617_v54 = vadd.f32 %v13020_v11, %v13018_v61 }
 0x269   : > { %v2620_v39 = vadd.f32 %v13036_v22, %v13032_v23 }
 0x26a   : > { %v3420_v10 = vpack.c.bf16 %v2936_v63, %v2934_v30 }
 0x26b   : > { %2329 = vmatmul.bf16.gmra.mxu0 %v9266_v14  ;;  %v2949_v6 = vadd.f32 %v13038_v40, %v2620_v39  ;;  %v11703_v39 = vld [vmem:[#allocation5 + $0x394] sm:$0xf] }
 0x26f   : > { %v3339_v17 = vpop.f32.mrf.mxu3  ;;  %v13062_v5 = vpop.f32.mrf.mxu1 }
 0x270   : > { %v13041_v21 = vadd.f32 %v3339_v17, %v12933_v27  ;;  %v13044_v28 = vpop.f32.mrf.mxu0  ;;  %v2610_v27 = vadd.f32 %v12980_v43, %v12976_v2  ;;  %v13064_v2 = vpop.f32.mrf.mxu2  ;;  %v9282_v43 = vor.u32 %v11691_v19, %v9279_v59  ;;  %9750 = vmatmul.msk.bf16.gmra.mxu2 %vm1959_vm1, %v9298_v20  ;;  %v9309_v17 = vld [vmem:[#allocation5 + $0x368] sm:$0xf] }
 0x271   : > { %v2622_v26 = vadd.f32 %v13046_v42, %v13044_v28 }
 0x272   : > { %v2939_v32 = vadd.f32 %v12982_v8, %v2610_v27  ;;  %2663 = vmatmul.bf16.gmra.mxu1 %v9282_v43  ;;  %v11698_v27 = vld [vmem:[#allocation5 + $0x368] sm:$0xf0] }
 0x273   : > { %v2951_v16 = vadd.f32 %v13048_v33, %v2622_v26 }
 0x274   : > { %9806 = vmatmul.msk.bf16.gmra.mxu3 %vm3154_vm3, %v3420_v10 }
 0x277   : > { %v3342_v0 = vpop.f32.mrf.mxu3  ;;  %v13072_v8 = vpop.f32.mrf.mxu1 }
 0x278   : > { %v13051_v18 = vadd.f32 %v3342_v0, %v12943_v38  ;;  %v13058_v34 = vpop.f32.mrf.mxu0  ;;  %v2941_v38 = vadd.f32 %v12992_v46, %v2612_v51  ;;  %v13074_v58 = vpop.f32.mrf.mxu2  ;;  %v9310_v0 = vor.u32 %v11699_v9, %v9309_v17  ;;  %v11697_v51 = vld [vmem:[#allocation5 + $0x364] sm:$0xf] }
 0x27a   : > { %v3421_v55 = vpack.c.bf16 %v2941_v38, %v2939_v32  ;;  %v9302_v32 = vor.u32 %v11698_v27, %v9301_v37  ;;  %v9303_v38 = vld [vmem:[#allocation5 + $0x36c] sm:$0xf0] }
 0x27b   : > { %2334 = vmatmul.bf16.gmra.mxu0 %v9278_v36  ;;  %v9306_v28 = vor.u32 %v11697_v51, %v9303_v38  ;;  %v3477_v36 = vpack.c.bf16 %v2951_v16, %v2949_v6  ;;  %v9327_v51 = vld [vmem:[#allocation5 + $0x39c] sm:$0xf0] }
 0x27f   : > { %v3344_v45 = vpop.f32.mrf.mxu3  ;;  %v13088_v62 = vpop.f32.mrf.mxu1 }
 0x280   : > { %v13067_v41 = vadd.f32 %v3344_v45, %v12959_v3  ;;  %v13070_v35 = vpop.f32.mrf.mxu0  ;;  %v2615_v3 = vadd.f32 %v13010_v47, %v13006_v57  ;;  %v13090_v57 = vpop.f32.mrf.mxu2  ;;  %v9294_v47 = vor.u32 %v11694_v25, %v9291_v60  ;;  %9751 = vmatmul.msk.bf16.gmra.mxu2 %vm1959_vm1, %v9310_v0  ;;  %v11704_v0 = vld [vmem:[#allocation5 + $0x398] sm:$0xf0] }
 0x281   : > { %v2627_v52 = vadd.f32 %v13072_v8, %v13070_v35 }
 0x282   : > { %v2944_v1 = vadd.f32 %v13012_v44, %v2615_v3  ;;  %2668 = vmatmul.bf16.gmra.mxu1 %v9294_v47  ;;  %v9313_v3 = vld [vmem:[#allocation5 + $0x378] sm:$0xf] }
 0x284   : > { %9807 = vmatmul.msk.bf16.gmra.mxu3 %vm3154_vm3, %v3421_v55  ;;  %v9321_v55 = vld [vmem:[#allocation5 + $0x380] sm:$0xf] }
 0x287   : > { %v3347_v46 = vpop.f32.mrf.mxu3  ;;  %v13098_v44 = vpop.f32.mrf.mxu1 }
 0x288   : > { %v13077_v50 = vadd.f32 %v3347_v46, %v12969_v13  ;;  %v13084_v7 = vpop.f32.mrf.mxu0  ;;  %v2946_v13 = vadd.f32 %v13022_v12, %v2617_v54  ;;  %v13100_v14 = vpop.f32.mrf.mxu2  ;;  %v11702_v46 = vld [vmem:[#allocation5 + $0x388] sm:$0xf0]  ;;  %v11701_v54 = vld [vmem:[#allocation5 + $0x380] sm:$0xf0] }
 0x289   : > { %v9322_v15 = vor.u32 %v11702_v46, %v9321_v55  ;;  %v9337_v46 = vld [vmem:[#allocation5 + $0x3a8] sm:$0xf] }
 0x28a   : > { %v3476_v11 = vpack.c.bf16 %v2946_v13, %v2944_v1  ;;  %v9314_v1 = vor.u32 %v11701_v54, %v9313_v3  ;;  %v9315_v13 = vld [vmem:[#allocation5 + $0x384] sm:$0xf0] }
 0x28b   : > { %2339 = vmatmul.bf16.gmra.mxu0 %v9290_v4 }
 0x28f   : > { %v3349_v30 = vpop.f32.mrf.mxu3  ;;  %v13118_v19 = vpop.f32.mrf.mxu1 }
 0x290   : > { %v13093_v61 = vadd.f32 %v3349_v30, %v12985_v24  ;;  %v13096_v63 = vpop.f32.mrf.mxu0  ;;  %v9813_v24 = vld [vmem:[%s14193_s4 + $0x1c] sm:$0xf]  ;;  %v13120_v22 = vpop.f32.mrf.mxu2  ;;  %9752 = vmatmul.msk.bf16.gmra.mxu2 %vm1959_vm1, %v9322_v15  ;;  %v11707_v15 = vld [vmem:[#allocation5 + $0x3b0] sm:$0xf0] }
 0x291   : > { %v3553_v10 = vsel %vm3167_vm2, %v9813_v24, 0  ;;  %v2632_v17 = vadd.f32 %v13098_v44, %v13096_v63  ;;  %v9338_v54 = vor.u32 %v11707_v15, %v9337_v46  ;;  %v11712_v46 = vld [vmem:[#allocation5 + $0x3dc] sm:$0xf] }
 0x292   : > { %3562 = vmatpush.bf16.msrb.mxu3 %v3553_v10  ;;  %2673 = vmatmul.bf16.gmra.mxu1 %v9306_v28  ;;  %v9325_v10 = vld [vmem:[#allocation5 + $0x390] sm:$0xf]  ;;  %v11708_v28 = vld [vmem:[#allocation5 + $0x3b8] sm:$0xf0] }
 0x293   : > { %v9326_v27 = vor.u32 %v11704_v0, %v9325_v10 }
 0x294   : > { %9809 = vmatmul.msk.bf16.vlgmr.msra.gmra.mxu3 %vm3154_vm3, %v3476_v11  ;;  %v9333_v11 = vld [vmem:[#allocation5 + $0x398] sm:$0xf] }
 0x297   : > { %v3390_v12 = vpop.f32.mrf.mxu3  ;;  %v13128_v40 = vpop.f32.mrf.mxu1 }
 0x298   : > { %v13103_v29 = vadd.f32 %v3390_v12, %v12995_v31  ;;  %v13114_v31 = vpop.f32.mrf.mxu0  ;;  %v13130_v45 = vpop.f32.mrf.mxu2  ;;  %v11705_v12 = vld [vmem:[#allocation5 + $0x3a0] sm:$0xf0] }
 0x299   : > { %v9334_v24 = vor.u32 %v11705_v12, %v9333_v11 }
 0x29b   : > { %2344 = vmatmul.bf16.gmra.mxu0 %v9302_v32 }
 0x29f   : > { %v3392_v23 = vpop.f32.mrf.mxu3  ;;  %v13144_v25 = vpop.f32.mrf.mxu1 }
 0x2a0   : > { %v13123_v42 = vadd.f32 %v3392_v23, %v13015_v53  ;;  %v13126_v59 = vpop.f32.mrf.mxu0  ;;  %v2625_v53 = vadd.f32 %v13062_v5, %v13058_v34  ;;  %v13146_v34 = vpop.f32.mrf.mxu2  ;;  %v9318_v5 = vor.u32 %v11700_v56, %v9315_v13  ;;  %9753 = vmatmul.msk.bf16.gmra.mxu2 %vm1959_vm1, %v9334_v24  ;;  %v9345_v23 = vld [vmem:[#allocation5 + $0x3b0] sm:$0xf]  ;;  %v9339_v56 = vld [vmem:[#allocation5 + $0x3b4] sm:$0xf0]  ;;  %v9349_v24 = vld [vmem:[#allocation5 + $0x3c0] sm:$0xf] }
 0x2a2   : > { %v2954_v49 = vadd.f32 %v13064_v2, %v2625_v53  ;;  %2678 = vmatmul.bf16.gmra.mxu1 %v9318_v5  ;;  %v11706_v53 = vld [vmem:[#allocation5 + $0x3ac] sm:$0xf]  ;;  %v11711_v5 = vld [vmem:[#allocation5 + $0x3d0] sm:$0xf0] }
 0x2a4   : > { %9810 = vmatmul.msk.bf16.gmra.mxu3 %vm3154_vm3, %v3477_v36  ;;  %v9346_v36 = vor.u32 %v11708_v28, %v9345_v23 }
 0x2a7   : > { %v3395_v33 = vpop.f32.mrf.mxu3  ;;  %v13154_v2 = vpop.f32.mrf.mxu1 }
 0x2a8   : > { %v13133_v43 = vadd.f32 %v3395_v33, %v13025_v48  ;;  %v13140_v20 = vpop.f32.mrf.mxu0  ;;  %v2956_v48 = vadd.f32 %v13074_v58, %v2627_v52  ;;  %v13156_v30 = vpop.f32.mrf.mxu2  ;;  %v2637_v33 = vadd.f32 %v13128_v40, %v13126_v59 }
 0x2a9   : > { %v2640_v11 = vadd.f32 %v13144_v25, %v13140_v20 }
 0x2aa   : > { %v3478_v8 = vpack.c.bf16 %v2956_v48, %v2954_v49 }
 0x2ab   : > { %2349 = vmatmul.bf16.gmra.mxu0 %v9314_v1  ;;  %v2969_v10 = vadd.f32 %v13146_v34, %v2640_v11  ;;  %v11716_v11 = vld [vmem:[#allocation5 + $0x3f8] sm:$0xf0] }
 0x2af   : > { %v3397_v4 = vpop.f32.mrf.mxu3  ;;  %v13170_v37 = vpop.f32.mrf.mxu1 }
 0x2b0   : > { %v13149_v35 = vadd.f32 %v3397_v4, %v13041_v21  ;;  %v13152_v60 = vpop.f32.mrf.mxu0  ;;  %v2630_v21 = vadd.f32 %v13088_v62, %v13084_v7  ;;  %v13172_v7 = vpop.f32.mrf.mxu2  ;;  %v9330_v62 = vor.u32 %v11703_v39, %v9327_v51  ;;  %9754 = vmatmul.msk.bf16.gmra.mxu2 %vm1959_vm1, %v9346_v36  ;;  %v9357_v4 = vld [vmem:[#allocation5 + $0x3c8] sm:$0xf] }
 0x2b1   : > { %v2642_v12 = vadd.f32 %v13154_v2, %v13152_v60 }
 0x2b2   : > { %v2959_v26 = vadd.f32 %v13090_v57, %v2630_v21  ;;  %2683 = vmatmul.bf16.gmra.mxu1 %v9330_v62  ;;  %v11710_v21 = vld [vmem:[#allocation5 + $0x3c8] sm:$0xf0] }
 0x2b3   : > { %v2971_v0 = vadd.f32 %v13156_v30, %v2642_v12  ;;  %v11715_v12 = vld [vmem:[#allocation5 + $0x3f4] sm:$0xf] }
 0x2b4   : > { %9811 = vmatmul.msk.bf16.gmra.mxu3 %vm3154_vm3, %v3478_v8 }
 0x2b7   : > { %v3400_v58 = vpop.f32.mrf.mxu3  ;;  %v13180_v57 = vpop.f32.mrf.mxu1 }
 0x2b8   : > { %v13159_v47 = vadd.f32 %v3400_v58, %v13051_v18  ;;  %v13166_v9 = vpop.f32.mrf.mxu0  ;;  %v2961_v18 = vadd.f32 %v13100_v14, %v2632_v17  ;;  %v13182_v32 = vpop.f32.mrf.mxu2  ;;  %v9358_v58 = vor.u32 %v11711_v5, %v9357_v4  ;;  %v11709_v17 = vld [vmem:[#allocation5 + $0x3c4] sm:$0xf] }
 0x2ba   : > { %v3479_v44 = vpack.c.bf16 %v2961_v18, %v2959_v26  ;;  %v9350_v26 = vor.u32 %v11710_v21, %v9349_v24  ;;  %v9351_v18 = vld [vmem:[#allocation5 + $0x3cc] sm:$0xf0] }
 0x2bb   : > { %2354 = vmatmul.bf16.gmra.mxu0 %v9326_v27  ;;  %v9354_v60 = vor.u32 %v11709_v17, %v9351_v18  ;;  %v3535_v27 = vpack.c.bf16 %v2971_v0, %v2969_v10  ;;  %v9375_v10 = vld [vmem:[#allocation5 + $0x3fc] sm:$0xf0] }
 0x2bf   : > { %v3402_v6 = vpop.f32.mrf.mxu3  ;;  %v13196_v3 = vpop.f32.mrf.mxu1 }
 0x2c0   : > { %v13175_v63 = vadd.f32 %v3402_v6, %v13067_v41  ;;  %v13178_v16 = vpop.f32.mrf.mxu0  ;;  %v2635_v41 = vadd.f32 %v13118_v19, %v13114_v31  ;;  %v13198_v31 = vpop.f32.mrf.mxu2  ;;  %v9342_v19 = vor.u32 %v11706_v53, %v9339_v56  ;;  %9755 = vmatmul.msk.bf16.gmra.mxu2 %vm1959_vm1, %v9358_v58  ;;  %v11818_v56 = vld [vmem:[#allocation7 + $0x78] sm:$0xff]  ;;  %v9373_v58 = vld [vmem:[#allocation5 + $0x3f0] sm:$0xf] }
 0x2c1   : > { %v2647_v28 = vadd.f32 %v13180_v57, %v13178_v16  ;;  %4629 = vmatpush.bf16.msrb.mxu2 %v11818_v56  ;;  %v9374_v17 = vor.u32 %v11716_v11, %v9373_v58  ;;  %v9405_v56 = vld [vmem:[#allocation5 + $0x428] sm:$0xf]  ;;  %v11722_v58 = vld [vmem:[#allocation5 + $0x428] sm:$0xf0]  ;;  %v11721_v11 = vld [vmem:[#allocation5 + $0x424] sm:$0xf] }
 0x2c2   : > { %v2964_v52 = vadd.f32 %v13120_v22, %v2635_v41  ;;  %2688 = vmatmul.bf16.gmra.mxu1 %v9342_v19  ;;  %v9361_v41 = vld [vmem:[#allocation5 + $0x3d8] sm:$0xf] }
 0x2c4   : > { %9812 = vmatmul.msk.bf16.gmra.mxu3 %vm3154_vm3, %v3479_v44  ;;  %v9369_v44 = vld [vmem:[#allocation5 + $0x3e0] sm:$0xf] }
 0x2c7   : > { %v3405_v14 = vpop.f32.mrf.mxu3  ;;  %v13206_v22 = vpop.f32.mrf.mxu1 }
 0x2c8   : > { %v13185_v38 = vadd.f32 %v3405_v14, %v13077_v50  ;;  %v13192_v55 = vpop.f32.mrf.mxu0  ;;  %v2966_v50 = vadd.f32 %v13130_v45, %v2637_v33  ;;  %v13208_v1 = vpop.f32.mrf.mxu2  ;;  %v11714_v14 = vld [vmem:[#allocation5 + $0x3e8] sm:$0xf0]  ;;  %v11713_v33 = vld [vmem:[#allocation5 + $0x3e0] sm:$0xf0] }
 0x2c9   : > { %v9370_v23 = vor.u32 %v11714_v14, %v9369_v44  ;;  %v2650_v4 = vadd.f32 %v13196_v3, %v13192_v55  ;;  %v9378_v3 = vor.u32 %v11715_v12, %v9375_v10  ;;  %v9399_v10 = vld [vmem:[#allocation5 + $0x42c] sm:$0xf0] }
 0x2ca   : > { %v3534_v40 = vpack.c.bf16 %v2966_v50, %v2964_v52  ;;  %v9362_v52 = vor.u32 %v11713_v33, %v9361_v41  ;;  %v9363_v50 = vld [vmem:[#allocation5 + $0x3e4] sm:$0xf0]  ;;  %v11719_v41 = vld [vmem:[#allocation5 + $0x410] sm:$0xf0]  ;;  %v11718_v33 = vld [vmem:[#allocation5 + $0x40c] sm:$0xf] }
 0x2cb   : > { %2359 = vmatmul.bf16.gmra.mxu0 %v9338_v54  ;;  %v2979_v24 = vadd.f32 %v13198_v31, %v2650_v4 }
 0x2cf   : > { %v3407_v49 = vpop.f32.mrf.mxu3  ;;  %v13226_v39 = vpop.f32.mrf.mxu1 }
 0x2d0   : > { %v13201_v59 = vadd.f32 %v3407_v49, %v13093_v61  ;;  %v13204_v48 = vpop.f32.mrf.mxu0  ;;  %v9818_v61 = vld [vmem:[%s14193_s4 + $0x20] sm:$0xf]  ;;  %v13228_v25 = vpop.f32.mrf.mxu2  ;;  %9756 = vmatmul.msk.bf16.gmra.mxu2 %vm1959_vm1, %v9370_v23 }
 0x2d1   : > { %v3611_v8 = vsel %vm3167_vm2, %v9818_v61, 0  ;;  %v2652_v5 = vadd.f32 %v13206_v22, %v13204_v48 }
 0x2d2   : > { %3620 = vmatpush.bf16.msra.mxu3 %v3611_v8  ;;  %2693 = vmatmul.bf16.gmra.mxu1 %v9354_v60 }
 0x2d4   : > { %9814 = vmatmul.msk.bf16.vlgmr.msrb.gmra.mxu3 %vm3154_vm3, %v3534_v40 }
 0x2d7   : > { %v3448_v45 = vpop.f32.mrf.mxu3  ;;  %v13236_v34 = vpop.f32.mrf.mxu1 }
 0x2d8   : > { %v13211_v13 = vadd.f32 %v3448_v45, %v13103_v29  ;;  %v13222_v29 = vpop.f32.mrf.mxu0  ;;  %v13238_v6 = vpop.f32.mrf.mxu2  ;;  %v9381_v45 = vld [vmem:[#allocation5 + $0x3f8] sm:$0xf] }
 0x2d9   : > { %v2655_v14 = vadd.f32 %v13226_v39, %v13222_v29 }
 0x2db   : > { %2364 = vmatmul.bf16.gmra.mxu0 %v9350_v26  ;;  %v11810_v26 = vld [vmem:[#allocation7 + $0x38] sm:$0xff] }
 0x2dc   : > { %4691 = vmatpush.bf16.msrb.mxu0 %v11810_v26 }
 0x2df   : > { %v3450_v20 = vpop.f32.mrf.mxu3  ;;  %v13252_v53 = vpop.f32.mrf.mxu1 }
 0x2e0   : > { %v13231_v2 = vadd.f32 %v3450_v20, %v13123_v42  ;;  %v13234_v51 = vpop.f32.mrf.mxu0  ;;  %v2645_v42 = vadd.f32 %v13170_v37, %v13166_v9  ;;  %v13254_v9 = vpop.f32.mrf.mxu2  ;;  %v9366_v37 = vor.u32 %v11712_v46, %v9363_v50 }
 0x2e1   : > { %v2657_v23 = vadd.f32 %v13236_v34, %v13234_v51 }
 0x2e2   : > { %v2974_v15 = vadd.f32 %v13172_v7, %v2645_v42  ;;  %2698 = vmatmul.bf16.gmra.mxu1 %v9366_v37 }
 0x2e3   : > { %v2986_v46 = vadd.f32 %v13238_v6, %v2657_v23  ;;  %v11725_v23 = vld [vmem:[#allocation5 + $0x440] sm:$0xf0] }
 0x2e4   : > { %9815 = vmatmul.msk.bf16.gmra.mxu3 %vm3154_vm3, %v3535_v27  ;;  %v11826_v27 = vld [vmem:[#allocation7 + $0xb8] sm:$0xff] }
 0x2e5   : > { %4771 = vmatpush.bf16.msrb.mxu1 %v11826_v27  ;;  %v11726_v27 = vld [vmem:[#allocation5 + $0x448] sm:$0xf0] }
 0x2e7   : > { %v3453_v30 = vpop.f32.mrf.mxu3 }
 0x2e8   : > { %v13241_v62 = vadd.f32 %v3453_v30, %v13133_v43  ;;  %v13248_v36 = vpop.f32.mrf.mxu0  ;;  %v2976_v43 = vadd.f32 %v13182_v32, %v2647_v28  ;;  %v13262_v32 = vpop.f32.mrf.mxu1  ;;  %v11720_v30 = vld [vmem:[#allocation5 + $0x418] sm:$0xf0]  ;;  %v9385_v28 = vld [vmem:[#allocation5 + $0x408] sm:$0xf] }
 0x2e9   : > { %v13264_v19 = vpop.f32.mrf.mxu2 }
 0x2ea   : > { %v3536_v57 = vpack.c.bf16 %v2976_v43, %v2974_v15  ;;  %v9386_v43 = vor.u32 %v11719_v41, %v9385_v28  ;;  %v11724_v28 = vld [vmem:[#allocation5 + $0x43c] sm:$0xf] }
 0x2eb   : > { %2369 = vmatmul.bf16.gmra.mxu0 %v9362_v52  ;;  %v9387_v52 = vld [vmem:[#allocation5 + $0x414] sm:$0xf0] }
 0x2ec   : > { %v9390_v51 = vor.u32 %v11718_v33, %v9387_v52 }
 0x2ef   : > { %v3455_v54 = vpop.f32.mrf.mxu3 }
 0x2f0   : > { %v13257_v16 = vadd.f32 %v3455_v54, %v13149_v35  ;;  %v13260_v7 = vpop.f32.mrf.mxu0  ;;  %v11717_v35 = vld [vmem:[#allocation5 + $0x400] sm:$0xf0]  ;;  %v13278_v21 = vpop.f32.mrf.mxu1 }
 0x2f1   : > { %v9382_v61 = vor.u32 %v11717_v35, %v9381_v45  ;;  %v13280_v55 = vpop.f32.mrf.mxu2  ;;  %v2662_v4 = vadd.f32 %v13262_v32, %v13260_v7  ;;  %v9402_v7 = vor.u32 %v11721_v11, %v9399_v10  ;;  %v9423_v11 = vld [vmem:[#allocation5 + $0x45c] sm:$0xf0] }
 0x2f2   : > { %2703 = vmatmul.bf16.gmra.mxu1 %v9378_v3 }
 0x2f3   : > { %9757 = vmatmul.msk.bf16.gmra.mxu2 %vm1959_vm1, %v9382_v61  ;;  %v2660_v61 = vadd.f32 %v13252_v53, %v13248_v36 }
 0x2f4   : > { %9816 = vmatmul.msk.bf16.gmra.mxu3 %vm3154_vm3, %v3536_v57 }
 0x2f5   : > { %v2989_v12 = vadd.f32 %v13254_v9, %v2660_v61  ;;  %v11727_v61 = vld [vmem:[#allocation5 + $0x454] sm:$0xf] }
 0x2f7   : > { %v3458_v49 = vpop.f32.mrf.mxu3 }
 0x2f8   : > { %v13267_v40 = vadd.f32 %v3458_v49, %v13159_v47  ;;  %v13274_v8 = vpop.f32.mrf.mxu0  ;;  %v2981_v47 = vadd.f32 %v13208_v1, %v2652_v5  ;;  %v13288_v1 = vpop.f32.mrf.mxu1  ;;  %v11723_v49 = vld [vmem:[#allocation5 + $0x430] sm:$0xf0]  ;;  %v9397_v5 = vld [vmem:[#allocation5 + $0x420] sm:$0xf] }
 0x2f9   : > { %v13290_v20 = vpop.f32.mrf.mxu2  ;;  %v9406_v35 = vor.u32 %v11723_v49, %v9405_v56 }
 0x2fa   : > { %v3537_v22 = vpack.c.bf16 %v2981_v47, %v2979_v24  ;;  %v2991_v24 = vadd.f32 %v13264_v19, %v2662_v4 }
 0x2fb   : > { %2374 = vmatmul.bf16.gmra.mxu0 %v9374_v17  ;;  %v9398_v17 = vor.u32 %v11722_v58, %v9397_v5 }
 0x2ff   : > { %v3460_v0 = vpop.f32.mrf.mxu3 }
 0x300   : > { %v13283_v48 = vadd.f32 %v3460_v0, %v13175_v63  ;;  %v13286_v31 = vpop.f32.mrf.mxu0  ;;  %v9393_v63 = vld [vmem:[#allocation5 + $0x410] sm:$0xf]  ;;  %v13304_v15 = vpop.f32.mrf.mxu1  ;;  %v3593_v0 = vpack.c.bf16 %v2991_v24, %v2989_v12 }
 0x301   : > { %v9394_v44 = vor.u32 %v11720_v30, %v9393_v63  ;;  %v13306_v39 = vpop.f32.mrf.mxu2  ;;  %v2667_v30 = vadd.f32 %v13288_v1, %v13286_v31 }
 0x302   : > { %2708 = vmatmul.bf16.gmra.mxu1 %v9390_v51 }
 0x303   : > { %9758 = vmatmul.msk.bf16.gmra.mxu2 %vm1959_vm1, %v9394_v44 }
 0x304   : > { %9817 = vmatmul.msk.bf16.gmra.mxu3 %vm3154_vm3, %v3537_v22 }
 0x307   : > { %v3463_v18 = vpop.f32.mrf.mxu3 }
 0x308   : > { %v13293_v60 = vadd.f32 %v3463_v18, %v13185_v38  ;;  %v13300_v42 = vpop.f32.mrf.mxu0  ;;  %v2984_v38 = vadd.f32 %v13228_v25, %v2655_v14  ;;  %v13314_v25 = vpop.f32.mrf.mxu1  ;;  %v9417_v18 = vld [vmem:[#allocation5 + $0x440] sm:$0xf]  ;;  %v9409_v14 = vld [vmem:[#allocation5 + $0x438] sm:$0xf] }
 0x309   : > { %v13316_v37 = vpop.f32.mrf.mxu2  ;;  %v9418_v63 = vor.u32 %v11726_v27, %v9417_v18  ;;  %v9433_v27 = vld [vmem:[#allocation5 + $0x468] sm:$0xf] }
 0x30a   : > { %v3592_v50 = vpack.c.bf16 %v2986_v46, %v2984_v38  ;;  %v9410_v38 = vor.u32 %v11725_v23, %v9409_v14  ;;  %v9411_v46 = vld [vmem:[#allocation5 + $0x444] sm:$0xf0] }
 0x30b   : > { %2379 = vmatmul.bf16.gmra.mxu0 %v9386_v43 }
 0x30f   : > { %v3465_v29 = vpop.f32.mrf.mxu3 }
 0x310   : > { %v13309_v34 = vadd.f32 %v3465_v29, %v13201_v59  ;;  %v13312_v54 = vpop.f32.mrf.mxu0  ;;  %v9823_v59 = vld [vmem:[%s14193_s4 + $0x24] sm:$0xf]  ;;  %v13334_v47 = vpop.f32.mrf.mxu1 }
 0x311   : > { %v3669_v45 = vsel %vm3167_vm2, %v9823_v59, 0  ;;  %v13336_v53 = vpop.f32.mrf.mxu2  ;;  %v2672_v56 = vadd.f32 %v13314_v25, %v13312_v54 }
 0x312   : > { %3678 = vmatpush.bf16.msrb.mxu3 %v3669_v45  ;;  %2713 = vmatmul.bf16.gmra.mxu1 %v9402_v7  ;;  %v9421_v45 = vld [vmem:[#allocation5 + $0x450] sm:$0xf]  ;;  %v11732_v7 = vld [vmem:[#allocation5 + $0x478] sm:$0xf0] }
 0x313   : > { %9759 = vmatmul.msk.bf16.gmra.mxu2 %vm1959_vm1, %v9406_v35  ;;  %v11728_v35 = vld [vmem:[#allocation5 + $0x458] sm:$0xf0] }
 0x314   : > { %9819 = vmatmul.msk.bf16.vlgmr.msra.gmra.mxu3 %vm3154_vm3, %v3592_v50  ;;  %v9429_v50 = vld [vmem:[#allocation5 + $0x458] sm:$0xf]  ;;  %v9422_v58 = vor.u32 %v11728_v35, %v9421_v45 }
 0x317   : > { %v3506_v6 = vpop.f32.mrf.mxu3 }
 0x318   : > { %v13319_v57 = vadd.f32 %v3506_v6, %v13211_v13  ;;  %v13330_v13 = vpop.f32.mrf.mxu0  ;;  %v13344_v9 = vpop.f32.mrf.mxu1  ;;  %v11729_v6 = vld [vmem:[#allocation5 + $0x460] sm:$0xf0] }
 0x319   : > { %v13346_v22 = vpop.f32.mrf.mxu2  ;;  %v9430_v59 = vor.u32 %v11729_v6, %v9429_v50 }
 0x31b   : > { %2384 = vmatmul.bf16.gmra.mxu0 %v9398_v17 }
 0x31f   : > { %v3508_v36 = vpop.f32.mrf.mxu3 }
 0x320   : > { %v13339_v32 = vadd.f32 %v3508_v36, %v13231_v2  ;;  %v13342_v3 = vpop.f32.mrf.mxu0  ;;  %v2665_v2 = vadd.f32 %v13278_v21, %v13274_v8  ;;  %v13360_v33 = vpop.f32.mrf.mxu1  ;;  %v9414_v21 = vor.u32 %v11724_v28, %v9411_v46  ;;  %v9441_v36 = vld [vmem:[#allocation5 + $0x470] sm:$0xf]  ;;  %v9435_v28 = vld [vmem:[#allocation5 + $0x474] sm:$0xf0] }
 0x321   : > { %v13362_v8 = vpop.f32.mrf.mxu2 }
 0x322   : > { %v2994_v41 = vadd.f32 %v13280_v55, %v2665_v2  ;;  %2718 = vmatmul.bf16.gmra.mxu1 %v9414_v21  ;;  %v11730_v2 = vld [vmem:[#allocation5 + $0x46c] sm:$0xf]  ;;  %v11735_v21 = vld [vmem:[#allocation5 + $0x490] sm:$0xf0] }
 0x323   : > { %9760 = vmatmul.msk.bf16.gmra.mxu2 %vm1959_vm1, %v9418_v63  ;;  %v11731_v63 = vld [vmem:[#allocation5 + $0x470] sm:$0xf0] }
 0x324   : > { %9820 = vmatmul.msk.bf16.gmra.mxu3 %vm3154_vm3, %v3593_v0  ;;  %v9442_v0 = vor.u32 %v11732_v7, %v9441_v36  ;;  %v9434_v23 = vor.u32 %v11731_v63, %v9433_v27  ;;  %v11736_v27 = vld [vmem:[#allocation5 + $0x49c] sm:$0xf] }
 0x327   : > { %v3511_v19 = vpop.f32.mrf.mxu3 }
 0x328   : > { %v13349_v26 = vadd.f32 %v3511_v19, %v13241_v62  ;;  %v13356_v44 = vpop.f32.mrf.mxu0  ;;  %v2996_v62 = vadd.f32 %v13290_v20, %v2667_v30  ;;  %v13370_v55 = vpop.f32.mrf.mxu1  ;;  %v2677_v19 = vadd.f32 %v13344_v9, %v13342_v3 }
 0x329   : > { %v13372_v29 = vpop.f32.mrf.mxu2  ;;  %v2680_v50 = vadd.f32 %v13360_v33, %v13356_v44 }
 0x32a   : > { %v3594_v1 = vpack.c.bf16 %v2996_v62, %v2994_v41 }
 0x32b   : > { %2389 = vmatmul.bf16.gmra.mxu0 %v9410_v38  ;;  %v3009_v45 = vadd.f32 %v13362_v8, %v2680_v50  ;;  %v11740_v50 = vld [vmem:[#allocation5 + $0x4b8] sm:$0xf0] }
 0x32f   : > { %v3513_v43 = vpop.f32.mrf.mxu3 }
 0x330   : > { %v13365_v31 = vadd.f32 %v3513_v43, %v13257_v16  ;;  %v13368_v52 = vpop.f32.mrf.mxu0  ;;  %v2670_v16 = vadd.f32 %v13304_v15, %v13300_v42  ;;  %v13386_v5 = vpop.f32.mrf.mxu1  ;;  %v9426_v15 = vor.u32 %v11727_v61, %v9423_v11  ;;  %v9453_v43 = vld [vmem:[#allocation5 + $0x488] sm:$0xf] }
 0x331   : > { %v13388_v42 = vpop.f32.mrf.mxu2  ;;  %v2682_v6 = vadd.f32 %v13370_v55, %v13368_v52 }
 0x332   : > { %v2999_v4 = vadd.f32 %v13306_v39, %v2670_v16  ;;  %2723 = vmatmul.bf16.gmra.mxu1 %v9426_v15  ;;  %v11734_v16 = vld [vmem:[#allocation5 + $0x488] sm:$0xf0] }
 0x333   : > { %9761 = vmatmul.msk.bf16.gmra.mxu2 %vm1959_vm1, %v9430_v59  ;;  %v9445_v59 = vld [vmem:[#allocation5 + $0x480] sm:$0xf]  ;;  %v3011_v35 = vadd.f32 %v13372_v29, %v2682_v6  ;;  %v11739_v6 = vld [vmem:[#allocation5 + $0x4b4] sm:$0xf] }
 0x334   : > { %9821 = vmatmul.msk.bf16.gmra.mxu3 %vm3154_vm3, %v3594_v1 }
 0x337   : > { %v3516_v20 = vpop.f32.mrf.mxu3 }
 0x338   : > { %v13375_v51 = vadd.f32 %v3516_v20, %v13267_v40  ;;  %v13382_v49 = vpop.f32.mrf.mxu0  ;;  %v3001_v40 = vadd.f32 %v13316_v37, %v2672_v56  ;;  %v13396_v39 = vpop.f32.mrf.mxu1  ;;  %v9454_v20 = vor.u32 %v11735_v21, %v9453_v43  ;;  %v11733_v56 = vld [vmem:[#allocation5 + $0x484] sm:$0xf] }
 0x339   : > { %v13398_v17 = vpop.f32.mrf.mxu2 }
 0x33a   : > { %v3595_v25 = vpack.c.bf16 %v3001_v40, %v2999_v4  ;;  %v9446_v4 = vor.u32 %v11734_v16, %v9445_v59  ;;  %v9447_v40 = vld [vmem:[#allocation5 + $0x48c] sm:$0xf0] }
 0x33b   : > { %2394 = vmatmul.bf16.gmra.mxu0 %v9422_v58  ;;  %v9450_v52 = vor.u32 %v11733_v56, %v9447_v40  ;;  %v3651_v58 = vpack.c.bf16 %v3011_v35, %v3009_v45  ;;  %v9471_v45 = vld [vmem:[#allocation5 + $0x4bc] sm:$0xf0] }
 0x33f   : > { %v3518_v12 = vpop.f32.mrf.mxu3 }
 0x340   : > { %v13391_v54 = vadd.f32 %v3518_v12, %v13283_v48  ;;  %v13394_v24 = vpop.f32.mrf.mxu0  ;;  %v2675_v48 = vadd.f32 %v13334_v47, %v13330_v13  ;;  %v13412_v14 = vpop.f32.mrf.mxu1  ;;  %v9438_v47 = vor.u32 %v11730_v2, %v9435_v28  ;;  %v11817_v28 = vld [vmem:[#allocation7 + $0x70] sm:$0xff] }
 0x341   : > { %v13414_v13 = vpop.f32.mrf.mxu2  ;;  %v2687_v7 = vadd.f32 %v13396_v39, %v13394_v24  ;;  %4630 = vmatpush.bf16.msrb.mxu2 %v11817_v28  ;;  %v9501_v28 = vld [vmem:[#allocation5 + $0x4e8] sm:$0xf] }
 0x342   : > { %v3004_v30 = vadd.f32 %v13336_v53, %v2675_v48  ;;  %2728 = vmatmul.bf16.gmra.mxu1 %v9438_v47  ;;  %v9457_v48 = vld [vmem:[#allocation5 + $0x498] sm:$0xf] }
 0x343   : > { %9762 = vmatmul.msk.bf16.gmra.mxu2 %vm1959_vm1, %v9442_v0 }
 0x344   : > { %9822 = vmatmul.msk.bf16.gmra.mxu3 %vm3154_vm3, %v3595_v25  ;;  %v9465_v25 = vld [vmem:[#allocation5 + $0x4a0] sm:$0xf] }
 0x347   : > { %v3521_v37 = vpop.f32.mrf.mxu3 }
 0x348   : > { %v13401_v10 = vadd.f32 %v3521_v37, %v13293_v60  ;;  %v13408_v18 = vpop.f32.mrf.mxu0  ;;  %v3006_v60 = vadd.f32 %v13346_v22, %v2677_v19  ;;  %v13422_v53 = vpop.f32.mrf.mxu1  ;;  %v11738_v37 = vld [vmem:[#allocation5 + $0x4a8] sm:$0xf0]  ;;  %v11737_v19 = vld [vmem:[#allocation5 + $0x4a0] sm:$0xf0] }
 0x349   : > { %v13424_v38 = vpop.f32.mrf.mxu2  ;;  %v9466_v36 = vor.u32 %v11738_v37, %v9465_v25  ;;  %v2690_v43 = vadd.f32 %v13412_v14, %v13408_v18  ;;  %v9474_v14 = vor.u32 %v11739_v6, %v9471_v45  ;;  %v9495_v45 = vld [vmem:[#allocation5 + $0x4ec] sm:$0xf0] }
 0x34a   : > { %v3650_v9 = vpack.c.bf16 %v3006_v60, %v3004_v30  ;;  %v9458_v30 = vor.u32 %v11737_v19, %v9457_v48  ;;  %v9459_v60 = vld [vmem:[#allocation5 + $0x4a4] sm:$0xf0]  ;;  %v11743_v48 = vld [vmem:[#allocation5 + $0x4d0] sm:$0xf0]  ;;  %v11742_v19 = vld [vmem:[#allocation5 + $0x4cc] sm:$0xf] }
 0x34b   : > { %2399 = vmatmul.bf16.gmra.mxu0 %v9434_v23  ;;  %v3019_v59 = vadd.f32 %v13414_v13, %v2690_v43 }
 0x34f   : > { %v3523_v41 = vpop.f32.mrf.mxu3 }
 0x350   : > { %v13417_v3 = vadd.f32 %v3523_v41, %v13309_v34  ;;  %v13420_v62 = vpop.f32.mrf.mxu0  ;;  %v9828_v34 = vld [vmem:[%s14193_s4 + $0x28] sm:$0xf]  ;;  %v13442_v61 = vpop.f32.mrf.mxu1 }
 0x351   : > { %v3727_v1 = vsel %vm3167_vm2, %v9828_v34, 0  ;;  %v13444_v33 = vpop.f32.mrf.mxu2  ;;  %v2692_v21 = vadd.f32 %v13422_v53, %v13420_v62 }
 0x352   : > { %3736 = vmatpush.bf16.msra.mxu3 %v3727_v1  ;;  %2733 = vmatmul.bf16.gmra.mxu1 %v9450_v52 }
 0x353   : > { %9763 = vmatmul.msk.bf16.gmra.mxu2 %vm1959_vm1, %v9454_v20  ;;  %v9469_v20 = vld [vmem:[#allocation5 + $0x4b0] sm:$0xf] }
 0x354   : > { %9824 = vmatmul.msk.bf16.vlgmr.msrb.gmra.mxu3 %vm3154_vm3, %v3650_v9  ;;  %v9470_v56 = vor.u32 %v11740_v50, %v9469_v20  ;;  %v11746_v20 = vld [vmem:[#allocation5 + $0x4e8] sm:$0xf0]  ;;  %v11745_v50 = vld [vmem:[#allocation5 + $0x4e4] sm:$0xf] }
 0x357   : > { %v3564_v22 = vpop.f32.mrf.mxu3 }
 0x358   : > { %v13427_v46 = vadd.f32 %v3564_v22, %v13319_v57  ;;  %v13438_v57 = vpop.f32.mrf.mxu0  ;;  %v13452_v8 = vpop.f32.mrf.mxu1  ;;  %v9477_v22 = vld [vmem:[#allocation5 + $0x4b8] sm:$0xf] }
 0x359   : > { %v13454_v12 = vpop.f32.mrf.mxu2  ;;  %v2695_v37 = vadd.f32 %v13442_v61, %v13438_v57 }
 0x35b   : > { %2404 = vmatmul.bf16.gmra.mxu0 %v9446_v4  ;;  %v11809_v4 = vld [vmem:[#allocation7 + $0x30] sm:$0xff] }
 0x35c   : > { %4692 = vmatpush.bf16.msrb.mxu0 %v11809_v4 }
 0x35f   : > { %v3566_v44 = vpop.f32.mrf.mxu3 }
 0x360   : > { %v13447_v55 = vadd.f32 %v3566_v44, %v13339_v32  ;;  %v13450_v11 = vpop.f32.mrf.mxu0  ;;  %v2685_v32 = vadd.f32 %v13386_v5, %v13382_v49  ;;  %v13468_v2 = vpop.f32.mrf.mxu1  ;;  %v9462_v5 = vor.u32 %v11736_v27, %v9459_v60 }
 0x361   : > { %v13470_v49 = vpop.f32.mrf.mxu2 }
 0x362   : > { %v3014_v63 = vadd.f32 %v13388_v42, %v2685_v32  ;;  %2738 = vmatmul.bf16.gmra.mxu1 %v9462_v5 }
 0x363   : > { %9764 = vmatmul.msk.bf16.gmra.mxu2 %vm1959_vm1, %v9466_v36  ;;  %v2697_v36 = vadd.f32 %v13452_v8, %v13450_v11 }
 0x364   : > { %9825 = vmatmul.msk.bf16.gmra.mxu3 %vm3154_vm3, %v3651_v58  ;;  %v11825_v58 = vld [vmem:[#allocation7 + $0xb0] sm:$0xff] }
 0x365   : > { %4772 = vmatpush.bf16.msrb.mxu1 %v11825_v58  ;;  %v3026_v27 = vadd.f32 %v13454_v12, %v2697_v36  ;;  %v11750_v58 = vld [vmem:[#allocation5 + $0x508] sm:$0xf0]  ;;  %v11749_v36 = vld [vmem:[#allocation5 + $0x500] sm:$0xf0] }
 0x367   : > { %v3569_v29 = vpop.f32.mrf.mxu3 }
 0x368   : > { %v13457_v15 = vadd.f32 %v3569_v29, %v13349_v26  ;;  %v13464_v0 = vpop.f32.mrf.mxu0  ;;  %v3016_v26 = vadd.f32 %v13398_v17, %v2687_v7  ;;  %v13478_v17 = vpop.f32.mrf.mxu1  ;;  %v11744_v29 = vld [vmem:[#allocation5 + $0x4d8] sm:$0xf0]  ;;  %v9481_v7 = vld [vmem:[#allocation5 + $0x4c8] sm:$0xf] }
 0x369   : > { %v13480_v47 = vpop.f32.mrf.mxu2 }
 0x36a   : > { %v3652_v39 = vpack.c.bf16 %v3016_v26, %v3014_v63  ;;  %v9482_v26 = vor.u32 %v11743_v48, %v9481_v7  ;;  %v11748_v7 = vld [vmem:[#allocation5 + $0x4fc] sm:$0xf] }
 0x36b   : > { %2409 = vmatmul.bf16.gmra.mxu0 %v9458_v30  ;;  %v9483_v30 = vld [vmem:[#allocation5 + $0x4d4] sm:$0xf0] }
 0x36c   : > { %v9486_v11 = vor.u32 %v11742_v19, %v9483_v30 }
 0x36f   : > { %v3571_v23 = vpop.f32.mrf.mxu3 }
 0x370   : > { %v13473_v24 = vadd.f32 %v3571_v23, %v13365_v31  ;;  %v13476_v42 = vpop.f32.mrf.mxu0  ;;  %v11741_v31 = vld [vmem:[#allocation5 + $0x4c0] sm:$0xf0]  ;;  %v13494_v16 = vpop.f32.mrf.mxu1 }
 0x371   : > { %v9478_v34 = vor.u32 %v11741_v31, %v9477_v22  ;;  %v2702_v43 = vadd.f32 %v13478_v17, %v13476_v42  ;;  %v9498_v42 = vor.u32 %v11745_v50, %v9495_v45  ;;  %v9519_v50 = vld [vmem:[#allocation5 + $0x51c] sm:$0xf0] }
 0x372   : > { %2743 = vmatmul.bf16.gmra.mxu1 %v9474_v14 }
 0x373   : > { %9765 = vmatmul.msk.bf16.gmra.mxu2 %vm1959_vm1, %v9478_v34  ;;  %v2700_v34 = vadd.f32 %v13468_v2, %v13464_v0 }
 0x374   : > { %9826 = vmatmul.msk.bf16.gmra.mxu3 %vm3154_vm3, %v3652_v39 }
 0x375   : > { %v3029_v6 = vadd.f32 %v13470_v49, %v2700_v34  ;;  %v11751_v34 = vld [vmem:[#allocation5 + $0x514] sm:$0xf] }
 0x376   : > { %v13496_v18 = vpop.f32.mrf.mxu2 }
 0x377   : > { %v3574_v41 = vpop.f32.mrf.mxu3 }
 0x378   : > { %v13483_v9 = vadd.f32 %v3574_v41, %v13375_v51  ;;  %v13490_v1 = vpop.f32.mrf.mxu0  ;;  %v3021_v51 = vadd.f32 %v13424_v38, %v2692_v21  ;;  %v13504_v38 = vpop.f32.mrf.mxu1  ;;  %v11747_v41 = vld [vmem:[#allocation5 + $0x4f0] sm:$0xf0]  ;;  %v9493_v21 = vld [vmem:[#allocation5 + $0x4e0] sm:$0xf] }
 0x379   : > { %v9502_v31 = vor.u32 %v11747_v41, %v9501_v28 }
 0x37a   : > { %v3653_v53 = vpack.c.bf16 %v3021_v51, %v3019_v59  ;;  %v3031_v59 = vadd.f32 %v13480_v47, %v2702_v43 }
 0x37b   : > { %2414 = vmatmul.bf16.gmra.mxu0 %v9470_v56  ;;  %v9494_v56 = vor.u32 %v11746_v20, %v9493_v21 }
 0x37e   : > { %v13506_v44 = vpop.f32.mrf.mxu2 }
 0x37f   : > { %v3576_v35 = vpop.f32.mrf.mxu3 }
 0x380   : > { %v13499_v62 = vadd.f32 %v3576_v35, %v13391_v54  ;;  %v13502_v13 = vpop.f32.mrf.mxu0  ;;  %v9489_v54 = vld [vmem:[#allocation5 + $0x4d0] sm:$0xf]  ;;  %v13520_v63 = vpop.f32.mrf.mxu1  ;;  %v3709_v35 = vpack.c.bf16 %v3031_v59, %v3029_v6 }
 0x381   : > { %v9490_v25 = vor.u32 %v11744_v29, %v9489_v54  ;;  %v2707_v29 = vadd.f32 %v13504_v38, %v13502_v13 }
 0x382   : > { %2748 = vmatmul.bf16.gmra.mxu1 %v9486_v11 }
 0x383   : > { %9766 = vmatmul.msk.bf16.gmra.mxu2 %vm1959_vm1, %v9490_v25 }
 0x384   : > { %9827 = vmatmul.msk.bf16.gmra.mxu3 %vm3154_vm3, %v3653_v53 }
 0x386   : > { %v13522_v61 = vpop.f32.mrf.mxu2 }
 0x387   : > { %v3579_v40 = vpop.f32.mrf.mxu3 }
 0x388   : > { %v13509_v52 = vadd.f32 %v3579_v40, %v13401_v10  ;;  %v13516_v32 = vpop.f32.mrf.mxu0  ;;  %v3024_v10 = vadd.f32 %v13444_v33, %v2695_v37  ;;  %v13530_v33 = vpop.f32.mrf.mxu1  ;;  %v9513_v40 = vld [vmem:[#allocation5 + $0x500] sm:$0xf]  ;;  %v9505_v37 = vld [vmem:[#allocation5 + $0x4f8] sm:$0xf] }
 0x389   : > { %v9514_v54 = vor.u32 %v11750_v58, %v9513_v40  ;;  %v9529_v58 = vld [vmem:[#allocation5 + $0x528] sm:$0xf] }
 0x38a   : > { %v3708_v60 = vpack.c.bf16 %v3026_v27, %v3024_v10  ;;  %v9506_v10 = vor.u32 %v11749_v36, %v9505_v37  ;;  %v9507_v27 = vld [vmem:[#allocation5 + $0x504] sm:$0xf0] }
 0x38b   : > { %2419 = vmatmul.bf16.gmra.mxu0 %v9482_v26 }
 0x38e   : > { %v13532_v5 = vpop.f32.mrf.mxu2 }
 0x38f   : > { %v3581_v57 = vpop.f32.mrf.mxu3 }
 0x390   : > { %v13525_v8 = vadd.f32 %v3581_v57, %v13417_v3  ;;  %v13528_v23 = vpop.f32.mrf.mxu0  ;;  %v9833_v3 = vld [vmem:[%s14193_s4 + $0x2c] sm:$0xf]  ;;  %v13550_v51 = vpop.f32.mrf.mxu1 }
 0x391   : > { %v3785_v22 = vsel %vm3167_vm2, %v9833_v3, 0  ;;  %v2712_v28 = vadd.f32 %v13530_v33, %v13528_v23 }
 0x392   : > { %3794 = vmatpush.bf16.msrb.mxu3 %v3785_v22  ;;  %2753 = vmatmul.bf16.gmra.mxu1 %v9498_v42  ;;  %v9517_v22 = vld [vmem:[#allocation5 + $0x510] sm:$0xf]  ;;  %v11756_v42 = vld [vmem:[#allocation5 + $0x538] sm:$0xf0] }
 0x393   : > { %9767 = vmatmul.msk.bf16.gmra.mxu2 %vm1959_vm1, %v9502_v31  ;;  %v11752_v31 = vld [vmem:[#allocation5 + $0x518] sm:$0xf0] }
 0x394   : > { %9829 = vmatmul.msk.bf16.vlgmr.msra.gmra.mxu3 %vm3154_vm3, %v3708_v60  ;;  %v9525_v60 = vld [vmem:[#allocation5 + $0x518] sm:$0xf]  ;;  %v9518_v20 = vor.u32 %v11752_v31, %v9517_v22 }
 0x396   : > { %v13552_v2 = vpop.f32.mrf.mxu2 }
 0x397   : > { %v3622_v12 = vpop.f32.mrf.mxu3 }
 0x398   : > { %v13535_v39 = vadd.f32 %v3622_v12, %v13427_v46  ;;  %v13546_v46 = vpop.f32.mrf.mxu0  ;;  %v13560_v49 = vpop.f32.mrf.mxu1  ;;  %v11753_v12 = vld [vmem:[#allocation5 + $0x520] sm:$0xf0] }
 0x399   : > { %v9526_v3 = vor.u32 %v11753_v12, %v9525_v60 }
 0x39b   : > { %2424 = vmatmul.bf16.gmra.mxu0 %v9494_v56 }
 0x39e   : > { %v13562_v53 = vpop.f32.mrf.mxu2 }
 0x39f   : > { %v3624_v0 = vpop.f32.mrf.mxu3 }
 0x3a0   : > { %v13555_v17 = vadd.f32 %v3624_v0, %v13447_v55  ;;  %v13558_v14 = vpop.f32.mrf.mxu0  ;;  %v2705_v55 = vadd.f32 %v13494_v16, %v13490_v1  ;;  %v13576_v19 = vpop.f32.mrf.mxu1  ;;  %v9510_v16 = vor.u32 %v11748_v7, %v9507_v27  ;;  %v9537_v0 = vld [vmem:[#allocation5 + $0x530] sm:$0xf]  ;;  %v9531_v7 = vld [vmem:[#allocation5 + $0x534] sm:$0xf0] }
 0x3a2   : > { %v3034_v48 = vadd.f32 %v13496_v18, %v2705_v55  ;;  %2758 = vmatmul.bf16.gmra.mxu1 %v9510_v16  ;;  %v11754_v55 = vld [vmem:[#allocation5 + $0x52c] sm:$0xf]  ;;  %v11759_v16 = vld [vmem:[#allocation5 + $0x550] sm:$0xf0] }
 0x3a3   : > { %9768 = vmatmul.msk.bf16.gmra.mxu2 %vm1959_vm1, %v9514_v54  ;;  %v11755_v54 = vld [vmem:[#allocation5 + $0x530] sm:$0xf0] }
 0x3a4   : > { %9830 = vmatmul.msk.bf16.gmra.mxu3 %vm3154_vm3, %v3709_v35  ;;  %v9538_v35 = vor.u32 %v11756_v42, %v9537_v0  ;;  %v9530_v36 = vor.u32 %v11755_v54, %v9529_v58  ;;  %v11760_v58 = vld [vmem:[#allocation5 + $0x55c] sm:$0xf] }
 0x3a6   : > { %v13578_v1 = vpop.f32.mrf.mxu2 }
 0x3a7   : > { %v3627_v47 = vpop.f32.mrf.mxu3 }
 0x3a8   : > { %v13565_v4 = vadd.f32 %v3627_v47, %v13457_v15  ;;  %v13572_v25 = vpop.f32.mrf.mxu0  ;;  %v3036_v15 = vadd.f32 %v13506_v44, %v2707_v29  ;;  %v13586_v18 = vpop.f32.mrf.mxu1  ;;  %v2717_v47 = vadd.f32 %v13560_v49, %v13558_v14 }
 0x3a9   : > { %v2720_v60 = vadd.f32 %v13576_v19, %v13572_v25 }
 0x3aa   : > { %v3710_v38 = vpack.c.bf16 %v3036_v15, %v3034_v48 }
 0x3ab   : > { %2429 = vmatmul.bf16.gmra.mxu0 %v9506_v10  ;;  %v3049_v22 = vadd.f32 %v13578_v1, %v2720_v60  ;;  %v11764_v60 = vld [vmem:[#allocation5 + $0x578] sm:$0xf0] }
 0x3ae   : > { %v13588_v57 = vpop.f32.mrf.mxu2 }
 0x3af   : > { %v3629_v26 = vpop.f32.mrf.mxu3 }
 0x3b0   : > { %v13581_v13 = vadd.f32 %v3629_v26, %v13473_v24  ;;  %v13584_v30 = vpop.f32.mrf.mxu0  ;;  %v2710_v24 = vadd.f32 %v13520_v63, %v13516_v32  ;;  %v13602_v21 = vpop.f32.mrf.mxu1  ;;  %v9522_v63 = vor.u32 %v11751_v34, %v9519_v50  ;;  %v9549_v26 = vld [vmem:[#allocation5 + $0x548] sm:$0xf] }
 0x3b1   : > { %v2722_v12 = vadd.f32 %v13586_v18, %v13584_v30 }
 0x3b2   : > { %v3039_v43 = vadd.f32 %v13522_v61, %v2710_v24  ;;  %2763 = vmatmul.bf16.gmra.mxu1 %v9522_v63  ;;  %v11758_v24 = vld [vmem:[#allocation5 + $0x548] sm:$0xf0] }
 0x3b3   : > { %9769 = vmatmul.msk.bf16.gmra.mxu2 %vm1959_vm1, %v9526_v3  ;;  %v9541_v3 = vld [vmem:[#allocation5 + $0x540] sm:$0xf]  ;;  %v3051_v31 = vadd.f32 %v13588_v57, %v2722_v12  ;;  %v11763_v12 = vld [vmem:[#allocation5 + $0x574] sm:$0xf] }
 0x3b4   : > { %9831 = vmatmul.msk.bf16.gmra.mxu3 %vm3154_vm3, %v3710_v38 }
 0x3b6   : > { %v13604_v32 = vpop.f32.mrf.mxu2 }
 0x3b7   : > { %v3632_v44 = vpop.f32.mrf.mxu3 }
 0x3b8   : > { %v13591_v11 = vadd.f32 %v3632_v44, %v13483_v9  ;;  %v13598_v41 = vpop.f32.mrf.mxu0  ;;  %v3041_v9 = vadd.f32 %v13532_v5, %v2712_v28  ;;  %v13612_v61 = vpop.f32.mrf.mxu1  ;;  %v9550_v44 = vor.u32 %v11759_v16, %v9549_v26  ;;  %v11757_v28 = vld [vmem:[#allocation5 + $0x544] sm:$0xf] }
 0x3ba   : > { %v3711_v33 = vpack.c.bf16 %v3041_v9, %v3039_v43  ;;  %v9542_v43 = vor.u32 %v11758_v24, %v9541_v3  ;;  %v9543_v9 = vld [vmem:[#allocation5 + $0x54c] sm:$0xf0] }
 0x3bb   : > { %2434 = vmatmul.bf16.gmra.mxu0 %v9518_v20  ;;  %v9546_v30 = vor.u32 %v11757_v28, %v9543_v9  ;;  %v3767_v20 = vpack.c.bf16 %v3051_v31, %v3049_v22  ;;  %v9567_v22 = vld [vmem:[#allocation5 + $0x57c] sm:$0xf0] }
 0x3be   : > { %v13614_v56 = vpop.f32.mrf.mxu2 }
 0x3bf   : > { %v3634_v6 = vpop.f32.mrf.mxu3 }
 0x3c0   : > { %v13607_v23 = vadd.f32 %v3634_v6, %v13499_v62  ;;  %v13610_v59 = vpop.f32.mrf.mxu0  ;;  %v2715_v62 = vadd.f32 %v13550_v51, %v13546_v46  ;;  %v13628_v37 = vpop.f32.mrf.mxu1  ;;  %v9534_v51 = vor.u32 %v11754_v55, %v9531_v7  ;;  %v11816_v7 = vld [vmem:[#allocation7 + $0x68] sm:$0xff] }
 0x3c1   : > { %v2727_v42 = vadd.f32 %v13612_v61, %v13610_v59  ;;  %4631 = vmatpush.bf16.msrb.mxu2 %v11816_v7  ;;  %v9597_v7 = vld [vmem:[#allocation5 + $0x5a8] sm:$0xf] }
 0x3c2   : > { %v3044_v29 = vadd.f32 %v13552_v2, %v2715_v62  ;;  %2768 = vmatmul.bf16.gmra.mxu1 %v9534_v51  ;;  %v9553_v62 = vld [vmem:[#allocation5 + $0x558] sm:$0xf] }
 0x3c3   : > { %9770 = vmatmul.msk.bf16.gmra.mxu2 %vm1959_vm1, %v9538_v35 }
 0x3c4   : > { %9832 = vmatmul.msk.bf16.gmra.mxu3 %vm3154_vm3, %v3711_v33  ;;  %v9561_v33 = vld [vmem:[#allocation5 + $0x560] sm:$0xf] }
 0x3c6   : > { %v13630_v46 = vpop.f32.mrf.mxu2 }
 0x3c7   : > { %v3637_v5 = vpop.f32.mrf.mxu3 }
 0x3c8   : > { %v13617_v45 = vadd.f32 %v3637_v5, %v13509_v52  ;;  %v13624_v40 = vpop.f32.mrf.mxu0  ;;  %v3046_v52 = vadd.f32 %v13562_v53, %v2717_v47  ;;  %v13638_v2 = vpop.f32.mrf.mxu1  ;;  %v11762_v5 = vld [vmem:[#allocation5 + $0x568] sm:$0xf0]  ;;  %v11761_v47 = vld [vmem:[#allocation5 + $0x560] sm:$0xf0] }
 0x3c9   : > { %v9562_v0 = vor.u32 %v11762_v5, %v9561_v33  ;;  %v2730_v26 = vadd.f32 %v13628_v37, %v13624_v40  ;;  %v9570_v37 = vor.u32 %v11763_v12, %v9567_v22  ;;  %v9591_v22 = vld [vmem:[#allocation5 + $0x5ac] sm:$0xf0] }
 0x3ca   : > { %v3766_v49 = vpack.c.bf16 %v3046_v52, %v3044_v29  ;;  %v9554_v29 = vor.u32 %v11761_v47, %v9553_v62  ;;  %v9555_v52 = vld [vmem:[#allocation5 + $0x564] sm:$0xf0]  ;;  %v11767_v62 = vld [vmem:[#allocation5 + $0x590] sm:$0xf0]  ;;  %v11766_v47 = vld [vmem:[#allocation5 + $0x58c] sm:$0xf] }
 0x3cb   : > { %2439 = vmatmul.bf16.gmra.mxu0 %v9530_v36  ;;  %v3059_v3 = vadd.f32 %v13630_v46, %v2730_v26 }
 0x3ce   : > { %v13640_v10 = vpop.f32.mrf.mxu2 }
 0x3cf   : > { %v3639_v48 = vpop.f32.mrf.mxu3 }
 0x3d0   : > { %v13633_v14 = vadd.f32 %v3639_v48, %v13525_v8  ;;  %v13636_v15 = vpop.f32.mrf.mxu0  ;;  %v9838_v8 = vld [vmem:[%s14193_s4 + $0x30] sm:$0xf]  ;;  %v13658_v34 = vpop.f32.mrf.mxu1 }
 0x3d1   : > { %v3843_v38 = vsel %vm3167_vm2, %v9838_v8, 0  ;;  %v2732_v16 = vadd.f32 %v13638_v2, %v13636_v15 }
 0x3d2   : > { %3852 = vmatpush.bf16.msra.mxu3 %v3843_v38  ;;  %2773 = vmatmul.bf16.gmra.mxu1 %v9546_v30 }
 0x3d3   : > { %9771 = vmatmul.msk.bf16.gmra.mxu2 %vm1959_vm1, %v9550_v44  ;;  %v9565_v44 = vld [vmem:[#allocation5 + $0x570] sm:$0xf] }
 0x3d4   : > { %9834 = vmatmul.msk.bf16.vlgmr.msrb.gmra.mxu3 %vm3154_vm3, %v3766_v49  ;;  %v9566_v28 = vor.u32 %v11764_v60, %v9565_v44  ;;  %v11770_v44 = vld [vmem:[#allocation5 + $0x5a8] sm:$0xf0]  ;;  %v11769_v60 = vld [vmem:[#allocation5 + $0x5a4] sm:$0xf] }
 0x3d6   : > { %v13660_v19 = vpop.f32.mrf.mxu2 }
 0x3d7   : > { %v3680_v53 = vpop.f32.mrf.mxu3 }
 0x3d8   : > { %v13643_v27 = vadd.f32 %v3680_v53, %v13535_v39  ;;  %v13654_v39 = vpop.f32.mrf.mxu0  ;;  %v13668_v1 = vpop.f32.mrf.mxu1  ;;  %v9573_v53 = vld [vmem:[#allocation5 + $0x578] sm:$0xf] }
 0x3d9   : > { %v2735_v5 = vadd.f32 %v13658_v34, %v13654_v39 }
 0x3db   : > { %2444 = vmatmul.bf16.gmra.mxu0 %v9542_v43  ;;  %v11808_v43 = vld [vmem:[#allocation7 + $0x28] sm:$0xff] }
 0x3dc   : > { %4693 = vmatpush.bf16.msrb.mxu0 %v11808_v43 }
 0x3de   : > { %v13670_v6 = vpop.f32.mrf.mxu2 }
 0x3df   : > { %v3682_v25 = vpop.f32.mrf.mxu3 }
 0x3e0   : > { %v13663_v18 = vadd.f32 %v3682_v25, %v13555_v17  ;;  %v13666_v50 = vpop.f32.mrf.mxu0  ;;  %v2725_v17 = vadd.f32 %v13602_v21, %v13598_v41  ;;  %v13684_v55 = vpop.f32.mrf.mxu1  ;;  %v9558_v21 = vor.u32 %v11760_v58, %v9555_v52 }
 0x3e2   : > { %v3054_v54 = vadd.f32 %v13604_v32, %v2725_v17  ;;  %2778 = vmatmul.bf16.gmra.mxu1 %v9558_v21 }
 0x3e3   : > { %9772 = vmatmul.msk.bf16.gmra.mxu2 %vm1959_vm1, %v9562_v0  ;;  %v2737_v0 = vadd.f32 %v13668_v1, %v13666_v50 }
 0x3e4   : > { %9835 = vmatmul.msk.bf16.gmra.mxu3 %vm3154_vm3, %v3767_v20  ;;  %v11824_v20 = vld [vmem:[#allocation7 + $0xa8] sm:$0xff] }
 0x3e5   : > { %4773 = vmatpush.bf16.msrb.mxu1 %v11824_v20  ;;  %v3066_v58 = vadd.f32 %v13670_v6, %v2737_v0  ;;  %v11774_v20 = vld [vmem:[#allocation5 + $0x5c8] sm:$0xf0]  ;;  %v11773_v0 = vld [vmem:[#allocation5 + $0x5c0] sm:$0xf0] }
 0x3e6   : > { %v13686_v41 = vpop.f32.mrf.mxu2 }
 0x3e7   : > { %v3685_v57 = vpop.f32.mrf.mxu3 }
 0x3e8   : > { %v13673_v63 = vadd.f32 %v3685_v57, %v13565_v4  ;;  %v13680_v35 = vpop.f32.mrf.mxu0  ;;  %v3056_v4 = vadd.f32 %v13614_v56, %v2727_v42  ;;  %v13694_v56 = vpop.f32.mrf.mxu1  ;;  %v11768_v57 = vld [vmem:[#allocation5 + $0x598] sm:$0xf0]  ;;  %v9577_v42 = vld [vmem:[#allocation5 + $0x588] sm:$0xf] }
 0x3ea   : > { %v3768_v61 = vpack.c.bf16 %v3056_v4, %v3054_v54  ;;  %v9578_v4 = vor.u32 %v11767_v62, %v9577_v42  ;;  %v11772_v42 = vld [vmem:[#allocation5 + $0x5bc] sm:$0xf] }
 0x3eb   : > { %2449 = vmatmul.bf16.gmra.mxu0 %v9554_v29  ;;  %v9579_v29 = vld [vmem:[#allocation5 + $0x594] sm:$0xf0] }
 0x3ec   : > { %v9582_v50 = vor.u32 %v11766_v47, %v9579_v29 }
 0x3ee   : > { %v13696_v51 = vpop.f32.mrf.mxu2 }
 0x3ef   : > { %v3687_v36 = vpop.f32.mrf.mxu3 }
 0x3f0   : > { %v13689_v59 = vadd.f32 %v3687_v36, %v13581_v13  ;;  %v13692_v32 = vpop.f32.mrf.mxu0  ;;  %v11765_v13 = vld [vmem:[#allocation5 + $0x580] sm:$0xf0]  ;;  %v13710_v24 = vpop.f32.mrf.mxu1 }
 0x3f1   : > { %v9574_v8 = vor.u32 %v11765_v13, %v9573_v53  ;;  %v2742_v26 = vadd.f32 %v13694_v56, %v13692_v32  ;;  %v9594_v32 = vor.u32 %v11769_v60, %v9591_v22  ;;  %v9615_v60 = vld [vmem:[#allocation5 + $0x5dc] sm:$0xf0] }
 0x3f2   : > { %2783 = vmatmul.bf16.gmra.mxu1 %v9570_v37 }
 0x3f3   : > { %9773 = vmatmul.msk.bf16.gmra.mxu2 %vm1959_vm1, %v9574_v8  ;;  %v2740_v8 = vadd.f32 %v13684_v55, %v13680_v35 }
 0x3f4   : > { %9836 = vmatmul.msk.bf16.gmra.mxu3 %vm3154_vm3, %v3768_v61 }
 0x3f5   : > { %v3069_v12 = vadd.f32 %v13686_v41, %v2740_v8  ;;  %v11775_v8 = vld [vmem:[#allocation5 + $0x5d4] sm:$0xf] }
 0x3f6   : > { %v13712_v40 = vpop.f32.mrf.mxu2 }
 0x3f7   : > { %v3690_v48 = vpop.f32.mrf.mxu3 }
 0x3f8   : > { %v13699_v49 = vadd.f32 %v3690_v48, %v13591_v11  ;;  %v13706_v38 = vpop.f32.mrf.mxu0  ;;  %v3061_v11 = vadd.f32 %v13640_v10, %v2732_v16  ;;  %v13720_v10 = vpop.f32.mrf.mxu1  ;;  %v11771_v48 = vld [vmem:[#allocation5 + $0x5b0] sm:$0xf0]  ;;  %v9589_v16 = vld [vmem:[#allocation5 + $0x5a0] sm:$0xf] }
 0x3f9   : > { %v9598_v13 = vor.u32 %v11771_v48, %v9597_v7 }
 0x3fa   : > { %v3769_v2 = vpack.c.bf16 %v3061_v11, %v3059_v3  ;;  %v3071_v3 = vadd.f32 %v13696_v51, %v2742_v26 }
 0x3fb   : > { %2454 = vmatmul.bf16.gmra.mxu0 %v9566_v28  ;;  %v9590_v28 = vor.u32 %v11770_v44, %v9589_v16 }
 0x3fe   : > { %v13722_v25 = vpop.f32.mrf.mxu2 }
 0x3ff   : > { %v3692_v31 = vpop.f32.mrf.mxu3 }
 0x400   : > { %v13715_v15 = vadd.f32 %v3692_v31, %v13607_v23  ;;  %v13718_v46 = vpop.f32.mrf.mxu0  ;;  %v9585_v23 = vld [vmem:[#allocation5 + $0x590] sm:$0xf]  ;;  %v13736_v54 = vpop.f32.mrf.mxu1  ;;  %v3825_v31 = vpack.c.bf16 %v3071_v3, %v3069_v12 }
 0x401   : > { %v9586_v33 = vor.u32 %v11768_v57, %v9585_v23  ;;  %v2747_v57 = vadd.f32 %v13720_v10, %v13718_v46 }
 0x402   : > { %2788 = vmatmul.bf16.gmra.mxu1 %v9582_v50 }
 0x403   : > { %9774 = vmatmul.msk.bf16.gmra.mxu2 %vm1959_vm1, %v9586_v33 }
 0x404   : > { %9837 = vmatmul.msk.bf16.gmra.mxu3 %vm3154_vm3, %v3769_v2 }
 0x406   : > { %v13738_v34 = vpop.f32.mrf.mxu2 }
 0x407   : > { %v3695_v9 = vpop.f32.mrf.mxu3 }
 0x408   : > { %v13725_v30 = vadd.f32 %v3695_v9, %v13617_v45  ;;  %v13732_v17 = vpop.f32.mrf.mxu0  ;;  %v3064_v45 = vadd.f32 %v13660_v19, %v2735_v5  ;;  %v13746_v19 = vpop.f32.mrf.mxu1  ;;  %v9609_v9 = vld [vmem:[#allocation5 + $0x5c0] sm:$0xf]  ;;  %v9601_v5 = vld [vmem:[#allocation5 + $0x5b8] sm:$0xf] }
 0x409   : > { %v9610_v23 = vor.u32 %v11774_v20, %v9609_v9  ;;  %v9625_v20 = vld [vmem:[#allocation5 + $0x5e8] sm:$0xf] }
 0x40a   : > { %v3824_v52 = vpack.c.bf16 %v3066_v58, %v3064_v45  ;;  %v9602_v45 = vor.u32 %v11773_v0, %v9601_v5  ;;  %v9603_v58 = vld [vmem:[#allocation5 + $0x5c4] sm:$0xf0] }
 0x40b   : > { %2459 = vmatmul.bf16.gmra.mxu0 %v9578_v4 }
 0x40e   : > { %v13748_v21 = vpop.f32.mrf.mxu2 }
 0x40f   : > { %v3697_v39 = vpop.f32.mrf.mxu3 }
 0x410   : > { %v13741_v1 = vadd.f32 %v3697_v39, %v13633_v14  ;;  %v13744_v36 = vpop.f32.mrf.mxu0  ;;  %v9843_v14 = vld [vmem:[%s14193_s4 + $0x34] sm:$0xf]  ;;  %v13766_v11 = vpop.f32.mrf.mxu1 }
 0x411   : > { %v3901_v53 = vsel %vm3167_vm2, %v9843_v14, 0  ;;  %v2752_v7 = vadd.f32 %v13746_v19, %v13744_v36 }
 0x412   : > { %3910 = vmatpush.bf16.msrb.mxu3 %v3901_v53  ;;  %2793 = vmatmul.bf16.gmra.mxu1 %v9594_v32  ;;  %v9613_v53 = vld [vmem:[#allocation5 + $0x5d0] sm:$0xf]  ;;  %v11780_v32 = vld [vmem:[#allocation5 + $0x5f8] sm:$0xf0] }
 0x413   : > { %9775 = vmatmul.msk.bf16.gmra.mxu2 %vm1959_vm1, %v9598_v13  ;;  %v11776_v13 = vld [vmem:[#allocation5 + $0x5d8] sm:$0xf0] }
 0x414   : > { %9839 = vmatmul.msk.bf16.vlgmr.msra.gmra.mxu3 %vm3154_vm3, %v3824_v52  ;;  %v9621_v52 = vld [vmem:[#allocation5 + $0x5d8] sm:$0xf]  ;;  %v9614_v44 = vor.u32 %v11776_v13, %v9613_v53 }
 0x416   : > { %v13768_v55 = vpop.f32.mrf.mxu2 }
 0x417   : > { %v3738_v6 = vpop.f32.mrf.mxu3 }
 0x418   : > { %v13751_v61 = vadd.f32 %v3738_v6, %v13643_v27  ;;  %v13762_v27 = vpop.f32.mrf.mxu0  ;;  %v13776_v41 = vpop.f32.mrf.mxu1  ;;  %v11777_v6 = vld [vmem:[#allocation5 + $0x5e0] sm:$0xf0] }
 0x419   : > { %v9622_v14 = vor.u32 %v11777_v6, %v9621_v52 }
 0x41b   : > { %2464 = vmatmul.bf16.gmra.mxu0 %v9590_v28 }
 0x41e   : > { %v13778_v2 = vpop.f32.mrf.mxu2 }
 0x41f   : > { %v3740_v35 = vpop.f32.mrf.mxu3 }
 0x420   : > { %v13771_v56 = vadd.f32 %v3740_v35, %v13663_v18  ;;  %v13774_v37 = vpop.f32.mrf.mxu0  ;;  %v2745_v18 = vadd.f32 %v13710_v24, %v13706_v38  ;;  %v13792_v47 = vpop.f32.mrf.mxu1  ;;  %v9606_v24 = vor.u32 %v11772_v42, %v9603_v58  ;;  %v9633_v35 = vld [vmem:[#allocation5 + $0x5f0] sm:$0xf]  ;;  %v9627_v42 = vld [vmem:[#allocation5 + $0x5f4] sm:$0xf0] }
 0x422   : > { %v3074_v62 = vadd.f32 %v13712_v40, %v2745_v18  ;;  %2798 = vmatmul.bf16.gmra.mxu1 %v9606_v24  ;;  %v11778_v18 = vld [vmem:[#allocation5 + $0x5ec] sm:$0xf] }
 0x423   : > { %9776 = vmatmul.msk.bf16.gmra.mxu2 %vm1959_vm1, %v9610_v23  ;;  %v11779_v23 = vld [vmem:[#allocation5 + $0x5f0] sm:$0xf0] }
 0x424   : > { %9840 = vmatmul.msk.bf16.gmra.mxu3 %vm3154_vm3, %v3825_v31  ;;  %v9634_v31 = vor.u32 %v11780_v32, %v9633_v35  ;;  %v9626_v0 = vor.u32 %v11779_v23, %v9625_v20  ;;  %v11823_v20 = vld [vmem:[#allocation7 + $0xa0] sm:$0xff] }
 0x425   : > { %4774 = vmatpush.bf16.msrb.mxu1 %v11823_v20 }
 0x426   : > { %v13794_v38 = vpop.f32.mrf.mxu2 }
 0x427   : > { %v3743_v51 = vpop.f32.mrf.mxu3 }
 0x428   : > { %v13781_v43 = vadd.f32 %v3743_v51, %v13673_v63  ;;  %v13788_v33 = vpop.f32.mrf.mxu0  ;;  %v3076_v63 = vadd.f32 %v13722_v25, %v2747_v57  ;;  %v2761_v40 = vpop.f32.mrf.mxu1  ;;  %v2755_v51 = vadd.f32 %v13766_v11, %v13762_v27 }
 0x42a   : > { %v3826_v10 = vpack.c.bf16 %v3076_v63, %v3074_v62  ;;  %v3084_v57 = vadd.f32 %v13768_v55, %v2755_v51  ;;  %v9630_v63 = vor.u32 %v11778_v18, %v9627_v42  ;;  %v11807_v51 = vld [vmem:[#allocation7 + $0x20] sm:$0xff] }
 0x42b   : > { %2469 = vmatmul.bf16.gmra.mxu0 %v9602_v45 }
 0x42c   : > { %4694 = vmatpush.bf16.msrb.mxu0 %v11807_v51 }
 0x42e   : > { %v13802_v39 = vpop.f32.mrf.mxu2 }
 0x42f   : > { %v3745_v4 = vpop.f32.mrf.mxu3 }
 0x430   : > { %v13797_v46 = vadd.f32 %v3745_v4, %v13689_v59  ;;  %v13800_v29 = vpop.f32.mrf.mxu0  ;;  %v2750_v59 = vadd.f32 %v13736_v54, %v13732_v17  ;;  %v2764_v16 = vpop.f32.mrf.mxu1  ;;  %v9618_v17 = vor.u32 %v11775_v8, %v9615_v60 }
 0x431   : > { %v2762_v24 = vadd.f32 %v2761_v40, %v13800_v29 }
 0x432   : > { %v3079_v26 = vadd.f32 %v13738_v34, %v2750_v59  ;;  %2803 = vmatmul.bf16.gmra.mxu1 %v9618_v17 }
 0x433   : > { %9777 = vmatmul.msk.bf16.gmra.mxu2 %vm1959_vm1, %v9622_v14  ;;  %v3091_v52 = vadd.f32 %v13802_v39, %v2762_v24 }
 0x434   : > { %9841 = vmatmul.msk.bf16.gmra.mxu3 %vm3154_vm3, %v3826_v10 }
 0x436   : > { %v3093_v3 = vpop.f32.mrf.mxu2 }
 0x437   : > { %v3748_v25 = vpop.f32.mrf.mxu3 }
 0x438   : > { %v13805_v50 = vadd.f32 %v3748_v25, %v13699_v49  ;;  %v13812_v48 = vpop.f32.mrf.mxu0  ;;  %v3081_v49 = vadd.f32 %v13748_v21, %v2752_v7  ;;  %v2766_v28 = vpop.f32.mrf.mxu1 }
 0x43a   : > { %v3827_v36 = vpack.c.bf16 %v3081_v49, %v3079_v26 }
 0x43b   : > { %2474 = vmatmul.bf16.gmra.mxu0 %v9614_v44 }
 0x43e   : > { %v3095_v34 = vpop.f32.mrf.mxu2 }
 0x43f   : > { %v3750_v12 = vpop.f32.mrf.mxu3 }
 0x440   : > { %v13817_v54 = vadd.f32 %v3750_v12, %v13715_v15  ;;  %v2437_v19 = vpop.f32.mrf.mxu0  ;;  %v2757_v15 = vadd.f32 %v13776_v41, %v13774_v37  ;;  %v2769_v5 = vpop.f32.mrf.mxu1  ;;  %v11815_v12 = vld [vmem:[#allocation7 + $0x60] sm:$0xff] }
 0x441   : > { %v2767_v29 = vadd.f32 %v2766_v28, %v2437_v19  ;;  %4632 = vmatpush.bf16.msrb.mxu2 %v11815_v12 }
 0x442   : > { %2808 = vmatmul.bf16.gmra.mxu1 %v9630_v63 }
 0x443   : > { %9778 = vmatmul.msk.bf16.gmra.mxu2 %vm1959_vm1, %v9634_v31  ;;  %v3096_v8 = vadd.f32 %v3095_v34, %v2767_v29  ;;  %vm4142_vm1 = vsmask.f32 7950 }
 0x444   : > { %9842 = vmatmul.msk.bf16.gmra.mxu3 %vm3154_vm3, %v3827_v36 }
 0x446   : > { %v3098_v11 = vpop.f32.mrf.mxu2 }
 0x447   : > { %v3753_v22 = vpop.f32.mrf.mxu3 }
 0x448   : > { %v13821_v21 = vadd.f32 %v3753_v22, %v13725_v30  ;;  %v2440_v9 = vpop.f32.mrf.mxu0  ;;  %v3086_v30 = vadd.f32 %v13778_v2, %v2757_v15  ;;  %v2771_v58 = vpop.f32.mrf.mxu1  ;;  %v9848_v2 = vld [vmem:[%s14193_s4 + $0x38] sm:$0xf] }
 0x449   : > { %v3959_v4 = vsel %vm3167_vm2, %v9848_v2, 0  ;;  %v2770_v36 = vadd.f32 %v2769_v5, %v2440_v9 }
 0x44a   : > { %v3882_v37 = vpack.c.bf16 %v3086_v30, %v3084_v57  ;;  %3968 = vmatpush.bf16.msra.mxu3 %v3959_v4 }
 0x44b   : > { %2479 = vmatmul.bf16.gmra.mxu0 %v9626_v0  ;;  %v3099_v19 = vadd.f32 %v3098_v11, %v2770_v36 }
 0x44e   : > { %v3100_v10 = vpop.f32.mrf.mxu2 }
 0x44f   : > { %v3755_v62 = vpop.f32.mrf.mxu3 }
 0x450   : > { %v13831_v27 = vadd.f32 %v3755_v62, %v13741_v1  ;;  %v2442_v41 = vpop.f32.mrf.mxu0  ;;  %v2760_v1 = vadd.f32 %v13792_v47, %v13788_v33  ;;  %v2774_v59 = vpop.f32.mrf.mxu1  ;;  %v2765_v47 = vadd.f32 %v2764_v16, %v13812_v48 }
 0x452   : > { %v3089_v25 = vadd.f32 %v13794_v38, %v2760_v1  ;;  %v3094_v39 = vadd.f32 %v3093_v3, %v2765_v47  ;;  %v2772_v3 = vadd.f32 %v2771_v58, %v2442_v41 }
 0x454   : > { %9844 = vmatmul.msk.bf16.vlgmr.msrb.gmra.mxu3 %vm3154_vm3, %v3882_v37  ;;  %v3883_v7 = vpack.c.bf16 %v3091_v52, %v3089_v25  ;;  %v3884_v44 = vpack.c.bf16 %v3096_v8, %v3094_v39  ;;  %v3101_v28 = vadd.f32 %v3100_v10, %v2772_v3 }
 0x456   : > { %v3103_v53 = vpop.f32.mrf.mxu2  ;;  %v3885_v32 = vpack.c.bf16 %v3101_v28, %v3099_v19 }
 0x457   : > { %v3796_v45 = vpop.f32.mrf.mxu3 }
 0x458   : > { %v13835_v55 = vadd.f32 %v3796_v45, %v13751_v61  ;;  %v2445_v14 = vpop.f32.mrf.mxu0  ;;  %v2776_v40 = vpop.f32.mrf.mxu1  ;;  %v9853_v45 = vld [vmem:[%s14193_s4 + $0x3c] sm:$0xf] }
 0x459   : > { %v2775_v18 = vadd.f32 %v2774_v59, %v2445_v14  ;;  %v4017_v58 = vsel %vm3167_vm2, %v9853_v45, 0 }
 0x45a   : > { %4026 = vmatpush.bf16.msrb.mxu3 %v4017_v58 }
 0x45b   : > { %v3104_v5 = vadd.f32 %v3103_v53, %v2775_v18 }
 0x45f   : > { %v3798_v6 = vpop.f32.mrf.mxu3 }
 0x460   : > { %v13847_v61 = vadd.f32 %v3798_v6, %v13771_v56  ;;  %v2447_v38 = vpop.f32.mrf.mxu0  ;;  %v3105_v56 = vpop.f32.mrf.mxu2 }
 0x461   : > { %v2779_v17 = vpop.f32.mrf.mxu1  ;;  %v2777_v57 = vadd.f32 %v2776_v40, %v2447_v38 }
 0x464   : > { %9845 = vmatmul.msk.bf16.gmra.mxu3 %vm3154_vm3, %v3883_v7 }
 0x467   : > { %v3801_v13 = vpop.f32.mrf.mxu3 }
 0x468   : > { %v13851_v33 = vadd.f32 %v3801_v13, %v13781_v43  ;;  %v2450_v60 = vpop.f32.mrf.mxu0  ;;  %v3108_v16 = vpop.f32.mrf.mxu2 }
 0x469   : > { %v2780_v2 = vadd.f32 %v2779_v17, %v2450_v60 }
 0x46b   : > { %v3109_v24 = vadd.f32 %v3108_v16, %v2780_v2 }
 0x46f   : > { %v3803_v26 = vpop.f32.mrf.mxu3 }
 0x470   : > { %v13855_v49 = vadd.f32 %v3803_v26, %v13797_v46  ;;  %v2452_v22 = vpop.f32.mrf.mxu0  ;;  %v2781_v46 = vpop.f32.mrf.mxu1 }
 0x471   : > { %v3110_v31 = vpop.f32.mrf.mxu2  ;;  %v2782_v4 = vadd.f32 %v2781_v46, %v2452_v22 }
 0x473   : > { %v3111_v10 = vadd.f32 %v3110_v31, %v2782_v4 }
 0x474   : > { %9846 = vmatmul.msk.bf16.gmra.mxu3 %vm3154_vm3, %v3884_v44 }
 0x475   : > { %v3941_v14 = vpack.c.bf16 %v3111_v10, %v3109_v24 }
 0x477   : > { %v3806_v43 = vpop.f32.mrf.mxu3 }
 0x478   : > { %v13859_v48 = vadd.f32 %v3806_v43, %v13805_v50  ;;  %v2455_v9 = vpop.f32.mrf.mxu0  ;;  %v2784_v23 = vpop.f32.mrf.mxu1 }
 0x479   : > { %v3113_v30 = vpop.f32.mrf.mxu2  ;;  %v2785_v13 = vadd.f32 %v2784_v23, %v2455_v9 }
 0x47b   : > { %v3114_v38 = vadd.f32 %v3113_v30, %v2785_v13 }
 0x47f   : > { %v3808_v34 = vpop.f32.mrf.mxu3 }
 0x480   : > { %v13862_v35 = vadd.f32 %v3808_v34, %v13817_v54  ;;  %v3106_v54 = vadd.f32 %v3105_v56, %v2777_v57  ;;  %v2457_v63 = vpop.f32.mrf.mxu0  ;;  %v2786_v11 = vpop.f32.mrf.mxu1 }
 0x481   : > { %v3115_v37 = vpop.f32.mrf.mxu2  ;;  %v2787_v47 = vadd.f32 %v2786_v11, %v2457_v63 }
 0x482   : > { %v3940_v62 = vpack.c.bf16 %v3106_v54, %v3104_v5 }
 0x483   : > { %v3116_v40 = vadd.f32 %v3115_v37, %v2787_v47 }
 0x484   : > { %9847 = vmatmul.msk.bf16.gmra.mxu3 %vm3154_vm3, %v3885_v32 }
 0x485   : > { %v3942_v56 = vpack.c.bf16 %v3116_v40, %v3114_v38 }
 0x487   : > { %v3811_v15 = vpop.f32.mrf.mxu3 }
 0x488   : > { %v13866_v50 = vadd.f32 %v3811_v15, %v13821_v21  ;;  %v2789_v1 = vpop.f32.mrf.mxu1 }
 0x489   : > { %v3118_v6 = vpop.f32.mrf.mxu2 }
 0x48f   : > { %v3813_v0 = vpop.f32.mrf.mxu3 }
 0x490   : > { %v13869_v42 = vadd.f32 %v3813_v0, %v13831_v27  ;;  %v2460_v27 = vpop.f32.mrf.mxu0  ;;  %v2791_v7 = vpop.f32.mrf.mxu1 }
 0x491   : > { %v3120_v29 = vpop.f32.mrf.mxu2  ;;  %v2790_v17 = vadd.f32 %v2789_v1, %v2460_v27 }
 0x493   : > { %v3119_v36 = vadd.f32 %v3118_v6, %v2790_v17  ;;  %v11806_v17 = vld [vmem:[#allocation7 + $0x18] sm:$0xff] }
 0x494   : > { %9849 = vmatmul.msk.bf16.vlgmr.msra.gmra.mxu3 %vm3154_vm3, %v3940_v62  ;;  %4695 = vmatpush.bf16.msrb.mxu0 %v11806_v17 }
 0x497   : > { %v3854_v21 = vpop.f32.mrf.mxu3 }
 0x498   : > { %v3874_v41 = vadd.f32 %v3854_v21, %v13835_v55  ;;  %v2462_v55 = vpop.f32.mrf.mxu0  ;;  %v2794_v26 = vpop.f32.mrf.mxu1 }
 0x499   : > { %v3123_v44 = vpop.f32.mrf.mxu2 }
 0x49f   : > { %v3856_v25 = vpop.f32.mrf.mxu3 }
 0x4a0   : > { %v13878_v52 = vadd.f32 %v3856_v25, %v13847_v61  ;;  %v2465_v61 = vpop.f32.mrf.mxu0  ;;  %v2796_v16 = vpop.f32.mrf.mxu1 }
 0x4a1   : > { %v3125_v28 = vpop.f32.mrf.mxu2  ;;  %v2795_v51 = vadd.f32 %v2794_v26, %v2465_v61 }
 0x4a3   : > { %v3124_v9 = vadd.f32 %v3123_v44, %v2795_v51 }
 0x4a4   : > { %9850 = vmatmul.msk.bf16.gmra.mxu3 %vm3154_vm3, %v3941_v14 }
 0x4a7   : > { %v3859_v59 = vpop.f32.mrf.mxu3 }
 0x4a8   : > { %v3876_v53 = vadd.f32 %v3859_v59, %v13851_v33  ;;  %v2792_v33 = vadd.f32 %v2791_v7, %v2462_v55  ;;  %v2467_v43 = vpop.f32.mrf.mxu0  ;;  %v2799_v46 = vpop.f32.mrf.mxu1  ;;  %v11814_v7 = vld [vmem:[#allocation7 + $0x58] sm:$0xff] }
 0x4a9   : > { %v2797_v15 = vadd.f32 %v2796_v16, %v2467_v43  ;;  %4633 = vmatpush.bf16.msrb.mxu2 %v11814_v7 }
 0x4aa   : > { %v3121_v3 = vadd.f32 %v3120_v29, %v2792_v33 }
 0x4ab   : > { %v3126_v20 = vadd.f32 %v3125_v28, %v2797_v15  ;;  %v13929_v15 = vld [vmem:[%s14197_s8] ss:$0 sm:$0xff] }
 0x4ac   : > { %v3943_v22 = vpack.c.bf16 %v3121_v3, %v3119_v36  ;;  %v11822_v36 = vld [vmem:[#allocation7 + $0x98] sm:$0xff] }
 0x4ad   : > { %4775 = vmatpush.bf16.msrb.mxu1 %v11822_v36 }
 0x4af   : > { %v3861_v39 = vpop.f32.mrf.mxu3 }
 0x4b0   : > { %v13883_v8 = vadd.f32 %v3861_v39, %v13855_v49  ;;  %v2470_v34 = vpop.f32.mrf.mxu0  ;;  %v2801_v57 = vpop.f32.mrf.mxu1 }
 0x4b1   : > { %v2800_v63 = vadd.f32 %v2799_v46, %v2470_v34  ;;  %v12413_v34 = vmov 0  }
 0x4b2   : > { %560 = vst [vmem:[#allocation2 + $0x4] sm:$0xf] %v12413_v34 }
 0x4b3   : > { %561 = vst [vmem:[#allocation2 + $0x8] sm:$0xf] %v12413_v34 }
 0x4b4   : > { %9851 = vmatmul.msk.bf16.gmra.mxu3 %vm3154_vm3, %v3942_v56  ;;  %559 = vst [vmem:[#allocation2] sm:$0xf] %v12413_v34 }
 0x4b5   : > { %562 = vst [vmem:[#allocation2 + $0xc] sm:$0xf] %v12413_v34 }
 0x4b6   : > { %563 = vst [vmem:[#allocation2 + $0x10] sm:$0xf] %v12413_v34 }
 0x4b7   : > { %v3864_v60 = vpop.f32.mrf.mxu3  ;;  %564 = vst [vmem:[#allocation2 + $0x14] sm:$0xf] %v12413_v34 }
 0x4b8   : > { %v3878_v12 = vadd.f32 %v3864_v60, %v13859_v48  ;;  %v3128_v48 = vpop.f32.mrf.mxu2  ;;  %v2472_v23 = vpop.f32.mrf.mxu0  ;;  %565 = vst [vmem:[#allocation2 + $0x18] sm:$0xf] %v12413_v34 }
 0x4b9   : > { %v2802_v11 = vadd.f32 %v2801_v57, %v2472_v23  ;;  %v3129_v37 = vadd.f32 %v3128_v48, %v2800_v63  ;;  %566 = vst [vmem:[#allocation2 + $0x1c] sm:$0xf] %v12413_v34 }
 0x4ba   : > { %567 = vst [vmem:[#allocation2 + $0x20] sm:$0xf] %v12413_v34 }
 0x4bb   : > { %568 = vst [vmem:[#allocation2 + $0x24] sm:$0xf] %v12413_v34 }
 0x4bc   : > { %569 = vst [vmem:[#allocation2 + $0x28] sm:$0xf] %v12413_v34 }
 0x4bd   : > { %570 = vst [vmem:[#allocation2 + $0x2c] sm:$0xf] %v12413_v34 }
 0x4be   : > { %571 = vst [vmem:[#allocation2 + $0x30] sm:$0x3] %v12413_v34 }
 0x4bf   : > { %v3866_v19 = vpop.f32.mrf.mxu3  ;;  %572 = vst [vmem:[#allocation3] sm:$0xf] %v12413_v34 }
 0x4c0   : > { %v13888_v49 = vadd.f32 %v3866_v19, %v13862_v35  ;;  %v3998_v35 = vpack.c.bf16 %v3126_v20, %v3124_v9  ;;  %v3130_v5 = vpop.f32.mrf.mxu2  ;;  %v2475_v62 = vpop.f32.mrf.mxu0  ;;  %573 = vst [vmem:[#allocation3 + $0x4] sm:$0xf] %v12413_v34 }
 0x4c1   : > { %v3131_v45 = vadd.f32 %v3130_v5, %v2802_v11  ;;  %574 = vst [vmem:[#allocation3 + $0x8] sm:$0xf] %v12413_v34 }
 0x4c2   : > { %575 = vst [vmem:[#allocation3 + $0xc] sm:$0xf] %v12413_v34 }
 0x4c3   : > { %v3999_v2 = vpack.c.bf16 %v3131_v45, %v3129_v37  ;;  %576 = vst [vmem:[#allocation3 + $0x10] sm:$0x3] %v12413_v34 }
 0x4c4   : > { %9852 = vmatmul.msk.bf16.gmra.mxu3 %vm3154_vm3, %v3943_v22  ;;  %577 = vst [vmem:[#allocation4] sm:$0xf] %v12413_v34 }
 0x4c5   : > { %578 = vst [vmem:[#allocation4 + $0x4] sm:$0xf] %v12413_v34 }
 0x4c7   : > { %v3869_v32 = vpop.f32.mrf.mxu3 }
 0x4c8   : > { %v3880_v31 = vadd.f32 %v3869_v32, %v13866_v50  ;;  %v2804_v50 = vpop.f32.mrf.mxu1  ;;  %v3133_v21 = vpop.f32.mrf.mxu2 }
 0x4c9   : > { %v2477_v4 = vpop.f32.mrf.mxu0 }
 0x4cf   : > { %v3871_v18 = vpop.f32.mrf.mxu3 }
 0x4d0   : > { %v13893_v30 = vadd.f32 %v3871_v18, %v13869_v42  ;;  %v2806_v42 = vpop.f32.mrf.mxu1  ;;  %v3135_v27 = vpop.f32.mrf.mxu2 }
 0x4d1   : > { %v2807_v10 = vadd.f32 %v2806_v42, %v2477_v4  ;;  %v2480_v25 = vpop.f32.mrf.mxu0  ;;  %v4104_v4 = vld [vmem:[#allocation2 + $0x8] sm:$0x3] }
 0x4d3   : > { %v3136_v55 = vadd.f32 %v3135_v27, %v2807_v10 }
 0x4d4   : > { %9854 = vmatmul.msk.bf16.vlgmr.msrb.gmra.mxu3 %vm3154_vm3, %v3998_v35 }
 0x4d7   : > { %v3912_v54 = vpop.f32.mrf.mxu3 }
 0x4d8   : > { %v13896_v0 = vadd.f32 %v3912_v54, %v3874_v41  ;;  %v2805_v41 = vadd.f32 %v2804_v50, %v2475_v62  ;;  %v2809_v6 = vpop.f32.mrf.mxu1  ;;  %v3138_v13 = vpop.f32.mrf.mxu2 }
 0x4d9   : > { %v2482_v29 = vpop.f32.mrf.mxu0 }
 0x4da   : > { %v3134_v14 = vadd.f32 %v3133_v21, %v2805_v41 }
 0x4dc   : > { %v4000_v47 = vpack.c.bf16 %v3136_v55, %v3134_v14 }
 0x4df   : > { %v13898_v58 = vpop.f32.mrf.mxu3 }
 0x4e0   : > { %v2811_v38 = vpop.f32.mrf.mxu1  ;;  %v3140_v26 = vpop.f32.mrf.mxu2  ;;  %v3933_v18 = vadd.f32 %v13898_v58, %v13878_v52  ;;  %v4098_v52 = vld [vmem:[#allocation2 + $0x4] sm:$0xe] }
 0x4e1   : > { %v2812_v61 = vadd.f32 %v2811_v38, %v2482_v29  ;;  %v4121_v38 = vld [vmem:[#allocation2 + $0x8] sm:$0xc]  ;;  %v5902_v29 = vld [vmem:[#allocation3 + $0x8] sm:$0xe] }
 0x4e3   : > { %v3141_v44 = vadd.f32 %v3140_v26, %v2812_v61 }
 0x4e4   : > { %9855 = vmatmul.msk.bf16.gmra.mxu3 %vm3154_vm3, %v3999_v2 }
 0x4e7   : > { %v3917_v1 = vpop.f32.mrf.mxu3 }
 0x4e8   : > { %v13901_v24 = vadd.f32 %v3917_v1, %v3876_v53  ;;  %v2810_v53 = vadd.f32 %v2809_v6, %v2480_v25 }
 0x4ea   : > { %v3139_v56 = vadd.f32 %v3138_v13, %v2810_v53 }
 0x4ec   : > { %v4001_v33 = vpack.c.bf16 %v3141_v44, %v3139_v56  ;;  %v4127_v56 = vld [vmem:[#allocation2 + $0xc] sm:$0x7] }
 0x4ef   : > { %v13903_v59 = vpop.f32.mrf.mxu3 }
 0x4f4   : > { %9856 = vmatmul.msk.bf16.gmra.mxu3 %vm3154_vm3, %v4000_v47  ;;  %v3935_v47 = vadd.f32 %v13903_v59, %v13883_v8 }
 0x4f7   : > { %v3922_v40 = vpop.f32.mrf.mxu3 }
 0x4f8   : > { %v13906_v39 = vadd.f32 %v3922_v40, %v3878_v12 }
 0x4ff   : > { %v13908_v60 = vpop.f32.mrf.mxu3 }
 0x504   : > { %9857 = vmatmul.msk.bf16.gmra.mxu3 %vm3154_vm3, %v4001_v33  ;;  %vm13968_vm3 = vmand %vm4141_vm15, %vm4142_vm1  ;;  %vm4169_vm15 = vsmask.f32 256 }
 0x505   : > { %vm13985_vm1 = vmand %vm3167_vm2, %vm4163_vm10  ;;  %vm4405_vm2 = vcmask 818176  }
 0x506   : > { %vm13990_vm5 = vmand %vm4168_vm12, %vm4169_vm15 }
 0x507   : > { %v3927_v43 = vpop.f32.mrf.mxu3 }
 0x508   : > { %v13911_v16 = vadd.f32 %v3927_v43, %v3880_v31 }
 0x50f   : > { %v13913_v3 = vpop.f32.mrf.mxu3 }
 0x517   : > { %v3970_v12 = vpop.f32.mrf.mxu3 }
 0x518   : > { %v3990_v51 = vadd.f32 %v3970_v12, %v13896_v0 }
 0x51f   : > { %v3972_v19 = vpop.f32.mrf.mxu3 }
 0x520   : > { %v3991_v35 = vadd.f32 %v3972_v19, %v3933_v18 }
 0x527   : > { %v3975_v28 = vpop.f32.mrf.mxu3 }
 0x528   : > { %v3992_v42 = vadd.f32 %v3975_v28, %v13901_v24  ;;  %v4144_v28 = vld [vmem:[#allocation2 + $0xc] sm:$0x8] }
 0x52f   : > { %v13915_v22 = vpop.f32.mrf.mxu3 }
 0x530   : > { %v3993_v61 = vadd.f32 %v13915_v22, %v3935_v47  ;;  %v11805_v47 = vld [vmem:[#allocation7 + $0x10] sm:$0xff] }
 0x531   : > { %4696 = vmatpush.bf16.msrb.mxu0 %v11805_v47 }
 0x537   : > { %v13917_v46 = vpop.f32.mrf.mxu3 }
 0x53f   : > { %v13919_v32 = vpop.f32.mrf.mxu3 }
 0x547   : > { %v13921_v31 = vpop.f32.mrf.mxu3 }
 0x54f   : > { %v13923_v48 = vpop.f32.mrf.mxu3 }
 0x557   : > { %v4028_v9 = vpop.f32.mrf.mxu3 }
 0x558   : > { %v4048_v20 = vadd.f32 %v4028_v9, %v3990_v51 }
 0x55a   : > { %v4060_v23 = vadd.f32 %v13929_v15, %v4048_v20 }
 0x55c   : > { %v4068_v57 = vmax.f32 %v4060_v23, 0.0 }
 0x55e   : > { %v4076_v5 = vpack.c.bf16 %v4068_v57, %v4068_v57  ;;  %v4150_v57 = vld [vmem:[#allocation2 + $0x10] sm:$0xf] }
 0x55f   : > { %v4030_v54 = vpop.f32.mrf.mxu3 }
 0x560   : > { %v4085_v62 = vshrl.u32 %v4076_v5, 16  ;;  %v4088_v50 = vshll.u32 %v4076_v5, 16  ;;  %v4049_v0 = vadd.f32 %v4030_v54, %v3991_v35  ;;  %v3994_v35 = vadd.f32 %v13917_v46, %v13906_v39  ;;  %v4165_v46 = vld [vmem:[#allocation2 + $0x14] sm:$0xf] }
 0x562   : > { %v4087_v63 = vrot.slane %v4085_v62, 6  ;;  %v4090_v11 = vrot.slane %v4088_v50, 7  ;;  %v4061_v21 = vadd.f32 %v13929_v15, %v4049_v0 }
 0x564   : > { %v4091_v45 = vor.u32 %v4090_v11, %v4087_v63  ;;  %v4069_v58 = vmax.f32 %v4061_v21, 0.0 }
 0x566   : > { %v4092_v27 = vrot.slane %v4091_v45, 4  ;;  %v4099_v1 = vsel %vm13936_vm7, %v4091_v45, %v4098_v52  ;;  %v4077_v41 = vpack.c.bf16 %v4069_v58, %v4069_v58  ;;  %v4171_v58 = vld [vmem:[#allocation2 + $0x18] sm:$0x1]  ;;  %v11787_v52 = vld [vmem:[%s14190_s1] sm:$0xff] }
 0x567   : > { %4100 = vst [vmem:[#allocation2 + $0x4] sm:$0xe] %v4099_v1  ;;  %v4033_v10 = vpop.f32.mrf.mxu3 }
 0x568   : > { %v4105_v25 = vsel %vm13941_vm8, %v4092_v27, %v4104_v4  ;;  %v4108_v6 = vshrl.u32 %v4077_v41, 16  ;;  %v4111_v14 = vshll.u32 %v4077_v41, 16  ;;  %v4050_v55 = vadd.f32 %v4033_v10, %v3992_v42 }
 0x569   : > { %4106 = vst [vmem:[#allocation2 + $0x8] sm:$0x3] %v4105_v25  ;;  %v3937_v4 = vadd.f32 %v13908_v60, %v13888_v49  ;;  %v11813_v49 = vld [vmem:[#allocation7 + $0x50] sm:$0xff] }
 0x56a   : > { %v4110_v7 = vrot.slane %v4108_v6, 5  ;;  %v4113_v13 = vrot.slane %v4111_v14, 6  ;;  %v4062_v24 = vadd.f32 %v13929_v15, %v4050_v55  ;;  %v4253_v55 = vld [vmem:[#allocation2 + $0x30] sm:$0x3]  ;;  %4634 = vmatpush.bf16.msrb.mxu2 %v11813_v49 }
 0x56b   : > { %v3995_v41 = vadd.f32 %v13919_v32, %v3937_v4  ;;  %v4391_v60 = vunpack.c.l.b16 %v4253_v55  ;;  %v4235_v55 = vld [vmem:[#allocation2 + $0x28] sm:$0xf] }
 0x56c   : > { %v4114_v40 = vor.u32 %v4113_v13, %v4110_v7  ;;  %v4070_v53 = vmax.f32 %v4062_v24, 0.0 }
 0x56e   : > { %v4115_v44 = vrot.slane %v4114_v40, 4  ;;  %v4122_v8 = vsel %vm13954_vm13, %v4114_v40, %v4121_v38  ;;  %v4078_v59 = vpack.c.bf16 %v4070_v53, %v4070_v53  ;;  %v11821_v38 = vld [vmem:[#allocation7 + $0x90] sm:$0xff] }
 0x56f   : > { %4123 = vst [vmem:[#allocation2 + $0x8] sm:$0xc] %v4122_v8  ;;  %v4035_v17 = vpop.f32.mrf.mxu3  ;;  %4776 = vmatpush.bf16.msrb.mxu1 %v11821_v38 }
 0x570   : > { %v4128_v33 = vsel %vm13960_vm14, %v4115_v44, %v4127_v56  ;;  %v4131_v43 = vshll.u32 %v4078_v59, 16  ;;  %v4134_v36 = vshrl.u32 %v4078_v59, 16  ;;  %v4051_v12 = vadd.f32 %v4035_v17, %v3993_v61  ;;  %v4185_v56 = vld [vmem:[#allocation2 + $0x18] sm:$0xe]  ;;  %v4188_v17 = vld [vmem:[#allocation2 + $0x1c] sm:$0x3] }
 0x571   : > { %4129 = vst [vmem:[#allocation2 + $0xc] sm:$0x7] %v4128_v33  ;;  %v4398_v61 = vpack.c.b16 %v4391_v60, %v4391_v60  ;;  %v3996_v33 = vadd.f32 %v13921_v31, %v13911_v16  ;;  %v3939_v16 = vadd.f32 %v13913_v3, %v13893_v30  ;;  %v4219_v30 = vld [vmem:[#allocation2 + $0x20] sm:$0x8] }
 0x572   : > { %v4133_v22 = vrot.slane %v4131_v43, 5  ;;  %v4136_v34 = vrot.slane %v4134_v36, 4  ;;  %v4063_v51 = vadd.f32 %v13929_v15, %v4051_v12 }
 0x573   : > { %v4455_v59 = vsel %vm2152_vm0, %v4398_v61, 0  ;;  %v11789_v61 = vld [vmem:[%s14190_s1 + $0x10] sm:$0xff] }
 0x574   : > { %v4137_v9 = vor.u32 %v4136_v34, %v4133_v22  ;;  %v4145_v20 = vsel %vm13968_vm3, %v4133_v22, %v4144_v28  ;;  %v4071_v23 = vmax.f32 %v4063_v51, 0.0  ;;  %4458 = vmatpush.bf16.msra.mxu3 %v4455_v59  ;;  %v11804_v59 = vld [vmem:[#allocation7 + $0x8] sm:$0xff] }
 0x575   : > { %4146 = vst [vmem:[#allocation2 + $0xc] sm:$0x8] %v4145_v20  ;;  %4697 = vmatpush.bf16.msrb.mxu0 %v11804_v59  ;;  %v11851_v59 = vld [vmem:[#allocation7 + $0x180] sm:$0xff] }
 0x576   : > { %v4138_v5 = vrot.slane %v4137_v9, 4  ;;  %v4079_v54 = vpack.c.bf16 %v4071_v23, %v4071_v23 }
 0x577   : > { %v4038_v62 = vpop.f32.mrf.mxu3 }
 0x578   : > { %v4151_v50 = vsel %vm13976_vm6, %v4138_v5, %v4150_v57  ;;  %v4154_v0 = vshrl.u32 %v4079_v54, 16  ;;  %v4052_v63 = vadd.f32 %v4038_v62, %v3994_v35  ;;  %v4157_v21 = vshll.u32 %v4079_v54, 16  ;;  %v4202_v35 = vld [vmem:[#allocation2 + $0x1c] sm:$0xc]  ;;  %v4205_v5 = vld [vmem:[#allocation2 + $0x20] sm:$0x7] }
 0x579   : > { %4152 = vst [vmem:[#allocation2 + $0x10] sm:$0xf] %v4151_v50  ;;  %v3997_v54 = vadd.f32 %v13923_v48, %v3939_v16 }
 0x57a   : > { %v4156_v11 = vrot.slane %v4154_v0, 7  ;;  %v4064_v39 = vadd.f32 %v13929_v15, %v4052_v63 }
 0x57c   : > { %v4159_v42 = vor.u32 %v4157_v21, %v4156_v11  ;;  %v4160_v27 = vrot.slane %v4156_v11, 4  ;;  %v4072_v1 = vmax.f32 %v4064_v39, 0.0 }
 0x57e   : > { %v4166_v10 = vsel %vm13985_vm1, %v4159_v42, %v4165_v46  ;;  %v4172_v25 = vsel %vm13990_vm5, %v4160_v27, %v4171_v58  ;;  %v4080_v6 = vpack.c.bf16 %v4072_v1, %v4072_v1  ;;  %v4222_v1 = vld [vmem:[#allocation2 + $0x24] sm:$0xf] }
 0x57f   : > { %4167 = vst [vmem:[#allocation2 + $0x14] sm:$0xf] %v4166_v10  ;;  %v4040_v14 = vpop.f32.mrf.mxu3 }
 0x580   : > { %4173 = vst [vmem:[#allocation2 + $0x18] sm:$0x1] %v4172_v25  ;;  %v4175_v7 = vshrl.u32 %v4080_v6, 16  ;;  %v4178_v13 = vshll.u32 %v4080_v6, 16  ;;  %v4053_v24 = vadd.f32 %v4040_v14, %v3995_v41 }
 0x582   : > { %v4177_v40 = vrot.slane %v4175_v7, 6  ;;  %v4180_v32 = vrot.slane %v4178_v13, 7  ;;  %v4065_v53 = vadd.f32 %v13929_v15, %v4053_v24  ;;  %v4238_v7 = vld [vmem:[#allocation2 + $0x2c] sm:$0x1] }
 0x584   : > { %v4181_v44 = vor.u32 %v4180_v32, %v4177_v40  ;;  %v4073_v8 = vmax.f32 %v4065_v53, 0.0  ;;  %v11782_v40 = vld [vmem:[#allocation2 + $0x8] sm:$0xff]  ;;  %v11781_v32 = vld [vmem:[#allocation2] sm:$0xff] }
 0x585   : > { %v11788_v53 = vld [vmem:[%s14190_s1 + $0x8] sm:$0xff] }
 0x586   : > { %v4182_v43 = vrot.slane %v4181_v44, 4  ;;  %v4186_v36 = vsel %vm13936_vm7, %v4181_v44, %v4185_v56  ;;  %v4081_v12 = vpack.c.bf16 %v4073_v8, %v4073_v8  ;;  %v11783_v38 = vld [vmem:[#allocation2 + $0x10] sm:$0xff]  ;;  %v11790_v56 = vld [vmem:[%s14190_s1 + $0x18] sm:$0xff]  ;;  %v11791_v8 = vld [vmem:[%s14190_s1 + $0x20] sm:$0xff]  ;;  %vm5900_vm7 = vsmask.f32 3334 }
 0x587   : > { %4187 = vst [vmem:[#allocation2 + $0x18] sm:$0xe] %v4186_v36  ;;  %v4043_v28 = vpop.f32.mrf.mxu3  ;;  %v11812_v44 = vld [vmem:[#allocation7 + $0x48] sm:$0xff]  ;;  %v11803_v36 = vld [vmem:[#allocation7] sm:$0xff] }
 0x588   : > { %v4189_v22 = vsel %vm13941_vm8, %v4182_v43, %v4188_v17  ;;  %v4192_v34 = vshrl.u32 %v4081_v12, 16  ;;  %v4195_v51 = vshll.u32 %v4081_v12, 16  ;;  %v4054_v9 = vadd.f32 %v4043_v28, %v3996_v33  ;;  %4635 = vmatpush.bf16.msrb.mxu2 %v11812_v44  ;;  %v11820_v17 = vld [vmem:[#allocation7 + $0x88] sm:$0xff]  ;;  %v11792_v33 = vld [vmem:[%s14190_s1 + $0x28] sm:$0xff]  ;;  %v11793_v43 = vld [vmem:[%s14190_s1 + $0x30] sm:$0xff]  ;;  %4698 = vmatpush.bf16.msrb.mxu0 %v11803_v36 }
 0x589   : > { %4190 = vst [vmem:[#allocation2 + $0x1c] sm:$0x3] %v4189_v22  ;;  %4777 = vmatpush.bf16.msrb.mxu1 %v11820_v17  ;;  %v11794_v12 = vld [vmem:[%s14190_s1 + $0x38] sm:$0xff]  ;;  %v11811_v28 = vld [vmem:[#allocation7 + $0x40] sm:$0xff]  ;;  %v11795_v22 = vld [vmem:[%s14190_s1 + $0x40] sm:$0xff] }
 0x58a   : > { %v4194_v20 = vrot.slane %v4192_v34, 5  ;;  %v4197_v23 = vrot.slane %v4195_v51, 6  ;;  %v4066_v57 = vadd.f32 %v13929_v15, %v4054_v9  ;;  %v11834_v34 = vld [vmem:[#allocation7 + $0xf8] sm:$0xff]  ;;  %v11833_v51 = vld [vmem:[#allocation7 + $0xf0] sm:$0xff]  ;;  %v11852_v44 = vld [vmem:[#allocation7 + $0x188] sm:$0xff] }
 0x58b   : > { %v11863_v17 = vld [vmem:[#allocation7 + $0x1e0] sm:$0xff]  ;;  %v11800_v36 = vld [vmem:[%s14190_s1 + $0x68] sm:$0xff] }
 0x58c   : > { %v4198_v31 = vor.u32 %v4197_v23, %v4194_v20  ;;  %v4074_v37 = vmax.f32 %v4066_v57, 0.0  ;;  %4636 = vmatpush.bf16.msrb.mxu2 %v11811_v28  ;;  %v11832_v20 = vld [vmem:[#allocation7 + $0xe8] sm:$0xff]  ;;  %v11819_v23 = vld [vmem:[#allocation7 + $0x80] sm:$0xff]  ;;  %v11874_v28 = vld [vmem:[#allocation7 + $0x238] sm:$0xff] }
 0x58d   : > { %v11831_v57 = vld [vmem:[#allocation7 + $0xe0] sm:$0xff]  ;;  %4778 = vmatpush.bf16.msrb.mxu1 %v11819_v23 }
 0x58e   : > { %v4199_v62 = vrot.slane %v4198_v31, 4  ;;  %v4203_v50 = vsel %vm13954_vm13, %v4198_v31, %v4202_v35  ;;  %v4082_v0 = vpack.c.bf16 %v4074_v37, %v4074_v37  ;;  %v11796_v31 = vld [vmem:[%s14190_s1 + $0x48] sm:$0xff]  ;;  %v11859_v23 = vld [vmem:[#allocation7 + $0x1c0] sm:$0xff] }
 0x58f   : > { %4204 = vst [vmem:[#allocation2 + $0x1c] sm:$0xc] %v4203_v50  ;;  %v4045_v63 = vpop.f32.mrf.mxu3  ;;  %v11830_v37 = vld [vmem:[#allocation7 + $0xd8] sm:$0xff] }
 0x590   : > { %v4206_v11 = vsel %vm13960_vm14, %v4199_v62, %v4205_v5  ;;  %v4209_v21 = vshll.u32 %v4082_v0, 16  ;;  %v4212_v39 = vshrl.u32 %v4082_v0, 16  ;;  %v4055_v46 = vadd.f32 %v4045_v63, %v3997_v54  ;;  %4853 = vmatpush.bf16.msra.mxu2 %v11834_v34  ;;  %v11842_v5 = vld [vmem:[#allocation7 + $0x138] sm:$0xff]  ;;  %v11829_v54 = vld [vmem:[#allocation7 + $0xd0] sm:$0xff]  ;;  %v11828_v0 = vld [vmem:[#allocation7 + $0xc8] sm:$0xff] }
 0x591   : > { %4207 = vst [vmem:[#allocation2 + $0x20] sm:$0x7] %v4206_v11  ;;  %4935 = vmatpush.bf16.msra.mxu0 %v11842_v5  ;;  %v11841_v62 = vld [vmem:[#allocation7 + $0x130] sm:$0xff]  ;;  %v11840_v63 = vld [vmem:[#allocation7 + $0x128] sm:$0xff]  ;;  %v11827_v11 = vld [vmem:[#allocation7 + $0xc0] sm:$0xff] }
 0x592   : > { %v4211_v3 = vrot.slane %v4209_v21, 5  ;;  %v4214_v58 = vrot.slane %v4212_v39, 4  ;;  %v4067_v4 = vadd.f32 %v13929_v15, %v4055_v46  ;;  %v11839_v21 = vld [vmem:[#allocation7 + $0x120] sm:$0xff]  ;;  %v11873_v34 = vld [vmem:[#allocation7 + $0x230] sm:$0xff]  ;;  %v11882_v5 = vld [vmem:[#allocation7 + $0x278] sm:$0xff] }
 0x593   : > { %vm5910_vm14 = vsmask.f32 2306 }
 0x594   : > { %v4215_v48 = vor.u32 %v4214_v58, %v4211_v3  ;;  %v4220_v42 = vsel %vm13968_vm3, %v4211_v3, %v4219_v30  ;;  %v4075_v27 = vmax.f32 %v4067_v4, 0.0  ;;  %4854 = vmatpush.bf16.msra.mxu2 %v11833_v51  ;;  %v11797_v30 = vld [vmem:[%s14190_s1 + $0x50] sm:$0xff]  ;;  %v11838_v3 = vld [vmem:[#allocation7 + $0x118] sm:$0xff]  ;;  %v11837_v4 = vld [vmem:[#allocation7 + $0x110] sm:$0xff] }
 0x595   : > { %4221 = vst [vmem:[#allocation2 + $0x20] sm:$0x8] %v4220_v42  ;;  %4936 = vmatpush.bf16.msra.mxu0 %v11841_v62  ;;  %v11850_v58 = vld [vmem:[#allocation7 + $0x178] sm:$0xff]  ;;  %v11881_v62 = vld [vmem:[#allocation7 + $0x270] sm:$0xff] }
 0x596   : > { %v4216_v41 = vrot.slane %v4215_v48, 4  ;;  %v4083_v10 = vpack.c.bf16 %v4075_v27, %v4075_v27  ;;  %v11784_v47 = vld [vmem:[#allocation2 + $0x18] sm:$0xff]  ;;  %5017 = vmatpush.bf16.msra.mxu1 %v11850_v58  ;;  %v11849_v48 = vld [vmem:[#allocation7 + $0x170] sm:$0xff]  ;;  %v11890_v58 = vld [vmem:[#allocation7 + $0x2b8] sm:$0xff] }
 0x597   : > { %v11836_v27 = vld [vmem:[#allocation7 + $0x108] sm:$0xff] }
 0x598   : > { %v4223_v26 = vsel %vm13976_vm6, %v4216_v41, %v4222_v1  ;;  %v4226_v25 = vshrl.u32 %v4083_v10, 16  ;;  %v4229_v14 = vshll.u32 %v4083_v10, 16  ;;  %4855 = vmatpush.bf16.msra.mxu2 %v11832_v20  ;;  %v11848_v1 = vld [vmem:[#allocation7 + $0x168] sm:$0xff]  ;;  %v11835_v41 = vld [vmem:[#allocation7 + $0x100] sm:$0xff] }
 0x599   : > { %4224 = vst [vmem:[#allocation2 + $0x24] sm:$0xf] %v4223_v26  ;;  %4937 = vmatpush.bf16.msra.mxu0 %v11840_v63  ;;  %v11847_v10 = vld [vmem:[#allocation7 + $0x160] sm:$0xff]  ;;  %v11872_v20 = vld [vmem:[#allocation7 + $0x228] sm:$0xff] }
 0x59a   : > { %v4228_v6 = vrot.slane %v4226_v25, 7  ;;  %5018 = vmatpush.bf16.msra.mxu1 %v11849_v48  ;;  %v11880_v63 = vld [vmem:[#allocation7 + $0x268] sm:$0xff]  ;;  %v11889_v48 = vld [vmem:[#allocation7 + $0x2b0] sm:$0xff] }
 0x59c   : > { %v4231_v13 = vor.u32 %v4229_v14, %v4228_v6  ;;  %v4232_v15 = vrot.slane %v4228_v6, 4  ;;  %4856 = vmatpush.bf16.msra.mxu2 %v11831_v57  ;;  %v11798_v6 = vld [vmem:[%s14190_s1 + $0x58] sm:$0xff]  ;;  %v11846_v14 = vld [vmem:[#allocation7 + $0x158] sm:$0xff]  ;;  %v11871_v57 = vld [vmem:[#allocation7 + $0x220] sm:$0xff] }
 0x59d   : > { %4938 = vmatpush.bf16.msra.mxu0 %v11839_v21  ;;  %v11879_v21 = vld [vmem:[#allocation7 + $0x260] sm:$0xff] }
 0x59e   : > { %v4236_v24 = vsel %vm13985_vm1, %v4231_v13, %v4235_v55  ;;  %v4239_v49 = vsel %vm13990_vm5, %v4232_v15, %v4238_v7  ;;  %5019 = vmatpush.bf16.msra.mxu1 %v11848_v1  ;;  %v11858_v55 = vld [vmem:[#allocation7 + $0x1b8] sm:$0xff]  ;;  %v11845_v7 = vld [vmem:[#allocation7 + $0x150] sm:$0xff]  ;;  %v11888_v1 = vld [vmem:[#allocation7 + $0x2a8] sm:$0xff] }
 0x59f   : > { %4237 = vst [vmem:[#allocation2 + $0x28] sm:$0xf] %v4236_v24  ;;  %v11857_v13 = vld [vmem:[#allocation7 + $0x1b0] sm:$0xff]  ;;  %v11844_v24 = vld [vmem:[#allocation7 + $0x148] sm:$0xff] }
 0x5a0   : > { %4240 = vst [vmem:[#allocation2 + $0x2c] sm:$0x1] %v4239_v49  ;;  %v11785_v18 = vld [vmem:[#allocation2 + $0x20] sm:$0xff]  ;;  %4857 = vmatpush.bf16.msra.mxu2 %v11830_v37  ;;  %v11856_v49 = vld [vmem:[#allocation7 + $0x1a8] sm:$0xff]  ;;  %v11870_v37 = vld [vmem:[#allocation7 + $0x218] sm:$0xff] }
 0x5a1   : > { %4939 = vmatpush.bf16.msra.mxu0 %v11838_v3  ;;  %v11878_v3 = vld [vmem:[#allocation7 + $0x258] sm:$0xff] }
 0x5a2   : > { %5020 = vmatpush.bf16.msra.mxu1 %v11847_v10  ;;  %v11887_v10 = vld [vmem:[#allocation7 + $0x2a0] sm:$0xff] }
 0x5a4   : > { %4858 = vmatpush.bf16.msra.mxu2 %v11829_v54  ;;  %v11869_v54 = vld [vmem:[#allocation7 + $0x210] sm:$0xff] }
 0x5a5   : > { %4940 = vmatpush.bf16.msra.mxu0 %v11837_v4  ;;  %v11877_v4 = vld [vmem:[#allocation7 + $0x250] sm:$0xff] }
 0x5a6   : > { %5021 = vmatpush.bf16.msra.mxu1 %v11846_v14  ;;  %v11898_v14 = vld [vmem:[#allocation7 + $0x2f8] sm:$0xff] }
 0x5a7   : > { %v11786_v60 = vld [vmem:[#allocation2 + $0x28] sm:$0xff] }
 0x5a8   : > { %4459 = vmatpush.bf16.msra.mxu3 %v11786_v60  ;;  %4859 = vmatpush.bf16.msra.mxu2 %v11828_v0  ;;  %v11843_v60 = vld [vmem:[#allocation7 + $0x140] sm:$0xff]  ;;  %v11868_v0 = vld [vmem:[#allocation7 + $0x208] sm:$0xff] }
 0x5a9   : > { %4941 = vmatpush.bf16.msra.mxu0 %v11836_v27  ;;  %v11876_v27 = vld [vmem:[#allocation7 + $0x248] sm:$0xff] }
 0x5aa   : > { %5022 = vmatpush.bf16.msra.mxu1 %v11845_v7  ;;  %v11897_v7 = vld [vmem:[#allocation7 + $0x2f0] sm:$0xff] }
 0x5ac   : > { %4460 = vmatpush.bf16.msra.mxu3 %v11785_v18  ;;  %4860 = vmatpush.bf16.msra.mxu2 %v11827_v11  ;;  %v11855_v18 = vld [vmem:[#allocation7 + $0x1a0] sm:$0xff] }
 0x5ad   : > { %4942 = vmatpush.bf16.msra.mxu0 %v11835_v41  ;;  %v11867_v11 = vld [vmem:[#allocation7 + $0x200] sm:$0xff] }
 0x5ae   : > { %5023 = vmatpush.bf16.msra.mxu1 %v11844_v24  ;;  %v11875_v41 = vld [vmem:[#allocation7 + $0x240] sm:$0xff]  ;;  %v11896_v24 = vld [vmem:[#allocation7 + $0x2e8] sm:$0xff] }
 0x5b0   : > { %4461 = vmatpush.bf16.msra.mxu3 %v11784_v47 }
 0x5b2   : > { %5024 = vmatpush.bf16.msra.mxu1 %v11843_v60  ;;  %v11895_v60 = vld [vmem:[#allocation7 + $0x2e0] sm:$0xff] }
 0x5b4   : > { %4462 = vmatpush.bf16.msra.mxu3 %v11783_v38 }
 0x5b8   : > { %4463 = vmatpush.bf16.msra.mxu3 %v11782_v40  ;;  %v11799_v40 = vld [vmem:[%s14190_s1 + $0x60] sm:$0xff] }
 0x5bc   : > { %4464 = vmatpush.bf16.msra.mxu3 %v11781_v32  ;;  %v11854_v32 = vld [vmem:[#allocation7 + $0x198] sm:$0xff] }
 0x5bf   : > { %9946 = vmatmul.msk.bf16.vlgmr.msra.gmra.mxu3 %vm4405_vm2, %v11787_v52  ;;  %v11866_v52 = vld [vmem:[#allocation7 + $0x1f8] sm:$0xff] }
 0x5cf   : > { %9947 = vmatmul.msk.bf16.gmra.mxu3 %vm4405_vm2, %v11788_v53  ;;  %v11853_v53 = vld [vmem:[#allocation7 + $0x190] sm:$0xff] }
 0x5df   : > { %9948 = vmatmul.msk.bf16.gmra.mxu3 %vm4405_vm2, %v11789_v61  ;;  %v11865_v61 = vld [vmem:[#allocation7 + $0x1f0] sm:$0xff] }
 0x5ef   : > { %9949 = vmatmul.msk.bf16.gmra.mxu3 %vm4405_vm2, %v11790_v56 }
 0x5ff   : > { %9950 = vmatmul.msk.bf16.gmra.mxu3 %vm4405_vm2, %v11791_v8  ;;  %v11864_v8 = vld [vmem:[#allocation7 + $0x1e8] sm:$0xff] }
 0x60f   : > { %9951 = vmatmul.msk.bf16.gmra.mxu3 %vm4405_vm2, %v11792_v33 }
 0x61f   : > { %9952 = vmatmul.msk.bf16.gmra.mxu3 %vm4405_vm2, %v11793_v43 }
 0x62f   : > { %9953 = vmatmul.msk.bf16.gmra.mxu3 %vm4405_vm2, %v11794_v12  ;;  %v11862_v12 = vld [vmem:[#allocation7 + $0x1d8] sm:$0xff] }
 0x63f   : > { %9954 = vmatmul.msk.bf16.gmra.mxu3 %vm4405_vm2, %v11795_v22  ;;  %v11861_v22 = vld [vmem:[#allocation7 + $0x1d0] sm:$0xff] }
 0x642   : > { %v4466_v9 = vpop.f32.mrf.mxu3 }
 0x64a   : > { %v4468_v35 = vpop.f32.mrf.mxu3 }
 0x64b   : > { %v4546_v16 = vpack.c.bf16 %v4468_v35, %v4466_v9  ;;  %v11860_v9 = vld [vmem:[#allocation7 + $0x1c8] sm:$0xff] }
 0x64d   : > { %4699 = vmatmul.bf16.vlgmr.msrb.gmra.mxu0 %v4546_v16 }
 0x64e   : > { %5181 = vmatpush.bf16.msrb.mxu0 %v11866_v52  ;;  %v11905_v52 = vld [vmem:[#allocation7 + $0x330] sm:$0xff] }
 0x64f   : > { %9955 = vmatmul.msk.bf16.gmra.mxu3 %vm4405_vm2, %v11796_v31  ;;  %v11801_v31 = vld [vmem:[%s14190_s1 + $0x70] sm:$0xff] }
 0x652   : > { %v4471_v50 = vpop.f32.mrf.mxu3  ;;  %5182 = vmatpush.bf16.msrb.mxu0 %v11865_v61  ;;  %v11892_v61 = vld [vmem:[#allocation7 + $0x2c8] sm:$0xff] }
 0x656   : > { %5183 = vmatpush.bf16.msrb.mxu0 %v11864_v8  ;;  %v11903_v8 = vld [vmem:[#allocation7 + $0x320] sm:$0xff] }
 0x65a   : > { %v4473_v39 = vpop.f32.mrf.mxu3  ;;  %5184 = vmatpush.bf16.msrb.mxu0 %v11863_v17 }
 0x65b   : > { %v4563_v46 = vpack.c.bf16 %v4473_v39, %v4471_v50 }
 0x65d   : > { %4637 = vmatmul.bf16.vlgmr.msrb.gmra.mxu2 %v4563_v46 }
 0x65e   : > { %5099 = vmatpush.bf16.msrb.mxu2 %v11858_v55  ;;  %5185 = vmatpush.bf16.msrb.mxu0 %v11862_v12  ;;  %v11885_v55 = vld [vmem:[#allocation7 + $0x290] sm:$0xff] }
 0x65f   : > { %9956 = vmatmul.msk.bf16.gmra.mxu3 %vm4405_vm2, %v11797_v30  ;;  %v11802_v30 = vld [vmem:[%s14190_s1 + $0x78] sm:$0xff]  ;;  %v11913_v12 = vld [vmem:[#allocation7 + $0x370] sm:$0xff] }
 0x662   : > { %v4476_v42 = vpop.f32.mrf.mxu3  ;;  %5100 = vmatpush.bf16.msrb.mxu2 %v11857_v13  ;;  %5186 = vmatpush.bf16.msrb.mxu0 %v11861_v22  ;;  %v11900_v22 = vld [vmem:[#allocation7 + $0x308] sm:$0xff] }
 0x666   : > { %5101 = vmatpush.bf16.msrb.mxu2 %v11856_v49  ;;  %5187 = vmatpush.bf16.msrb.mxu0 %v11860_v9  ;;  %v11883_v49 = vld [vmem:[#allocation7 + $0x280] sm:$0xff] }
 0x667   : > { %v11911_v9 = vld [vmem:[#allocation7 + $0x360] sm:$0xff] }
 0x66a   : > { %v4478_v26 = vpop.f32.mrf.mxu3  ;;  %5102 = vmatpush.bf16.msrb.mxu2 %v11855_v18  ;;  %5188 = vmatpush.bf16.msrb.mxu0 %v11859_v23 }
 0x66b   : > { %v4705_v25 = vpack.c.bf16 %v4478_v26, %v4476_v42 }
 0x66d   : > { %4779 = vmatmul.bf16.vlgmr.msrb.gmra.mxu1 %v4705_v25 }
 0x66e   : > { %5103 = vmatpush.bf16.msrb.mxu2 %v11854_v32  ;;  %5263 = vmatpush.bf16.msrb.mxu1 %v11874_v28  ;;  %v11893_v32 = vld [vmem:[#allocation7 + $0x2d0] sm:$0xff] }
 0x66f   : > { %9957 = vmatmul.msk.bf16.gmra.mxu3 %vm4405_vm2, %v11798_v6  ;;  %v11886_v6 = vld [vmem:[#allocation7 + $0x298] sm:$0xff] }
 0x672   : > { %v4481_v15 = vpop.f32.mrf.mxu3  ;;  %5104 = vmatpush.bf16.msrb.mxu2 %v11853_v53  ;;  %5264 = vmatpush.bf16.msrb.mxu1 %v11873_v34  ;;  %v11912_v34 = vld [vmem:[#allocation7 + $0x368] sm:$0xff] }
 0x676   : > { %5105 = vmatpush.bf16.msrb.mxu2 %v11852_v44  ;;  %5265 = vmatpush.bf16.msrb.mxu1 %v11872_v20  ;;  %v11891_v44 = vld [vmem:[#allocation7 + $0x2c0] sm:$0xff] }
 0x67a   : > { %v4483_v47 = vpop.f32.mrf.mxu3  ;;  %5106 = vmatpush.bf16.msrb.mxu2 %v11851_v59  ;;  %5266 = vmatpush.bf16.msrb.mxu1 %v11871_v57  ;;  %v11910_v57 = vld [vmem:[#allocation7 + $0x358] sm:$0xff] }
 0x67b   : > { %v4787_v38 = vpack.c.bf16 %v4483_v47, %v4481_v15  ;;  %v11884_v15 = vld [vmem:[#allocation7 + $0x288] sm:$0xff] }
 0x67d   : > { %4861 = vmatmul.bf16.vlgmr.msra.gmra.mxu2 %v4787_v38  ;;  %v11894_v38 = vld [vmem:[#allocation7 + $0x2d8] sm:$0xff] }
 0x67e   : > { %5267 = vmatpush.bf16.msrb.mxu1 %v11870_v37  ;;  %5345 = vmatpush.bf16.msra.mxu2 %v11882_v5  ;;  %v11908_v5 = vld [vmem:[#allocation7 + $0x348] sm:$0xff] }
 0x67f   : > { %9958 = vmatmul.msk.bf16.gmra.mxu3 %vm4405_vm2, %v11799_v40  ;;  %v11906_v40 = vld [vmem:[#allocation7 + $0x338] sm:$0xff] }
 0x682   : > { %v4486_v56 = vpop.f32.mrf.mxu3  ;;  %5268 = vmatpush.bf16.msrb.mxu1 %v11869_v54  ;;  %5346 = vmatpush.bf16.msra.mxu2 %v11881_v62  ;;  %v11920_v54 = vld [vmem:[#allocation7 + $0x3a8] sm:$0xff]  ;;  %v11907_v62 = vld [vmem:[#allocation7 + $0x340] sm:$0xff] }
 0x686   : > { %5269 = vmatpush.bf16.msrb.mxu1 %v11868_v0  ;;  %5347 = vmatpush.bf16.msra.mxu2 %v11880_v63 }
 0x68a   : > { %v4488_v33 = vpop.f32.mrf.mxu3  ;;  %5270 = vmatpush.bf16.msrb.mxu1 %v11867_v11  ;;  %5348 = vmatpush.bf16.msra.mxu2 %v11879_v21  ;;  %v11918_v11 = vld [vmem:[#allocation7 + $0x398] sm:$0xff] }
 0x68b   : > { %v4869_v43 = vpack.c.bf16 %v4488_v33, %v4486_v56  ;;  %v11904_v56 = vld [vmem:[#allocation7 + $0x328] sm:$0xff]  ;;  %v11902_v33 = vld [vmem:[#allocation7 + $0x318] sm:$0xff] }
 0x68c   : > { %v11930_v21 = vld [vmem:[#allocation7 + $0x3f8] sm:$0xff] }
 0x68d   : > { %4943 = vmatmul.bf16.vlgmr.msra.gmra.mxu0 %v4869_v43  ;;  %v11914_v43 = vld [vmem:[#allocation7 + $0x378] sm:$0xff] }
 0x68e   : > { %5349 = vmatpush.bf16.msra.mxu2 %v11878_v3  ;;  %5427 = vmatpush.bf16.msra.mxu0 %v11890_v58  ;;  %v11916_v3 = vld [vmem:[#allocation7 + $0x388] sm:$0xff] }
 0x68f   : > { %9959 = vmatmul.msk.bf16.gmra.mxu3 %vm4405_vm2, %v11800_v36  ;;  %v11901_v36 = vld [vmem:[#allocation7 + $0x310] sm:$0xff]  ;;  %v11928_v58 = vld [vmem:[#allocation7 + $0x3e8] sm:$0xff] }
 0x692   : > { %v4491_v51 = vpop.f32.mrf.mxu3  ;;  %5350 = vmatpush.bf16.msra.mxu2 %v11877_v4  ;;  %5428 = vmatpush.bf16.msra.mxu0 %v11889_v48  ;;  %v11915_v4 = vld [vmem:[#allocation7 + $0x380] sm:$0xff] }
 0x693   : > { %v11927_v48 = vld [vmem:[#allocation7 + $0x3e0] sm:$0xff] }
 0x696   : > { %5351 = vmatpush.bf16.msra.mxu2 %v11876_v27  ;;  %5429 = vmatpush.bf16.msra.mxu0 %v11888_v1  ;;  %v11926_v1 = vld [vmem:[#allocation7 + $0x3d8] sm:$0xff] }
 0x69a   : > { %v4493_v35 = vpop.f32.mrf.mxu3  ;;  %5352 = vmatpush.bf16.msra.mxu2 %v11875_v41  ;;  %5430 = vmatpush.bf16.msra.mxu0 %v11887_v10  ;;  %v11925_v41 = vld [vmem:[#allocation7 + $0x3d0] sm:$0xff] }
 0x69b   : > { %v4951_v16 = vpack.c.bf16 %v4493_v35, %v4491_v51  ;;  %v11899_v51 = vld [vmem:[#allocation7 + $0x300] sm:$0xff]  ;;  %v11922_v35 = vld [vmem:[#allocation7 + $0x3b8] sm:$0xff] }
 0x69d   : > { %5025 = vmatmul.bf16.vlgmr.msra.gmra.mxu1 %v4951_v16  ;;  %v11909_v16 = vld [vmem:[#allocation7 + $0x350] sm:$0xff] }
 0x69e   : > { %5431 = vmatpush.bf16.msra.mxu0 %v11886_v6  ;;  %5509 = vmatpush.bf16.msra.mxu1 %v11898_v14 }
 0x69f   : > { %9960 = vmatmul.msk.bf16.gmra.mxu3 %vm4405_vm2, %v11801_v31  ;;  %v11921_v31 = vld [vmem:[#allocation7 + $0x3b0] sm:$0xff] }
 0x6a2   : > { %v4496_v50 = vpop.f32.mrf.mxu3  ;;  %5432 = vmatpush.bf16.msra.mxu0 %v11885_v55  ;;  %5510 = vmatpush.bf16.msra.mxu1 %v11897_v7 }
 0x6a6   : > { %5433 = vmatpush.bf16.msra.mxu0 %v11884_v15  ;;  %5511 = vmatpush.bf16.msra.mxu1 %v11896_v24 }
 0x6aa   : > { %v4498_v39 = vpop.f32.mrf.mxu3  ;;  %5434 = vmatpush.bf16.msra.mxu0 %v11883_v49  ;;  %5512 = vmatpush.bf16.msra.mxu1 %v11895_v60 }
 0x6ab   : > { %v5033_v46 = vpack.c.bf16 %v4498_v39, %v4496_v50  ;;  %v11919_v50 = vld [vmem:[#allocation7 + $0x3a0] sm:$0xff]  ;;  %v11917_v39 = vld [vmem:[#allocation7 + $0x390] sm:$0xff] }
 0x6ad   : > { %5107 = vmatmul.bf16.vlgmr.msrb.gmra.mxu2 %v5033_v46  ;;  %v11929_v46 = vld [vmem:[#allocation7 + $0x3f0] sm:$0xff] }
 0x6ae   : > { %5513 = vmatpush.bf16.msra.mxu1 %v11894_v38  ;;  %5591 = vmatpush.bf16.msrb.mxu2 %v11906_v40 }
 0x6af   : > { %9961 = vmatmul.msk.bf16.gmra.mxu3 %vm4405_vm2, %v11802_v30 }
 0x6b2   : > { %v4501_v42 = vpop.f32.mrf.mxu3  ;;  %5514 = vmatpush.bf16.msra.mxu1 %v11893_v32  ;;  %5592 = vmatpush.bf16.msrb.mxu2 %v11905_v52 }
 0x6b6   : > { %5515 = vmatpush.bf16.msra.mxu1 %v11892_v61  ;;  %5593 = vmatpush.bf16.msrb.mxu2 %v11904_v56 }
 0x6ba   : > { %v4503_v26 = vpop.f32.mrf.mxu3  ;;  %5516 = vmatpush.bf16.msra.mxu1 %v11891_v44  ;;  %5594 = vmatpush.bf16.msrb.mxu2 %v11903_v8  ;;  %v11992_v8 = vld [vmem:[#allocation9 + $0x1b8] sm:$0xff] }
 0x6bb   : > { %v5115_v25 = vpack.c.bf16 %v4503_v26, %v4501_v42  ;;  %v11924_v26 = vld [vmem:[#allocation7 + $0x3c8] sm:$0xff]  ;;  %6557 = vmatpush.bf16.msrb.mxu3 %v11992_v8 }
 0x6bd   : > { %5189 = vmatmul.bf16.vlgmr.msrb.gmra.mxu0 %v5115_v25  ;;  %v11923_v25 = vld [vmem:[#allocation7 + $0x3c0] sm:$0xff] }
 0x6be   : > { %5595 = vmatpush.bf16.msrb.mxu2 %v11902_v33  ;;  %5673 = vmatpush.bf16.msrb.mxu0 %v11914_v43 }
 0x6c2   : > { %v4506_v13 = vpop.f32.mrf.mxu3  ;;  %5596 = vmatpush.bf16.msrb.mxu2 %v11901_v36  ;;  %5674 = vmatpush.bf16.msrb.mxu0 %v11913_v12 }
 0x6c6   : > { %5597 = vmatpush.bf16.msrb.mxu2 %v11900_v22  ;;  %5675 = vmatpush.bf16.msrb.mxu0 %v11912_v34 }
 0x6ca   : > { %v4508_v18 = vpop.f32.mrf.mxu3  ;;  %5598 = vmatpush.bf16.msrb.mxu2 %v11899_v51  ;;  %5676 = vmatpush.bf16.msrb.mxu0 %v11911_v9 }
 0x6cb   : > { %v5197_v47 = vpack.c.bf16 %v4508_v18, %v4506_v13  ;;  %v4700_v18 = vpop.f32.mrf.mxu0 }
 0x6cd   : > { %5271 = vmatmul.bf16.vlgmr.msrb.gmra.mxu1 %v5197_v47 }
 0x6ce   : > { %5677 = vmatpush.bf16.msrb.mxu0 %v11910_v57  ;;  %5755 = vmatpush.bf16.msrb.mxu1 %v11922_v35 }
 0x6d2   : > { %v4511_v53 = vpop.f32.mrf.mxu3  ;;  %5678 = vmatpush.bf16.msrb.mxu0 %v11909_v16  ;;  %5756 = vmatpush.bf16.msrb.mxu1 %v11921_v31 }
 0x6d3   : > { %v4702_v32 = vpop.f32.mrf.mxu0 }
 0x6d6   : > { %5679 = vmatpush.bf16.msrb.mxu0 %v11908_v5  ;;  %5757 = vmatpush.bf16.msrb.mxu1 %v11920_v54 }
 0x6da   : > { %v4513_v59 = vpop.f32.mrf.mxu3  ;;  %5680 = vmatpush.bf16.msrb.mxu0 %v11907_v62  ;;  %5758 = vmatpush.bf16.msrb.mxu1 %v11919_v50 }
 0x6db   : > { %v5279_v17 = vpack.c.bf16 %v4513_v59, %v4511_v53 }
 0x6dd   : > { %5353 = vmatmul.bf16.vlgmr.msra.gmra.mxu2 %v5279_v17 }
 0x6de   : > { %5759 = vmatpush.bf16.msrb.mxu1 %v11918_v11  ;;  %5837 = vmatpush.bf16.msra.mxu2 %v11930_v21 }
 0x6e0   : > { %v4638_v60 = vpop.f32.mrf.mxu2 }
 0x6e1   : > { %v4701_v34 = vadd.f32 %v4700_v18, %v4638_v60 }
 0x6e2   : > { %v4516_v28 = vpop.f32.mrf.mxu3  ;;  %5760 = vmatpush.bf16.msrb.mxu1 %v11917_v39  ;;  %5838 = vmatpush.bf16.msra.mxu2 %v11929_v46 }
 0x6e6   : > { %5761 = vmatpush.bf16.msrb.mxu1 %v11916_v3  ;;  %5839 = vmatpush.bf16.msra.mxu2 %v11928_v58 }
 0x6e8   : > { %v4640_v47 = vpop.f32.mrf.mxu2 }
 0x6e9   : > { %v4703_v16 = vadd.f32 %v4702_v32, %v4640_v47 }
 0x6ea   : > { %v4518_v20 = vpop.f32.mrf.mxu3  ;;  %5762 = vmatpush.bf16.msrb.mxu1 %v11915_v4  ;;  %5840 = vmatpush.bf16.msra.mxu2 %v11927_v48  ;;  %v4780_v38 = vpop.f32.mrf.mxu1 }
 0x6eb   : > { %v5361_v23 = vpack.c.bf16 %v4518_v20, %v4516_v28  ;;  %v4785_v20 = vadd.f32 %v4780_v38, %v4701_v34  ;;  %v5885_v34 = vld [vmem:[#allocation3 + $0x4] sm:$0xc] }
 0x6ed   : > { %5435 = vmatmul.bf16.vlgmr.msra.gmra.mxu0 %v5361_v23 }
 0x6ee   : > { %5841 = vmatpush.bf16.msra.mxu2 %v11926_v1  ;;  %v5919_v1 = vld [vmem:[#allocation3 + $0x10] sm:$0x3] }
 0x6f2   : > { %v4521_v37 = vpop.f32.mrf.mxu3  ;;  %5842 = vmatpush.bf16.msra.mxu2 %v11925_v41  ;;  %v4782_v52 = vpop.f32.mrf.mxu1 }
 0x6f3   : > { %v4786_v5 = vadd.f32 %v4782_v52, %v4703_v16 }
 0x6f6   : > { %5843 = vmatpush.bf16.msra.mxu2 %v11924_v26  ;;  %v11991_v26 = vld [vmem:[#allocation9 + $0x1b0] sm:$0xff] }
 0x6f7   : > { %6558 = vmatpush.bf16.msrb.mxu3 %v11991_v26  ;;  %v11951_v26 = vld [vmem:[#allocation9 + $0x70] sm:$0xff] }
 0x6fa   : > { %v4523_v0 = vpop.f32.mrf.mxu3  ;;  %5844 = vmatpush.bf16.msra.mxu2 %v11923_v25  ;;  %v5957_v25 = vunpack.c.l.b16 %v5919_v1  ;;  %v11988_v1 = vld [vmem:[#allocation9 + $0x198] sm:$0xff] }
 0x6fb   : > { %v5443_v63 = vpack.c.bf16 %v4523_v0, %v4521_v37 }
 0x6fd   : > { %5517 = vmatmul.bf16.vlgmr.msra.gmra.mxu1 %v5443_v63 }
 0x700   : > { %v4862_v40 = vpop.f32.mrf.mxu2 }
 0x701   : > { %v4867_v57 = vadd.f32 %v4862_v40, %v4785_v20 }
 0x702   : > { %v4526_v30 = vpop.f32.mrf.mxu3 }
 0x708   : > { %v4864_v53 = vpop.f32.mrf.mxu2 }
 0x709   : > { %v4868_v50 = vadd.f32 %v4864_v53, %v4786_v5 }
 0x70a   : > { %v4528_v42 = vpop.f32.mrf.mxu3  ;;  %v4944_v61 = vpop.f32.mrf.mxu0 }
 0x70b   : > { %v5525_v27 = vpack.c.bf16 %v4528_v42, %v4526_v30  ;;  %v4949_v35 = vadd.f32 %v4944_v61, %v4867_v57 }
 0x70d   : > { %5599 = vmatmul.bf16.vlgmr.msrb.gmra.mxu2 %v5525_v27 }
 0x712   : > { %v4531_v10 = vpop.f32.mrf.mxu3  ;;  %v4946_v59 = vpop.f32.mrf.mxu0 }
 0x713   : > { %v4950_v11 = vadd.f32 %v4946_v59, %v4868_v50 }
 0x71a   : > { %v4533_v6 = vpop.f32.mrf.mxu3  ;;  %v5026_v56 = vpop.f32.mrf.mxu1 }
 0x71b   : > { %v5607_v14 = vpack.c.bf16 %v4533_v6, %v4531_v10  ;;  %v5031_v31 = vadd.f32 %v5026_v56, %v4949_v35  ;;  %v5877_v35 = vld [vmem:[#allocation3 + $0x4] sm:$0x3] }
 0x71d   : > { %5681 = vmatmul.bf16.vlgmr.msrb.gmra.mxu0 %v5607_v14 }
 0x722   : > { %v4536_v55 = vpop.f32.mrf.mxu3  ;;  %v5028_v17 = vpop.f32.mrf.mxu1 }
 0x723   : > { %v5032_v39 = vadd.f32 %v5028_v17, %v4950_v11 }
 0x72a   : > { %v4538_v7 = vpop.f32.mrf.mxu3 }
 0x72b   : > { %v5689_v13 = vpack.c.bf16 %v4538_v7, %v4536_v55  ;;  %v5960_v55 = vpack.c.b16 %v5957_v25, %v5957_v25  ;;  %v11968_v25 = vld [vmem:[#allocation9 + $0xf8] sm:$0xff] }
 0x72d   : > { %5763 = vmatmul.bf16.vlgmr.msrb.gmra.mxu1 %v5689_v13 }
 0x730   : > { %v5108_v44 = vpop.f32.mrf.mxu2 }
 0x731   : > { %v5113_v54 = vadd.f32 %v5108_v44, %v5031_v31 }
 0x732   : > { %v4541_v15 = vpop.f32.mrf.mxu3 }
 0x738   : > { %v5110_v33 = vpop.f32.mrf.mxu2 }
 0x739   : > { %v5114_v30 = vadd.f32 %v5110_v33, %v5032_v39  ;;  %v5874_v33 = vld [vmem:[#allocation3] sm:$0x8] }
 0x73a   : > { %v4543_v24 = vpop.f32.mrf.mxu3  ;;  %v5190_v43 = vpop.f32.mrf.mxu0 }
 0x73b   : > { %v5771_v49 = vpack.c.bf16 %v4543_v24, %v4541_v15  ;;  %v5195_v0 = vadd.f32 %v5190_v43, %v5113_v54  ;;  %v12259_v15 = vld [vmem:[%s14198_s9] ss:$0 sm:$0xff]  ;;  %v5977_v24 = vsel %vm2152_vm0, %v5960_v55, 0  ;;  %v11950_v55 = vld [vmem:[#allocation9 + $0x68] sm:$0xff] }
 0x73c   : > { %5984 = vmatpush.bf16.msra.mxu0 %v5977_v24  ;;  %v11949_v24 = vld [vmem:[#allocation9 + $0x60] sm:$0xff] }
 0x73d   : > { %5845 = vmatmul.bf16.vlgmr.msra.gmra.mxu2 %v5771_v49 }
 0x742   : > { %v5192_v28 = vpop.f32.mrf.mxu0 }
 0x743   : > { %v5196_v48 = vadd.f32 %v5192_v28, %v5114_v30 }
 0x74a   : > { %v5272_v36 = vpop.f32.mrf.mxu1 }
 0x74b   : > { %v5277_v21 = vadd.f32 %v5272_v36, %v5195_v0 }
 0x752   : > { %v5274_v22 = vpop.f32.mrf.mxu1 }
 0x753   : > { %v5278_v41 = vadd.f32 %v5274_v22, %v5196_v48  ;;  %v11990_v22 = vld [vmem:[#allocation9 + $0x1a8] sm:$0xff]  ;;  %v11933_v48 = vld [vmem:[%s14191_s2] sm:$0xff] }
 0x754   : > { %6559 = vmatpush.bf16.msrb.mxu3 %v11990_v22  ;;  %v11975_v22 = vld [vmem:[#allocation9 + $0x130] sm:$0xff] }
 0x760   : > { %v5354_v12 = vpop.f32.mrf.mxu2 }
 0x761   : > { %v5359_v46 = vadd.f32 %v5354_v12, %v5277_v21 }
 0x768   : > { %v5356_v51 = vpop.f32.mrf.mxu2 }
 0x769   : > { %v5360_v6 = vadd.f32 %v5356_v51, %v5278_v41  ;;  %v5888_v51 = vld [vmem:[#allocation3 + $0x8] sm:$0x1]  ;;  %v11952_v41 = vld [vmem:[#allocation9 + $0x78] sm:$0xff] }
 0x76a   : > { %v5436_v9 = vpop.f32.mrf.mxu0  ;;  %6093 = vmatpush.bf16.msra.mxu1 %v11952_v41  ;;  %v12007_v41 = vld [vmem:[#allocation9 + $0x230] sm:$0xff] }
 0x76b   : > { %v5441_v3 = vadd.f32 %v5436_v9, %v5359_v46  ;;  %v5912_v46 = vld [vmem:[#allocation3 + $0xc] sm:$0x7] }
 0x76e   : > { %6094 = vmatpush.bf16.msra.mxu1 %v11951_v26  ;;  %v11983_v26 = vld [vmem:[#allocation9 + $0x170] sm:$0xff] }
 0x772   : > { %v5438_v62 = vpop.f32.mrf.mxu0  ;;  %6095 = vmatpush.bf16.msra.mxu1 %v11950_v55  ;;  %v12017_v55 = vld [vmem:[#allocation9 + $0x280] sm:$0xff] }
 0x773   : > { %v5442_v7 = vadd.f32 %v5438_v62, %v5360_v6  ;;  %v11943_v6 = vld [vmem:[#allocation9 + $0x30] sm:$0xff] }
 0x776   : > { %6096 = vmatpush.bf16.msra.mxu1 %v11949_v24  ;;  %v12005_v24 = vld [vmem:[#allocation9 + $0x220] sm:$0xff] }
 0x77a   : > { %v5518_v23 = vpop.f32.mrf.mxu1 }
 0x77b   : > { %v5523_v42 = vadd.f32 %v5518_v23, %v5441_v3 }
 0x782   : > { %v5520_v63 = vpop.f32.mrf.mxu1 }
 0x783   : > { %v5524_v60 = vadd.f32 %v5520_v63, %v5442_v7  ;;  %v11942_v7 = vld [vmem:[#allocation9 + $0x28] sm:$0xff] }
 0x790   : > { %v5600_v37 = vpop.f32.mrf.mxu2 }
 0x791   : > { %v5605_v10 = vadd.f32 %v5600_v37, %v5523_v42  ;;  %v11989_v42 = vld [vmem:[#allocation9 + $0x1a0] sm:$0xff] }
 0x792   : > { %6560 = vmatpush.bf16.msrb.mxu3 %v11989_v42  ;;  %v12019_v42 = vld [vmem:[#allocation9 + $0x290] sm:$0xff] }
 0x796   : > { %6561 = vmatpush.bf16.msrb.mxu3 %v11988_v1 }
 0x798   : > { %v5602_v58 = vpop.f32.mrf.mxu2 }
 0x799   : > { %v5606_v38 = vadd.f32 %v5602_v58, %v5524_v60  ;;  %v11935_v60 = vld [vmem:[%s14191_s2 + $0x10] sm:$0xff] }
 0x79a   : > { %v5682_v4 = vpop.f32.mrf.mxu0 }
 0x79b   : > { %v5687_v14 = vadd.f32 %v5682_v4, %v5605_v10  ;;  %v11944_v10 = vld [vmem:[#allocation9 + $0x38] sm:$0xff] }
 0x79c   : > { %6154 = vmatpush.bf16.msrb.mxu2 %v11944_v10  ;;  %v12018_v10 = vld [vmem:[#allocation9 + $0x288] sm:$0xff] }
 0x7a0   : > { %6155 = vmatpush.bf16.msrb.mxu2 %v11943_v6  ;;  %v12006_v6 = vld [vmem:[#allocation9 + $0x228] sm:$0xff] }
 0x7a2   : > { %v5684_v47 = vpop.f32.mrf.mxu0 }
 0x7a3   : > { %v5688_v52 = vadd.f32 %v5684_v47, %v5606_v38  ;;  %v11948_v47 = vld [vmem:[#allocation9 + $0x58] sm:$0xff] }
 0x7a4   : > { %6156 = vmatpush.bf16.msrb.mxu2 %v11942_v7  ;;  %v11940_v38 = vld [vmem:[#allocation9 + $0x18] sm:$0xff]  ;;  %6097 = vmatpush.bf16.msra.mxu1 %v11948_v47  ;;  %v11982_v7 = vld [vmem:[#allocation9 + $0x168] sm:$0xff] }
 0x7a5   : > { %v12004_v47 = vld [vmem:[#allocation9 + $0x218] sm:$0xff] }
 0x7aa   : > { %v5764_v27 = vpop.f32.mrf.mxu1 }
 0x7ab   : > { %v5769_v13 = vadd.f32 %v5764_v27, %v5687_v14  ;;  %v11934_v27 = vld [vmem:[%s14191_s2 + $0x8] sm:$0xff]  ;;  %v11967_v14 = vld [vmem:[#allocation9 + $0xf0] sm:$0xff] }
 0x7b2   : > { %v5766_v32 = vpop.f32.mrf.mxu1 }
 0x7b3   : > { %v5770_v61 = vadd.f32 %v5766_v32, %v5688_v52  ;;  %v11947_v32 = vld [vmem:[#allocation9 + $0x50] sm:$0xff] }
 0x7b4   : > { %v11939_v52 = vld [vmem:[#allocation9 + $0x10] sm:$0xff]  ;;  %6098 = vmatpush.bf16.msra.mxu1 %v11947_v32  ;;  %v12030_v32 = vld [vmem:[#allocation9 + $0x2e8] sm:$0xff] }
 0x7c0   : > { %v5846_v49 = vpop.f32.mrf.mxu2 }
 0x7c1   : > { %v5851_v18 = vadd.f32 %v5846_v49, %v5769_v13  ;;  %v11987_v13 = vld [vmem:[#allocation9 + $0x190] sm:$0xff]  ;;  %v11941_v49 = vld [vmem:[#allocation9 + $0x20] sm:$0xff] }
 0x7c2   : > { %6562 = vmatpush.bf16.msrb.mxu3 %v11987_v13  ;;  %6157 = vmatpush.bf16.msrb.mxu2 %v11941_v49  ;;  %v12032_v13 = vld [vmem:[#allocation9 + $0x2f8] sm:$0xff]  ;;  %v11981_v49 = vld [vmem:[#allocation9 + $0x160] sm:$0xff] }
 0x7c3   : > { %v5857_v40 = vadd.f32 %v12259_v15, %v5851_v18  ;;  %v11965_v18 = vld [vmem:[#allocation9 + $0xe0] sm:$0xff] }
 0x7c5   : > { %v5859_v53 = vmax.f32 %v5857_v40, 0.0  ;;  %v11964_v40 = vld [vmem:[#allocation9 + $0xd8] sm:$0xff] }
 0x7c6   : > { %6158 = vmatpush.bf16.msrb.mxu2 %v11940_v38 }
 0x7c7   : > { %v5861_v56 = vpack.c.bf16 %v5859_v53, %v5859_v53  ;;  %v11963_v53 = vld [vmem:[#allocation9 + $0xd0] sm:$0xff] }
 0x7c8   : > { %v5848_v44 = vpop.f32.mrf.mxu2 }
 0x7c9   : > { %v5864_v8 = vshll.u32 %v5861_v56, 16  ;;  %v5867_v59 = vshrl.u32 %v5861_v56, 16  ;;  %v5852_v17 = vadd.f32 %v5848_v44, %v5770_v61  ;;  %v11946_v61 = vld [vmem:[#allocation9 + $0x48] sm:$0xff] }
 0x7ca   : > { %6159 = vmatpush.bf16.msrb.mxu2 %v11939_v52  ;;  %v11938_v56 = vld [vmem:[#allocation9 + $0x8] sm:$0xff]  ;;  %6099 = vmatpush.bf16.msra.mxu1 %v11946_v61  ;;  %v12003_v52 = vld [vmem:[#allocation9 + $0x210] sm:$0xff]  ;;  %v12029_v61 = vld [vmem:[#allocation9 + $0x2e0] sm:$0xff] }
 0x7cb   : > { %v5866_v43 = vrot.slane %v5864_v8, 5  ;;  %v5869_v36 = vrot.slane %v5867_v59, 4  ;;  %v5880_v12 = vrot.slane %v5867_v59, 7  ;;  %v5858_v28 = vadd.f32 %v12259_v15, %v5852_v17  ;;  %v11966_v15 = vld [vmem:[#allocation9 + $0xe8] sm:$0xff]  ;;  %v11937_v59 = vld [vmem:[#allocation9] sm:$0xff]  ;;  %v11960_v17 = vld [vmem:[#allocation9 + $0xb8] sm:$0xff] }
 0x7cc   : > { %v11962_v44 = vld [vmem:[#allocation9 + $0xc8] sm:$0xff] }
 0x7cd   : > { %v5870_v9 = vor.u32 %v5869_v36, %v5866_v43  ;;  %v5875_v20 = vsel %vm13968_vm3, %v5866_v43, %v5874_v33  ;;  %v5881_v23 = vor.u32 %v5880_v12, %v5864_v8  ;;  %v5882_v57 = vrot.slane %v5880_v12, 4  ;;  %vm5911_vm3 = vmand %vm4124_vm11, %vm5910_vm14  ;;  %v11945_v8 = vld [vmem:[#allocation9 + $0x40] sm:$0xff]  ;;  %v11936_v33 = vld [vmem:[%s14191_s2 + $0x18] sm:$0xff] }
 0x7ce   : > { %5876 = vst [vmem:[#allocation3] sm:$0x8] %v5875_v20  ;;  %v5860_v16 = vmax.f32 %v5858_v28, 0.0  ;;  %6160 = vmatpush.bf16.msrb.mxu2 %v11938_v56  ;;  %v11976_v43 = vld [vmem:[#allocation9 + $0x138] sm:$0xff]  ;;  %v11961_v36 = vld [vmem:[#allocation9 + $0xc0] sm:$0xff]  ;;  %6100 = vmatpush.bf16.msra.mxu1 %v11945_v8  ;;  %v11959_v28 = vld [vmem:[#allocation9 + $0xb0] sm:$0xff] }
 0x7cf   : > { %v5871_v31 = vrot.slane %v5870_v9, 4  ;;  %v5886_v37 = vsel %vm13954_vm13, %v5881_v23, %v5885_v34  ;;  %v5889_v5 = vsel %vm13990_vm5, %v5882_v57, %v5888_v51  ;;  %vm5901_vm13 = vmand %vm4095_vm4, %vm5900_vm7  ;;  %vm5963_vm4 = vcmask 293888   ;;  %v12000_v12 = vld [vmem:[#allocation9 + $0x1f8] sm:$0xff]  ;;  %v11999_v34 = vld [vmem:[#allocation9 + $0x1f0] sm:$0xff] }
 0x7d0   : > { %5887 = vst [vmem:[#allocation3 + $0x4] sm:$0xc] %v5886_v37  ;;  %v5862_v54 = vpack.c.bf16 %v5860_v16, %v5860_v16  ;;  %v11958_v51 = vld [vmem:[#allocation9 + $0xa8] sm:$0xff]  ;;  %v11957_v23 = vld [vmem:[#allocation9 + $0xa0] sm:$0xff]  ;;  %v11956_v16 = vld [vmem:[#allocation9 + $0x98] sm:$0xff] }
 0x7d1   : > { %v5878_v62 = vsel %vm13941_vm8, %v5871_v31, %v5877_v35  ;;  %5890 = vst [vmem:[#allocation3 + $0x8] sm:$0x1] %v5889_v5  ;;  %v11974_v9 = vld [vmem:[#allocation9 + $0x128] sm:$0xff]  ;;  %v11973_v57 = vld [vmem:[#allocation9 + $0x120] sm:$0xff]  ;;  %v11972_v31 = vld [vmem:[#allocation9 + $0x118] sm:$0xff] }
 0x7d2   : > { %5879 = vst [vmem:[#allocation3 + $0x4] sm:$0x3] %v5878_v62  ;;  %v5892_v19 = vshrl.u32 %v5862_v54, 16  ;;  %v5895_v50 = vshll.u32 %v5862_v54, 16  ;;  %6161 = vmatpush.bf16.msrb.mxu2 %v11937_v59  ;;  %6233 = vmatpush.bf16.msrb.mxu1 %v11960_v17  ;;  %v11998_v20 = vld [vmem:[#allocation9 + $0x1e8] sm:$0xff]  ;;  %v11997_v35 = vld [vmem:[#allocation9 + $0x1e0] sm:$0xff] }
 0x7d3   : > { %v11955_v37 = vld [vmem:[#allocation9 + $0x90] sm:$0xff]  ;;  %v11954_v54 = vld [vmem:[#allocation9 + $0x88] sm:$0xff]  ;;  %v12056_v8 = vld [vmem:[#allocation9 + $0x3b8] sm:$0xff]  ;;  %vm7317_vm8 = vsmask.f32 3338 }
 0x7d4   : > { %v5894_v0 = vrot.slane %v5892_v19, 6  ;;  %v5897_v63 = vrot.slane %v5895_v50, 7  ;;  %v5905_v11 = vrot.slane %v5892_v19, 5  ;;  %v5906_v21 = vrot.slane %v5895_v50, 6  ;;  %v11971_v5 = vld [vmem:[#allocation9 + $0x110] sm:$0xff]  ;;  %v11970_v62 = vld [vmem:[#allocation9 + $0x108] sm:$0xff]  ;;  %vm14128_vm6 = vmand %vm4118_vm9, %vm7317_vm8 }
 0x7d5   : > { %v11996_v19 = vld [vmem:[#allocation9 + $0x1d8] sm:$0xff]  ;;  %v11953_v50 = vld [vmem:[#allocation9 + $0x80] sm:$0xff]  ;;  %v11978_v17 = vld [vmem:[#allocation9 + $0x148] sm:$0xff]  ;;  %vm7327_vm11 = vsmask.f32 1282 }
 0x7d6   : > { %v5898_v45 = vor.u32 %v5897_v63, %v5894_v0  ;;  %v5907_v39 = vor.u32 %v5906_v21, %v5905_v11  ;;  %6395 = vmatpush.bf16.msra.mxu2 %v11976_v43  ;;  %6234 = vmatpush.bf16.msrb.mxu1 %v11959_v28  ;;  %v11969_v0 = vld [vmem:[#allocation9 + $0x100] sm:$0xff]  ;;  %v11986_v63 = vld [vmem:[#allocation9 + $0x188] sm:$0xff]  ;;  %v11995_v11 = vld [vmem:[#allocation9 + $0x1d0] sm:$0xff] }
 0x7d7   : > { %6563 = vmatpush.bf16.msrb.mxu3 %v11986_v63  ;;  %v11994_v21 = vld [vmem:[#allocation9 + $0x1c8] sm:$0xff]  ;;  %v12040_v28 = vld [vmem:[#allocation9 + $0x338] sm:$0xff]  ;;  %vm7328_vm10 = vmand %vm2152_vm0, %vm7327_vm11  ;;  %vm7347_vm0 = vcmask 130048  }
 0x7d8   : > { %v5903_v2 = vsel %vm5901_vm13, %v5898_v45, %v5902_v29  ;;  %v5908_v30 = vrot.slane %v5907_v39, 4  ;;  %v11985_v29 = vld [vmem:[#allocation9 + $0x180] sm:$0xff]  ;;  %v12024_v45 = vld [vmem:[#allocation9 + $0x2b8] sm:$0xff] }
 0x7d9   : > { %5904 = vst [vmem:[#allocation3 + $0x8] sm:$0xe] %v5903_v2  ;;  %v11931_v4 = vld [vmem:[#allocation3] sm:$0xff] }
 0x7da   : > { %v5913_v3 = vsel %vm5911_vm3, %v5908_v30, %v5912_v46  ;;  %6396 = vmatpush.bf16.msra.mxu2 %v11975_v22  ;;  %6235 = vmatpush.bf16.msrb.mxu1 %v11958_v51  ;;  %v11993_v39 = vld [vmem:[#allocation9 + $0x1c0] sm:$0xff]  ;;  %v12023_v46 = vld [vmem:[#allocation9 + $0x2b0] sm:$0xff]  ;;  %v12022_v2 = vld [vmem:[#allocation9 + $0x2a8] sm:$0xff] }
 0x7db   : > { %5914 = vst [vmem:[#allocation3 + $0xc] sm:$0x7] %v5913_v3  ;;  %6564 = vmatpush.bf16.msrb.mxu3 %v11985_v29  ;;  %v12021_v30 = vld [vmem:[#allocation9 + $0x2a0] sm:$0xff]  ;;  %v12020_v3 = vld [vmem:[#allocation9 + $0x298] sm:$0xff]  ;;  %v12063_v29 = vld [vmem:[#allocation9 + $0x3f0] sm:$0xff] }
 0x7dc   : > { %v11977_v22 = vld [vmem:[#allocation9 + $0x140] sm:$0xff]  ;;  %v12016_v51 = vld [vmem:[#allocation9 + $0x278] sm:$0xff] }
 0x7de   : > { %6397 = vmatpush.bf16.msra.mxu2 %v11974_v9  ;;  %6236 = vmatpush.bf16.msrb.mxu1 %v11957_v23 }
 0x7df   : > { %6881 = vmatpush.bf16.msra.mxu3 %v12024_v45 }
 0x7e2   : > { %v11932_v58 = vld [vmem:[#allocation3 + $0x8] sm:$0xff]  ;;  %6398 = vmatpush.bf16.msra.mxu2 %v11973_v57  ;;  %6237 = vmatpush.bf16.msrb.mxu1 %v11956_v16 }
 0x7e3   : > { %5985 = vmatpush.bf16.msra.mxu0 %v11932_v58  ;;  %6882 = vmatpush.bf16.msra.mxu3 %v12023_v46  ;;  %v12026_v16 = vld [vmem:[#allocation9 + $0x2c8] sm:$0xff]  ;;  %v12051_v46 = vld [vmem:[#allocation9 + $0x390] sm:$0xff] }
 0x7e6   : > { %6399 = vmatpush.bf16.msra.mxu2 %v11972_v31  ;;  %6238 = vmatpush.bf16.msrb.mxu1 %v11955_v37  ;;  %v12015_v31 = vld [vmem:[#allocation9 + $0x270] sm:$0xff]  ;;  %v12053_v37 = vld [vmem:[#allocation9 + $0x3a0] sm:$0xff] }
 0x7e7   : > { %5986 = vmatpush.bf16.msra.mxu0 %v11931_v4  ;;  %6883 = vmatpush.bf16.msra.mxu3 %v12022_v2  ;;  %v12008_v4 = vld [vmem:[#allocation9 + $0x238] sm:$0xff] }
 0x7e8   : > { %v12012_v2 = vld [vmem:[#allocation9 + $0x258] sm:$0xff] }
 0x7ea   : > { %10498 = vmatmul.msk.bf16.vlgmr.msra.gmra.mxu0 %vm5963_vm4, %v11933_v48  ;;  %6400 = vmatpush.bf16.msra.mxu2 %v11971_v5  ;;  %v12038_v5 = vld [vmem:[#allocation9 + $0x328] sm:$0xff] }
 0x7eb   : > { %6315 = vmatpush.bf16.msrb.mxu0 %v11968_v25  ;;  %6239 = vmatpush.bf16.msrb.mxu1 %v11954_v54  ;;  %v12025_v54 = vld [vmem:[#allocation9 + $0x2c0] sm:$0xff] }
 0x7ec   : > { %6884 = vmatpush.bf16.msra.mxu3 %v12021_v30  ;;  %v12062_v30 = vld [vmem:[#allocation9 + $0x3e8] sm:$0xff] }
 0x7ee   : > { %6401 = vmatpush.bf16.msra.mxu2 %v11970_v62  ;;  %v12014_v62 = vld [vmem:[#allocation9 + $0x268] sm:$0xff] }
 0x7ef   : > { %6316 = vmatpush.bf16.msrb.mxu0 %v11967_v14  ;;  %6240 = vmatpush.bf16.msrb.mxu1 %v11953_v50 }
 0x7f0   : > { %6885 = vmatpush.bf16.msra.mxu3 %v12020_v3 }
 0x7f2   : > { %6402 = vmatpush.bf16.msra.mxu2 %v11969_v0  ;;  %v12037_v0 = vld [vmem:[#allocation9 + $0x320] sm:$0xff] }
 0x7f3   : > { %6317 = vmatpush.bf16.msrb.mxu0 %v11966_v15 }
 0x7f4   : > { %6886 = vmatpush.bf16.msra.mxu3 %v12019_v42  ;;  %v12061_v42 = vld [vmem:[#allocation9 + $0x3e0] sm:$0xff] }
 0x7f7   : > { %6318 = vmatpush.bf16.msrb.mxu0 %v11965_v18 }
 0x7f8   : > { %6887 = vmatpush.bf16.msra.mxu3 %v12018_v10  ;;  %v12060_v10 = vld [vmem:[#allocation9 + $0x3d8] sm:$0xff] }
 0x7fa   : > { %10499 = vmatmul.msk.bf16.gmra.mxu0 %vm5963_vm4, %v11934_v27  ;;  %v11984_v27 = vld [vmem:[#allocation9 + $0x178] sm:$0xff] }
 0x7fb   : > { %6319 = vmatpush.bf16.msrb.mxu0 %v11964_v40  ;;  %v11980_v40 = vld [vmem:[#allocation9 + $0x158] sm:$0xff] }
 0x7fc   : > { %6888 = vmatpush.bf16.msra.mxu3 %v12017_v55  ;;  %v12059_v55 = vld [vmem:[#allocation9 + $0x3d0] sm:$0xff] }
 0x7ff   : > { %6320 = vmatpush.bf16.msrb.mxu0 %v11963_v53  ;;  %v11979_v53 = vld [vmem:[#allocation9 + $0x150] sm:$0xff] }
 0x803   : > { %6321 = vmatpush.bf16.msrb.mxu0 %v11962_v44  ;;  %v12002_v44 = vld [vmem:[#allocation9 + $0x208] sm:$0xff] }
 0x807   : > { %6322 = vmatpush.bf16.msrb.mxu0 %v11961_v36  ;;  %v12001_v36 = vld [vmem:[#allocation9 + $0x200] sm:$0xff] }
 0x80a   : > { %10500 = vmatmul.msk.bf16.gmra.mxu0 %vm5963_vm4, %v11935_v60  ;;  %v12031_v60 = vld [vmem:[#allocation9 + $0x2f0] sm:$0xff] }
 0x80b   : > { %6639 = vmatpush.bf16.msra.mxu0 %v12000_v12  ;;  %v12055_v12 = vld [vmem:[#allocation9 + $0x3b0] sm:$0xff] }
 0x80f   : > { %6640 = vmatpush.bf16.msra.mxu0 %v11999_v34  ;;  %v12027_v34 = vld [vmem:[#allocation9 + $0x2d0] sm:$0xff] }
 0x813   : > { %6641 = vmatpush.bf16.msra.mxu0 %v11998_v20  ;;  %v12054_v20 = vld [vmem:[#allocation9 + $0x3a8] sm:$0xff] }
 0x817   : > { %6642 = vmatpush.bf16.msra.mxu0 %v11997_v35  ;;  %v12039_v35 = vld [vmem:[#allocation9 + $0x330] sm:$0xff] }
 0x81a   : > { %10501 = vmatmul.msk.bf16.gmra.mxu0 %vm5963_vm4, %v11936_v33  ;;  %v12028_v33 = vld [vmem:[#allocation9 + $0x2d8] sm:$0xff] }
 0x81b   : > { %6643 = vmatpush.bf16.msra.mxu0 %v11996_v19  ;;  %v12064_v19 = vld [vmem:[#allocation9 + $0x3f8] sm:$0xff] }
 0x81f   : > { %6644 = vmatpush.bf16.msra.mxu0 %v11995_v11  ;;  %v12052_v11 = vld [vmem:[#allocation9 + $0x398] sm:$0xff] }
 0x823   : > { %6645 = vmatpush.bf16.msra.mxu0 %v11994_v21  ;;  %v12013_v21 = vld [vmem:[#allocation9 + $0x260] sm:$0xff] }
 0x827   : > { %6646 = vmatpush.bf16.msra.mxu0 %v11993_v39  ;;  %v12036_v39 = vld [vmem:[#allocation9 + $0x318] sm:$0xff] }
 0x867   : > { %v5988_v58 = vpop.f32.mrf.mxu0 }
 0x868   : > { %v6008_v48 = vpack.c.bf16 %v5988_v58, %v5988_v58  ;;  %v12035_v58 = vld [vmem:[#allocation9 + $0x310] sm:$0xff] }
 0x86a   : > { %v6043_v1 = vrot.slane %v6008_v48, 2  ;;  %6162 = vmatmul.bf16.vlgmr.msrb.gmra.mxu2 %v6008_v48  ;;  %v12011_v48 = vld [vmem:[#allocation9 + $0x250] sm:$0xff] }
 0x86b   : > { %6719 = vmatpush.bf16.msrb.mxu2 %v12008_v4  ;;  %v12050_v4 = vld [vmem:[#allocation9 + $0x388] sm:$0xff] }
 0x86c   : > { %6101 = vmatmul.bf16.vlgmr.msra.gmra.mxu1 %v6043_v1  ;;  %v12049_v1 = vld [vmem:[#allocation9 + $0x380] sm:$0xff] }
 0x86d   : > { %6477 = vmatpush.bf16.msra.mxu1 %v11984_v27  ;;  %v12034_v27 = vld [vmem:[#allocation9 + $0x308] sm:$0xff] }
 0x86f   : > { %v5990_v25 = vpop.f32.mrf.mxu0  ;;  %6720 = vmatpush.bf16.msrb.mxu2 %v12007_v41  ;;  %v12010_v41 = vld [vmem:[#allocation9 + $0x248] sm:$0xff] }
 0x870   : > { %v6167_v14 = vpack.c.bf16 %v5990_v25, %v5990_v25  ;;  %v12033_v25 = vld [vmem:[#allocation9 + $0x300] sm:$0xff] }
 0x871   : > { %6478 = vmatpush.bf16.msra.mxu1 %v11983_v26 }
 0x872   : > { %v6265_v15 = vrot.slane %v6167_v14, 2 }
 0x873   : > { %6721 = vmatpush.bf16.msrb.mxu2 %v12006_v6 }
 0x874   : > { %6323 = vmatmul.bf16.vlgmr.msrb.gmra.mxu0 %v6265_v15 }
 0x875   : > { %6479 = vmatpush.bf16.msra.mxu1 %v11982_v7  ;;  %6963 = vmatpush.bf16.msrb.mxu0 %v12032_v13  ;;  %v12048_v13 = vld [vmem:[#allocation9 + $0x378] sm:$0xff] }
 0x877   : > { %v5993_v18 = vpop.f32.mrf.mxu0  ;;  %6722 = vmatpush.bf16.msrb.mxu2 %v12005_v24  ;;  %v12058_v24 = vld [vmem:[#allocation9 + $0x3c8] sm:$0xff] }
 0x878   : > { %v6329_v38 = vpack.c.bf16 %v5993_v18, %v5993_v18  ;;  %v12046_v18 = vld [vmem:[#allocation9 + $0x368] sm:$0xff] }
 0x879   : > { %6480 = vmatpush.bf16.msra.mxu1 %v11981_v49  ;;  %6964 = vmatpush.bf16.msrb.mxu0 %v12031_v60  ;;  %v12047_v49 = vld [vmem:[#allocation9 + $0x370] sm:$0xff]  ;;  %v12057_v60 = vld [vmem:[#allocation9 + $0x3c0] sm:$0xff] }
 0x87a   : > { %6403 = vmatmul.bf16.vlgmr.msra.gmra.mxu2 %v6329_v38  ;;  %v6427_v23 = vrot.slane %v6329_v38, 2  ;;  %v12045_v38 = vld [vmem:[#allocation9 + $0x360] sm:$0xff] }
 0x87b   : > { %6723 = vmatpush.bf16.msrb.mxu2 %v12004_v47 }
 0x87c   : > { %6241 = vmatmul.bf16.vlgmr.msrb.gmra.mxu1 %v6167_v14  ;;  %v12009_v14 = vld [vmem:[#allocation9 + $0x240] sm:$0xff] }
 0x87d   : > { %6481 = vmatpush.bf16.msra.mxu1 %v11980_v40  ;;  %6965 = vmatpush.bf16.msrb.mxu0 %v12030_v32  ;;  %v12044_v40 = vld [vmem:[#allocation9 + $0x358] sm:$0xff]  ;;  %v12043_v32 = vld [vmem:[#allocation9 + $0x350] sm:$0xff] }
 0x87f   : > { %6724 = vmatpush.bf16.msrb.mxu2 %v12003_v52  ;;  %v5995_v56 = vpop.f32.mrf.mxu0  ;;  %v12042_v52 = vld [vmem:[#allocation9 + $0x348] sm:$0xff] }
 0x880   : > { %v6491_v59 = vpack.c.bf16 %v5995_v56, %v5995_v56 }
 0x881   : > { %6482 = vmatpush.bf16.msra.mxu1 %v11979_v53  ;;  %6966 = vmatpush.bf16.msrb.mxu0 %v12029_v61  ;;  %v12041_v53 = vld [vmem:[#allocation9 + $0x340] sm:$0xff] }
 0x882   : > { %v6589_v43 = vrot.slane %v6491_v59, 2  ;;  %6565 = vmatmul.bf16.vlgmr.msrb.gmra.mxu3 %v6491_v59 }
 0x883   : > { %6725 = vmatpush.bf16.msrb.mxu2 %v12002_v44  ;;  %7205 = vmatpush.bf16.msrb.mxu3 %v12056_v8 }
 0x884   : > { %6647 = vmatmul.bf16.vlgmr.msra.gmra.mxu0 %v6589_v43 }
 0x885   : > { %6483 = vmatpush.bf16.msra.mxu1 %v11978_v17  ;;  %6967 = vmatpush.bf16.msrb.mxu0 %v12028_v33 }
 0x887   : > { %6726 = vmatpush.bf16.msrb.mxu2 %v12001_v36  ;;  %v5998_v9 = vpop.f32.mrf.mxu0  ;;  %7206 = vmatpush.bf16.msrb.mxu3 %v12055_v12 }
 0x888   : > { %v14120_v57 = vpack.c.bf16 %v5998_v9, %v5998_v9 }
 0x889   : > { %6484 = vmatpush.bf16.msra.mxu1 %v11977_v22  ;;  %6968 = vmatpush.bf16.msrb.mxu0 %v12027_v34 }
 0x88a   : > { %6727 = vmatmul.bf16.vlgmr.msrb.gmra.mxu2 %v14120_v57  ;;  %v6751_v15 = vrot.slane %v14120_v57, 2 }
 0x88b   : > { %7043 = vmatpush.bf16.msra.mxu2 %v12040_v28  ;;  %7207 = vmatpush.bf16.msrb.mxu3 %v12054_v20 }
 0x88c   : > { %6485 = vmatmul.bf16.vlgmr.msra.gmra.mxu1 %v6427_v23 }
 0x88d   : > { %6801 = vmatpush.bf16.msrb.mxu1 %v12016_v51  ;;  %6969 = vmatpush.bf16.msrb.mxu0 %v12026_v16 }
 0x88f   : > { %7044 = vmatpush.bf16.msra.mxu2 %v12039_v35  ;;  %v6000_v50 = vpop.f32.mrf.mxu0  ;;  %7208 = vmatpush.bf16.msrb.mxu3 %v12053_v37 }
 0x890   : > { %v6815_v63 = vpack.c.bf16 %v6000_v50, %v6000_v50 }
 0x891   : > { %6802 = vmatpush.bf16.msrb.mxu1 %v12015_v31  ;;  %6970 = vmatpush.bf16.msrb.mxu0 %v12025_v54 }
 0x892   : > { %v6913_v45 = vrot.slane %v6815_v63, 2  ;;  %6889 = vmatmul.bf16.vlgmr.msra.gmra.mxu3 %v6815_v63 }
 0x893   : > { %7045 = vmatpush.bf16.msra.mxu2 %v12038_v5  ;;  %7209 = vmatpush.bf16.msrb.mxu3 %v12052_v11 }
 0x894   : > { %6971 = vmatmul.bf16.vlgmr.msrb.gmra.mxu0 %v6913_v45 }
 0x895   : > { %6803 = vmatpush.bf16.msrb.mxu1 %v12014_v62  ;;  %7287 = vmatpush.bf16.msra.mxu0 %v12064_v19 }
 0x897   : > { %7046 = vmatpush.bf16.msra.mxu2 %v12037_v0  ;;  %v6003_v3 = vpop.f32.mrf.mxu0  ;;  %7210 = vmatpush.bf16.msrb.mxu3 %v12051_v46 }
 0x898   : > { %v6977_v7 = vpack.c.bf16 %v6003_v3, %v6003_v3 }
 0x899   : > { %6804 = vmatpush.bf16.msrb.mxu1 %v12013_v21  ;;  %7288 = vmatpush.bf16.msra.mxu0 %v12063_v29 }
 0x89a   : > { %v7075_v61 = vrot.slane %v6977_v7, 2 }
 0x89b   : > { %7047 = vmatpush.bf16.msra.mxu2 %v12036_v39  ;;  %7211 = vmatpush.bf16.msrb.mxu3 %v12050_v4 }
 0x89d   : > { %6805 = vmatpush.bf16.msrb.mxu1 %v12012_v2  ;;  %7289 = vmatpush.bf16.msra.mxu0 %v12062_v30 }
 0x89f   : > { %7048 = vmatpush.bf16.msra.mxu2 %v12035_v58  ;;  %v6005_v26 = vpop.f32.mrf.mxu0  ;;  %7212 = vmatpush.bf16.msrb.mxu3 %v12049_v1 }
 0x8a0   : > { %v7139_v6 = vpack.c.bf16 %v6005_v26, %v6005_v26  ;;  %v12090_v26 = vld [vmem:[#allocation10 + $0xb8] sm:$0xff] }
 0x8a1   : > { %6806 = vmatpush.bf16.msrb.mxu1 %v12011_v48  ;;  %7290 = vmatpush.bf16.msra.mxu0 %v12061_v42 }
 0x8a2   : > { %7213 = vmatmul.bf16.vlgmr.msrb.gmra.mxu3 %v7139_v6  ;;  %v7237_v47 = vrot.slane %v7139_v6, 2  ;;  %v12260_v6 = vld [vmem:[%s14199_s10] ss:$0 sm:$0xff] }
 0x8a3   : > { %7049 = vmatpush.bf16.msra.mxu2 %v12034_v27  ;;  %7593 = vmatpush.bf16.msra.mxu3 %v12090_v26  ;;  %v12118_v26 = vld [vmem:[#allocation10 + $0x198] sm:$0xff] }
 0x8a5   : > { %6807 = vmatpush.bf16.msrb.mxu1 %v12010_v41  ;;  %7291 = vmatpush.bf16.msra.mxu0 %v12060_v10  ;;  %v12082_v10 = vld [vmem:[#allocation10 + $0x78] sm:$0xff] }
 0x8a7   : > { %7050 = vmatpush.bf16.msra.mxu2 %v12033_v25 }
 0x8a9   : > { %6808 = vmatpush.bf16.msrb.mxu1 %v12009_v14  ;;  %7292 = vmatpush.bf16.msra.mxu0 %v12059_v55  ;;  %v12098_v14 = vld [vmem:[#allocation10 + $0xf8] sm:$0xff]  ;;  %v12081_v55 = vld [vmem:[#allocation10 + $0x70] sm:$0xff] }
 0x8aa   : > { %7051 = vmatmul.bf16.vlgmr.msra.gmra.mxu2 %v6977_v7  ;;  %v12089_v7 = vld [vmem:[#allocation10 + $0xb0] sm:$0xff] }
 0x8ab   : > { %7594 = vmatpush.bf16.msra.mxu3 %v12089_v7  ;;  %v12068_v7 = vld [vmem:[#allocation10 + $0x8] sm:$0xff] }
 0x8ac   : > { %6809 = vmatmul.bf16.vlgmr.msrb.gmra.mxu1 %v6751_v15 }
 0x8ad   : > { %7125 = vmatpush.bf16.msra.mxu1 %v12048_v13  ;;  %7293 = vmatpush.bf16.msra.mxu0 %v12058_v24 }
 0x8b1   : > { %7126 = vmatpush.bf16.msra.mxu1 %v12047_v49  ;;  %7294 = vmatpush.bf16.msra.mxu0 %v12057_v60  ;;  %v12097_v49 = vld [vmem:[#allocation10 + $0xf0] sm:$0xff]  ;;  %v12080_v60 = vld [vmem:[#allocation10 + $0x68] sm:$0xff] }
 0x8b4   : > { %7295 = vmatmul.bf16.vlgmr.msra.gmra.mxu0 %v7237_v47 }
 0x8b5   : > { %7127 = vmatpush.bf16.msra.mxu1 %v12046_v18  ;;  %7674 = vmatpush.bf16.msrb.mxu0 %v12098_v14  ;;  %v12088_v18 = vld [vmem:[#allocation10 + $0xa8] sm:$0xff]  ;;  %v12101_v14 = vld [vmem:[#allocation10 + $0x110] sm:$0xff] }
 0x8b6   : > { %7595 = vmatpush.bf16.msra.mxu3 %v12088_v18  ;;  %v12111_v18 = vld [vmem:[#allocation10 + $0x160] sm:$0xff] }
 0x8b9   : > { %7128 = vmatpush.bf16.msra.mxu1 %v12045_v38  ;;  %7675 = vmatpush.bf16.msrb.mxu0 %v12097_v49  ;;  %v12113_v49 = vld [vmem:[#allocation10 + $0x170] sm:$0xff] }
 0x8bd   : > { %7129 = vmatpush.bf16.msra.mxu1 %v12044_v40  ;;  %v12096_v40 = vld [vmem:[#allocation10 + $0xe8] sm:$0xff] }
 0x8be   : > { %7676 = vmatpush.bf16.msrb.mxu0 %v12096_v40  ;;  %v12108_v40 = vld [vmem:[#allocation10 + $0x148] sm:$0xff] }
 0x8c1   : > { %7130 = vmatpush.bf16.msra.mxu1 %v12043_v32  ;;  %v12079_v32 = vld [vmem:[#allocation10 + $0x60] sm:$0xff] }
 0x8c5   : > { %7131 = vmatpush.bf16.msra.mxu1 %v12042_v52  ;;  %v12087_v52 = vld [vmem:[#allocation10 + $0xa0] sm:$0xff] }
 0x8c6   : > { %7596 = vmatpush.bf16.msra.mxu3 %v12087_v52  ;;  %v12116_v52 = vld [vmem:[#allocation10 + $0x188] sm:$0xff] }
 0x8c9   : > { %7132 = vmatpush.bf16.msra.mxu1 %v12041_v53 }
 0x8cc   : > { %7133 = vmatmul.bf16.vlgmr.msra.gmra.mxu1 %v7075_v61 }
 0x8cd   : > { %7451 = vmatpush.bf16.msrb.mxu1 %v12082_v10  ;;  %v12102_v10 = vld [vmem:[#allocation10 + $0x118] sm:$0xff] }
 0x8d1   : > { %7452 = vmatpush.bf16.msrb.mxu1 %v12081_v55  ;;  %v12117_v55 = vld [vmem:[#allocation10 + $0x190] sm:$0xff] }
 0x8d5   : > { %7453 = vmatpush.bf16.msrb.mxu1 %v12080_v60  ;;  %v12112_v60 = vld [vmem:[#allocation10 + $0x168] sm:$0xff] }
 0x8d9   : > { %7454 = vmatpush.bf16.msrb.mxu1 %v12079_v32  ;;  %v12100_v32 = vld [vmem:[#allocation10 + $0x108] sm:$0xff] }
 0x8e9   : > { %v6102_v56 = vpop.f32.mrf.mxu1 }
 0x8ed   : > { %v6163_v44 = vpop.f32.mrf.mxu2 }
 0x8ee   : > { %v6164_v5 = vadd.f32 %v6163_v44, %v6102_v56  ;;  %v12099_v56 = vld [vmem:[#allocation10 + $0x100] sm:$0xff] }
 0x8f1   : > { %v6104_v8 = vpop.f32.mrf.mxu1  ;;  %v6324_v59 = vpop.f32.mrf.mxu0 }
 0x8f5   : > { %v6165_v17 = vpop.f32.mrf.mxu2 }
 0x8f9   : > { %v6242_v33 = vpop.f32.mrf.mxu1  ;;  %v6326_v43 = vpop.f32.mrf.mxu0 }
 0x8fa   : > { %v6246_v54 = vadd.f32 %v6242_v33, %v6164_v5  ;;  %v12095_v43 = vld [vmem:[#allocation10 + $0xe0] sm:$0xff]  ;;  %v12074_v5 = vld [vmem:[#allocation10 + $0x38] sm:$0xff] }
 0x8fb   : > { %7677 = vmatpush.bf16.msrb.mxu0 %v12095_v43  ;;  %v12138_v43 = vld [vmem:[#allocation10 + $0x238] sm:$0xff] }
 0x8fc   : > { %v6328_v19 = vadd.f32 %v6324_v59, %v6246_v54  ;;  %v7319_v59 = vld [vmem:[#allocation4] sm:$0xc]  ;;  %v12092_v54 = vld [vmem:[#allocation10 + $0xc8] sm:$0xff] }
 0x8fd   : > { %v6404_v36 = vpop.f32.mrf.mxu2 }
 0x8fe   : > { %v6408_v50 = vadd.f32 %v6404_v36, %v6328_v19  ;;  %v12078_v36 = vld [vmem:[#allocation10 + $0x58] sm:$0xff]  ;;  %v12075_v19 = vld [vmem:[#allocation10 + $0x40] sm:$0xff] }
 0x8ff   : > { %7455 = vmatpush.bf16.msrb.mxu1 %v12078_v36  ;;  %v12154_v36 = vld [vmem:[#allocation10 + $0x2b8] sm:$0xff] }
 0x901   : > { %v6244_v12 = vpop.f32.mrf.mxu1  ;;  %v6648_v28 = vpop.f32.mrf.mxu0 }
 0x902   : > { %v12086_v12 = vld [vmem:[#allocation10 + $0x98] sm:$0xff] }
 0x903   : > { %7597 = vmatpush.bf16.msra.mxu3 %v12086_v12 }
 0x905   : > { %v6406_v22 = vpop.f32.mrf.mxu2  ;;  %v6566_v34 = vpop.f32.mrf.mxu3 }
 0x909   : > { %v6486_v51 = vpop.f32.mrf.mxu1  ;;  %v6650_v9 = vpop.f32.mrf.mxu0 }
 0x90a   : > { %v6490_v11 = vadd.f32 %v6486_v51, %v6408_v50  ;;  %v12083_v50 = vld [vmem:[#allocation10 + $0x80] sm:$0xff] }
 0x90c   : > { %v6570_v29 = vadd.f32 %v6566_v34, %v6490_v11  ;;  %v7329_v34 = vld [vmem:[#allocation4 + $0x4] sm:$0x3] }
 0x90d   : > { %v6728_v20 = vpop.f32.mrf.mxu2  ;;  %v6568_v23 = vpop.f32.mrf.mxu3  ;;  %v12122_v11 = vld [vmem:[#allocation10 + $0x1b8] sm:$0xff] }
 0x90e   : > { %v6652_v2 = vadd.f32 %v6648_v28, %v6570_v29  ;;  %v12077_v23 = vld [vmem:[#allocation10 + $0x50] sm:$0xff] }
 0x90f   : > { %7456 = vmatpush.bf16.msrb.mxu1 %v12077_v23  ;;  %v12073_v29 = vld [vmem:[#allocation10 + $0x30] sm:$0xff]  ;;  %v12144_v23 = vld [vmem:[#allocation10 + $0x268] sm:$0xff] }
 0x910   : > { %v6732_v3 = vadd.f32 %v6728_v20, %v6652_v2  ;;  %v12094_v20 = vld [vmem:[#allocation10 + $0xd8] sm:$0xff]  ;;  %v12072_v2 = vld [vmem:[#allocation10 + $0x28] sm:$0xff] }
 0x911   : > { %v6488_v57 = vpop.f32.mrf.mxu1  ;;  %v6972_v35 = vpop.f32.mrf.mxu0  ;;  %7678 = vmatpush.bf16.msrb.mxu0 %v12094_v20  ;;  %v12153_v20 = vld [vmem:[#allocation10 + $0x2b0] sm:$0xff] }
 0x912   : > { %v12085_v57 = vld [vmem:[#allocation10 + $0x90] sm:$0xff] }
 0x913   : > { %7598 = vmatpush.bf16.msra.mxu3 %v12085_v57  ;;  %v12161_v57 = vld [vmem:[#allocation10 + $0x2f0] sm:$0xff] }
 0x915   : > { %v6730_v16 = vpop.f32.mrf.mxu2  ;;  %v6890_v31 = vpop.f32.mrf.mxu3 }
 0x916   : > { %v12093_v16 = vld [vmem:[#allocation10 + $0xd0] sm:$0xff] }
 0x917   : > { %7679 = vmatpush.bf16.msrb.mxu0 %v12093_v16  ;;  %v12152_v16 = vld [vmem:[#allocation10 + $0x2a8] sm:$0xff] }
 0x919   : > { %v6974_v37 = vpop.f32.mrf.mxu0 }
 0x91a   : > { %v12084_v37 = vld [vmem:[#allocation10 + $0x88] sm:$0xff] }
 0x91b   : > { %7599 = vmatpush.bf16.msra.mxu3 %v12084_v37  ;;  %7680 = vmatpush.bf16.msrb.mxu0 %v12092_v54  ;;  %v12160_v37 = vld [vmem:[#allocation10 + $0x2e8] sm:$0xff]  ;;  %v12151_v54 = vld [vmem:[#allocation10 + $0x2a0] sm:$0xff] }
 0x91d   : > { %v6892_v62 = vpop.f32.mrf.mxu3 }
 0x91f   : > { %7600 = vmatpush.bf16.msra.mxu3 %v12083_v50 }
 0x923   : > { %7917 = vmatpush.bf16.msrb.mxu3 %v12122_v11 }
 0x925   : > { %v7214_v63 = vpop.f32.mrf.mxu3 }
 0x929   : > { %v6810_v0 = vpop.f32.mrf.mxu1 }
 0x92a   : > { %v6814_v58 = vadd.f32 %v6810_v0, %v6732_v3  ;;  %v12066_v0 = vld [vmem:[%s14192_s3] sm:$0xff]  ;;  %v12104_v3 = vld [vmem:[#allocation10 + $0x128] sm:$0xff] }
 0x92c   : > { %v6894_v48 = vadd.f32 %v6890_v31, %v6814_v58  ;;  %v12076_v31 = vld [vmem:[#allocation10 + $0x48] sm:$0xff] }
 0x92d   : > { %v7052_v21 = vpop.f32.mrf.mxu2  ;;  %v7216_v46 = vpop.f32.mrf.mxu3  ;;  %7457 = vmatpush.bf16.msrb.mxu1 %v12076_v31  ;;  %v12120_v58 = vld [vmem:[#allocation10 + $0x1a8] sm:$0xff]  ;;  %v12143_v31 = vld [vmem:[#allocation10 + $0x260] sm:$0xff] }
 0x92e   : > { %v6976_v42 = vadd.f32 %v6972_v35, %v6894_v48  ;;  %v12121_v46 = vld [vmem:[#allocation10 + $0x1b0] sm:$0xff]  ;;  %v12128_v48 = vld [vmem:[#allocation10 + $0x1e8] sm:$0xff] }
 0x92f   : > { %7918 = vmatpush.bf16.msrb.mxu3 %v12121_v46  ;;  %v12133_v46 = vld [vmem:[#allocation10 + $0x210] sm:$0xff] }
 0x930   : > { %v7056_v27 = vadd.f32 %v7052_v21, %v6976_v42  ;;  %v12091_v21 = vld [vmem:[#allocation10 + $0xc0] sm:$0xff] }
 0x931   : > { %v6812_v45 = vpop.f32.mrf.mxu1  ;;  %v7296_v39 = vpop.f32.mrf.mxu0  ;;  %7458 = vmatpush.bf16.msrb.mxu1 %v12075_v19  ;;  %7681 = vmatpush.bf16.msrb.mxu0 %v12091_v21  ;;  %v12103_v42 = vld [vmem:[#allocation10 + $0x120] sm:$0xff] }
 0x932   : > { %v12130_v45 = vld [vmem:[#allocation10 + $0x1f8] sm:$0xff]  ;;  %v12159_v19 = vld [vmem:[#allocation10 + $0x2e0] sm:$0xff] }
 0x933   : > { %7919 = vmatpush.bf16.msrb.mxu3 %v12120_v58  ;;  %v12132_v58 = vld [vmem:[#allocation10 + $0x208] sm:$0xff] }
 0x935   : > { %v7054_v30 = vpop.f32.mrf.mxu2  ;;  %7998 = vmatpush.bf16.msra.mxu0 %v12130_v45  ;;  %v12158_v45 = vld [vmem:[#allocation10 + $0x2d8] sm:$0xff] }
 0x936   : > { %v12129_v30 = vld [vmem:[#allocation10 + $0x1f0] sm:$0xff] }
 0x939   : > { %v7298_v4 = vpop.f32.mrf.mxu0  ;;  %7999 = vmatpush.bf16.msra.mxu0 %v12129_v30  ;;  %v12140_v30 = vld [vmem:[#allocation10 + $0x248] sm:$0xff] }
 0x93a   : > { %v12071_v4 = vld [vmem:[#allocation10 + $0x20] sm:$0xff] }
 0x93d   : > { %8000 = vmatpush.bf16.msra.mxu0 %v12128_v48 }
 0x949   : > { %v7134_v1 = vpop.f32.mrf.mxu1 }
 0x94a   : > { %v7138_v41 = vadd.f32 %v7134_v1, %v7056_v27  ;;  %v12119_v27 = vld [vmem:[#allocation10 + $0x1a0] sm:$0xff]  ;;  %v12070_v1 = vld [vmem:[#allocation10 + $0x18] sm:$0xff] }
 0x94b   : > { %7920 = vmatpush.bf16.msrb.mxu3 %v12119_v27  ;;  %v12156_v27 = vld [vmem:[#allocation10 + $0x2c8] sm:$0xff] }
 0x94c   : > { %v7218_v25 = vadd.f32 %v7214_v63, %v7138_v41  ;;  %v12106_v63 = vld [vmem:[#allocation10 + $0x138] sm:$0xff]  ;;  %v12127_v41 = vld [vmem:[#allocation10 + $0x1e0] sm:$0xff] }
 0x94d   : > { %7755 = vmatpush.bf16.msra.mxu1 %v12106_v63  ;;  %8001 = vmatpush.bf16.msra.mxu0 %v12127_v41  ;;  %v12150_v63 = vld [vmem:[#allocation10 + $0x298] sm:$0xff] }
 0x94e   : > { %v7300_v13 = vadd.f32 %v7296_v39, %v7218_v25  ;;  %v12105_v39 = vld [vmem:[#allocation10 + $0x130] sm:$0xff] }
 0x94f   : > { %v12069_v25 = vld [vmem:[#allocation10 + $0x10] sm:$0xff]  ;;  %7921 = vmatpush.bf16.msrb.mxu3 %v12118_v26  ;;  %v12147_v26 = vld [vmem:[#allocation10 + $0x280] sm:$0xff] }
 0x950   : > { %v7305_v15 = vadd.f32 %v12260_v6, %v7300_v13  ;;  %v12126_v6 = vld [vmem:[#allocation10 + $0x1d8] sm:$0xff]  ;;  %v12125_v13 = vld [vmem:[#allocation10 + $0x1d0] sm:$0xff] }
 0x951   : > { %v7136_v24 = vpop.f32.mrf.mxu1  ;;  %7756 = vmatpush.bf16.msra.mxu1 %v12105_v39  ;;  %8002 = vmatpush.bf16.msra.mxu0 %v12126_v6  ;;  %v12186_v6 = vld [vmem:[#allocation10 + $0x3b8] sm:$0xff] }
 0x952   : > { %v7306_v47 = vmax.f32 %v7305_v15, 0.0  ;;  %v12067_v15 = vld [vmem:[#allocation10] sm:$0xff]  ;;  %v12114_v24 = vld [vmem:[#allocation10 + $0x178] sm:$0xff] }
 0x953   : > { %7922 = vmatpush.bf16.msrb.mxu3 %v12117_v55  ;;  %v12177_v55 = vld [vmem:[#allocation10 + $0x370] sm:$0xff] }
 0x954   : > { %v7307_v38 = vpack.c.bf16 %v7306_v47, %v7306_v47  ;;  %v12110_v47 = vld [vmem:[#allocation10 + $0x158] sm:$0xff] }
 0x955   : > { %7757 = vmatpush.bf16.msra.mxu1 %v12104_v3  ;;  %8003 = vmatpush.bf16.msra.mxu0 %v12125_v13  ;;  %v12157_v3 = vld [vmem:[#allocation10 + $0x2d0] sm:$0xff] }
 0x956   : > { %v7309_v53 = vshrl.u32 %v7307_v38, 16  ;;  %v7312_v61 = vshll.u32 %v7307_v38, 16  ;;  %v12109_v38 = vld [vmem:[#allocation10 + $0x150] sm:$0xff] }
 0x957   : > { %7923 = vmatpush.bf16.msrb.mxu3 %v12116_v52  ;;  %v12192_v52 = vld [vmem:[#allocation10 + $0x3e8] sm:$0xff] }
 0x958   : > { %v7311_v44 = vrot.slane %v7309_v53, 5  ;;  %v7314_v8 = vrot.slane %v7312_v61, 6  ;;  %v7322_v17 = vrot.slane %v7309_v53, 4  ;;  %v7323_v33 = vrot.slane %v7312_v61, 5  ;;  %v12107_v53 = vld [vmem:[#allocation10 + $0x140] sm:$0xff]  ;;  %v12124_v61 = vld [vmem:[#allocation10 + $0x1c8] sm:$0xff] }
 0x959   : > { %7758 = vmatpush.bf16.msra.mxu1 %v12103_v42  ;;  %8004 = vmatpush.bf16.msra.mxu0 %v12124_v61  ;;  %v12139_v42 = vld [vmem:[#allocation10 + $0x240] sm:$0xff] }
 0x95a   : > { %v7315_v28 = vor.u32 %v7314_v8, %v7311_v44  ;;  %v7324_v22 = vor.u32 %v7323_v33, %v7322_v17  ;;  %v12115_v44 = vld [vmem:[#allocation10 + $0x180] sm:$0xff]  ;;  %v12146_v17 = vld [vmem:[#allocation10 + $0x278] sm:$0xff] }
 0x95b   : > { %7924 = vmatpush.bf16.msrb.mxu3 %v12115_v44  ;;  %v12123_v8 = vld [vmem:[#allocation10 + $0x1c0] sm:$0xff] }
 0x95c   : > { %v7320_v51 = vsel %vm14128_vm6, %v7315_v28, %v7319_v59  ;;  %v7325_v9 = vrot.slane %v7324_v22, 4  ;;  %v12145_v22 = vld [vmem:[#allocation10 + $0x270] sm:$0xff]  ;;  %v12183_v61 = vld [vmem:[#allocation10 + $0x3a0] sm:$0xff] }
 0x95d   : > { %7321 = vst [vmem:[#allocation4] sm:$0xc] %v7320_v51  ;;  %7759 = vmatpush.bf16.msra.mxu1 %v12102_v10  ;;  %8005 = vmatpush.bf16.msra.mxu0 %v12123_v8  ;;  %v12131_v10 = vld [vmem:[#allocation10 + $0x200] sm:$0xff]  ;;  %v12166_v8 = vld [vmem:[#allocation10 + $0x318] sm:$0xff] }
 0x95e   : > { %v7330_v35 = vsel %vm7328_vm10, %v7325_v9, %v7329_v34  ;;  %v12162_v34 = vld [vmem:[#allocation10 + $0x2f8] sm:$0xff]  ;;  %v12137_v9 = vld [vmem:[#allocation10 + $0x230] sm:$0xff]  ;;  %v12191_v44 = vld [vmem:[#allocation10 + $0x3e0] sm:$0xff] }
 0x95f   : > { %7331 = vst [vmem:[#allocation4 + $0x4] sm:$0x3] %v7330_v35  ;;  %v12136_v35 = vld [vmem:[#allocation10 + $0x228] sm:$0xff] }
 0x961   : > { %7760 = vmatpush.bf16.msra.mxu1 %v12101_v14  ;;  %v12155_v14 = vld [vmem:[#allocation10 + $0x2c0] sm:$0xff] }
 0x965   : > { %7761 = vmatpush.bf16.msra.mxu1 %v12100_v32  ;;  %v12175_v32 = vld [vmem:[#allocation10 + $0x360] sm:$0xff] }
 0x966   : > { %v12065_v62 = vld [vmem:[#allocation4] sm:$0xff] }
 0x967   : > { %7358 = vmatpush.bf16.msrb.mxu2 %v12065_v62  ;;  %v12142_v62 = vld [vmem:[#allocation10 + $0x258] sm:$0xff] }
 0x969   : > { %7762 = vmatpush.bf16.msra.mxu1 %v12099_v56  ;;  %v12174_v56 = vld [vmem:[#allocation10 + $0x358] sm:$0xff] }
 0x96a   : > { %11022 = vmatmul.msk.bf16.vlgmr.msrb.gmra.mxu2 %vm7347_vm0, %v12066_v0  ;;  %v12134_v0 = vld [vmem:[#allocation10 + $0x218] sm:$0xff] }
 0x96b   : > { %7512 = vmatpush.bf16.msra.mxu2 %v12074_v5  ;;  %v12135_v5 = vld [vmem:[#allocation10 + $0x220] sm:$0xff] }
 0x96f   : > { %7513 = vmatpush.bf16.msra.mxu2 %v12073_v29  ;;  %v12141_v29 = vld [vmem:[#allocation10 + $0x250] sm:$0xff] }
 0x973   : > { %7514 = vmatpush.bf16.msra.mxu2 %v12072_v2  ;;  %v12149_v2 = vld [vmem:[#allocation10 + $0x290] sm:$0xff] }
 0x977   : > { %7515 = vmatpush.bf16.msra.mxu2 %v12071_v4  ;;  %v12148_v4 = vld [vmem:[#allocation10 + $0x288] sm:$0xff] }
 0x97b   : > { %7516 = vmatpush.bf16.msra.mxu2 %v12070_v1  ;;  %v12178_v1 = vld [vmem:[#allocation10 + $0x378] sm:$0xff] }
 0x97f   : > { %7517 = vmatpush.bf16.msra.mxu2 %v12069_v25  ;;  %v12170_v25 = vld [vmem:[#allocation10 + $0x338] sm:$0xff] }
 0x983   : > { %7518 = vmatpush.bf16.msra.mxu2 %v12068_v7  ;;  %v12194_v7 = vld [vmem:[#allocation10 + $0x3f8] sm:$0xff] }
 0x987   : > { %7519 = vmatpush.bf16.msra.mxu2 %v12067_v15  ;;  %v12169_v15 = vld [vmem:[#allocation10 + $0x330] sm:$0xff] }
 0x98b   : > { %7836 = vmatpush.bf16.msrb.mxu2 %v12114_v24  ;;  %v12185_v24 = vld [vmem:[#allocation10 + $0x3b0] sm:$0xff] }
 0x98f   : > { %7837 = vmatpush.bf16.msrb.mxu2 %v12113_v49 }
 0x993   : > { %7838 = vmatpush.bf16.msrb.mxu2 %v12112_v60  ;;  %v12176_v60 = vld [vmem:[#allocation10 + $0x368] sm:$0xff] }
 0x997   : > { %7839 = vmatpush.bf16.msrb.mxu2 %v12111_v18  ;;  %v12193_v18 = vld [vmem:[#allocation10 + $0x3f0] sm:$0xff] }
 0x99b   : > { %7840 = vmatpush.bf16.msrb.mxu2 %v12110_v47 }
 0x99f   : > { %7841 = vmatpush.bf16.msrb.mxu2 %v12109_v38  ;;  %v12168_v38 = vld [vmem:[#allocation10 + $0x328] sm:$0xff] }
 0x9a3   : > { %7842 = vmatpush.bf16.msrb.mxu2 %v12108_v40  ;;  %v12184_v40 = vld [vmem:[#allocation10 + $0x3a8] sm:$0xff] }
 0x9a7   : > { %7843 = vmatpush.bf16.msrb.mxu2 %v12107_v53  ;;  %v12167_v53 = vld [vmem:[#allocation10 + $0x320] sm:$0xff] }
 0x9ed   : > { %v7360_v59 = vpop.f32.mrf.mxu2 }
 0x9ee   : > { %v7365_v33 = vpack.c.bf16 %v7360_v59, %v7360_v59  ;;  %v12182_v59 = vld [vmem:[#allocation10 + $0x398] sm:$0xff] }
 0x9f0   : > { %7520 = vmatmul.bf16.vlgmr.msra.gmra.mxu2 %v7365_v33  ;;  %v7400_v12 = vshrl.u32 %v7365_v33, 16  ;;  %v7543_v28 = vrot.slane %v7365_v33, 1  ;;  %v7705_v11 = vrot.slane %v7365_v33, 2  ;;  %v7867_v21 = vrot.slane %v7365_v33, 3  ;;  %v12190_v33 = vld [vmem:[#allocation10 + $0x3d8] sm:$0xff] }
 0x9f1   : > { %8161 = vmatpush.bf16.msra.mxu2 %v12146_v17  ;;  %v12173_v17 = vld [vmem:[#allocation10 + $0x350] sm:$0xff] }
 0x9f2   : > { %7459 = vmatmul.bf16.vlgmr.msrb.gmra.mxu1 %v7400_v12  ;;  %7601 = vmatmul.bf16.vlgmr.msra.gmra.mxu3 %v7543_v28  ;;  %v7624_v51 = vrot.slane %v7400_v12, 1  ;;  %v7786_v50 = vrot.slane %v7400_v12, 2  ;;  %v7948_v39 = vrot.slane %v7400_v12, 3  ;;  %v12172_v12 = vld [vmem:[#allocation10 + $0x348] sm:$0xff]  ;;  %v12189_v28 = vld [vmem:[#allocation10 + $0x3d0] sm:$0xff] }
 0x9f3   : > { %8078 = vmatpush.bf16.msrb.mxu1 %v12138_v43  ;;  %8243 = vmatpush.bf16.msra.mxu3 %v12154_v36  ;;  %v12165_v43 = vld [vmem:[#allocation10 + $0x310] sm:$0xff] }
 0x9f4   : > { %7682 = vmatmul.bf16.vlgmr.msrb.gmra.mxu0 %v7624_v51  ;;  %v12181_v36 = vld [vmem:[#allocation10 + $0x390] sm:$0xff]  ;;  %v12171_v51 = vld [vmem:[#allocation10 + $0x340] sm:$0xff] }
 0x9f5   : > { %8162 = vmatpush.bf16.msra.mxu2 %v12145_v22  ;;  %8324 = vmatpush.bf16.msrb.mxu0 %v12162_v34  ;;  %v7362_v48 = vpop.f32.mrf.mxu2  ;;  %v12164_v22 = vld [vmem:[#allocation10 + $0x308] sm:$0xff] }
 0x9f6   : > { %v14139_v41 = vpack.c.bf16 %v7362_v48, %v7362_v48  ;;  %v12180_v34 = vld [vmem:[#allocation10 + $0x388] sm:$0xff] }
 0x9f7   : > { %8079 = vmatpush.bf16.msrb.mxu1 %v12137_v9  ;;  %8244 = vmatpush.bf16.msra.mxu3 %v12153_v20  ;;  %v12188_v9 = vld [vmem:[#allocation10 + $0x3c8] sm:$0xff]  ;;  %v12163_v20 = vld [vmem:[#allocation10 + $0x300] sm:$0xff] }
 0x9f8   : > { %v14142_v13 = vshrl.u32 %v14139_v41, 16  ;;  %v8193_v49 = vrot.slane %v14139_v41, 1 }
 0x9f9   : > { %8163 = vmatpush.bf16.msra.mxu2 %v12144_v23  ;;  %8325 = vmatpush.bf16.msrb.mxu0 %v12161_v57  ;;  %v12179_v23 = vld [vmem:[#allocation10 + $0x380] sm:$0xff] }
 0x9fa   : > { %v8274_v47 = vrot.slane %v14142_v13, 1  ;;  %v12187_v57 = vld [vmem:[#allocation10 + $0x3c0] sm:$0xff] }
 0x9fb   : > { %8080 = vmatpush.bf16.msrb.mxu1 %v12136_v35  ;;  %8245 = vmatpush.bf16.msra.mxu3 %v12152_v16  ;;  %v8436_v35 = vrot.slane %v14142_v13, 2  ;;  %v8355_v16 = vrot.slane %v14139_v41, 2 }
 0x9fd   : > { %8164 = vmatpush.bf16.msra.mxu2 %v12143_v31  ;;  %8326 = vmatpush.bf16.msrb.mxu0 %v12160_v37  ;;  %v8517_v31 = vrot.slane %v14139_v41, 3  ;;  %v8598_v37 = vrot.slane %v14142_v13, 3 }
 0x9ff   : > { %8081 = vmatpush.bf16.msrb.mxu1 %v12135_v5  ;;  %8246 = vmatpush.bf16.msra.mxu3 %v12151_v54 }
 0xa00   : > { %7844 = vmatmul.bf16.vlgmr.msrb.gmra.mxu2 %v7786_v50 }
 0xa01   : > { %8165 = vmatpush.bf16.msra.mxu2 %v12142_v62  ;;  %8327 = vmatpush.bf16.msrb.mxu0 %v12159_v19 }
 0xa02   : > { %7763 = vmatmul.bf16.vlgmr.msra.gmra.mxu1 %v7705_v11  ;;  %7925 = vmatmul.bf16.vlgmr.msrb.gmra.mxu3 %v7867_v21  ;;  %v12202_v11 = vld [vmem:[%s14201_s12 + $0x38] sm:$0xff] }
 0xa03   : > { %8082 = vmatpush.bf16.msrb.mxu1 %v12134_v0  ;;  %8247 = vmatpush.bf16.msra.mxu3 %v12150_v63 }
 0xa04   : > { %8006 = vmatmul.bf16.vlgmr.msra.gmra.mxu0 %v7948_v39 }
 0xa05   : > { %8166 = vmatpush.bf16.msra.mxu2 %v12141_v29  ;;  %8328 = vmatpush.bf16.msrb.mxu0 %v12158_v45  ;;  %v12201_v29 = vld [vmem:[%s14201_s12 + $0x30] sm:$0xff] }
 0xa07   : > { %8083 = vmatpush.bf16.msrb.mxu1 %v12133_v46  ;;  %8248 = vmatpush.bf16.msra.mxu3 %v12149_v2  ;;  %v12200_v46 = vld [vmem:[%s14201_s12 + $0x28] sm:$0xff] }
 0xa09   : > { %8167 = vmatpush.bf16.msra.mxu2 %v12140_v30  ;;  %8329 = vmatpush.bf16.msrb.mxu0 %v12157_v3  ;;  %v12199_v3 = vld [vmem:[%s14201_s12 + $0x20] sm:$0xff] }
 0xa0b   : > { %8084 = vmatpush.bf16.msrb.mxu1 %v12132_v58  ;;  %8249 = vmatpush.bf16.msra.mxu3 %v12148_v4 }
 0xa0d   : > { %8168 = vmatpush.bf16.msra.mxu2 %v12139_v42  ;;  %8330 = vmatpush.bf16.msrb.mxu0 %v12156_v27  ;;  %v12198_v42 = vld [vmem:[%s14201_s12 + $0x18] sm:$0xff] }
 0xa0f   : > { %8085 = vmatpush.bf16.msrb.mxu1 %v12131_v10  ;;  %8250 = vmatpush.bf16.msra.mxu3 %v12147_v26  ;;  %v12197_v10 = vld [vmem:[%s14201_s12 + $0x10] sm:$0xff] }
 0xa10   : > { %8169 = vmatmul.bf16.vlgmr.msra.gmra.mxu2 %v14142_v13 }
 0xa11   : > { %8486 = vmatpush.bf16.msrb.mxu2 %v12178_v1  ;;  %8331 = vmatpush.bf16.msrb.mxu0 %v12155_v14  ;;  %v12196_v14 = vld [vmem:[%s14201_s12 + $0x8] sm:$0xff] }
 0xa12   : > { %8086 = vmatmul.bf16.vlgmr.msrb.gmra.mxu1 %v14139_v41  ;;  %8251 = vmatmul.bf16.vlgmr.msra.gmra.mxu3 %v8193_v49 }
 0xa13   : > { %8405 = vmatpush.bf16.msra.mxu1 %v12170_v25  ;;  %8567 = vmatpush.bf16.msrb.mxu3 %v12186_v6 }
 0xa14   : > { %8332 = vmatmul.bf16.vlgmr.msrb.gmra.mxu0 %v8274_v47 }
 0xa15   : > { %8487 = vmatpush.bf16.msrb.mxu2 %v12177_v55  ;;  %8648 = vmatpush.bf16.msra.mxu0 %v12194_v7 }
 0xa17   : > { %8406 = vmatpush.bf16.msra.mxu1 %v12169_v15  ;;  %8568 = vmatpush.bf16.msrb.mxu3 %v12185_v24  ;;  %v12195_v24 = vld [vmem:[%s14201_s12] sm:$0xff] }
 0xa19   : > { %8488 = vmatpush.bf16.msrb.mxu2 %v12176_v60  ;;  %8649 = vmatpush.bf16.msra.mxu0 %v12193_v18 }
 0xa1b   : > { %8407 = vmatpush.bf16.msra.mxu1 %v12168_v38  ;;  %8569 = vmatpush.bf16.msrb.mxu3 %v12184_v40 }
 0xa1d   : > { %8489 = vmatpush.bf16.msrb.mxu2 %v12175_v32  ;;  %8650 = vmatpush.bf16.msra.mxu0 %v12192_v52 }
 0xa1f   : > { %8408 = vmatpush.bf16.msra.mxu1 %v12167_v53  ;;  %8570 = vmatpush.bf16.msrb.mxu3 %v12183_v61 }
 0xa21   : > { %8490 = vmatpush.bf16.msrb.mxu2 %v12174_v56  ;;  %8651 = vmatpush.bf16.msra.mxu0 %v12191_v44 }
 0xa23   : > { %8409 = vmatpush.bf16.msra.mxu1 %v12166_v8  ;;  %8571 = vmatpush.bf16.msrb.mxu3 %v12182_v59 }
 0xa25   : > { %8491 = vmatpush.bf16.msrb.mxu2 %v12173_v17  ;;  %8652 = vmatpush.bf16.msra.mxu0 %v12190_v33 }
 0xa27   : > { %8410 = vmatpush.bf16.msra.mxu1 %v12165_v43  ;;  %8572 = vmatpush.bf16.msrb.mxu3 %v12181_v36  ;;  %v8662_v36 = vld [vmem:[%s14200_s11] sm:$0x1] }
 0xa29   : > { %8492 = vmatpush.bf16.msrb.mxu2 %v12172_v12  ;;  %8653 = vmatpush.bf16.msra.mxu0 %v12189_v28 }
 0xa2b   : > { %8411 = vmatpush.bf16.msra.mxu1 %v12164_v22  ;;  %8573 = vmatpush.bf16.msrb.mxu3 %v12180_v34 }
 0xa2d   : > { %8493 = vmatpush.bf16.msrb.mxu2 %v12171_v51  ;;  %8654 = vmatpush.bf16.msra.mxu0 %v12188_v9 }
 0xa2f   : > { %8412 = vmatpush.bf16.msra.mxu1 %v12163_v20  ;;  %8574 = vmatpush.bf16.msrb.mxu3 %v12179_v23 }
 0xa30   : > { %8494 = vmatmul.bf16.vlgmr.msrb.gmra.mxu2 %v8436_v35 }
 0xa31   : > { %8655 = vmatpush.bf16.msra.mxu0 %v12187_v57  ;;  %v8683_v57 = vld [vmem:[%s14233_s27] sm:$0x1] }
 0xa32   : > { %8413 = vmatmul.bf16.vlgmr.msra.gmra.mxu1 %v8355_v16  ;;  %8575 = vmatmul.bf16.vlgmr.msrb.gmra.mxu3 %v8517_v31 }
 0xa33   : > { %8732 = vmatpush.bf16.msrb.mxu1 %v12202_v11 }
 0xa34   : > { %8656 = vmatmul.bf16.vlgmr.msra.gmra.mxu0 %v8598_v37 }
 0xa37   : > { %8733 = vmatpush.bf16.msrb.mxu1 %v12201_v29 }
 0xa3b   : > { %8734 = vmatpush.bf16.msrb.mxu1 %v12200_v46 }
 0xa3f   : > { %8735 = vmatpush.bf16.msrb.mxu1 %v12199_v3 }
 0xa43   : > { %8736 = vmatpush.bf16.msrb.mxu1 %v12198_v42 }
 0xa47   : > { %8737 = vmatpush.bf16.msrb.mxu1 %v12197_v10 }
 0xa4b   : > { %8738 = vmatpush.bf16.msrb.mxu1 %v12196_v14 }
 0xa4f   : > { %8739 = vmatpush.bf16.msrb.mxu1 %v12195_v24 }
 0xa6f   : > { %v7460_v5 = vpop.f32.mrf.mxu1 }
 0xa71   : > { %v7683_v54 = vpop.f32.mrf.mxu0 }
 0xa73   : > { %v7521_v62 = vpop.f32.mrf.mxu2 }
 0xa74   : > { %v7522_v27 = vadd.f32 %v7521_v62, %v7460_v5 }
 0xa75   : > { %v7602_v19 = vpop.f32.mrf.mxu3 }
 0xa76   : > { %v7606_v26 = vadd.f32 %v7602_v19, %v7522_v27 }
 0xa77   : > { %v7462_v50 = vpop.f32.mrf.mxu1 }
 0xa78   : > { %v7687_v55 = vadd.f32 %v7683_v54, %v7606_v26 }
 0xa79   : > { %v7685_v0 = vpop.f32.mrf.mxu0 }
 0xa7b   : > { %v7523_v63 = vpop.f32.mrf.mxu2 }
 0xa7d   : > { %v7604_v21 = vpop.f32.mrf.mxu3 }
 0xa7f   : > { %v7764_v45 = vpop.f32.mrf.mxu1 }
 0xa80   : > { %v7768_v13 = vadd.f32 %v7764_v45, %v7687_v55 }
 0xa81   : > { %v8007_v39 = vpop.f32.mrf.mxu0 }
 0xa83   : > { %v7845_v2 = vpop.f32.mrf.mxu2 }
 0xa84   : > { %v7849_v49 = vadd.f32 %v7845_v2, %v7768_v13 }
 0xa85   : > { %v7926_v30 = vpop.f32.mrf.mxu3 }
 0xa86   : > { %v7930_v47 = vadd.f32 %v7926_v30, %v7849_v49 }
 0xa87   : > { %v7766_v58 = vpop.f32.mrf.mxu1 }
 0xa88   : > { %v8011_v40 = vadd.f32 %v8007_v39, %v7930_v47 }
 0xa89   : > { %v8009_v4 = vpop.f32.mrf.mxu0 }
 0xa8b   : > { %v7847_v48 = vpop.f32.mrf.mxu2 }
 0xa8d   : > { %v7928_v1 = vpop.f32.mrf.mxu3 }
 0xa8f   : > { %v8087_v41 = vpop.f32.mrf.mxu1 }
 0xa90   : > { %v8091_v32 = vadd.f32 %v8087_v41, %v8011_v40 }
 0xa91   : > { %v8333_v25 = vpop.f32.mrf.mxu0 }
 0xa93   : > { %v8170_v6 = vpop.f32.mrf.mxu2 }
 0xa94   : > { %v8174_v52 = vadd.f32 %v8170_v6, %v8091_v32 }
 0xa95   : > { %v8252_v7 = vpop.f32.mrf.mxu3 }
 0xa96   : > { %v8256_v53 = vadd.f32 %v8252_v7, %v8174_v52 }
 0xa97   : > { %v8089_v15 = vpop.f32.mrf.mxu1 }
 0xa98   : > { %v8337_v56 = vadd.f32 %v8333_v25, %v8256_v53 }
 0xa99   : > { %v8335_v60 = vpop.f32.mrf.mxu0 }
 0xa9b   : > { %v8172_v18 = vpop.f32.mrf.mxu2 }
 0xa9d   : > { %v8254_v38 = vpop.f32.mrf.mxu3 }
 0xaaf   : > { %v8414_v61 = vpop.f32.mrf.mxu1 }
 0xab0   : > { %v8418_v8 = vadd.f32 %v8414_v61, %v8337_v56 }
 0xab1   : > { %v8657_v44 = vpop.f32.mrf.mxu0 }
 0xab3   : > { %v8495_v59 = vpop.f32.mrf.mxu2 }
 0xab4   : > { %v8499_v17 = vadd.f32 %v8495_v59, %v8418_v8 }
 0xab5   : > { %v8576_v33 = vpop.f32.mrf.mxu3 }
 0xab6   : > { %v8580_v43 = vadd.f32 %v8576_v33, %v8499_v17 }
 0xab7   : > { %v8416_v12 = vpop.f32.mrf.mxu1 }
 0xab8   : > { %v8661_v28 = vadd.f32 %v8657_v44, %v8580_v43 }
 0xab9   : > { %v8659_v22 = vpop.f32.mrf.mxu0 }
 0xaba   : > { %v8663_v34 = vadd.f32 %v8662_v36, %v8661_v28 }
 0xabb   : > { %v8497_v51 = vpop.f32.mrf.mxu2 }
 0xabc   : > { %v8664_v9 = vmax.f32 %v8663_v34, 0.0 }
 0xabd   : > { %v8578_v20 = vpop.f32.mrf.mxu3 }
 0xabe   : > { %v8666_v23 = vpack.c.bf16 %v8664_v9, %v8664_v9 }
 0xac0   : > { %8740 = vmatmul.bf16.vlgmr.msrb.gmra.mxu1 %v8666_v23 }
 0xb3d   : > { %v8741_v35 = vpop.f32.mrf.mxu1 }
 0xb3e   : > { %v8742_v16 = vadd.f32 %v8741_v35, %v8683_v57 }
 0xb40   : > { %v8745_v31 = vsub.f32 0.0, %v8742_v16 }
 0xb42   : > { %v8746_v37 = vmul.f32 1.442695, %v8745_v31 }
 0xb44   : > { %12261 = vpow2.f32 %v8746_v37 }
 0xb45   : > { %v8743_v5 = vpop.f32.mrf.mxu1 }
 0xb4a   : > { %v12262_v54 = vpop.eup %12261 }
 0xb4b   : > { %v8748_v62 = vadd.f32 1.0, %v12262_v54 }
 0xb4d   : > { %12263 = vrcp.f32 %v8748_v62  ;;  %v8760_v63 = vand.u32 2147483648, %v8748_v62  ;;  %v8758_v21 = vand.u32 2147483647, %v8748_v62  ;;  %vm8754_vm12 = vweird.f32 %v8748_v62 }
 0xb4f   : > { %v8761_v45 = vor.u32 1.1754944e-38, %v8760_v63  ;;  %vm8759_vm1 = vcmp.eq.f32.partialorder %v8758_v21, 8.507059e+37 }
 0xb53   : > { %v12264_v19 = vpop.eup %12263 }
 0xb54   : > { %v8750_v50 = vmul.f32 %v12264_v19, %v8748_v62  ;;  %vm8755_vm9 = vweird.f32 %v12264_v19 }
 0xb55   : > { %vm8756_vm15 = vmor %vm8754_vm12, %vm8755_vm9 }
 0xb56   : > { %v8751_v0 = vsub.f32 1.0, %v8750_v50 }
 0xb58   : > { %v8752_v11 = vmul.f32 %v12264_v19, %v8751_v0 }
 0xb5a   : > { %v8753_v29 = vadd.f32 %v12264_v19, %v8752_v11 }
 0xb5c   : > { %v8757_v39 = vsel %vm8756_vm15, %v12264_v19, %v8753_v29 }
 0xb5d   : > { %v8762_v46 = vsel %vm8759_vm1, %v8761_v45, %v8757_v39 }
 0xb5e   : > { %8764 = vst [vmem:[%s557_s0] sm:$0x1] %v8762_v46 }
 0xb5f PF: > { %s14235_s5 = sld [smem:[#allocation15_spill]] }
 0xb65   : > { %s28_s18 = sadd.s32 1, %s14235_s5  }
 0xb66   : > { %p25_p7 = scmp.ge.s32.totalorder %s28_s18, 4  }
 0xb68   :  { %27 = sbr.rel (!%p25_p7) target bundleno = 8 (0x8), region = 187 }
 0xb6d   :  { %8782 = vsyncpa [#allocation6], 1 }
 0xb6e   :  { %8784 = vsyncpa [#allocation6 + $0x1], 1 }
 0xb6f   :  { %8785 = vsyncpa [#allocation8], 1 }
 0xb70   :  { %8786 = vsyncpa [#allocation11], 1 }

</bundles_post_ra>
